<compile_context>
chip_gen: v7x
topology: tpu7x:2x2x1
jax: 0.10.0
libtpu: 0.0.40
codegen_flags: <defaults>
</compile_context>

<pallas_src>
import functools

import jax
import jax.numpy as jnp
from jax.experimental import pallas as pl
from jax.experimental.pallas import tpu as pltpu

BT = 8                                            # batch tile (sublane aligned)
TAPS_5X5 = tuple((dy, dx) for dy in range(5) for dx in range(5))
_VMEM_LIMIT = 32 * 1024 * 1024


# ----------------------------------------------------------------------------
# Fused conv + BN(folded) + ReLU + 2x2 max-pool kernel
# ----------------------------------------------------------------------------
def _conv_pool_kernel(x_ref, w_ref, o_ref, out_ref, *,
                      H, W, Cout, taps, out_pad, bt):
    """One conv layer of Net, fully fused.

    x_ref:   (1, Hp, Wp*bt, Cin)  bf16 activations; column index = w*bt + b so
             a (dy, dx) conv tap is a contiguous 8-aligned slice (in-kernel
             im2col without materializing patches).
    w_ref:   (T, Cin, Cout)       bf16 per-tap weights, BN scale pre-folded.
    o_ref:   (1, Cout)            f32 offset = (bias - mean)*scale + beta.
    out_ref: (1, H/2 + 2*out_pad, (W/2 + 2*out_pad)*bt, Cout) bf16 pooled
             output, already zero-padded spatially for the next conv layer.
    """
    H2, W2 = H // 2, W // 2
    WB = W * bt
    off = o_ref[...]                                    # (1, Cout) f32

    if out_pad:   # zero the spatial halo once; the interior is written below
        out_ref[...] = jnp.zeros(out_ref.shape, out_ref.dtype)

    def row_body(ho, carry):
        r0 = 2 * ho                                     # two conv rows -> one pooled row
        acc0 = jnp.zeros((WB, Cout), jnp.float32)
        acc1 = jnp.zeros((WB, Cout), jnp.float32)
        for t, (dy, dx) in enumerate(taps):             # shifted-slice tap accumulation
            wt = w_ref[t]                               # (Cin, Cout) bf16
            x0 = x_ref[0, r0 + dy, pl.ds(dx * bt, WB), :]      # (WB, Cin) bf16
            x1 = x_ref[0, r0 + 1 + dy, pl.ds(dx * bt, WB), :]
            acc0 = acc0 + jnp.dot(x0, wt, preferred_element_type=jnp.float32)
            acc1 = acc1 + jnp.dot(x1, wt, preferred_element_type=jnp.float32)
        m = jnp.maximum(acc0, acc1)                     # vertical half of 2x2 pool
        for wo in range(W2):                            # horizontal half + epilogue
            blk = jnp.maximum(m[(2 * wo) * bt:(2 * wo + 1) * bt],
                              m[(2 * wo + 1) * bt:(2 * wo + 2) * bt])   # (bt, Cout)
            # +offset / ReLU commute with max (monotone), so applying them after
            # the pool is exact and 4x cheaper.
            blk = jnp.maximum(blk + off, 0.0)
            out_ref[0, out_pad + ho, pl.ds((out_pad + wo) * bt, bt), :] = (
                blk.astype(out_ref.dtype))
        return carry

    jax.lax.fori_loop(0, H2, row_body, 0)


def conv_pool_layer(x, w, o, *, H, W, Cout, taps, out_pad, bt=BT):
    NB = x.shape[0]
    Ho = H // 2 + 2 * out_pad
    Wo = W // 2 + 2 * out_pad
    kernel = functools.partial(_conv_pool_kernel, H=H, W=W, Cout=Cout,
                               taps=taps, out_pad=out_pad, bt=bt)
    return pl.pallas_call(
        kernel,
        out_shape=jax.ShapeDtypeStruct((NB, Ho, Wo * bt, Cout), jnp.bfloat16),
        grid=(NB,),
        in_specs=[
            pl.BlockSpec((1,) + x.shape[1:], lambda i: (i, 0, 0, 0)),
            pl.BlockSpec(w.shape, lambda i: (0, 0, 0)),
            pl.BlockSpec(o.shape, lambda i: (0, 0)),
        ],
        out_specs=pl.BlockSpec((1, Ho, Wo * bt, Cout), lambda i: (i, 0, 0, 0)),
        compiler_params=pltpu.CompilerParams(
            dimension_semantics=("parallel",),
            vmem_limit_bytes=_VMEM_LIMIT),
    )(x, w, o)


# ----------------------------------------------------------------------------
# Fused fc1 + ReLU + fc2 + ReLU + fc3 + log_softmax kernel (VMEM resident)
# ----------------------------------------------------------------------------
def _fc_head_kernel(x_ref, w1_ref, b1_ref, w2_ref, b2_ref, w3_ref, b3_ref,
                    out_ref, *, bt):
    # x_ref: (1, 3, 3*bt, 128) bf16 conv3 output block.
    h1 = jnp.zeros((bt, w1_ref.shape[-1]), jnp.float32)
    for t in range(9):                       # the 3x3 spatial taps of fc1
        h, w = divmod(t, 3)
        xt = x_ref[0, h, pl.ds(w * bt, bt), :]                 # (bt, 128)
        h1 = h1 + jnp.dot(xt, w1_ref[t], preferred_element_type=jnp.float32)
    h1 = jnp.maximum(h1 + b1_ref[...], 0.0)
    h2 = jnp.dot(h1.astype(jnp.bfloat16), w2_ref[...],
                 preferred_element_type=jnp.float32)
    h2 = jnp.maximum(h2 + b2_ref[...], 0.0)
    logits = jnp.dot(h2.astype(jnp.bfloat16), w3_ref[...],
                     preferred_element_type=jnp.float32) + b3_ref[...]
    mx = jnp.max(logits, axis=-1, keepdims=True)
    lse = mx + jnp.log(jnp.sum(jnp.exp(logits - mx), axis=-1, keepdims=True))
    out_ref[...] = (logits - lse).astype(out_ref.dtype)


def fc_head(x, w1, b1, w2, b2, w3, b3, *, bt=BT):
    NB = x.shape[0]
    kernel = functools.partial(_fc_head_kernel, bt=bt)
    return pl.pallas_call(
        kernel,
        out_shape=jax.ShapeDtypeStruct((NB * bt, 10), jnp.float32),
        grid=(NB,),
        in_specs=[
            pl.BlockSpec((1,) + x.shape[1:], lambda i: (i, 0, 0, 0)),
            pl.BlockSpec(w1.shape, lambda i: (0, 0, 0)),
            pl.BlockSpec(b1.shape, lambda i: (0, 0)),
            pl.BlockSpec(w2.shape, lambda i: (0, 0)),
            pl.BlockSpec(b2.shape, lambda i: (0, 0)),
            pl.BlockSpec(w3.shape, lambda i: (0, 0)),
            pl.BlockSpec(b3.shape, lambda i: (0, 0)),
        ],
        out_specs=pl.BlockSpec((bt, 10), lambda i: (i, 0)),
        compiler_params=pltpu.CompilerParams(
            dimension_semantics=("parallel",),
            vmem_limit_bytes=_VMEM_LIMIT),
    )(x, w1, b1, w2, b2, w3, b3)


# ----------------------------------------------------------------------------
# Forward pass
# ----------------------------------------------------------------------------
def net_forward(x_nchw, pp):
    """Net forward (inference). x_nchw: (B, 1, 28, 28) float32 -> (B, 10) f32."""
    B = x_nchw.shape[0]
    bt = BT
    NB = int(pl.cdiv(B, bt))
    Bpad = NB * bt

    # conv1 has Cin=1: its 25-tap patch matrix is tiny (25x a 1-channel image),
    # so build it here and feed it as a single K=25 tap; conv2/conv3 (where the
    # 25x inflation would be real HBM traffic) build patches inside the kernel.
    x = x_nchw[:, 0].astype(jnp.float32)
    x = jnp.pad(x, ((0, Bpad - B), (2, 2), (2, 2)))            # (Bpad, 32, 32)
    cols = [x[:, dy:dy + 28, dx:dx + 28] for dy, dx in TAPS_5X5]
    p = jnp.stack(cols, axis=-1)                               # (Bpad, 28, 28, 25)
    p = p.reshape(NB, bt, 28, 28, 25).transpose(0, 2, 3, 1, 4)
    p = p.reshape(NB, 28, 28 * bt, 25).astype(jnp.bfloat16)

    a1 = conv_pool_layer(p, pp["c1_w"], pp["c1_o"], H=28, W=28, Cout=32,
                         taps=((0, 0),), out_pad=2, bt=bt)     # (NB, 18, 144, 32)
    a2 = conv_pool_layer(a1, pp["c2_w"], pp["c2_o"], H=14, W=14, Cout=64,
                         taps=TAPS_5X5, out_pad=2, bt=bt)      # (NB, 11, 88, 64)
    # dropout(p=0.3): identity in inference
    a3 = conv_pool_layer(a2, pp["c3_w"], pp["c3_o"], H=7, W=7, Cout=128,
                         taps=TAPS_5X5, out_pad=0, bt=bt)      # (NB, 3, 24, 128)
    # dropout(p=0.4) and the two dropout(p=0.5): identity in inference
    out = fc_head(a3, pp["fc1_w"], pp["fc1_b"], pp["fc2_w"], pp["fc2_b"],
                  pp["fc3_w"], pp["fc3_b"], bt=bt)             # (Bpad, 10)
    return out[:B]


# ----------------------------------------------------------------------------
# One-time parameter packing (outside the jitted forward)
# ----------------------------------------------------------------------------
def prepare_params(p, eps=1e-5):
    """Fold BatchNorm into conv weights/offsets and pack everything into the
    exact layouts the kernels consume (bf16 weights, f32 offsets/biases)."""
    f32, bf16 = jnp.float32, jnp.bfloat16

    def bn_fold(b, g, beta, mean, var):
        s = g / jnp.sqrt(var + eps)
        return s, (b - mean) * s + beta

    pp = {}
    # conv1 (Cin=1): single tap with K=25, matching wrapper-built patches.
    s1, o1 = bn_fold(p["conv1_b"], p["bn1_g"], p["bn1_b"], p["bn1_m"], p["bn1_v"])
    w1 = p["conv1_w"].reshape(32, 25).T * s1[None, :]          # (25, 32)
    pp["c1_w"] = w1[None].astype(bf16)                         # (1, 25, 32)
    pp["c1_o"] = o1.reshape(1, 32).astype(f32)

    for idx, cin, cout in ((2, 32, 64), (3, 64, 128)):
        s, o = bn_fold(p[f"conv{idx}_b"], p[f"bn{idx}_g"], p[f"bn{idx}_b"],
                       p[f"bn{idx}_m"], p[f"bn{idx}_v"])
        w = jnp.transpose(p[f"conv{idx}_w"], (2, 3, 1, 0)).reshape(25, cin, cout)
        pp[f"c{idx}_w"] = (w * s[None, None, :]).astype(bf16)  # (25, Cin, Cout)
        pp[f"c{idx}_o"] = o.reshape(1, cout).astype(f32)

    # fc1: permute PyTorch's (c, h, w) input-feature order into per-(h, w)
    # 128-wide taps matching the conv3 output layout (no runtime transpose).
    w = p["fc1_w"].reshape(512, 128, 3, 3)
    pp["fc1_w"] = jnp.transpose(w, (2, 3, 1, 0)).reshape(9, 128, 512).astype(bf16)
    pp["fc1_b"] = p["fc1_b"].reshape(1, 512).astype(f32)
    pp["fc2_w"] = p["fc2_w"].T.astype(bf16)                    # (512, 256)
    pp["fc2_b"] = p["fc2_b"].reshape(1, 256).astype(f32)
    pp["fc3_w"] = p["fc3_w"].T.astype(bf16)                    # (256, 10)
    pp["fc3_b"] = p["fc3_b"].reshape(1, 10).astype(f32)
    return pp


# ----------------------------------------------------------------------------
# Deterministic parameter initialization (shapes from Net.__init__)
# ----------------------------------------------------------------------------
def init_params(key):
    ks = iter(jax.random.split(key, 32))
    f32 = jnp.float32

    def conv(cout, cin):
        fan_in = cin * 25
        w = jax.random.normal(next(ks), (cout, cin, 5, 5), f32) / jnp.sqrt(fan_in)
        b = 0.01 * jax.random.normal(next(ks), (cout,), f32)
        return w, b

    def bn(c):
        g = 1.0 + 0.1 * jax.random.normal(next(ks), (c,), f32)
        b = 0.1 * jax.random.normal(next(ks), (c,), f32)
        m = 0.1 * jax.random.normal(next(ks), (c,), f32)
        v = jax.random.uniform(next(ks), (c,), f32, 0.5, 1.5)
        return g, b, m, v

    def linear(nout, nin):
        w = jax.random.normal(next(ks), (nout, nin), f32) / jnp.sqrt(nin)
        b = 0.01 * jax.random.normal(next(ks), (nout,), f32)
        return w, b

    p = {}
    p["conv1_w"], p["conv1_b"] = conv(32, 1)
    p["bn1_g"], p["bn1_b"], p["bn1_m"], p["bn1_v"] = bn(32)
    p["conv2_w"], p["conv2_b"] = conv(64, 32)
    p["bn2_g"], p["bn2_b"], p["bn2_m"], p["bn2_v"] = bn(64)
    p["conv3_w"], p["conv3_b"] = conv(128, 64)
    p["bn3_g"], p["bn3_b"], p["bn3_m"], p["bn3_v"] = bn(128)
    p["fc1_w"], p["fc1_b"] = linear(512, 3 * 3 * 128)
    p["fc2_w"], p["fc2_b"] = linear(256, 512)
    p["fc3_w"], p["fc3_b"] = linear(10, 256)
    return p


# ----------------------------------------------------------------------------
# Plain-JAX float32 reference of the PyTorch module (eval mode) for checking
# ----------------------------------------------------------------------------
def reference_forward(x, p, eps=1e-5):
    def conv_bn_relu(x, w, b, g, beta, mean, var):
        y = jax.lax.conv_general_dilated(
            x, w, window_strides=(1, 1), padding=((2, 2), (2, 2)),
            dimension_numbers=("NCHW", "OIHW", "NCHW"))
        y = y + b[None, :, None, None]
        s = (g / jnp.sqrt(var + eps))[None, :, None, None]
        y = (y - mean[None, :, None, None]) * s + beta[None, :, None, None]
        return jnp.maximum(y, 0.0)

    def pool(x):
        B, C, H, W = x.shape
        x = x[:, :, :H // 2 * 2, :W // 2 * 2]
        return x.reshape(B, C, H // 2, 2, W // 2, 2).max(axis=(3, 5))

    x = pool(conv_bn_relu(x, p["conv1_w"], p["conv1_b"], p["bn1_g"],
                          p["bn1_b"], p["bn1_m"], p["bn1_v"]))
    x = pool(conv_bn_relu(x, p["conv2_w"], p["conv2_b"], p["bn2_g"],
                          p["bn2_b"], p["bn2_m"], p["bn2_v"]))
    x = pool(conv_bn_relu(x, p["conv3_w"], p["conv3_b"], p["bn3_g"],
                          p["bn3_b"], p["bn3_m"], p["bn3_v"]))
    x = x.reshape(x.shape[0], -1)                       # NCHW flatten: (c, h, w)
    x = jnp.maximum(x @ p["fc1_w"].T + p["fc1_b"], 0.0)
    x = jnp.maximum(x @ p["fc2_w"].T + p["fc2_b"], 0.0)
    x = x @ p["fc3_w"].T + p["fc3_b"]
    return jax.nn.log_softmax(x, axis=-1)


if __name__ == "__main__":
    key = jax.random.PRNGKey(0)
    k_param, k_x = jax.random.split(key)
    params = init_params(k_param)
    # MNIST-shaped input: batch=2, 1 channel, 28x28 (required by fc1: 3*3*128)
    x = jax.random.normal(k_x, (2, 1, 28, 28), jnp.float32)

    packed = prepare_params(params)            # one-time packing, outside jit
    fwd = jax.jit(net_forward)
    out = jax.block_until_ready(fwd(x, packed))

    assert out.shape == (2, 10)
    assert bool(jnp.all(jnp.isfinite(out)))
    # log_softmax rows must exponentiate to ~1
    assert bool(jnp.allclose(jnp.sum(jnp.exp(out), axis=1), 1.0, atol=1e-4))
    # cross-check against a plain-JAX f32 reference (bf16 matmuls => loose tol)
    ref = jax.jit(reference_forward)(x, params)
    err = float(jnp.max(jnp.abs(out - ref)))
    assert err < 0.3, f"mismatch vs f32 reference: {err}"
    print("KERNEL_OK")
</pallas_src>

<mosaic_0001>
module attributes {stable_mosaic.version = 11 : i64} {
  func.func @_conv_pool_kernel(%arg0: i32, %arg1: memref<1x28x224x25xbf16, #tpu.memory_space<vmem>>, %arg2: memref<1x25x32xbf16, #tpu.memory_space<vmem>>, %arg3: memref<1x32xf32, #tpu.memory_space<vmem>>, %arg4: memref<1x18x144x32xbf16, #tpu.memory_space<vmem>>) attributes {dimension_semantics = [#tpu.dimension_semantics<parallel>], iteration_bounds = array<i64: 1>, scalar_prefetch = 0 : i64, scratch_operands = 0 : i64, tpu.core_type = #tpu.core_type<tc>, window_params = [{transform_indices = @transform_0, window_bounds = array<i64: 1, 28, 224, 25>}, {pipeline_mode = #tpu.pipeline_mode<synchronous>, transform_indices = @transform_1, window_bounds = array<i64: 1, 25, 32>}, {pipeline_mode = #tpu.pipeline_mode<synchronous>, transform_indices = @transform_2, window_bounds = array<i64: 1, 32>}, {transform_indices = @transform_3, window_bounds = array<i64: 1, 18, 144, 32>}]} {
    %c0 = arith.constant 0 : index
    %c0_0 = arith.constant 0 : index
    %0 = vector.load %arg3[%c0, %c0_0] : memref<1x32xf32, #tpu.memory_space<vmem>>, vector<1x32xf32>
    %cst = arith.constant 0.000000e+00 : bf16
    %1 = vector.broadcast %cst : bf16 to vector<1x18x144x32xbf16>
    %c0_1 = arith.constant 0 : index
    %c0_2 = arith.constant 0 : index
    %c0_3 = arith.constant 0 : index
    %c0_4 = arith.constant 0 : index
    %2 = vector.load %arg4[%c0_1, %c0_2, %c0_3, %c0_4] : memref<1x18x144x32xbf16, #tpu.memory_space<vmem>>, vector<1x18x144x32xbf16>
    tpu.vector_store %arg4[%c0_1, %c0_2, %c0_3, %c0_4], %1 {strides = array<i32>} : memref<1x18x144x32xbf16, #tpu.memory_space<vmem>>, vector<1x18x144x32xbf16>,
    %c0_i32 = arith.constant 0 : i32
    %c14_i32 = arith.constant 14 : i32
    %3 = arith.addi %c0_i32, %c14_i32 : i32
    %c1_i32 = arith.constant 1 : i32
    scf.for %arg5 = %c0_i32 to %3 step %c1_i32  : i32 {
      %c2_i32 = arith.constant 2 : i32
      %4 = arith.muli %c2_i32, %arg5 : i32
      %cst_6 = arith.constant 0.000000e+00 : f32
      %5 = vector.broadcast %cst_6 : f32 to vector<224x32xf32>
      %cst_7 = arith.constant 0.000000e+00 : f32
      %6 = vector.broadcast %cst_7 : f32 to vector<224x32xf32>
      %c0_8 = arith.constant 0 : index
      %c0_9 = arith.constant 0 : index
      %c0_10 = arith.constant 0 : index
      %7 = vector.load %arg2[%c0_8, %c0_9, %c0_10] : memref<1x25x32xbf16, #tpu.memory_space<vmem>>, vector<1x25x32xbf16>
      %8 = vector.shape_cast %7 : vector<1x25x32xbf16> to vector<25x32xbf16>
      %c0_i32_11 = arith.constant 0 : i32
      %9 = arith.addi %4, %c0_i32_11 : i32
      %c0_12 = arith.constant 0 : index
      %10 = arith.index_cast %9 : i32 to index
      %c0_13 = arith.constant 0 : index
      %c0_14 = arith.constant 0 : index
      %11 = vector.load %arg1[%c0_12, %10, %c0_13, %c0_14] : memref<1x28x224x25xbf16, #tpu.memory_space<vmem>>, vector<1x1x224x25xbf16>
      %12 = vector.shape_cast %11 : vector<1x1x224x25xbf16> to vector<224x25xbf16>
      %c1_i32_15 = arith.constant 1 : i32
      %13 = arith.addi %4, %c1_i32_15 : i32
      %c0_i32_16 = arith.constant 0 : i32
      %14 = arith.addi %13, %c0_i32_16 : i32
      %c0_17 = arith.constant 0 : index
      %15 = arith.index_cast %14 : i32 to index
      %c0_18 = arith.constant 0 : index
      %c0_19 = arith.constant 0 : index
      %16 = vector.load %arg1[%c0_17, %15, %c0_18, %c0_19] : memref<1x28x224x25xbf16, #tpu.memory_space<vmem>>, vector<1x1x224x25xbf16>
      %17 = vector.shape_cast %16 : vector<1x1x224x25xbf16> to vector<224x25xbf16>
      %cst_20 = arith.constant dense<0.000000e+00> : vector<224x32xf32>
      %18 = tpu.matmul %12, %8, %cst_20 {dimension_numbers = #tpu.dot_dimension_numbers<[1], [0], [0], [1], [0, 0, 1, 1], [], []>} : vector<224x25xbf16>, vector<25x32xbf16>, vector<224x32xf32> -> vector<224x32xf32>
      %19 = arith.addf %5, %18 : vector<224x32xf32>
      %cst_21 = arith.constant dense<0.000000e+00> : vector<224x32xf32>
      %20 = tpu.matmul %17, %8, %cst_21 {dimension_numbers = #tpu.dot_dimension_numbers<[1], [0], [0], [1], [0, 0, 1, 1], [], []>} : vector<224x25xbf16>, vector<25x32xbf16>, vector<224x32xf32> -> vector<224x32xf32>
      %21 = arith.addf %6, %20 : vector<224x32xf32>
      %22 = arith.maximumf %19, %21 : vector<224x32xf32>
      %23 = vector.extract_strided_slice %22 {offsets = [0, 0], sizes = [8, 32], strides = [1, 1]} : vector<224x32xf32> to vector<8x32xf32>
      %24 = vector.extract_strided_slice %22 {offsets = [8, 0], sizes = [8, 32], strides = [1, 1]} : vector<224x32xf32> to vector<8x32xf32>
      %25 = arith.maximumf %23, %24 : vector<8x32xf32>
      %26 = vector.broadcast %0 : vector<1x32xf32> to vector<8x32xf32>
      %27 = arith.addf %25, %26 : vector<8x32xf32>
      %cst_22 = arith.constant 0.000000e+00 : f32
      %28 = vector.broadcast %cst_22 : f32 to vector<8x32xf32>
      %29 = arith.maximumf %27, %28 : vector<8x32xf32>
      %30 = arith.truncf %29 : vector<8x32xf32> to vector<8x32xbf16>
      %c2_i32_23 = arith.constant 2 : i32
      %31 = arith.addi %c2_i32_23, %arg5 : i32
      %c0_24 = arith.constant 0 : index
      %32 = arith.index_cast %31 : i32 to index
      %c16 = arith.constant 16 : index
      %c0_25 = arith.constant 0 : index
      %33 = vector.load %arg4[%c0_24, %32, %c16, %c0_25] : memref<1x18x144x32xbf16, #tpu.memory_space<vmem>>, vector<1x1x8x32xbf16>
      %34 = vector.shape_cast %33 : vector<1x1x8x32xbf16> to vector<8x32xbf16>
      %35 = vector.shape_cast %30 : vector<8x32xbf16> to vector<1x1x8x32xbf16>
      tpu.vector_store %arg4[%c0_24, %32, %c16, %c0_25], %35 {strides = array<i32>} : memref<1x18x144x32xbf16, #tpu.memory_space<vmem>>, vector<1x1x8x32xbf16>,
      %36 = vector.extract_strided_slice %22 {offsets = [16, 0], sizes = [8, 32], strides = [1, 1]} : vector<224x32xf32> to vector<8x32xf32>
      %37 = vector.extract_strided_slice %22 {offsets = [24, 0], sizes = [8, 32], strides = [1, 1]} : vector<224x32xf32> to vector<8x32xf32>
      %38 = arith.maximumf %36, %37 : vector<8x32xf32>
      %39 = vector.broadcast %0 : vector<1x32xf32> to vector<8x32xf32>
      %40 = arith.addf %38, %39 : vector<8x32xf32>
      %cst_26 = arith.constant 0.000000e+00 : f32
      %41 = vector.broadcast %cst_26 : f32 to vector<8x32xf32>
      %42 = arith.maximumf %40, %41 : vector<8x32xf32>
      %43 = arith.truncf %42 : vector<8x32xf32> to vector<8x32xbf16>
      %c2_i32_27 = arith.constant 2 : i32
      %44 = arith.addi %c2_i32_27, %arg5 : i32
      %c0_28 = arith.constant 0 : index
      %45 = arith.index_cast %44 : i32 to index
      %c24 = arith.constant 24 : index
      %c0_29 = arith.constant 0 : index
      %46 = vector.load %arg4[%c0_28, %45, %c24, %c0_29] : memref<1x18x144x32xbf16, #tpu.memory_space<vmem>>, vector<1x1x8x32xbf16>
      %47 = vector.shape_cast %46 : vector<1x1x8x32xbf16> to vector<8x32xbf16>
      %48 = vector.shape_cast %43 : vector<8x32xbf16> to vector<1x1x8x32xbf16>
      tpu.vector_store %arg4[%c0_28, %45, %c24, %c0_29], %48 {strides = array<i32>} : memref<1x18x144x32xbf16, #tpu.memory_space<vmem>>, vector<1x1x8x32xbf16>,
      %49 = vector.extract_strided_slice %22 {offsets = [32, 0], sizes = [8, 32], strides = [1, 1]} : vector<224x32xf32> to vector<8x32xf32>
      %50 = vector.extract_strided_slice %22 {offsets = [40, 0], sizes = [8, 32], strides = [1, 1]} : vector<224x32xf32> to vector<8x32xf32>
      %51 = arith.maximumf %49, %50 : vector<8x32xf32>
      %52 = vector.broadcast %0 : vector<1x32xf32> to vector<8x32xf32>
      %53 = arith.addf %51, %52 : vector<8x32xf32>
      %cst_30 = arith.constant 0.000000e+00 : f32
      %54 = vector.broadcast %cst_30 : f32 to vector<8x32xf32>
      %55 = arith.maximumf %53, %54 : vector<8x32xf32>
      %56 = arith.truncf %55 : vector<8x32xf32> to vector<8x32xbf16>
      %c2_i32_31 = arith.constant 2 : i32
      %57 = arith.addi %c2_i32_31, %arg5 : i32
      %c0_32 = arith.constant 0 : index
      %58 = arith.index_cast %57 : i32 to index
      %c32 = arith.constant 32 : index
      %c0_33 = arith.constant 0 : index
      %59 = vector.load %arg4[%c0_32, %58, %c32, %c0_33] : memref<1x18x144x32xbf16, #tpu.memory_space<vmem>>, vector<1x1x8x32xbf16>
      %60 = vector.shape_cast %59 : vector<1x1x8x32xbf16> to vector<8x32xbf16>
      %61 = vector.shape_cast %56 : vector<8x32xbf16> to vector<1x1x8x32xbf16>
      tpu.vector_store %arg4[%c0_32, %58, %c32, %c0_33], %61 {strides = array<i32>} : memref<1x18x144x32xbf16, #tpu.memory_space<vmem>>, vector<1x1x8x32xbf16>,
      %62 = vector.extract_strided_slice %22 {offsets = [48, 0], sizes = [8, 32], strides = [1, 1]} : vector<224x32xf32> to vector<8x32xf32>
      %63 = vector.extract_strided_slice %22 {offsets = [56, 0], sizes = [8, 32], strides = [1, 1]} : vector<224x32xf32> to vector<8x32xf32>
      %64 = arith.maximumf %62, %63 : vector<8x32xf32>
      %65 = vector.broadcast %0 : vector<1x32xf32> to vector<8x32xf32>
      %66 = arith.addf %64, %65 : vector<8x32xf32>
      %cst_34 = arith.constant 0.000000e+00 : f32
      %67 = vector.broadcast %cst_34 : f32 to vector<8x32xf32>
      %68 = arith.maximumf %66, %67 : vector<8x32xf32>
      %69 = arith.truncf %68 : vector<8x32xf32> to vector<8x32xbf16>
      %c2_i32_35 = arith.constant 2 : i32
      %70 = arith.addi %c2_i32_35, %arg5 : i32
      %c0_36 = arith.constant 0 : index
      %71 = arith.index_cast %70 : i32 to index
      %c40 = arith.constant 40 : index
      %c0_37 = arith.constant 0 : index
      %72 = vector.load %arg4[%c0_36, %71, %c40, %c0_37] : memref<1x18x144x32xbf16, #tpu.memory_space<vmem>>, vector<1x1x8x32xbf16>
      %73 = vector.shape_cast %72 : vector<1x1x8x32xbf16> to vector<8x32xbf16>
      %74 = vector.shape_cast %69 : vector<8x32xbf16> to vector<1x1x8x32xbf16>
      tpu.vector_store %arg4[%c0_36, %71, %c40, %c0_37], %74 {strides = array<i32>} : memref<1x18x144x32xbf16, #tpu.memory_space<vmem>>, vector<1x1x8x32xbf16>,
      %75 = vector.extract_strided_slice %22 {offsets = [64, 0], sizes = [8, 32], strides = [1, 1]} : vector<224x32xf32> to vector<8x32xf32>
      %76 = vector.extract_strided_slice %22 {offsets = [72, 0], sizes = [8, 32], strides = [1, 1]} : vector<224x32xf32> to vector<8x32xf32>
      %77 = arith.maximumf %75, %76 : vector<8x32xf32>
      %78 = vector.broadcast %0 : vector<1x32xf32> to vector<8x32xf32>
      %79 = arith.addf %77, %78 : vector<8x32xf32>
      %cst_38 = arith.constant 0.000000e+00 : f32
      %80 = vector.broadcast %cst_38 : f32 to vector<8x32xf32>
      %81 = arith.maximumf %79, %80 : vector<8x32xf32>
      %82 = arith.truncf %81 : vector<8x32xf32> to vector<8x32xbf16>
      %c2_i32_39 = arith.constant 2 : i32
      %83 = arith.addi %c2_i32_39, %arg5 : i32
      %c0_40 = arith.constant 0 : index
      %84 = arith.index_cast %83 : i32 to index
      %c48 = arith.constant 48 : index
      %c0_41 = arith.constant 0 : index
      %85 = vector.load %arg4[%c0_40, %84, %c48, %c0_41] : memref<1x18x144x32xbf16, #tpu.memory_space<vmem>>, vector<1x1x8x32xbf16>
      %86 = vector.shape_cast %85 : vector<1x1x8x32xbf16> to vector<8x32xbf16>
      %87 = vector.shape_cast %82 : vector<8x32xbf16> to vector<1x1x8x32xbf16>
      tpu.vector_store %arg4[%c0_40, %84, %c48, %c0_41], %87 {strides = array<i32>} : memref<1x18x144x32xbf16, #tpu.memory_space<vmem>>, vector<1x1x8x32xbf16>,
      %88 = vector.extract_strided_slice %22 {offsets = [80, 0], sizes = [8, 32], strides = [1, 1]} : vector<224x32xf32> to vector<8x32xf32>
      %89 = vector.extract_strided_slice %22 {offsets = [88, 0], sizes = [8, 32], strides = [1, 1]} : vector<224x32xf32> to vector<8x32xf32>
      %90 = arith.maximumf %88, %89 : vector<8x32xf32>
      %91 = vector.broadcast %0 : vector<1x32xf32> to vector<8x32xf32>
      %92 = arith.addf %90, %91 : vector<8x32xf32>
      %cst_42 = arith.constant 0.000000e+00 : f32
      %93 = vector.broadcast %cst_42 : f32 to vector<8x32xf32>
      %94 = arith.maximumf %92, %93 : vector<8x32xf32>
      %95 = arith.truncf %94 : vector<8x32xf32> to vector<8x32xbf16>
      %c2_i32_43 = arith.constant 2 : i32
      %96 = arith.addi %c2_i32_43, %arg5 : i32
      %c0_44 = arith.constant 0 : index
      %97 = arith.index_cast %96 : i32 to index
      %c56 = arith.constant 56 : index
      %c0_45 = arith.constant 0 : index
      %98 = vector.load %arg4[%c0_44, %97, %c56, %c0_45] : memref<1x18x144x32xbf16, #tpu.memory_space<vmem>>, vector<1x1x8x32xbf16>
      %99 = vector.shape_cast %98 : vector<1x1x8x32xbf16> to vector<8x32xbf16>
      %100 = vector.shape_cast %95 : vector<8x32xbf16> to vector<1x1x8x32xbf16>
      tpu.vector_store %arg4[%c0_44, %97, %c56, %c0_45], %100 {strides = array<i32>} : memref<1x18x144x32xbf16, #tpu.memory_space<vmem>>, vector<1x1x8x32xbf16>,
      %101 = vector.extract_strided_slice %22 {offsets = [96, 0], sizes = [8, 32], strides = [1, 1]} : vector<224x32xf32> to vector<8x32xf32>
      %102 = vector.extract_strided_slice %22 {offsets = [104, 0], sizes = [8, 32], strides = [1, 1]} : vector<224x32xf32> to vector<8x32xf32>
      %103 = arith.maximumf %101, %102 : vector<8x32xf32>
      %104 = vector.broadcast %0 : vector<1x32xf32> to vector<8x32xf32>
      %105 = arith.addf %103, %104 : vector<8x32xf32>
      %cst_46 = arith.constant 0.000000e+00 : f32
      %106 = vector.broadcast %cst_46 : f32 to vector<8x32xf32>
      %107 = arith.maximumf %105, %106 : vector<8x32xf32>
      %108 = arith.truncf %107 : vector<8x32xf32> to vector<8x32xbf16>
      %c2_i32_47 = arith.constant 2 : i32
      %109 = arith.addi %c2_i32_47, %arg5 : i32
      %c0_48 = arith.constant 0 : index
      %110 = arith.index_cast %109 : i32 to index
      %c64 = arith.constant 64 : index
      %c0_49 = arith.constant 0 : index
      %111 = vector.load %arg4[%c0_48, %110, %c64, %c0_49] : memref<1x18x144x32xbf16, #tpu.memory_space<vmem>>, vector<1x1x8x32xbf16>
      %112 = vector.shape_cast %111 : vector<1x1x8x32xbf16> to vector<8x32xbf16>
      %113 = vector.shape_cast %108 : vector<8x32xbf16> to vector<1x1x8x32xbf16>
      tpu.vector_store %arg4[%c0_48, %110, %c64, %c0_49], %113 {strides = array<i32>} : memref<1x18x144x32xbf16, #tpu.memory_space<vmem>>, vector<1x1x8x32xbf16>,
      %114 = vector.extract_strided_slice %22 {offsets = [112, 0], sizes = [8, 32], strides = [1, 1]} : vector<224x32xf32> to vector<8x32xf32>
      %115 = vector.extract_strided_slice %22 {offsets = [120, 0], sizes = [8, 32], strides = [1, 1]} : vector<224x32xf32> to vector<8x32xf32>
      %116 = arith.maximumf %114, %115 : vector<8x32xf32>
      %117 = vector.broadcast %0 : vector<1x32xf32> to vector<8x32xf32>
      %118 = arith.addf %116, %117 : vector<8x32xf32>
      %cst_50 = arith.constant 0.000000e+00 : f32
      %119 = vector.broadcast %cst_50 : f32 to vector<8x32xf32>
      %120 = arith.maximumf %118, %119 : vector<8x32xf32>
      %121 = arith.truncf %120 : vector<8x32xf32> to vector<8x32xbf16>
      %c2_i32_51 = arith.constant 2 : i32
      %122 = arith.addi %c2_i32_51, %arg5 : i32
      %c0_52 = arith.constant 0 : index
      %123 = arith.index_cast %122 : i32 to index
      %c72 = arith.constant 72 : index
      %c0_53 = arith.constant 0 : index
      %124 = vector.load %arg4[%c0_52, %123, %c72, %c0_53] : memref<1x18x144x32xbf16, #tpu.memory_space<vmem>>, vector<1x1x8x32xbf16>
      %125 = vector.shape_cast %124 : vector<1x1x8x32xbf16> to vector<8x32xbf16>
      %126 = vector.shape_cast %121 : vector<8x32xbf16> to vector<1x1x8x32xbf16>
      tpu.vector_store %arg4[%c0_52, %123, %c72, %c0_53], %126 {strides = array<i32>} : memref<1x18x144x32xbf16, #tpu.memory_space<vmem>>, vector<1x1x8x32xbf16>,
      %127 = vector.extract_strided_slice %22 {offsets = [128, 0], sizes = [8, 32], strides = [1, 1]} : vector<224x32xf32> to vector<8x32xf32>
      %128 = vector.extract_strided_slice %22 {offsets = [136, 0], sizes = [8, 32], strides = [1, 1]} : vector<224x32xf32> to vector<8x32xf32>
      %129 = arith.maximumf %127, %128 : vector<8x32xf32>
      %130 = vector.broadcast %0 : vector<1x32xf32> to vector<8x32xf32>
      %131 = arith.addf %129, %130 : vector<8x32xf32>
      %cst_54 = arith.constant 0.000000e+00 : f32
      %132 = vector.broadcast %cst_54 : f32 to vector<8x32xf32>
      %133 = arith.maximumf %131, %132 : vector<8x32xf32>
      %134 = arith.truncf %133 : vector<8x32xf32> to vector<8x32xbf16>
      %c2_i32_55 = arith.constant 2 : i32
      %135 = arith.addi %c2_i32_55, %arg5 : i32
      %c0_56 = arith.constant 0 : index
      %136 = arith.index_cast %135 : i32 to index
      %c80 = arith.constant 80 : index
      %c0_57 = arith.constant 0 : index
      %137 = vector.load %arg4[%c0_56, %136, %c80, %c0_57] : memref<1x18x144x32xbf16, #tpu.memory_space<vmem>>, vector<1x1x8x32xbf16>
      %138 = vector.shape_cast %137 : vector<1x1x8x32xbf16> to vector<8x32xbf16>
      %139 = vector.shape_cast %134 : vector<8x32xbf16> to vector<1x1x8x32xbf16>
      tpu.vector_store %arg4[%c0_56, %136, %c80, %c0_57], %139 {strides = array<i32>} : memref<1x18x144x32xbf16, #tpu.memory_space<vmem>>, vector<1x1x8x32xbf16>,
      %140 = vector.extract_strided_slice %22 {offsets = [144, 0], sizes = [8, 32], strides = [1, 1]} : vector<224x32xf32> to vector<8x32xf32>
      %141 = vector.extract_strided_slice %22 {offsets = [152, 0], sizes = [8, 32], strides = [1, 1]} : vector<224x32xf32> to vector<8x32xf32>
      %142 = arith.maximumf %140, %141 : vector<8x32xf32>
      %143 = vector.broadcast %0 : vector<1x32xf32> to vector<8x32xf32>
      %144 = arith.addf %142, %143 : vector<8x32xf32>
      %cst_58 = arith.constant 0.000000e+00 : f32
      %145 = vector.broadcast %cst_58 : f32 to vector<8x32xf32>
      %146 = arith.maximumf %144, %145 : vector<8x32xf32>
      %147 = arith.truncf %146 : vector<8x32xf32> to vector<8x32xbf16>
      %c2_i32_59 = arith.constant 2 : i32
      %148 = arith.addi %c2_i32_59, %arg5 : i32
      %c0_60 = arith.constant 0 : index
      %149 = arith.index_cast %148 : i32 to index
      %c88 = arith.constant 88 : index
      %c0_61 = arith.constant 0 : index
      %150 = vector.load %arg4[%c0_60, %149, %c88, %c0_61] : memref<1x18x144x32xbf16, #tpu.memory_space<vmem>>, vector<1x1x8x32xbf16>
      %151 = vector.shape_cast %150 : vector<1x1x8x32xbf16> to vector<8x32xbf16>
      %152 = vector.shape_cast %147 : vector<8x32xbf16> to vector<1x1x8x32xbf16>
      tpu.vector_store %arg4[%c0_60, %149, %c88, %c0_61], %152 {strides = array<i32>} : memref<1x18x144x32xbf16, #tpu.memory_space<vmem>>, vector<1x1x8x32xbf16>,
      %153 = vector.extract_strided_slice %22 {offsets = [160, 0], sizes = [8, 32], strides = [1, 1]} : vector<224x32xf32> to vector<8x32xf32>
      %154 = vector.extract_strided_slice %22 {offsets = [168, 0], sizes = [8, 32], strides = [1, 1]} : vector<224x32xf32> to vector<8x32xf32>
      %155 = arith.maximumf %153, %154 : vector<8x32xf32>
      %156 = vector.broadcast %0 : vector<1x32xf32> to vector<8x32xf32>
      %157 = arith.addf %155, %156 : vector<8x32xf32>
      %cst_62 = arith.constant 0.000000e+00 : f32
      %158 = vector.broadcast %cst_62 : f32 to vector<8x32xf32>
      %159 = arith.maximumf %157, %158 : vector<8x32xf32>
      %160 = arith.truncf %159 : vector<8x32xf32> to vector<8x32xbf16>
      %c2_i32_63 = arith.constant 2 : i32
      %161 = arith.addi %c2_i32_63, %arg5 : i32
      %c0_64 = arith.constant 0 : index
      %162 = arith.index_cast %161 : i32 to index
      %c96 = arith.constant 96 : index
      %c0_65 = arith.constant 0 : index
      %163 = vector.load %arg4[%c0_64, %162, %c96, %c0_65] : memref<1x18x144x32xbf16, #tpu.memory_space<vmem>>, vector<1x1x8x32xbf16>
      %164 = vector.shape_cast %163 : vector<1x1x8x32xbf16> to vector<8x32xbf16>
      %165 = vector.shape_cast %160 : vector<8x32xbf16> to vector<1x1x8x32xbf16>
      tpu.vector_store %arg4[%c0_64, %162, %c96, %c0_65], %165 {strides = array<i32>} : memref<1x18x144x32xbf16, #tpu.memory_space<vmem>>, vector<1x1x8x32xbf16>,
      %166 = vector.extract_strided_slice %22 {offsets = [176, 0], sizes = [8, 32], strides = [1, 1]} : vector<224x32xf32> to vector<8x32xf32>
      %167 = vector.extract_strided_slice %22 {offsets = [184, 0], sizes = [8, 32], strides = [1, 1]} : vector<224x32xf32> to vector<8x32xf32>
      %168 = arith.maximumf %166, %167 : vector<8x32xf32>
      %169 = vector.broadcast %0 : vector<1x32xf32> to vector<8x32xf32>
      %170 = arith.addf %168, %169 : vector<8x32xf32>
      %cst_66 = arith.constant 0.000000e+00 : f32
      %171 = vector.broadcast %cst_66 : f32 to vector<8x32xf32>
      %172 = arith.maximumf %170, %171 : vector<8x32xf32>
      %173 = arith.truncf %172 : vector<8x32xf32> to vector<8x32xbf16>
      %c2_i32_67 = arith.constant 2 : i32
      %174 = arith.addi %c2_i32_67, %arg5 : i32
      %c0_68 = arith.constant 0 : index
      %175 = arith.index_cast %174 : i32 to index
      %c104 = arith.constant 104 : index
      %c0_69 = arith.constant 0 : index
      %176 = vector.load %arg4[%c0_68, %175, %c104, %c0_69] : memref<1x18x144x32xbf16, #tpu.memory_space<vmem>>, vector<1x1x8x32xbf16>
      %177 = vector.shape_cast %176 : vector<1x1x8x32xbf16> to vector<8x32xbf16>
      %178 = vector.shape_cast %173 : vector<8x32xbf16> to vector<1x1x8x32xbf16>
      tpu.vector_store %arg4[%c0_68, %175, %c104, %c0_69], %178 {strides = array<i32>} : memref<1x18x144x32xbf16, #tpu.memory_space<vmem>>, vector<1x1x8x32xbf16>,
      %179 = vector.extract_strided_slice %22 {offsets = [192, 0], sizes = [8, 32], strides = [1, 1]} : vector<224x32xf32> to vector<8x32xf32>
      %180 = vector.extract_strided_slice %22 {offsets = [200, 0], sizes = [8, 32], strides = [1, 1]} : vector<224x32xf32> to vector<8x32xf32>
      %181 = arith.maximumf %179, %180 : vector<8x32xf32>
      %182 = vector.broadcast %0 : vector<1x32xf32> to vector<8x32xf32>
      %183 = arith.addf %181, %182 : vector<8x32xf32>
      %cst_70 = arith.constant 0.000000e+00 : f32
      %184 = vector.broadcast %cst_70 : f32 to vector<8x32xf32>
      %185 = arith.maximumf %183, %184 : vector<8x32xf32>
      %186 = arith.truncf %185 : vector<8x32xf32> to vector<8x32xbf16>
      %c2_i32_71 = arith.constant 2 : i32
      %187 = arith.addi %c2_i32_71, %arg5 : i32
      %c0_72 = arith.constant 0 : index
      %188 = arith.index_cast %187 : i32 to index
      %c112 = arith.constant 112 : index
      %c0_73 = arith.constant 0 : index
      %189 = vector.load %arg4[%c0_72, %188, %c112, %c0_73] : memref<1x18x144x32xbf16, #tpu.memory_space<vmem>>, vector<1x1x8x32xbf16>
      %190 = vector.shape_cast %189 : vector<1x1x8x32xbf16> to vector<8x32xbf16>
      %191 = vector.shape_cast %186 : vector<8x32xbf16> to vector<1x1x8x32xbf16>
      tpu.vector_store %arg4[%c0_72, %188, %c112, %c0_73], %191 {strides = array<i32>} : memref<1x18x144x32xbf16, #tpu.memory_space<vmem>>, vector<1x1x8x32xbf16>,
      %192 = vector.extract_strided_slice %22 {offsets = [208, 0], sizes = [8, 32], strides = [1, 1]} : vector<224x32xf32> to vector<8x32xf32>
      %193 = vector.extract_strided_slice %22 {offsets = [216, 0], sizes = [8, 32], strides = [1, 1]} : vector<224x32xf32> to vector<8x32xf32>
      %194 = arith.maximumf %192, %193 : vector<8x32xf32>
      %195 = vector.broadcast %0 : vector<1x32xf32> to vector<8x32xf32>
      %196 = arith.addf %194, %195 : vector<8x32xf32>
      %cst_74 = arith.constant 0.000000e+00 : f32
      %197 = vector.broadcast %cst_74 : f32 to vector<8x32xf32>
      %198 = arith.maximumf %196, %197 : vector<8x32xf32>
      %199 = arith.truncf %198 : vector<8x32xf32> to vector<8x32xbf16>
      %c2_i32_75 = arith.constant 2 : i32
      %200 = arith.addi %c2_i32_75, %arg5 : i32
      %c0_76 = arith.constant 0 : index
      %201 = arith.index_cast %200 : i32 to index
      %c120 = arith.constant 120 : index
      %c0_77 = arith.constant 0 : index
      %202 = vector.load %arg4[%c0_76, %201, %c120, %c0_77] : memref<1x18x144x32xbf16, #tpu.memory_space<vmem>>, vector<1x1x8x32xbf16>
      %203 = vector.shape_cast %202 : vector<1x1x8x32xbf16> to vector<8x32xbf16>
      %204 = vector.shape_cast %199 : vector<8x32xbf16> to vector<1x1x8x32xbf16>
      tpu.vector_store %arg4[%c0_76, %201, %c120, %c0_77], %204 {strides = array<i32>} : memref<1x18x144x32xbf16, #tpu.memory_space<vmem>>, vector<1x1x8x32xbf16>,
    }
    %c14_i32_5 = arith.constant 14 : i32
    return
  }
  func.func @transform_0(%arg0: i32) -> (i32, i32, i32, i32) {
    %c0_i32 = arith.constant 0 : i32
    %c0_i32_0 = arith.constant 0 : i32
    %c0_i32_1 = arith.constant 0 : i32
    %c0_i32_2 = arith.constant 0 : i32
    return %arg0, %c0_i32, %c0_i32_0, %c0_i32_1 : i32, i32, i32, i32
  }
  func.func @transform_1(%arg0: i32) -> (i32, i32, i32) {
    %c0_i32 = arith.constant 0 : i32
    %c0_i32_0 = arith.constant 0 : i32
    %c0_i32_1 = arith.constant 0 : i32
    %c0_i32_2 = arith.constant 0 : i32
    return %c0_i32, %c0_i32_0, %c0_i32_1 : i32, i32, i32
  }
  func.func @transform_2(%arg0: i32) -> (i32, i32) {
    %c0_i32 = arith.constant 0 : i32
    %c0_i32_0 = arith.constant 0 : i32
    %c0_i32_1 = arith.constant 0 : i32
    return %c0_i32, %c0_i32_0 : i32, i32
  }
  func.func @transform_3(%arg0: i32) -> (i32, i32, i32, i32) {
    %c0_i32 = arith.constant 0 : i32
    %c0_i32_0 = arith.constant 0 : i32
    %c0_i32_1 = arith.constant 0 : i32
    %c0_i32_2 = arith.constant 0 : i32
    return %arg0, %c0_i32, %c0_i32_0, %c0_i32_1 : i32, i32, i32, i32
  }
}

module attributes {stable_mosaic.version = 11 : i64} {
  func.func @_conv_pool_kernel(%arg0: i32, %arg1: memref<1x18x144x32xbf16, #tpu.memory_space<vmem>>, %arg2: memref<25x32x64xbf16, #tpu.memory_space<vmem>>, %arg3: memref<1x64xf32, #tpu.memory_space<vmem>>, %arg4: memref<1x11x88x64xbf16, #tpu.memory_space<vmem>>) attributes {dimension_semantics = [#tpu.dimension_semantics<parallel>], iteration_bounds = array<i64: 1>, scalar_prefetch = 0 : i64, scratch_operands = 0 : i64, tpu.core_type = #tpu.core_type<tc>, window_params = [{transform_indices = @transform_0, window_bounds = array<i64: 1, 18, 144, 32>}, {pipeline_mode = #tpu.pipeline_mode<synchronous>, transform_indices = @transform_1, window_bounds = array<i64: 25, 32, 64>}, {pipeline_mode = #tpu.pipeline_mode<synchronous>, transform_indices = @transform_2, window_bounds = array<i64: 1, 64>}, {transform_indices = @transform_3, window_bounds = array<i64: 1, 11, 88, 64>}]} {
    %c0 = arith.constant 0 : index
    %c0_0 = arith.constant 0 : index
    %0 = vector.load %arg3[%c0, %c0_0] : memref<1x64xf32, #tpu.memory_space<vmem>>, vector<1x64xf32>
    %cst = arith.constant 0.000000e+00 : bf16
    %1 = vector.broadcast %cst : bf16 to vector<1x11x88x64xbf16>
    %c0_1 = arith.constant 0 : index
    %c0_2 = arith.constant 0 : index
    %c0_3 = arith.constant 0 : index
    %c0_4 = arith.constant 0 : index
    %2 = vector.load %arg4[%c0_1, %c0_2, %c0_3, %c0_4] : memref<1x11x88x64xbf16, #tpu.memory_space<vmem>>, vector<1x11x88x64xbf16>
    tpu.vector_store %arg4[%c0_1, %c0_2, %c0_3, %c0_4], %1 {strides = array<i32>} : memref<1x11x88x64xbf16, #tpu.memory_space<vmem>>, vector<1x11x88x64xbf16>,
    %c0_i32 = arith.constant 0 : i32
    %c7_i32 = arith.constant 7 : i32
    %3 = arith.addi %c0_i32, %c7_i32 : i32
    %c1_i32 = arith.constant 1 : i32
    scf.for %arg5 = %c0_i32 to %3 step %c1_i32  : i32 {
      %c2_i32 = arith.constant 2 : i32
      %4 = arith.muli %c2_i32, %arg5 : i32
      %cst_6 = arith.constant 0.000000e+00 : f32
      %5 = vector.broadcast %cst_6 : f32 to vector<112x64xf32>
      %cst_7 = arith.constant 0.000000e+00 : f32
      %6 = vector.broadcast %cst_7 : f32 to vector<112x64xf32>
      %c0_8 = arith.constant 0 : index
      %c0_9 = arith.constant 0 : index
      %c0_10 = arith.constant 0 : index
      %7 = vector.load %arg2[%c0_8, %c0_9, %c0_10] : memref<25x32x64xbf16, #tpu.memory_space<vmem>>, vector<1x32x64xbf16>
      %8 = vector.shape_cast %7 : vector<1x32x64xbf16> to vector<32x64xbf16>
      %c0_i32_11 = arith.constant 0 : i32
      %9 = arith.addi %4, %c0_i32_11 : i32
      %c0_12 = arith.constant 0 : index
      %10 = arith.index_cast %9 : i32 to index
      %c0_13 = arith.constant 0 : index
      %c0_14 = arith.constant 0 : index
      %11 = vector.load %arg1[%c0_12, %10, %c0_13, %c0_14] : memref<1x18x144x32xbf16, #tpu.memory_space<vmem>>, vector<1x1x112x32xbf16>
      %12 = vector.shape_cast %11 : vector<1x1x112x32xbf16> to vector<112x32xbf16>
      %c1_i32_15 = arith.constant 1 : i32
      %13 = arith.addi %4, %c1_i32_15 : i32
      %c0_i32_16 = arith.constant 0 : i32
      %14 = arith.addi %13, %c0_i32_16 : i32
      %c0_17 = arith.constant 0 : index
      %15 = arith.index_cast %14 : i32 to index
      %c0_18 = arith.constant 0 : index
      %c0_19 = arith.constant 0 : index
      %16 = vector.load %arg1[%c0_17, %15, %c0_18, %c0_19] : memref<1x18x144x32xbf16, #tpu.memory_space<vmem>>, vector<1x1x112x32xbf16>
      %17 = vector.shape_cast %16 : vector<1x1x112x32xbf16> to vector<112x32xbf16>
      %cst_20 = arith.constant dense<0.000000e+00> : vector<112x64xf32>
      %18 = tpu.matmul %12, %8, %cst_20 {dimension_numbers = #tpu.dot_dimension_numbers<[1], [0], [0], [1], [0, 0, 1, 1], [], []>} : vector<112x32xbf16>, vector<32x64xbf16>, vector<112x64xf32> -> vector<112x64xf32>
      %19 = arith.addf %5, %18 : vector<112x64xf32>
      %cst_21 = arith.constant dense<0.000000e+00> : vector<112x64xf32>
      %20 = tpu.matmul %17, %8, %cst_21 {dimension_numbers = #tpu.dot_dimension_numbers<[1], [0], [0], [1], [0, 0, 1, 1], [], []>} : vector<112x32xbf16>, vector<32x64xbf16>, vector<112x64xf32> -> vector<112x64xf32>
      %21 = arith.addf %6, %20 : vector<112x64xf32>
      %c1 = arith.constant 1 : index
      %c0_22 = arith.constant 0 : index
      %c0_23 = arith.constant 0 : index
      %22 = vector.load %arg2[%c1, %c0_22, %c0_23] : memref<25x32x64xbf16, #tpu.memory_space<vmem>>, vector<1x32x64xbf16>
      %23 = vector.shape_cast %22 : vector<1x32x64xbf16> to vector<32x64xbf16>
      %c0_i32_24 = arith.constant 0 : i32
      %24 = arith.addi %4, %c0_i32_24 : i32
      %c0_25 = arith.constant 0 : index
      %25 = arith.index_cast %24 : i32 to index
      %c8 = arith.constant 8 : index
      %c0_26 = arith.constant 0 : index
      %26 = vector.load %arg1[%c0_25, %25, %c8, %c0_26] : memref<1x18x144x32xbf16, #tpu.memory_space<vmem>>, vector<1x1x112x32xbf16>
      %27 = vector.shape_cast %26 : vector<1x1x112x32xbf16> to vector<112x32xbf16>
      %c1_i32_27 = arith.constant 1 : i32
      %28 = arith.addi %4, %c1_i32_27 : i32
      %c0_i32_28 = arith.constant 0 : i32
      %29 = arith.addi %28, %c0_i32_28 : i32
      %c0_29 = arith.constant 0 : index
      %30 = arith.index_cast %29 : i32 to index
      %c8_30 = arith.constant 8 : index
      %c0_31 = arith.constant 0 : index
      %31 = vector.load %arg1[%c0_29, %30, %c8_30, %c0_31] : memref<1x18x144x32xbf16, #tpu.memory_space<vmem>>, vector<1x1x112x32xbf16>
      %32 = vector.shape_cast %31 : vector<1x1x112x32xbf16> to vector<112x32xbf16>
      %cst_32 = arith.constant dense<0.000000e+00> : vector<112x64xf32>
      %33 = tpu.matmul %27, %23, %cst_32 {dimension_numbers = #tpu.dot_dimension_numbers<[1], [0], [0], [1], [0, 0, 1, 1], [], []>} : vector<112x32xbf16>, vector<32x64xbf16>, vector<112x64xf32> -> vector<112x64xf32>
      %34 = arith.addf %19, %33 : vector<112x64xf32>
      %cst_33 = arith.constant dense<0.000000e+00> : vector<112x64xf32>
      %35 = tpu.matmul %32, %23, %cst_33 {dimension_numbers = #tpu.dot_dimension_numbers<[1], [0], [0], [1], [0, 0, 1, 1], [], []>} : vector<112x32xbf16>, vector<32x64xbf16>, vector<112x64xf32> -> vector<112x64xf32>
      %36 = arith.addf %21, %35 : vector<112x64xf32>
      %c2 = arith.constant 2 : index
      %c0_34 = arith.constant 0 : index
      %c0_35 = arith.constant 0 : index
      %37 = vector.load %arg2[%c2, %c0_34, %c0_35] : memref<25x32x64xbf16, #tpu.memory_space<vmem>>, vector<1x32x64xbf16>
      %38 = vector.shape_cast %37 : vector<1x32x64xbf16> to vector<32x64xbf16>
      %c0_i32_36 = arith.constant 0 : i32
      %39 = arith.addi %4, %c0_i32_36 : i32
      %c0_37 = arith.constant 0 : index
      %40 = arith.index_cast %39 : i32 to index
      %c16 = arith.constant 16 : index
      %c0_38 = arith.constant 0 : index
      %41 = vector.load %arg1[%c0_37, %40, %c16, %c0_38] : memref<1x18x144x32xbf16, #tpu.memory_space<vmem>>, vector<1x1x112x32xbf16>
      %42 = vector.shape_cast %41 : vector<1x1x112x32xbf16> to vector<112x32xbf16>
      %c1_i32_39 = arith.constant 1 : i32
      %43 = arith.addi %4, %c1_i32_39 : i32
      %c0_i32_40 = arith.constant 0 : i32
      %44 = arith.addi %43, %c0_i32_40 : i32
      %c0_41 = arith.constant 0 : index
      %45 = arith.index_cast %44 : i32 to index
      %c16_42 = arith.constant 16 : index
      %c0_43 = arith.constant 0 : index
      %46 = vector.load %arg1[%c0_41, %45, %c16_42, %c0_43] : memref<1x18x144x32xbf16, #tpu.memory_space<vmem>>, vector<1x1x112x32xbf16>
      %47 = vector.shape_cast %46 : vector<1x1x112x32xbf16> to vector<112x32xbf16>
      %cst_44 = arith.constant dense<0.000000e+00> : vector<112x64xf32>
      %48 = tpu.matmul %42, %38, %cst_44 {dimension_numbers = #tpu.dot_dimension_numbers<[1], [0], [0], [1], [0, 0, 1, 1], [], []>} : vector<112x32xbf16>, vector<32x64xbf16>, vector<112x64xf32> -> vector<112x64xf32>
      %49 = arith.addf %34, %48 : vector<112x64xf32>
      %cst_45 = arith.constant dense<0.000000e+00> : vector<112x64xf32>
      %50 = tpu.matmul %47, %38, %cst_45 {dimension_numbers = #tpu.dot_dimension_numbers<[1], [0], [0], [1], [0, 0, 1, 1], [], []>} : vector<112x32xbf16>, vector<32x64xbf16>, vector<112x64xf32> -> vector<112x64xf32>
      %51 = arith.addf %36, %50 : vector<112x64xf32>
      %c3 = arith.constant 3 : index
      %c0_46 = arith.constant 0 : index
      %c0_47 = arith.constant 0 : index
      %52 = vector.load %arg2[%c3, %c0_46, %c0_47] : memref<25x32x64xbf16, #tpu.memory_space<vmem>>, vector<1x32x64xbf16>
      %53 = vector.shape_cast %52 : vector<1x32x64xbf16> to vector<32x64xbf16>
      %c0_i32_48 = arith.constant 0 : i32
      %54 = arith.addi %4, %c0_i32_48 : i32
      %c0_49 = arith.constant 0 : index
      %55 = arith.index_cast %54 : i32 to index
      %c24 = arith.constant 24 : index
      %c0_50 = arith.constant 0 : index
      %56 = vector.load %arg1[%c0_49, %55, %c24, %c0_50] : memref<1x18x144x32xbf16, #tpu.memory_space<vmem>>, vector<1x1x112x32xbf16>
      %57 = vector.shape_cast %56 : vector<1x1x112x32xbf16> to vector<112x32xbf16>
      %c1_i32_51 = arith.constant 1 : i32
      %58 = arith.addi %4, %c1_i32_51 : i32
      %c0_i32_52 = arith.constant 0 : i32
      %59 = arith.addi %58, %c0_i32_52 : i32
      %c0_53 = arith.constant 0 : index
      %60 = arith.index_cast %59 : i32 to index
      %c24_54 = arith.constant 24 : index
      %c0_55 = arith.constant 0 : index
      %61 = vector.load %arg1[%c0_53, %60, %c24_54, %c0_55] : memref<1x18x144x32xbf16, #tpu.memory_space<vmem>>, vector<1x1x112x32xbf16>
      %62 = vector.shape_cast %61 : vector<1x1x112x32xbf16> to vector<112x32xbf16>
      %cst_56 = arith.constant dense<0.000000e+00> : vector<112x64xf32>
      %63 = tpu.matmul %57, %53, %cst_56 {dimension_numbers = #tpu.dot_dimension_numbers<[1], [0], [0], [1], [0, 0, 1, 1], [], []>} : vector<112x32xbf16>, vector<32x64xbf16>, vector<112x64xf32> -> vector<112x64xf32>
      %64 = arith.addf %49, %63 : vector<112x64xf32>
      %cst_57 = arith.constant dense<0.000000e+00> : vector<112x64xf32>
      %65 = tpu.matmul %62, %53, %cst_57 {dimension_numbers = #tpu.dot_dimension_numbers<[1], [0], [0], [1], [0, 0, 1, 1], [], []>} : vector<112x32xbf16>, vector<32x64xbf16>, vector<112x64xf32> -> vector<112x64xf32>
      %66 = arith.addf %51, %65 : vector<112x64xf32>
      %c4 = arith.constant 4 : index
      %c0_58 = arith.constant 0 : index
      %c0_59 = arith.constant 0 : index
      %67 = vector.load %arg2[%c4, %c0_58, %c0_59] : memref<25x32x64xbf16, #tpu.memory_space<vmem>>, vector<1x32x64xbf16>
      %68 = vector.shape_cast %67 : vector<1x32x64xbf16> to vector<32x64xbf16>
      %c0_i32_60 = arith.constant 0 : i32
      %69 = arith.addi %4, %c0_i32_60 : i32
      %c0_61 = arith.constant 0 : index
      %70 = arith.index_cast %69 : i32 to index
      %c32 = arith.constant 32 : index
      %c0_62 = arith.constant 0 : index
      %71 = vector.load %arg1[%c0_61, %70, %c32, %c0_62] : memref<1x18x144x32xbf16, #tpu.memory_space<vmem>>, vector<1x1x112x32xbf16>
      %72 = vector.shape_cast %71 : vector<1x1x112x32xbf16> to vector<112x32xbf16>
      %c1_i32_63 = arith.constant 1 : i32
      %73 = arith.addi %4, %c1_i32_63 : i32
      %c0_i32_64 = arith.constant 0 : i32
      %74 = arith.addi %73, %c0_i32_64 : i32
      %c0_65 = arith.constant 0 : index
      %75 = arith.index_cast %74 : i32 to index
      %c32_66 = arith.constant 32 : index
      %c0_67 = arith.constant 0 : index
      %76 = vector.load %arg1[%c0_65, %75, %c32_66, %c0_67] : memref<1x18x144x32xbf16, #tpu.memory_space<vmem>>, vector<1x1x112x32xbf16>
      %77 = vector.shape_cast %76 : vector<1x1x112x32xbf16> to vector<112x32xbf16>
      %cst_68 = arith.constant dense<0.000000e+00> : vector<112x64xf32>
      %78 = tpu.matmul %72, %68, %cst_68 {dimension_numbers = #tpu.dot_dimension_numbers<[1], [0], [0], [1], [0, 0, 1, 1], [], []>} : vector<112x32xbf16>, vector<32x64xbf16>, vector<112x64xf32> -> vector<112x64xf32>
      %79 = arith.addf %64, %78 : vector<112x64xf32>
      %cst_69 = arith.constant dense<0.000000e+00> : vector<112x64xf32>
      %80 = tpu.matmul %77, %68, %cst_69 {dimension_numbers = #tpu.dot_dimension_numbers<[1], [0], [0], [1], [0, 0, 1, 1], [], []>} : vector<112x32xbf16>, vector<32x64xbf16>, vector<112x64xf32> -> vector<112x64xf32>
      %81 = arith.addf %66, %80 : vector<112x64xf32>
      %c5 = arith.constant 5 : index
      %c0_70 = arith.constant 0 : index
      %c0_71 = arith.constant 0 : index
      %82 = vector.load %arg2[%c5, %c0_70, %c0_71] : memref<25x32x64xbf16, #tpu.memory_space<vmem>>, vector<1x32x64xbf16>
      %83 = vector.shape_cast %82 : vector<1x32x64xbf16> to vector<32x64xbf16>
      %c1_i32_72 = arith.constant 1 : i32
      %84 = arith.addi %4, %c1_i32_72 : i32
      %c0_73 = arith.constant 0 : index
      %85 = arith.index_cast %84 : i32 to index
      %c0_74 = arith.constant 0 : index
      %c0_75 = arith.constant 0 : index
      %86 = vector.load %arg1[%c0_73, %85, %c0_74, %c0_75] : memref<1x18x144x32xbf16, #tpu.memory_space<vmem>>, vector<1x1x112x32xbf16>
      %87 = vector.shape_cast %86 : vector<1x1x112x32xbf16> to vector<112x32xbf16>
      %c1_i32_76 = arith.constant 1 : i32
      %88 = arith.addi %4, %c1_i32_76 : i32
      %c1_i32_77 = arith.constant 1 : i32
      %89 = arith.addi %88, %c1_i32_77 : i32
      %c0_78 = arith.constant 0 : index
      %90 = arith.index_cast %89 : i32 to index
      %c0_79 = arith.constant 0 : index
      %c0_80 = arith.constant 0 : index
      %91 = vector.load %arg1[%c0_78, %90, %c0_79, %c0_80] : memref<1x18x144x32xbf16, #tpu.memory_space<vmem>>, vector<1x1x112x32xbf16>
      %92 = vector.shape_cast %91 : vector<1x1x112x32xbf16> to vector<112x32xbf16>
      %cst_81 = arith.constant dense<0.000000e+00> : vector<112x64xf32>
      %93 = tpu.matmul %87, %83, %cst_81 {dimension_numbers = #tpu.dot_dimension_numbers<[1], [0], [0], [1], [0, 0, 1, 1], [], []>} : vector<112x32xbf16>, vector<32x64xbf16>, vector<112x64xf32> -> vector<112x64xf32>
      %94 = arith.addf %79, %93 : vector<112x64xf32>
      %cst_82 = arith.constant dense<0.000000e+00> : vector<112x64xf32>
      %95 = tpu.matmul %92, %83, %cst_82 {dimension_numbers = #tpu.dot_dimension_numbers<[1], [0], [0], [1], [0, 0, 1, 1], [], []>} : vector<112x32xbf16>, vector<32x64xbf16>, vector<112x64xf32> -> vector<112x64xf32>
      %96 = arith.addf %81, %95 : vector<112x64xf32>
      %c6 = arith.constant 6 : index
      %c0_83 = arith.constant 0 : index
      %c0_84 = arith.constant 0 : index
      %97 = vector.load %arg2[%c6, %c0_83, %c0_84] : memref<25x32x64xbf16, #tpu.memory_space<vmem>>, vector<1x32x64xbf16>
      %98 = vector.shape_cast %97 : vector<1x32x64xbf16> to vector<32x64xbf16>
      %c1_i32_85 = arith.constant 1 : i32
      %99 = arith.addi %4, %c1_i32_85 : i32
      %c0_86 = arith.constant 0 : index
      %100 = arith.index_cast %99 : i32 to index
      %c8_87 = arith.constant 8 : index
      %c0_88 = arith.constant 0 : index
      %101 = vector.load %arg1[%c0_86, %100, %c8_87, %c0_88] : memref<1x18x144x32xbf16, #tpu.memory_space<vmem>>, vector<1x1x112x32xbf16>
      %102 = vector.shape_cast %101 : vector<1x1x112x32xbf16> to vector<112x32xbf16>
      %c1_i32_89 = arith.constant 1 : i32
      %103 = arith.addi %4, %c1_i32_89 : i32
      %c1_i32_90 = arith.constant 1 : i32
      %104 = arith.addi %103, %c1_i32_90 : i32
      %c0_91 = arith.constant 0 : index
      %105 = arith.index_cast %104 : i32 to index
      %c8_92 = arith.constant 8 : index
      %c0_93 = arith.constant 0 : index
      %106 = vector.load %arg1[%c0_91, %105, %c8_92, %c0_93] : memref<1x18x144x32xbf16, #tpu.memory_space<vmem>>, vector<1x1x112x32xbf16>
      %107 = vector.shape_cast %106 : vector<1x1x112x32xbf16> to vector<112x32xbf16>
      %cst_94 = arith.constant dense<0.000000e+00> : vector<112x64xf32>
      %108 = tpu.matmul %102, %98, %cst_94 {dimension_numbers = #tpu.dot_dimension_numbers<[1], [0], [0], [1], [0, 0, 1, 1], [], []>} : vector<112x32xbf16>, vector<32x64xbf16>, vector<112x64xf32> -> vector<112x64xf32>
      %109 = arith.addf %94, %108 : vector<112x64xf32>
      %cst_95 = arith.constant dense<0.000000e+00> : vector<112x64xf32>
      %110 = tpu.matmul %107, %98, %cst_95 {dimension_numbers = #tpu.dot_dimension_numbers<[1], [0], [0], [1], [0, 0, 1, 1], [], []>} : vector<112x32xbf16>, vector<32x64xbf16>, vector<112x64xf32> -> vector<112x64xf32>
      %111 = arith.addf %96, %110 : vector<112x64xf32>
      %c7 = arith.constant 7 : index
      %c0_96 = arith.constant 0 : index
      %c0_97 = arith.constant 0 : index
      %112 = vector.load %arg2[%c7, %c0_96, %c0_97] : memref<25x32x64xbf16, #tpu.memory_space<vmem>>, vector<1x32x64xbf16>
      %113 = vector.shape_cast %112 : vector<1x32x64xbf16> to vector<32x64xbf16>
      %c1_i32_98 = arith.constant 1 : i32
      %114 = arith.addi %4, %c1_i32_98 : i32
      %c0_99 = arith.constant 0 : index
      %115 = arith.index_cast %114 : i32 to index
      %c16_100 = arith.constant 16 : index
      %c0_101 = arith.constant 0 : index
      %116 = vector.load %arg1[%c0_99, %115, %c16_100, %c0_101] : memref<1x18x144x32xbf16, #tpu.memory_space<vmem>>, vector<1x1x112x32xbf16>
      %117 = vector.shape_cast %116 : vector<1x1x112x32xbf16> to vector<112x32xbf16>
      %c1_i32_102 = arith.constant 1 : i32
      %118 = arith.addi %4, %c1_i32_102 : i32
      %c1_i32_103 = arith.constant 1 : i32
      %119 = arith.addi %118, %c1_i32_103 : i32
      %c0_104 = arith.constant 0 : index
      %120 = arith.index_cast %119 : i32 to index
      %c16_105 = arith.constant 16 : index
      %c0_106 = arith.constant 0 : index
      %121 = vector.load %arg1[%c0_104, %120, %c16_105, %c0_106] : memref<1x18x144x32xbf16, #tpu.memory_space<vmem>>, vector<1x1x112x32xbf16>
      %122 = vector.shape_cast %121 : vector<1x1x112x32xbf16> to vector<112x32xbf16>
      %cst_107 = arith.constant dense<0.000000e+00> : vector<112x64xf32>
      %123 = tpu.matmul %117, %113, %cst_107 {dimension_numbers = #tpu.dot_dimension_numbers<[1], [0], [0], [1], [0, 0, 1, 1], [], []>} : vector<112x32xbf16>, vector<32x64xbf16>, vector<112x64xf32> -> vector<112x64xf32>
      %124 = arith.addf %109, %123 : vector<112x64xf32>
      %cst_108 = arith.constant dense<0.000000e+00> : vector<112x64xf32>
      %125 = tpu.matmul %122, %113, %cst_108 {dimension_numbers = #tpu.dot_dimension_numbers<[1], [0], [0], [1], [0, 0, 1, 1], [], []>} : vector<112x32xbf16>, vector<32x64xbf16>, vector<112x64xf32> -> vector<112x64xf32>
      %126 = arith.addf %111, %125 : vector<112x64xf32>
      %c8_109 = arith.constant 8 : index
      %c0_110 = arith.constant 0 : index
      %c0_111 = arith.constant 0 : index
      %127 = vector.load %arg2[%c8_109, %c0_110, %c0_111] : memref<25x32x64xbf16, #tpu.memory_space<vmem>>, vector<1x32x64xbf16>
      %128 = vector.shape_cast %127 : vector<1x32x64xbf16> to vector<32x64xbf16>
      %c1_i32_112 = arith.constant 1 : i32
      %129 = arith.addi %4, %c1_i32_112 : i32
      %c0_113 = arith.constant 0 : index
      %130 = arith.index_cast %129 : i32 to index
      %c24_114 = arith.constant 24 : index
      %c0_115 = arith.constant 0 : index
      %131 = vector.load %arg1[%c0_113, %130, %c24_114, %c0_115] : memref<1x18x144x32xbf16, #tpu.memory_space<vmem>>, vector<1x1x112x32xbf16>
      %132 = vector.shape_cast %131 : vector<1x1x112x32xbf16> to vector<112x32xbf16>
      %c1_i32_116 = arith.constant 1 : i32
      %133 = arith.addi %4, %c1_i32_116 : i32
      %c1_i32_117 = arith.constant 1 : i32
      %134 = arith.addi %133, %c1_i32_117 : i32
      %c0_118 = arith.constant 0 : index
      %135 = arith.index_cast %134 : i32 to index
      %c24_119 = arith.constant 24 : index
      %c0_120 = arith.constant 0 : index
      %136 = vector.load %arg1[%c0_118, %135, %c24_119, %c0_120] : memref<1x18x144x32xbf16, #tpu.memory_space<vmem>>, vector<1x1x112x32xbf16>
      %137 = vector.shape_cast %136 : vector<1x1x112x32xbf16> to vector<112x32xbf16>
      %cst_121 = arith.constant dense<0.000000e+00> : vector<112x64xf32>
      %138 = tpu.matmul %132, %128, %cst_121 {dimension_numbers = #tpu.dot_dimension_numbers<[1], [0], [0], [1], [0, 0, 1, 1], [], []>} : vector<112x32xbf16>, vector<32x64xbf16>, vector<112x64xf32> -> vector<112x64xf32>
      %139 = arith.addf %124, %138 : vector<112x64xf32>
      %cst_122 = arith.constant dense<0.000000e+00> : vector<112x64xf32>
      %140 = tpu.matmul %137, %128, %cst_122 {dimension_numbers = #tpu.dot_dimension_numbers<[1], [0], [0], [1], [0, 0, 1, 1], [], []>} : vector<112x32xbf16>, vector<32x64xbf16>, vector<112x64xf32> -> vector<112x64xf32>
      %141 = arith.addf %126, %140 : vector<112x64xf32>
      %c9 = arith.constant 9 : index
      %c0_123 = arith.constant 0 : index
      %c0_124 = arith.constant 0 : index
      %142 = vector.load %arg2[%c9, %c0_123, %c0_124] : memref<25x32x64xbf16, #tpu.memory_space<vmem>>, vector<1x32x64xbf16>
      %143 = vector.shape_cast %142 : vector<1x32x64xbf16> to vector<32x64xbf16>
      %c1_i32_125 = arith.constant 1 : i32
      %144 = arith.addi %4, %c1_i32_125 : i32
      %c0_126 = arith.constant 0 : index
      %145 = arith.index_cast %144 : i32 to index
      %c32_127 = arith.constant 32 : index
      %c0_128 = arith.constant 0 : index
      %146 = vector.load %arg1[%c0_126, %145, %c32_127, %c0_128] : memref<1x18x144x32xbf16, #tpu.memory_space<vmem>>, vector<1x1x112x32xbf16>
      %147 = vector.shape_cast %146 : vector<1x1x112x32xbf16> to vector<112x32xbf16>
      %c1_i32_129 = arith.constant 1 : i32
      %148 = arith.addi %4, %c1_i32_129 : i32
      %c1_i32_130 = arith.constant 1 : i32
      %149 = arith.addi %148, %c1_i32_130 : i32
      %c0_131 = arith.constant 0 : index
      %150 = arith.index_cast %149 : i32 to index
      %c32_132 = arith.constant 32 : index
      %c0_133 = arith.constant 0 : index
      %151 = vector.load %arg1[%c0_131, %150, %c32_132, %c0_133] : memref<1x18x144x32xbf16, #tpu.memory_space<vmem>>, vector<1x1x112x32xbf16>
      %152 = vector.shape_cast %151 : vector<1x1x112x32xbf16> to vector<112x32xbf16>
      %cst_134 = arith.constant dense<0.000000e+00> : vector<112x64xf32>
      %153 = tpu.matmul %147, %143, %cst_134 {dimension_numbers = #tpu.dot_dimension_numbers<[1], [0], [0], [1], [0, 0, 1, 1], [], []>} : vector<112x32xbf16>, vector<32x64xbf16>, vector<112x64xf32> -> vector<112x64xf32>
      %154 = arith.addf %139, %153 : vector<112x64xf32>
      %cst_135 = arith.constant dense<0.000000e+00> : vector<112x64xf32>
      %155 = tpu.matmul %152, %143, %cst_135 {dimension_numbers = #tpu.dot_dimension_numbers<[1], [0], [0], [1], [0, 0, 1, 1], [], []>} : vector<112x32xbf16>, vector<32x64xbf16>, vector<112x64xf32> -> vector<112x64xf32>
      %156 = arith.addf %141, %155 : vector<112x64xf32>
      %c10 = arith.constant 10 : index
      %c0_136 = arith.constant 0 : index
      %c0_137 = arith.constant 0 : index
      %157 = vector.load %arg2[%c10, %c0_136, %c0_137] : memref<25x32x64xbf16, #tpu.memory_space<vmem>>, vector<1x32x64xbf16>
      %158 = vector.shape_cast %157 : vector<1x32x64xbf16> to vector<32x64xbf16>
      %c2_i32_138 = arith.constant 2 : i32
      %159 = arith.addi %4, %c2_i32_138 : i32
      %c0_139 = arith.constant 0 : index
      %160 = arith.index_cast %159 : i32 to index
      %c0_140 = arith.constant 0 : index
      %c0_141 = arith.constant 0 : index
      %161 = vector.load %arg1[%c0_139, %160, %c0_140, %c0_141] : memref<1x18x144x32xbf16, #tpu.memory_space<vmem>>, vector<1x1x112x32xbf16>
      %162 = vector.shape_cast %161 : vector<1x1x112x32xbf16> to vector<112x32xbf16>
      %c1_i32_142 = arith.constant 1 : i32
      %163 = arith.addi %4, %c1_i32_142 : i32
      %c2_i32_143 = arith.constant 2 : i32
      %164 = arith.addi %163, %c2_i32_143 : i32
      %c0_144 = arith.constant 0 : index
      %165 = arith.index_cast %164 : i32 to index
      %c0_145 = arith.constant 0 : index
      %c0_146 = arith.constant 0 : index
      %166 = vector.load %arg1[%c0_144, %165, %c0_145, %c0_146] : memref<1x18x144x32xbf16, #tpu.memory_space<vmem>>, vector<1x1x112x32xbf16>
      %167 = vector.shape_cast %166 : vector<1x1x112x32xbf16> to vector<112x32xbf16>
      %cst_147 = arith.constant dense<0.000000e+00> : vector<112x64xf32>
      %168 = tpu.matmul %162, %158, %cst_147 {dimension_numbers = #tpu.dot_dimension_numbers<[1], [0], [0], [1], [0, 0, 1, 1], [], []>} : vector<112x32xbf16>, vector<32x64xbf16>, vector<112x64xf32> -> vector<112x64xf32>
      %169 = arith.addf %154, %168 : vector<112x64xf32>
      %cst_148 = arith.constant dense<0.000000e+00> : vector<112x64xf32>
      %170 = tpu.matmul %167, %158, %cst_148 {dimension_numbers = #tpu.dot_dimension_numbers<[1], [0], [0], [1], [0, 0, 1, 1], [], []>} : vector<112x32xbf16>, vector<32x64xbf16>, vector<112x64xf32> -> vector<112x64xf32>
      %171 = arith.addf %156, %170 : vector<112x64xf32>
      %c11 = arith.constant 11 : index
      %c0_149 = arith.constant 0 : index
      %c0_150 = arith.constant 0 : index
      %172 = vector.load %arg2[%c11, %c0_149, %c0_150] : memref<25x32x64xbf16, #tpu.memory_space<vmem>>, vector<1x32x64xbf16>
      %173 = vector.shape_cast %172 : vector<1x32x64xbf16> to vector<32x64xbf16>
      %c2_i32_151 = arith.constant 2 : i32
      %174 = arith.addi %4, %c2_i32_151 : i32
      %c0_152 = arith.constant 0 : index
      %175 = arith.index_cast %174 : i32 to index
      %c8_153 = arith.constant 8 : index
      %c0_154 = arith.constant 0 : index
      %176 = vector.load %arg1[%c0_152, %175, %c8_153, %c0_154] : memref<1x18x144x32xbf16, #tpu.memory_space<vmem>>, vector<1x1x112x32xbf16>
      %177 = vector.shape_cast %176 : vector<1x1x112x32xbf16> to vector<112x32xbf16>
      %c1_i32_155 = arith.constant 1 : i32
      %178 = arith.addi %4, %c1_i32_155 : i32
      %c2_i32_156 = arith.constant 2 : i32
      %179 = arith.addi %178, %c2_i32_156 : i32
      %c0_157 = arith.constant 0 : index
      %180 = arith.index_cast %179 : i32 to index
      %c8_158 = arith.constant 8 : index
      %c0_159 = arith.constant 0 : index
      %181 = vector.load %arg1[%c0_157, %180, %c8_158, %c0_159] : memref<1x18x144x32xbf16, #tpu.memory_space<vmem>>, vector<1x1x112x32xbf16>
      %182 = vector.shape_cast %181 : vector<1x1x112x32xbf16> to vector<112x32xbf16>
      %cst_160 = arith.constant dense<0.000000e+00> : vector<112x64xf32>
      %183 = tpu.matmul %177, %173, %cst_160 {dimension_numbers = #tpu.dot_dimension_numbers<[1], [0], [0], [1], [0, 0, 1, 1], [], []>} : vector<112x32xbf16>, vector<32x64xbf16>, vector<112x64xf32> -> vector<112x64xf32>
      %184 = arith.addf %169, %183 : vector<112x64xf32>
      %cst_161 = arith.constant dense<0.000000e+00> : vector<112x64xf32>
      %185 = tpu.matmul %182, %173, %cst_161 {dimension_numbers = #tpu.dot_dimension_numbers<[1], [0], [0], [1], [0, 0, 1, 1], [], []>} : vector<112x32xbf16>, vector<32x64xbf16>, vector<112x64xf32> -> vector<112x64xf32>
      %186 = arith.addf %171, %185 : vector<112x64xf32>
      %c12 = arith.constant 12 : index
      %c0_162 = arith.constant 0 : index
      %c0_163 = arith.constant 0 : index
      %187 = vector.load %arg2[%c12, %c0_162, %c0_163] : memref<25x32x64xbf16, #tpu.memory_space<vmem>>, vector<1x32x64xbf16>
      %188 = vector.shape_cast %187 : vector<1x32x64xbf16> to vector<32x64xbf16>
      %c2_i32_164 = arith.constant 2 : i32
      %189 = arith.addi %4, %c2_i32_164 : i32
      %c0_165 = arith.constant 0 : index
      %190 = arith.index_cast %189 : i32 to index
      %c16_166 = arith.constant 16 : index
      %c0_167 = arith.constant 0 : index
      %191 = vector.load %arg1[%c0_165, %190, %c16_166, %c0_167] : memref<1x18x144x32xbf16, #tpu.memory_space<vmem>>, vector<1x1x112x32xbf16>
      %192 = vector.shape_cast %191 : vector<1x1x112x32xbf16> to vector<112x32xbf16>
      %c1_i32_168 = arith.constant 1 : i32
      %193 = arith.addi %4, %c1_i32_168 : i32
      %c2_i32_169 = arith.constant 2 : i32
      %194 = arith.addi %193, %c2_i32_169 : i32
      %c0_170 = arith.constant 0 : index
      %195 = arith.index_cast %194 : i32 to index
      %c16_171 = arith.constant 16 : index
      %c0_172 = arith.constant 0 : index
      %196 = vector.load %arg1[%c0_170, %195, %c16_171, %c0_172] : memref<1x18x144x32xbf16, #tpu.memory_space<vmem>>, vector<1x1x112x32xbf16>
      %197 = vector.shape_cast %196 : vector<1x1x112x32xbf16> to vector<112x32xbf16>
      %cst_173 = arith.constant dense<0.000000e+00> : vector<112x64xf32>
      %198 = tpu.matmul %192, %188, %cst_173 {dimension_numbers = #tpu.dot_dimension_numbers<[1], [0], [0], [1], [0, 0, 1, 1], [], []>} : vector<112x32xbf16>, vector<32x64xbf16>, vector<112x64xf32> -> vector<112x64xf32>
      %199 = arith.addf %184, %198 : vector<112x64xf32>
      %cst_174 = arith.constant dense<0.000000e+00> : vector<112x64xf32>
      %200 = tpu.matmul %197, %188, %cst_174 {dimension_numbers = #tpu.dot_dimension_numbers<[1], [0], [0], [1], [0, 0, 1, 1], [], []>} : vector<112x32xbf16>, vector<32x64xbf16>, vector<112x64xf32> -> vector<112x64xf32>
      %201 = arith.addf %186, %200 : vector<112x64xf32>
      %c13 = arith.constant 13 : index
      %c0_175 = arith.constant 0 : index
      %c0_176 = arith.constant 0 : index
      %202 = vector.load %arg2[%c13, %c0_175, %c0_176] : memref<25x32x64xbf16, #tpu.memory_space<vmem>>, vector<1x32x64xbf16>
      %203 = vector.shape_cast %202 : vector<1x32x64xbf16> to vector<32x64xbf16>
      %c2_i32_177 = arith.constant 2 : i32
      %204 = arith.addi %4, %c2_i32_177 : i32
      %c0_178 = arith.constant 0 : index
      %205 = arith.index_cast %204 : i32 to index
      %c24_179 = arith.constant 24 : index
      %c0_180 = arith.constant 0 : index
      %206 = vector.load %arg1[%c0_178, %205, %c24_179, %c0_180] : memref<1x18x144x32xbf16, #tpu.memory_space<vmem>>, vector<1x1x112x32xbf16>
      %207 = vector.shape_cast %206 : vector<1x1x112x32xbf16> to vector<112x32xbf16>
      %c1_i32_181 = arith.constant 1 : i32
      %208 = arith.addi %4, %c1_i32_181 : i32
      %c2_i32_182 = arith.constant 2 : i32
      %209 = arith.addi %208, %c2_i32_182 : i32
      %c0_183 = arith.constant 0 : index
      %210 = arith.index_cast %209 : i32 to index
      %c24_184 = arith.constant 24 : index
      %c0_185 = arith.constant 0 : index
      %211 = vector.load %arg1[%c0_183, %210, %c24_184, %c0_185] : memref<1x18x144x32xbf16, #tpu.memory_space<vmem>>, vector<1x1x112x32xbf16>
      %212 = vector.shape_cast %211 : vector<1x1x112x32xbf16> to vector<112x32xbf16>
      %cst_186 = arith.constant dense<0.000000e+00> : vector<112x64xf32>
      %213 = tpu.matmul %207, %203, %cst_186 {dimension_numbers = #tpu.dot_dimension_numbers<[1], [0], [0], [1], [0, 0, 1, 1], [], []>} : vector<112x32xbf16>, vector<32x64xbf16>, vector<112x64xf32> -> vector<112x64xf32>
      %214 = arith.addf %199, %213 : vector<112x64xf32>
      %cst_187 = arith.constant dense<0.000000e+00> : vector<112x64xf32>
      %215 = tpu.matmul %212, %203, %cst_187 {dimension_numbers = #tpu.dot_dimension_numbers<[1], [0], [0], [1], [0, 0, 1, 1], [], []>} : vector<112x32xbf16>, vector<32x64xbf16>, vector<112x64xf32> -> vector<112x64xf32>
      %216 = arith.addf %201, %215 : vector<112x64xf32>
      %c14 = arith.constant 14 : index
      %c0_188 = arith.constant 0 : index
      %c0_189 = arith.constant 0 : index
      %217 = vector.load %arg2[%c14, %c0_188, %c0_189] : memref<25x32x64xbf16, #tpu.memory_space<vmem>>, vector<1x32x64xbf16>
      %218 = vector.shape_cast %217 : vector<1x32x64xbf16> to vector<32x64xbf16>
      %c2_i32_190 = arith.constant 2 : i32
      %219 = arith.addi %4, %c2_i32_190 : i32
      %c0_191 = arith.constant 0 : index
      %220 = arith.index_cast %219 : i32 to index
      %c32_192 = arith.constant 32 : index
      %c0_193 = arith.constant 0 : index
      %221 = vector.load %arg1[%c0_191, %220, %c32_192, %c0_193] : memref<1x18x144x32xbf16, #tpu.memory_space<vmem>>, vector<1x1x112x32xbf16>
      %222 = vector.shape_cast %221 : vector<1x1x112x32xbf16> to vector<112x32xbf16>
      %c1_i32_194 = arith.constant 1 : i32
      %223 = arith.addi %4, %c1_i32_194 : i32
      %c2_i32_195 = arith.constant 2 : i32
      %224 = arith.addi %223, %c2_i32_195 : i32
      %c0_196 = arith.constant 0 : index
      %225 = arith.index_cast %224 : i32 to index
      %c32_197 = arith.constant 32 : index
      %c0_198 = arith.constant 0 : index
      %226 = vector.load %arg1[%c0_196, %225, %c32_197, %c0_198] : memref<1x18x144x32xbf16, #tpu.memory_space<vmem>>, vector<1x1x112x32xbf16>
      %227 = vector.shape_cast %226 : vector<1x1x112x32xbf16> to vector<112x32xbf16>
      %cst_199 = arith.constant dense<0.000000e+00> : vector<112x64xf32>
      %228 = tpu.matmul %222, %218, %cst_199 {dimension_numbers = #tpu.dot_dimension_numbers<[1], [0], [0], [1], [0, 0, 1, 1], [], []>} : vector<112x32xbf16>, vector<32x64xbf16>, vector<112x64xf32> -> vector<112x64xf32>
      %229 = arith.addf %214, %228 : vector<112x64xf32>
      %cst_200 = arith.constant dense<0.000000e+00> : vector<112x64xf32>
      %230 = tpu.matmul %227, %218, %cst_200 {dimension_numbers = #tpu.dot_dimension_numbers<[1], [0], [0], [1], [0, 0, 1, 1], [], []>} : vector<112x32xbf16>, vector<32x64xbf16>, vector<112x64xf32> -> vector<112x64xf32>
      %231 = arith.addf %216, %230 : vector<112x64xf32>
      %c15 = arith.constant 15 : index
      %c0_201 = arith.constant 0 : index
      %c0_202 = arith.constant 0 : index
      %232 = vector.load %arg2[%c15, %c0_201, %c0_202] : memref<25x32x64xbf16, #tpu.memory_space<vmem>>, vector<1x32x64xbf16>
      %233 = vector.shape_cast %232 : vector<1x32x64xbf16> to vector<32x64xbf16>
      %c3_i32 = arith.constant 3 : i32
      %234 = arith.addi %4, %c3_i32 : i32
      %c0_203 = arith.constant 0 : index
      %235 = arith.index_cast %234 : i32 to index
      %c0_204 = arith.constant 0 : index
      %c0_205 = arith.constant 0 : index
      %236 = vector.load %arg1[%c0_203, %235, %c0_204, %c0_205] : memref<1x18x144x32xbf16, #tpu.memory_space<vmem>>, vector<1x1x112x32xbf16>
      %237 = vector.shape_cast %236 : vector<1x1x112x32xbf16> to vector<112x32xbf16>
      %c1_i32_206 = arith.constant 1 : i32
      %238 = arith.addi %4, %c1_i32_206 : i32
      %c3_i32_207 = arith.constant 3 : i32
      %239 = arith.addi %238, %c3_i32_207 : i32
      %c0_208 = arith.constant 0 : index
      %240 = arith.index_cast %239 : i32 to index
      %c0_209 = arith.constant 0 : index
      %c0_210 = arith.constant 0 : index
      %241 = vector.load %arg1[%c0_208, %240, %c0_209, %c0_210] : memref<1x18x144x32xbf16, #tpu.memory_space<vmem>>, vector<1x1x112x32xbf16>
      %242 = vector.shape_cast %241 : vector<1x1x112x32xbf16> to vector<112x32xbf16>
      %cst_211 = arith.constant dense<0.000000e+00> : vector<112x64xf32>
      %243 = tpu.matmul %237, %233, %cst_211 {dimension_numbers = #tpu.dot_dimension_numbers<[1], [0], [0], [1], [0, 0, 1, 1], [], []>} : vector<112x32xbf16>, vector<32x64xbf16>, vector<112x64xf32> -> vector<112x64xf32>
      %244 = arith.addf %229, %243 : vector<112x64xf32>
      %cst_212 = arith.constant dense<0.000000e+00> : vector<112x64xf32>
      %245 = tpu.matmul %242, %233, %cst_212 {dimension_numbers = #tpu.dot_dimension_numbers<[1], [0], [0], [1], [0, 0, 1, 1], [], []>} : vector<112x32xbf16>, vector<32x64xbf16>, vector<112x64xf32> -> vector<112x64xf32>
      %246 = arith.addf %231, %245 : vector<112x64xf32>
      %c16_213 = arith.constant 16 : index
      %c0_214 = arith.constant 0 : index
      %c0_215 = arith.constant 0 : index
      %247 = vector.load %arg2[%c16_213, %c0_214, %c0_215] : memref<25x32x64xbf16, #tpu.memory_space<vmem>>, vector<1x32x64xbf16>
      %248 = vector.shape_cast %247 : vector<1x32x64xbf16> to vector<32x64xbf16>
      %c3_i32_216 = arith.constant 3 : i32
      %249 = arith.addi %4, %c3_i32_216 : i32
      %c0_217 = arith.constant 0 : index
      %250 = arith.index_cast %249 : i32 to index
      %c8_218 = arith.constant 8 : index
      %c0_219 = arith.constant 0 : index
      %251 = vector.load %arg1[%c0_217, %250, %c8_218, %c0_219] : memref<1x18x144x32xbf16, #tpu.memory_space<vmem>>, vector<1x1x112x32xbf16>
      %252 = vector.shape_cast %251 : vector<1x1x112x32xbf16> to vector<112x32xbf16>
      %c1_i32_220 = arith.constant 1 : i32
      %253 = arith.addi %4, %c1_i32_220 : i32
      %c3_i32_221 = arith.constant 3 : i32
      %254 = arith.addi %253, %c3_i32_221 : i32
      %c0_222 = arith.constant 0 : index
      %255 = arith.index_cast %254 : i32 to index
      %c8_223 = arith.constant 8 : index
      %c0_224 = arith.constant 0 : index
      %256 = vector.load %arg1[%c0_222, %255, %c8_223, %c0_224] : memref<1x18x144x32xbf16, #tpu.memory_space<vmem>>, vector<1x1x112x32xbf16>
      %257 = vector.shape_cast %256 : vector<1x1x112x32xbf16> to vector<112x32xbf16>
      %cst_225 = arith.constant dense<0.000000e+00> : vector<112x64xf32>
      %258 = tpu.matmul %252, %248, %cst_225 {dimension_numbers = #tpu.dot_dimension_numbers<[1], [0], [0], [1], [0, 0, 1, 1], [], []>} : vector<112x32xbf16>, vector<32x64xbf16>, vector<112x64xf32> -> vector<112x64xf32>
      %259 = arith.addf %244, %258 : vector<112x64xf32>
      %cst_226 = arith.constant dense<0.000000e+00> : vector<112x64xf32>
      %260 = tpu.matmul %257, %248, %cst_226 {dimension_numbers = #tpu.dot_dimension_numbers<[1], [0], [0], [1], [0, 0, 1, 1], [], []>} : vector<112x32xbf16>, vector<32x64xbf16>, vector<112x64xf32> -> vector<112x64xf32>
      %261 = arith.addf %246, %260 : vector<112x64xf32>
      %c17 = arith.constant 17 : index
      %c0_227 = arith.constant 0 : index
      %c0_228 = arith.constant 0 : index
      %262 = vector.load %arg2[%c17, %c0_227, %c0_228] : memref<25x32x64xbf16, #tpu.memory_space<vmem>>, vector<1x32x64xbf16>
      %263 = vector.shape_cast %262 : vector<1x32x64xbf16> to vector<32x64xbf16>
      %c3_i32_229 = arith.constant 3 : i32
      %264 = arith.addi %4, %c3_i32_229 : i32
      %c0_230 = arith.constant 0 : index
      %265 = arith.index_cast %264 : i32 to index
      %c16_231 = arith.constant 16 : index
      %c0_232 = arith.constant 0 : index
      %266 = vector.load %arg1[%c0_230, %265, %c16_231, %c0_232] : memref<1x18x144x32xbf16, #tpu.memory_space<vmem>>, vector<1x1x112x32xbf16>
      %267 = vector.shape_cast %266 : vector<1x1x112x32xbf16> to vector<112x32xbf16>
      %c1_i32_233 = arith.constant 1 : i32
      %268 = arith.addi %4, %c1_i32_233 : i32
      %c3_i32_234 = arith.constant 3 : i32
      %269 = arith.addi %268, %c3_i32_234 : i32
      %c0_235 = arith.constant 0 : index
      %270 = arith.index_cast %269 : i32 to index
      %c16_236 = arith.constant 16 : index
      %c0_237 = arith.constant 0 : index
      %271 = vector.load %arg1[%c0_235, %270, %c16_236, %c0_237] : memref<1x18x144x32xbf16, #tpu.memory_space<vmem>>, vector<1x1x112x32xbf16>
      %272 = vector.shape_cast %271 : vector<1x1x112x32xbf16> to vector<112x32xbf16>
      %cst_238 = arith.constant dense<0.000000e+00> : vector<112x64xf32>
      %273 = tpu.matmul %267, %263, %cst_238 {dimension_numbers = #tpu.dot_dimension_numbers<[1], [0], [0], [1], [0, 0, 1, 1], [], []>} : vector<112x32xbf16>, vector<32x64xbf16>, vector<112x64xf32> -> vector<112x64xf32>
      %274 = arith.addf %259, %273 : vector<112x64xf32>
      %cst_239 = arith.constant dense<0.000000e+00> : vector<112x64xf32>
      %275 = tpu.matmul %272, %263, %cst_239 {dimension_numbers = #tpu.dot_dimension_numbers<[1], [0], [0], [1], [0, 0, 1, 1], [], []>} : vector<112x32xbf16>, vector<32x64xbf16>, vector<112x64xf32> -> vector<112x64xf32>
      %276 = arith.addf %261, %275 : vector<112x64xf32>
      %c18 = arith.constant 18 : index
      %c0_240 = arith.constant 0 : index
      %c0_241 = arith.constant 0 : index
      %277 = vector.load %arg2[%c18, %c0_240, %c0_241] : memref<25x32x64xbf16, #tpu.memory_space<vmem>>, vector<1x32x64xbf16>
      %278 = vector.shape_cast %277 : vector<1x32x64xbf16> to vector<32x64xbf16>
      %c3_i32_242 = arith.constant 3 : i32
      %279 = arith.addi %4, %c3_i32_242 : i32
      %c0_243 = arith.constant 0 : index
      %280 = arith.index_cast %279 : i32 to index
      %c24_244 = arith.constant 24 : index
      %c0_245 = arith.constant 0 : index
      %281 = vector.load %arg1[%c0_243, %280, %c24_244, %c0_245] : memref<1x18x144x32xbf16, #tpu.memory_space<vmem>>, vector<1x1x112x32xbf16>
      %282 = vector.shape_cast %281 : vector<1x1x112x32xbf16> to vector<112x32xbf16>
      %c1_i32_246 = arith.constant 1 : i32
      %283 = arith.addi %4, %c1_i32_246 : i32
      %c3_i32_247 = arith.constant 3 : i32
      %284 = arith.addi %283, %c3_i32_247 : i32
      %c0_248 = arith.constant 0 : index
      %285 = arith.index_cast %284 : i32 to index
      %c24_249 = arith.constant 24 : index
      %c0_250 = arith.constant 0 : index
      %286 = vector.load %arg1[%c0_248, %285, %c24_249, %c0_250] : memref<1x18x144x32xbf16, #tpu.memory_space<vmem>>, vector<1x1x112x32xbf16>
      %287 = vector.shape_cast %286 : vector<1x1x112x32xbf16> to vector<112x32xbf16>
      %cst_251 = arith.constant dense<0.000000e+00> : vector<112x64xf32>
      %288 = tpu.matmul %282, %278, %cst_251 {dimension_numbers = #tpu.dot_dimension_numbers<[1], [0], [0], [1], [0, 0, 1, 1], [], []>} : vector<112x32xbf16>, vector<32x64xbf16>, vector<112x64xf32> -> vector<112x64xf32>
      %289 = arith.addf %274, %288 : vector<112x64xf32>
      %cst_252 = arith.constant dense<0.000000e+00> : vector<112x64xf32>
      %290 = tpu.matmul %287, %278, %cst_252 {dimension_numbers = #tpu.dot_dimension_numbers<[1], [0], [0], [1], [0, 0, 1, 1], [], []>} : vector<112x32xbf16>, vector<32x64xbf16>, vector<112x64xf32> -> vector<112x64xf32>
      %291 = arith.addf %276, %290 : vector<112x64xf32>
      %c19 = arith.constant 19 : index
      %c0_253 = arith.constant 0 : index
      %c0_254 = arith.constant 0 : index
      %292 = vector.load %arg2[%c19, %c0_253, %c0_254] : memref<25x32x64xbf16, #tpu.memory_space<vmem>>, vector<1x32x64xbf16>
      %293 = vector.shape_cast %292 : vector<1x32x64xbf16> to vector<32x64xbf16>
      %c3_i32_255 = arith.constant 3 : i32
      %294 = arith.addi %4, %c3_i32_255 : i32
      %c0_256 = arith.constant 0 : index
      %295 = arith.index_cast %294 : i32 to index
      %c32_257 = arith.constant 32 : index
      %c0_258 = arith.constant 0 : index
      %296 = vector.load %arg1[%c0_256, %295, %c32_257, %c0_258] : memref<1x18x144x32xbf16, #tpu.memory_space<vmem>>, vector<1x1x112x32xbf16>
      %297 = vector.shape_cast %296 : vector<1x1x112x32xbf16> to vector<112x32xbf16>
      %c1_i32_259 = arith.constant 1 : i32
      %298 = arith.addi %4, %c1_i32_259 : i32
      %c3_i32_260 = arith.constant 3 : i32
      %299 = arith.addi %298, %c3_i32_260 : i32
      %c0_261 = arith.constant 0 : index
      %300 = arith.index_cast %299 : i32 to index
      %c32_262 = arith.constant 32 : index
      %c0_263 = arith.constant 0 : index
      %301 = vector.load %arg1[%c0_261, %300, %c32_262, %c0_263] : memref<1x18x144x32xbf16, #tpu.memory_space<vmem>>, vector<1x1x112x32xbf16>
      %302 = vector.shape_cast %301 : vector<1x1x112x32xbf16> to vector<112x32xbf16>
      %cst_264 = arith.constant dense<0.000000e+00> : vector<112x64xf32>
      %303 = tpu.matmul %297, %293, %cst_264 {dimension_numbers = #tpu.dot_dimension_numbers<[1], [0], [0], [1], [0, 0, 1, 1], [], []>} : vector<112x32xbf16>, vector<32x64xbf16>, vector<112x64xf32> -> vector<112x64xf32>
      %304 = arith.addf %289, %303 : vector<112x64xf32>
      %cst_265 = arith.constant dense<0.000000e+00> : vector<112x64xf32>
      %305 = tpu.matmul %302, %293, %cst_265 {dimension_numbers = #tpu.dot_dimension_numbers<[1], [0], [0], [1], [0, 0, 1, 1], [], []>} : vector<112x32xbf16>, vector<32x64xbf16>, vector<112x64xf32> -> vector<112x64xf32>
      %306 = arith.addf %291, %305 : vector<112x64xf32>
      %c20 = arith.constant 20 : index
      %c0_266 = arith.constant 0 : index
      %c0_267 = arith.constant 0 : index
      %307 = vector.load %arg2[%c20, %c0_266, %c0_267] : memref<25x32x64xbf16, #tpu.memory_space<vmem>>, vector<1x32x64xbf16>
      %308 = vector.shape_cast %307 : vector<1x32x64xbf16> to vector<32x64xbf16>
      %c4_i32 = arith.constant 4 : i32
      %309 = arith.addi %4, %c4_i32 : i32
      %c0_268 = arith.constant 0 : index
      %310 = arith.index_cast %309 : i32 to index
      %c0_269 = arith.constant 0 : index
      %c0_270 = arith.constant 0 : index
      %311 = vector.load %arg1[%c0_268, %310, %c0_269, %c0_270] : memref<1x18x144x32xbf16, #tpu.memory_space<vmem>>, vector<1x1x112x32xbf16>
      %312 = vector.shape_cast %311 : vector<1x1x112x32xbf16> to vector<112x32xbf16>
      %c1_i32_271 = arith.constant 1 : i32
      %313 = arith.addi %4, %c1_i32_271 : i32
      %c4_i32_272 = arith.constant 4 : i32
      %314 = arith.addi %313, %c4_i32_272 : i32
      %c0_273 = arith.constant 0 : index
      %315 = arith.index_cast %314 : i32 to index
      %c0_274 = arith.constant 0 : index
      %c0_275 = arith.constant 0 : index
      %316 = vector.load %arg1[%c0_273, %315, %c0_274, %c0_275] : memref<1x18x144x32xbf16, #tpu.memory_space<vmem>>, vector<1x1x112x32xbf16>
      %317 = vector.shape_cast %316 : vector<1x1x112x32xbf16> to vector<112x32xbf16>
      %cst_276 = arith.constant dense<0.000000e+00> : vector<112x64xf32>
      %318 = tpu.matmul %312, %308, %cst_276 {dimension_numbers = #tpu.dot_dimension_numbers<[1], [0], [0], [1], [0, 0, 1, 1], [], []>} : vector<112x32xbf16>, vector<32x64xbf16>, vector<112x64xf32> -> vector<112x64xf32>
      %319 = arith.addf %304, %318 : vector<112x64xf32>
      %cst_277 = arith.constant dense<0.000000e+00> : vector<112x64xf32>
      %320 = tpu.matmul %317, %308, %cst_277 {dimension_numbers = #tpu.dot_dimension_numbers<[1], [0], [0], [1], [0, 0, 1, 1], [], []>} : vector<112x32xbf16>, vector<32x64xbf16>, vector<112x64xf32> -> vector<112x64xf32>
      %321 = arith.addf %306, %320 : vector<112x64xf32>
      %c21 = arith.constant 21 : index
      %c0_278 = arith.constant 0 : index
      %c0_279 = arith.constant 0 : index
      %322 = vector.load %arg2[%c21, %c0_278, %c0_279] : memref<25x32x64xbf16, #tpu.memory_space<vmem>>, vector<1x32x64xbf16>
      %323 = vector.shape_cast %322 : vector<1x32x64xbf16> to vector<32x64xbf16>
      %c4_i32_280 = arith.constant 4 : i32
      %324 = arith.addi %4, %c4_i32_280 : i32
      %c0_281 = arith.constant 0 : index
      %325 = arith.index_cast %324 : i32 to index
      %c8_282 = arith.constant 8 : index
      %c0_283 = arith.constant 0 : index
      %326 = vector.load %arg1[%c0_281, %325, %c8_282, %c0_283] : memref<1x18x144x32xbf16, #tpu.memory_space<vmem>>, vector<1x1x112x32xbf16>
      %327 = vector.shape_cast %326 : vector<1x1x112x32xbf16> to vector<112x32xbf16>
      %c1_i32_284 = arith.constant 1 : i32
      %328 = arith.addi %4, %c1_i32_284 : i32
      %c4_i32_285 = arith.constant 4 : i32
      %329 = arith.addi %328, %c4_i32_285 : i32
      %c0_286 = arith.constant 0 : index
      %330 = arith.index_cast %329 : i32 to index
      %c8_287 = arith.constant 8 : index
      %c0_288 = arith.constant 0 : index
      %331 = vector.load %arg1[%c0_286, %330, %c8_287, %c0_288] : memref<1x18x144x32xbf16, #tpu.memory_space<vmem>>, vector<1x1x112x32xbf16>
      %332 = vector.shape_cast %331 : vector<1x1x112x32xbf16> to vector<112x32xbf16>
      %cst_289 = arith.constant dense<0.000000e+00> : vector<112x64xf32>
      %333 = tpu.matmul %327, %323, %cst_289 {dimension_numbers = #tpu.dot_dimension_numbers<[1], [0], [0], [1], [0, 0, 1, 1], [], []>} : vector<112x32xbf16>, vector<32x64xbf16>, vector<112x64xf32> -> vector<112x64xf32>
      %334 = arith.addf %319, %333 : vector<112x64xf32>
      %cst_290 = arith.constant dense<0.000000e+00> : vector<112x64xf32>
      %335 = tpu.matmul %332, %323, %cst_290 {dimension_numbers = #tpu.dot_dimension_numbers<[1], [0], [0], [1], [0, 0, 1, 1], [], []>} : vector<112x32xbf16>, vector<32x64xbf16>, vector<112x64xf32> -> vector<112x64xf32>
      %336 = arith.addf %321, %335 : vector<112x64xf32>
      %c22 = arith.constant 22 : index
      %c0_291 = arith.constant 0 : index
      %c0_292 = arith.constant 0 : index
      %337 = vector.load %arg2[%c22, %c0_291, %c0_292] : memref<25x32x64xbf16, #tpu.memory_space<vmem>>, vector<1x32x64xbf16>
      %338 = vector.shape_cast %337 : vector<1x32x64xbf16> to vector<32x64xbf16>
      %c4_i32_293 = arith.constant 4 : i32
      %339 = arith.addi %4, %c4_i32_293 : i32
      %c0_294 = arith.constant 0 : index
      %340 = arith.index_cast %339 : i32 to index
      %c16_295 = arith.constant 16 : index
      %c0_296 = arith.constant 0 : index
      %341 = vector.load %arg1[%c0_294, %340, %c16_295, %c0_296] : memref<1x18x144x32xbf16, #tpu.memory_space<vmem>>, vector<1x1x112x32xbf16>
      %342 = vector.shape_cast %341 : vector<1x1x112x32xbf16> to vector<112x32xbf16>
      %c1_i32_297 = arith.constant 1 : i32
      %343 = arith.addi %4, %c1_i32_297 : i32
      %c4_i32_298 = arith.constant 4 : i32
      %344 = arith.addi %343, %c4_i32_298 : i32
      %c0_299 = arith.constant 0 : index
      %345 = arith.index_cast %344 : i32 to index
      %c16_300 = arith.constant 16 : index
      %c0_301 = arith.constant 0 : index
      %346 = vector.load %arg1[%c0_299, %345, %c16_300, %c0_301] : memref<1x18x144x32xbf16, #tpu.memory_space<vmem>>, vector<1x1x112x32xbf16>
      %347 = vector.shape_cast %346 : vector<1x1x112x32xbf16> to vector<112x32xbf16>
      %cst_302 = arith.constant dense<0.000000e+00> : vector<112x64xf32>
      %348 = tpu.matmul %342, %338, %cst_302 {dimension_numbers = #tpu.dot_dimension_numbers<[1], [0], [0], [1], [0, 0, 1, 1], [], []>} : vector<112x32xbf16>, vector<32x64xbf16>, vector<112x64xf32> -> vector<112x64xf32>
      %349 = arith.addf %334, %348 : vector<112x64xf32>
      %cst_303 = arith.constant dense<0.000000e+00> : vector<112x64xf32>
      %350 = tpu.matmul %347, %338, %cst_303 {dimension_numbers = #tpu.dot_dimension_numbers<[1], [0], [0], [1], [0, 0, 1, 1], [], []>} : vector<112x32xbf16>, vector<32x64xbf16>, vector<112x64xf32> -> vector<112x64xf32>
      %351 = arith.addf %336, %350 : vector<112x64xf32>
      %c23 = arith.constant 23 : index
      %c0_304 = arith.constant 0 : index
      %c0_305 = arith.constant 0 : index
      %352 = vector.load %arg2[%c23, %c0_304, %c0_305] : memref<25x32x64xbf16, #tpu.memory_space<vmem>>, vector<1x32x64xbf16>
      %353 = vector.shape_cast %352 : vector<1x32x64xbf16> to vector<32x64xbf16>
      %c4_i32_306 = arith.constant 4 : i32
      %354 = arith.addi %4, %c4_i32_306 : i32
      %c0_307 = arith.constant 0 : index
      %355 = arith.index_cast %354 : i32 to index
      %c24_308 = arith.constant 24 : index
      %c0_309 = arith.constant 0 : index
      %356 = vector.load %arg1[%c0_307, %355, %c24_308, %c0_309] : memref<1x18x144x32xbf16, #tpu.memory_space<vmem>>, vector<1x1x112x32xbf16>
      %357 = vector.shape_cast %356 : vector<1x1x112x32xbf16> to vector<112x32xbf16>
      %c1_i32_310 = arith.constant 1 : i32
      %358 = arith.addi %4, %c1_i32_310 : i32
      %c4_i32_311 = arith.constant 4 : i32
      %359 = arith.addi %358, %c4_i32_311 : i32
      %c0_312 = arith.constant 0 : index
      %360 = arith.index_cast %359 : i32 to index
      %c24_313 = arith.constant 24 : index
      %c0_314 = arith.constant 0 : index
      %361 = vector.load %arg1[%c0_312, %360, %c24_313, %c0_314] : memref<1x18x144x32xbf16, #tpu.memory_space<vmem>>, vector<1x1x112x32xbf16>
      %362 = vector.shape_cast %361 : vector<1x1x112x32xbf16> to vector<112x32xbf16>
      %cst_315 = arith.constant dense<0.000000e+00> : vector<112x64xf32>
      %363 = tpu.matmul %357, %353, %cst_315 {dimension_numbers = #tpu.dot_dimension_numbers<[1], [0], [0], [1], [0, 0, 1, 1], [], []>} : vector<112x32xbf16>, vector<32x64xbf16>, vector<112x64xf32> -> vector<112x64xf32>
      %364 = arith.addf %349, %363 : vector<112x64xf32>
      %cst_316 = arith.constant dense<0.000000e+00> : vector<112x64xf32>
      %365 = tpu.matmul %362, %353, %cst_316 {dimension_numbers = #tpu.dot_dimension_numbers<[1], [0], [0], [1], [0, 0, 1, 1], [], []>} : vector<112x32xbf16>, vector<32x64xbf16>, vector<112x64xf32> -> vector<112x64xf32>
      %366 = arith.addf %351, %365 : vector<112x64xf32>
      %c24_317 = arith.constant 24 : index
      %c0_318 = arith.constant 0 : index
      %c0_319 = arith.constant 0 : index
      %367 = vector.load %arg2[%c24_317, %c0_318, %c0_319] : memref<25x32x64xbf16, #tpu.memory_space<vmem>>, vector<1x32x64xbf16>
      %368 = vector.shape_cast %367 : vector<1x32x64xbf16> to vector<32x64xbf16>
      %c4_i32_320 = arith.constant 4 : i32
      %369 = arith.addi %4, %c4_i32_320 : i32
      %c0_321 = arith.constant 0 : index
      %370 = arith.index_cast %369 : i32 to index
      %c32_322 = arith.constant 32 : index
      %c0_323 = arith.constant 0 : index
      %371 = vector.load %arg1[%c0_321, %370, %c32_322, %c0_323] : memref<1x18x144x32xbf16, #tpu.memory_space<vmem>>, vector<1x1x112x32xbf16>
      %372 = vector.shape_cast %371 : vector<1x1x112x32xbf16> to vector<112x32xbf16>
      %c1_i32_324 = arith.constant 1 : i32
      %373 = arith.addi %4, %c1_i32_324 : i32
      %c4_i32_325 = arith.constant 4 : i32
      %374 = arith.addi %373, %c4_i32_325 : i32
      %c0_326 = arith.constant 0 : index
      %375 = arith.index_cast %374 : i32 to index
      %c32_327 = arith.constant 32 : index
      %c0_328 = arith.constant 0 : index
      %376 = vector.load %arg1[%c0_326, %375, %c32_327, %c0_328] : memref<1x18x144x32xbf16, #tpu.memory_space<vmem>>, vector<1x1x112x32xbf16>
      %377 = vector.shape_cast %376 : vector<1x1x112x32xbf16> to vector<112x32xbf16>
      %cst_329 = arith.constant dense<0.000000e+00> : vector<112x64xf32>
      %378 = tpu.matmul %372, %368, %cst_329 {dimension_numbers = #tpu.dot_dimension_numbers<[1], [0], [0], [1], [0, 0, 1, 1], [], []>} : vector<112x32xbf16>, vector<32x64xbf16>, vector<112x64xf32> -> vector<112x64xf32>
      %379 = arith.addf %364, %378 : vector<112x64xf32>
      %cst_330 = arith.constant dense<0.000000e+00> : vector<112x64xf32>
      %380 = tpu.matmul %377, %368, %cst_330 {dimension_numbers = #tpu.dot_dimension_numbers<[1], [0], [0], [1], [0, 0, 1, 1], [], []>} : vector<112x32xbf16>, vector<32x64xbf16>, vector<112x64xf32> -> vector<112x64xf32>
      %381 = arith.addf %366, %380 : vector<112x64xf32>
      %382 = arith.maximumf %379, %381 : vector<112x64xf32>
      %383 = vector.extract_strided_slice %382 {offsets = [0, 0], sizes = [8, 64], strides = [1, 1]} : vector<112x64xf32> to vector<8x64xf32>
      %384 = vector.extract_strided_slice %382 {offsets = [8, 0], sizes = [8, 64], strides = [1, 1]} : vector<112x64xf32> to vector<8x64xf32>
      %385 = arith.maximumf %383, %384 : vector<8x64xf32>
      %386 = vector.broadcast %0 : vector<1x64xf32> to vector<8x64xf32>
      %387 = arith.addf %385, %386 : vector<8x64xf32>
      %cst_331 = arith.constant 0.000000e+00 : f32
      %388 = vector.broadcast %cst_331 : f32 to vector<8x64xf32>
      %389 = arith.maximumf %387, %388 : vector<8x64xf32>
      %390 = arith.truncf %389 : vector<8x64xf32> to vector<8x64xbf16>
      %c2_i32_332 = arith.constant 2 : i32
      %391 = arith.addi %c2_i32_332, %arg5 : i32
      %c0_333 = arith.constant 0 : index
      %392 = arith.index_cast %391 : i32 to index
      %c16_334 = arith.constant 16 : index
      %c0_335 = arith.constant 0 : index
      %393 = vector.load %arg4[%c0_333, %392, %c16_334, %c0_335] : memref<1x11x88x64xbf16, #tpu.memory_space<vmem>>, vector<1x1x8x64xbf16>
      %394 = vector.shape_cast %393 : vector<1x1x8x64xbf16> to vector<8x64xbf16>
      %395 = vector.shape_cast %390 : vector<8x64xbf16> to vector<1x1x8x64xbf16>
      tpu.vector_store %arg4[%c0_333, %392, %c16_334, %c0_335], %395 {strides = array<i32>} : memref<1x11x88x64xbf16, #tpu.memory_space<vmem>>, vector<1x1x8x64xbf16>,
      %396 = vector.extract_strided_slice %382 {offsets = [16, 0], sizes = [8, 64], strides = [1, 1]} : vector<112x64xf32> to vector<8x64xf32>
      %397 = vector.extract_strided_slice %382 {offsets = [24, 0], sizes = [8, 64], strides = [1, 1]} : vector<112x64xf32> to vector<8x64xf32>
      %398 = arith.maximumf %396, %397 : vector<8x64xf32>
      %399 = vector.broadcast %0 : vector<1x64xf32> to vector<8x64xf32>
      %400 = arith.addf %398, %399 : vector<8x64xf32>
      %cst_336 = arith.constant 0.000000e+00 : f32
      %401 = vector.broadcast %cst_336 : f32 to vector<8x64xf32>
      %402 = arith.maximumf %400, %401 : vector<8x64xf32>
      %403 = arith.truncf %402 : vector<8x64xf32> to vector<8x64xbf16>
      %c2_i32_337 = arith.constant 2 : i32
      %404 = arith.addi %c2_i32_337, %arg5 : i32
      %c0_338 = arith.constant 0 : index
      %405 = arith.index_cast %404 : i32 to index
      %c24_339 = arith.constant 24 : index
      %c0_340 = arith.constant 0 : index
      %406 = vector.load %arg4[%c0_338, %405, %c24_339, %c0_340] : memref<1x11x88x64xbf16, #tpu.memory_space<vmem>>, vector<1x1x8x64xbf16>
      %407 = vector.shape_cast %406 : vector<1x1x8x64xbf16> to vector<8x64xbf16>
      %408 = vector.shape_cast %403 : vector<8x64xbf16> to vector<1x1x8x64xbf16>
      tpu.vector_store %arg4[%c0_338, %405, %c24_339, %c0_340], %408 {strides = array<i32>} : memref<1x11x88x64xbf16, #tpu.memory_space<vmem>>, vector<1x1x8x64xbf16>,
      %409 = vector.extract_strided_slice %382 {offsets = [32, 0], sizes = [8, 64], strides = [1, 1]} : vector<112x64xf32> to vector<8x64xf32>
      %410 = vector.extract_strided_slice %382 {offsets = [40, 0], sizes = [8, 64], strides = [1, 1]} : vector<112x64xf32> to vector<8x64xf32>
      %411 = arith.maximumf %409, %410 : vector<8x64xf32>
      %412 = vector.broadcast %0 : vector<1x64xf32> to vector<8x64xf32>
      %413 = arith.addf %411, %412 : vector<8x64xf32>
      %cst_341 = arith.constant 0.000000e+00 : f32
      %414 = vector.broadcast %cst_341 : f32 to vector<8x64xf32>
      %415 = arith.maximumf %413, %414 : vector<8x64xf32>
      %416 = arith.truncf %415 : vector<8x64xf32> to vector<8x64xbf16>
      %c2_i32_342 = arith.constant 2 : i32
      %417 = arith.addi %c2_i32_342, %arg5 : i32
      %c0_343 = arith.constant 0 : index
      %418 = arith.index_cast %417 : i32 to index
      %c32_344 = arith.constant 32 : index
      %c0_345 = arith.constant 0 : index
      %419 = vector.load %arg4[%c0_343, %418, %c32_344, %c0_345] : memref<1x11x88x64xbf16, #tpu.memory_space<vmem>>, vector<1x1x8x64xbf16>
      %420 = vector.shape_cast %419 : vector<1x1x8x64xbf16> to vector<8x64xbf16>
      %421 = vector.shape_cast %416 : vector<8x64xbf16> to vector<1x1x8x64xbf16>
      tpu.vector_store %arg4[%c0_343, %418, %c32_344, %c0_345], %421 {strides = array<i32>} : memref<1x11x88x64xbf16, #tpu.memory_space<vmem>>, vector<1x1x8x64xbf16>,
      %422 = vector.extract_strided_slice %382 {offsets = [48, 0], sizes = [8, 64], strides = [1, 1]} : vector<112x64xf32> to vector<8x64xf32>
      %423 = vector.extract_strided_slice %382 {offsets = [56, 0], sizes = [8, 64], strides = [1, 1]} : vector<112x64xf32> to vector<8x64xf32>
      %424 = arith.maximumf %422, %423 : vector<8x64xf32>
      %425 = vector.broadcast %0 : vector<1x64xf32> to vector<8x64xf32>
      %426 = arith.addf %424, %425 : vector<8x64xf32>
      %cst_346 = arith.constant 0.000000e+00 : f32
      %427 = vector.broadcast %cst_346 : f32 to vector<8x64xf32>
      %428 = arith.maximumf %426, %427 : vector<8x64xf32>
      %429 = arith.truncf %428 : vector<8x64xf32> to vector<8x64xbf16>
      %c2_i32_347 = arith.constant 2 : i32
      %430 = arith.addi %c2_i32_347, %arg5 : i32
      %c0_348 = arith.constant 0 : index
      %431 = arith.index_cast %430 : i32 to index
      %c40 = arith.constant 40 : index
      %c0_349 = arith.constant 0 : index
      %432 = vector.load %arg4[%c0_348, %431, %c40, %c0_349] : memref<1x11x88x64xbf16, #tpu.memory_space<vmem>>, vector<1x1x8x64xbf16>
      %433 = vector.shape_cast %432 : vector<1x1x8x64xbf16> to vector<8x64xbf16>
      %434 = vector.shape_cast %429 : vector<8x64xbf16> to vector<1x1x8x64xbf16>
      tpu.vector_store %arg4[%c0_348, %431, %c40, %c0_349], %434 {strides = array<i32>} : memref<1x11x88x64xbf16, #tpu.memory_space<vmem>>, vector<1x1x8x64xbf16>,
      %435 = vector.extract_strided_slice %382 {offsets = [64, 0], sizes = [8, 64], strides = [1, 1]} : vector<112x64xf32> to vector<8x64xf32>
      %436 = vector.extract_strided_slice %382 {offsets = [72, 0], sizes = [8, 64], strides = [1, 1]} : vector<112x64xf32> to vector<8x64xf32>
      %437 = arith.maximumf %435, %436 : vector<8x64xf32>
      %438 = vector.broadcast %0 : vector<1x64xf32> to vector<8x64xf32>
      %439 = arith.addf %437, %438 : vector<8x64xf32>
      %cst_350 = arith.constant 0.000000e+00 : f32
      %440 = vector.broadcast %cst_350 : f32 to vector<8x64xf32>
      %441 = arith.maximumf %439, %440 : vector<8x64xf32>
      %442 = arith.truncf %441 : vector<8x64xf32> to vector<8x64xbf16>
      %c2_i32_351 = arith.constant 2 : i32
      %443 = arith.addi %c2_i32_351, %arg5 : i32
      %c0_352 = arith.constant 0 : index
      %444 = arith.index_cast %443 : i32 to index
      %c48 = arith.constant 48 : index
      %c0_353 = arith.constant 0 : index
      %445 = vector.load %arg4[%c0_352, %444, %c48, %c0_353] : memref<1x11x88x64xbf16, #tpu.memory_space<vmem>>, vector<1x1x8x64xbf16>
      %446 = vector.shape_cast %445 : vector<1x1x8x64xbf16> to vector<8x64xbf16>
      %447 = vector.shape_cast %442 : vector<8x64xbf16> to vector<1x1x8x64xbf16>
      tpu.vector_store %arg4[%c0_352, %444, %c48, %c0_353], %447 {strides = array<i32>} : memref<1x11x88x64xbf16, #tpu.memory_space<vmem>>, vector<1x1x8x64xbf16>,
      %448 = vector.extract_strided_slice %382 {offsets = [80, 0], sizes = [8, 64], strides = [1, 1]} : vector<112x64xf32> to vector<8x64xf32>
      %449 = vector.extract_strided_slice %382 {offsets = [88, 0], sizes = [8, 64], strides = [1, 1]} : vector<112x64xf32> to vector<8x64xf32>
      %450 = arith.maximumf %448, %449 : vector<8x64xf32>
      %451 = vector.broadcast %0 : vector<1x64xf32> to vector<8x64xf32>
      %452 = arith.addf %450, %451 : vector<8x64xf32>
      %cst_354 = arith.constant 0.000000e+00 : f32
      %453 = vector.broadcast %cst_354 : f32 to vector<8x64xf32>
      %454 = arith.maximumf %452, %453 : vector<8x64xf32>
      %455 = arith.truncf %454 : vector<8x64xf32> to vector<8x64xbf16>
      %c2_i32_355 = arith.constant 2 : i32
      %456 = arith.addi %c2_i32_355, %arg5 : i32
      %c0_356 = arith.constant 0 : index
      %457 = arith.index_cast %456 : i32 to index
      %c56 = arith.constant 56 : index
      %c0_357 = arith.constant 0 : index
      %458 = vector.load %arg4[%c0_356, %457, %c56, %c0_357] : memref<1x11x88x64xbf16, #tpu.memory_space<vmem>>, vector<1x1x8x64xbf16>
      %459 = vector.shape_cast %458 : vector<1x1x8x64xbf16> to vector<8x64xbf16>
      %460 = vector.shape_cast %455 : vector<8x64xbf16> to vector<1x1x8x64xbf16>
      tpu.vector_store %arg4[%c0_356, %457, %c56, %c0_357], %460 {strides = array<i32>} : memref<1x11x88x64xbf16, #tpu.memory_space<vmem>>, vector<1x1x8x64xbf16>,
      %461 = vector.extract_strided_slice %382 {offsets = [96, 0], sizes = [8, 64], strides = [1, 1]} : vector<112x64xf32> to vector<8x64xf32>
      %462 = vector.extract_strided_slice %382 {offsets = [104, 0], sizes = [8, 64], strides = [1, 1]} : vector<112x64xf32> to vector<8x64xf32>
      %463 = arith.maximumf %461, %462 : vector<8x64xf32>
      %464 = vector.broadcast %0 : vector<1x64xf32> to vector<8x64xf32>
      %465 = arith.addf %463, %464 : vector<8x64xf32>
      %cst_358 = arith.constant 0.000000e+00 : f32
      %466 = vector.broadcast %cst_358 : f32 to vector<8x64xf32>
      %467 = arith.maximumf %465, %466 : vector<8x64xf32>
      %468 = arith.truncf %467 : vector<8x64xf32> to vector<8x64xbf16>
      %c2_i32_359 = arith.constant 2 : i32
      %469 = arith.addi %c2_i32_359, %arg5 : i32
      %c0_360 = arith.constant 0 : index
      %470 = arith.index_cast %469 : i32 to index
      %c64 = arith.constant 64 : index
      %c0_361 = arith.constant 0 : index
      %471 = vector.load %arg4[%c0_360, %470, %c64, %c0_361] : memref<1x11x88x64xbf16, #tpu.memory_space<vmem>>, vector<1x1x8x64xbf16>
      %472 = vector.shape_cast %471 : vector<1x1x8x64xbf16> to vector<8x64xbf16>
      %473 = vector.shape_cast %468 : vector<8x64xbf16> to vector<1x1x8x64xbf16>
      tpu.vector_store %arg4[%c0_360, %470, %c64, %c0_361], %473 {strides = array<i32>} : memref<1x11x88x64xbf16, #tpu.memory_space<vmem>>, vector<1x1x8x64xbf16>,
    }
    %c7_i32_5 = arith.constant 7 : i32
    return
  }
  func.func @transform_0(%arg0: i32) -> (i32, i32, i32, i32) {
    %c0_i32 = arith.constant 0 : i32
    %c0_i32_0 = arith.constant 0 : i32
    %c0_i32_1 = arith.constant 0 : i32
    %c0_i32_2 = arith.constant 0 : i32
    return %arg0, %c0_i32, %c0_i32_0, %c0_i32_1 : i32, i32, i32, i32
  }
  func.func @transform_1(%arg0: i32) -> (i32, i32, i32) {
    %c0_i32 = arith.constant 0 : i32
    %c0_i32_0 = arith.constant 0 : i32
    %c0_i32_1 = arith.constant 0 : i32
    %c0_i32_2 = arith.constant 0 : i32
    return %c0_i32, %c0_i32_0, %c0_i32_1 : i32, i32, i32
  }
  func.func @transform_2(%arg0: i32) -> (i32, i32) {
    %c0_i32 = arith.constant 0 : i32
    %c0_i32_0 = arith.constant 0 : i32
    %c0_i32_1 = arith.constant 0 : i32
    return %c0_i32, %c0_i32_0 : i32, i32
  }
  func.func @transform_3(%arg0: i32) -> (i32, i32, i32, i32) {
    %c0_i32 = arith.constant 0 : i32
    %c0_i32_0 = arith.constant 0 : i32
    %c0_i32_1 = arith.constant 0 : i32
    %c0_i32_2 = arith.constant 0 : i32
    return %arg0, %c0_i32, %c0_i32_0, %c0_i32_1 : i32, i32, i32, i32
  }
}

module attributes {stable_mosaic.version = 11 : i64} {
  func.func @_conv_pool_kernel(%arg0: i32, %arg1: memref<1x11x88x64xbf16, #tpu.memory_space<vmem>>, %arg2: memref<25x64x128xbf16, #tpu.memory_space<vmem>>, %arg3: memref<1x128xf32, #tpu.memory_space<vmem>>, %arg4: memref<1x3x24x128xbf16, #tpu.memory_space<vmem>>) attributes {dimension_semantics = [#tpu.dimension_semantics<parallel>], iteration_bounds = array<i64: 1>, scalar_prefetch = 0 : i64, scratch_operands = 0 : i64, tpu.core_type = #tpu.core_type<tc>, window_params = [{transform_indices = @transform_0, window_bounds = array<i64: 1, 11, 88, 64>}, {pipeline_mode = #tpu.pipeline_mode<synchronous>, transform_indices = @transform_1, window_bounds = array<i64: 25, 64, 128>}, {pipeline_mode = #tpu.pipeline_mode<synchronous>, transform_indices = @transform_2, window_bounds = array<i64: 1, 128>}, {transform_indices = @transform_3, window_bounds = array<i64: 1, 3, 24, 128>}]} {
    %c0 = arith.constant 0 : index
    %c0_0 = arith.constant 0 : index
    %0 = vector.load %arg3[%c0, %c0_0] : memref<1x128xf32, #tpu.memory_space<vmem>>, vector<1x128xf32>
    %c0_i32 = arith.constant 0 : i32
    %c3_i32 = arith.constant 3 : i32
    %1 = arith.addi %c0_i32, %c3_i32 : i32
    %c1_i32 = arith.constant 1 : i32
    scf.for %arg5 = %c0_i32 to %1 step %c1_i32  : i32 {
      %c2_i32 = arith.constant 2 : i32
      %2 = arith.muli %c2_i32, %arg5 : i32
      %cst = arith.constant 0.000000e+00 : f32
      %3 = vector.broadcast %cst : f32 to vector<56x128xf32>
      %cst_2 = arith.constant 0.000000e+00 : f32
      %4 = vector.broadcast %cst_2 : f32 to vector<56x128xf32>
      %c0_3 = arith.constant 0 : index
      %c0_4 = arith.constant 0 : index
      %c0_5 = arith.constant 0 : index
      %5 = vector.load %arg2[%c0_3, %c0_4, %c0_5] : memref<25x64x128xbf16, #tpu.memory_space<vmem>>, vector<1x64x128xbf16>
      %6 = vector.shape_cast %5 : vector<1x64x128xbf16> to vector<64x128xbf16>
      %c0_i32_6 = arith.constant 0 : i32
      %7 = arith.addi %2, %c0_i32_6 : i32
      %c0_7 = arith.constant 0 : index
      %8 = arith.index_cast %7 : i32 to index
      %c0_8 = arith.constant 0 : index
      %c0_9 = arith.constant 0 : index
      %9 = vector.load %arg1[%c0_7, %8, %c0_8, %c0_9] : memref<1x11x88x64xbf16, #tpu.memory_space<vmem>>, vector<1x1x56x64xbf16>
      %10 = vector.shape_cast %9 : vector<1x1x56x64xbf16> to vector<56x64xbf16>
      %c1_i32_10 = arith.constant 1 : i32
      %11 = arith.addi %2, %c1_i32_10 : i32
      %c0_i32_11 = arith.constant 0 : i32
      %12 = arith.addi %11, %c0_i32_11 : i32
      %c0_12 = arith.constant 0 : index
      %13 = arith.index_cast %12 : i32 to index
      %c0_13 = arith.constant 0 : index
      %c0_14 = arith.constant 0 : index
      %14 = vector.load %arg1[%c0_12, %13, %c0_13, %c0_14] : memref<1x11x88x64xbf16, #tpu.memory_space<vmem>>, vector<1x1x56x64xbf16>
      %15 = vector.shape_cast %14 : vector<1x1x56x64xbf16> to vector<56x64xbf16>
      %cst_15 = arith.constant dense<0.000000e+00> : vector<56x128xf32>
      %16 = tpu.matmul %10, %6, %cst_15 {dimension_numbers = #tpu.dot_dimension_numbers<[1], [0], [0], [1], [0, 0, 1, 1], [], []>} : vector<56x64xbf16>, vector<64x128xbf16>, vector<56x128xf32> -> vector<56x128xf32>
      %17 = arith.addf %3, %16 : vector<56x128xf32>
      %cst_16 = arith.constant dense<0.000000e+00> : vector<56x128xf32>
      %18 = tpu.matmul %15, %6, %cst_16 {dimension_numbers = #tpu.dot_dimension_numbers<[1], [0], [0], [1], [0, 0, 1, 1], [], []>} : vector<56x64xbf16>, vector<64x128xbf16>, vector<56x128xf32> -> vector<56x128xf32>
      %19 = arith.addf %4, %18 : vector<56x128xf32>
      %c1 = arith.constant 1 : index
      %c0_17 = arith.constant 0 : index
      %c0_18 = arith.constant 0 : index
      %20 = vector.load %arg2[%c1, %c0_17, %c0_18] : memref<25x64x128xbf16, #tpu.memory_space<vmem>>, vector<1x64x128xbf16>
      %21 = vector.shape_cast %20 : vector<1x64x128xbf16> to vector<64x128xbf16>
      %c0_i32_19 = arith.constant 0 : i32
      %22 = arith.addi %2, %c0_i32_19 : i32
      %c0_20 = arith.constant 0 : index
      %23 = arith.index_cast %22 : i32 to index
      %c8 = arith.constant 8 : index
      %c0_21 = arith.constant 0 : index
      %24 = vector.load %arg1[%c0_20, %23, %c8, %c0_21] : memref<1x11x88x64xbf16, #tpu.memory_space<vmem>>, vector<1x1x56x64xbf16>
      %25 = vector.shape_cast %24 : vector<1x1x56x64xbf16> to vector<56x64xbf16>
      %c1_i32_22 = arith.constant 1 : i32
      %26 = arith.addi %2, %c1_i32_22 : i32
      %c0_i32_23 = arith.constant 0 : i32
      %27 = arith.addi %26, %c0_i32_23 : i32
      %c0_24 = arith.constant 0 : index
      %28 = arith.index_cast %27 : i32 to index
      %c8_25 = arith.constant 8 : index
      %c0_26 = arith.constant 0 : index
      %29 = vector.load %arg1[%c0_24, %28, %c8_25, %c0_26] : memref<1x11x88x64xbf16, #tpu.memory_space<vmem>>, vector<1x1x56x64xbf16>
      %30 = vector.shape_cast %29 : vector<1x1x56x64xbf16> to vector<56x64xbf16>
      %cst_27 = arith.constant dense<0.000000e+00> : vector<56x128xf32>
      %31 = tpu.matmul %25, %21, %cst_27 {dimension_numbers = #tpu.dot_dimension_numbers<[1], [0], [0], [1], [0, 0, 1, 1], [], []>} : vector<56x64xbf16>, vector<64x128xbf16>, vector<56x128xf32> -> vector<56x128xf32>
      %32 = arith.addf %17, %31 : vector<56x128xf32>
      %cst_28 = arith.constant dense<0.000000e+00> : vector<56x128xf32>
      %33 = tpu.matmul %30, %21, %cst_28 {dimension_numbers = #tpu.dot_dimension_numbers<[1], [0], [0], [1], [0, 0, 1, 1], [], []>} : vector<56x64xbf16>, vector<64x128xbf16>, vector<56x128xf32> -> vector<56x128xf32>
      %34 = arith.addf %19, %33 : vector<56x128xf32>
      %c2 = arith.constant 2 : index
      %c0_29 = arith.constant 0 : index
      %c0_30 = arith.constant 0 : index
      %35 = vector.load %arg2[%c2, %c0_29, %c0_30] : memref<25x64x128xbf16, #tpu.memory_space<vmem>>, vector<1x64x128xbf16>
      %36 = vector.shape_cast %35 : vector<1x64x128xbf16> to vector<64x128xbf16>
      %c0_i32_31 = arith.constant 0 : i32
      %37 = arith.addi %2, %c0_i32_31 : i32
      %c0_32 = arith.constant 0 : index
      %38 = arith.index_cast %37 : i32 to index
      %c16 = arith.constant 16 : index
      %c0_33 = arith.constant 0 : index
      %39 = vector.load %arg1[%c0_32, %38, %c16, %c0_33] : memref<1x11x88x64xbf16, #tpu.memory_space<vmem>>, vector<1x1x56x64xbf16>
      %40 = vector.shape_cast %39 : vector<1x1x56x64xbf16> to vector<56x64xbf16>
      %c1_i32_34 = arith.constant 1 : i32
      %41 = arith.addi %2, %c1_i32_34 : i32
      %c0_i32_35 = arith.constant 0 : i32
      %42 = arith.addi %41, %c0_i32_35 : i32
      %c0_36 = arith.constant 0 : index
      %43 = arith.index_cast %42 : i32 to index
      %c16_37 = arith.constant 16 : index
      %c0_38 = arith.constant 0 : index
      %44 = vector.load %arg1[%c0_36, %43, %c16_37, %c0_38] : memref<1x11x88x64xbf16, #tpu.memory_space<vmem>>, vector<1x1x56x64xbf16>
      %45 = vector.shape_cast %44 : vector<1x1x56x64xbf16> to vector<56x64xbf16>
      %cst_39 = arith.constant dense<0.000000e+00> : vector<56x128xf32>
      %46 = tpu.matmul %40, %36, %cst_39 {dimension_numbers = #tpu.dot_dimension_numbers<[1], [0], [0], [1], [0, 0, 1, 1], [], []>} : vector<56x64xbf16>, vector<64x128xbf16>, vector<56x128xf32> -> vector<56x128xf32>
      %47 = arith.addf %32, %46 : vector<56x128xf32>
      %cst_40 = arith.constant dense<0.000000e+00> : vector<56x128xf32>
      %48 = tpu.matmul %45, %36, %cst_40 {dimension_numbers = #tpu.dot_dimension_numbers<[1], [0], [0], [1], [0, 0, 1, 1], [], []>} : vector<56x64xbf16>, vector<64x128xbf16>, vector<56x128xf32> -> vector<56x128xf32>
      %49 = arith.addf %34, %48 : vector<56x128xf32>
      %c3 = arith.constant 3 : index
      %c0_41 = arith.constant 0 : index
      %c0_42 = arith.constant 0 : index
      %50 = vector.load %arg2[%c3, %c0_41, %c0_42] : memref<25x64x128xbf16, #tpu.memory_space<vmem>>, vector<1x64x128xbf16>
      %51 = vector.shape_cast %50 : vector<1x64x128xbf16> to vector<64x128xbf16>
      %c0_i32_43 = arith.constant 0 : i32
      %52 = arith.addi %2, %c0_i32_43 : i32
      %c0_44 = arith.constant 0 : index
      %53 = arith.index_cast %52 : i32 to index
      %c24 = arith.constant 24 : index
      %c0_45 = arith.constant 0 : index
      %54 = vector.load %arg1[%c0_44, %53, %c24, %c0_45] : memref<1x11x88x64xbf16, #tpu.memory_space<vmem>>, vector<1x1x56x64xbf16>
      %55 = vector.shape_cast %54 : vector<1x1x56x64xbf16> to vector<56x64xbf16>
      %c1_i32_46 = arith.constant 1 : i32
      %56 = arith.addi %2, %c1_i32_46 : i32
      %c0_i32_47 = arith.constant 0 : i32
      %57 = arith.addi %56, %c0_i32_47 : i32
      %c0_48 = arith.constant 0 : index
      %58 = arith.index_cast %57 : i32 to index
      %c24_49 = arith.constant 24 : index
      %c0_50 = arith.constant 0 : index
      %59 = vector.load %arg1[%c0_48, %58, %c24_49, %c0_50] : memref<1x11x88x64xbf16, #tpu.memory_space<vmem>>, vector<1x1x56x64xbf16>
      %60 = vector.shape_cast %59 : vector<1x1x56x64xbf16> to vector<56x64xbf16>
      %cst_51 = arith.constant dense<0.000000e+00> : vector<56x128xf32>
      %61 = tpu.matmul %55, %51, %cst_51 {dimension_numbers = #tpu.dot_dimension_numbers<[1], [0], [0], [1], [0, 0, 1, 1], [], []>} : vector<56x64xbf16>, vector<64x128xbf16>, vector<56x128xf32> -> vector<56x128xf32>
      %62 = arith.addf %47, %61 : vector<56x128xf32>
      %cst_52 = arith.constant dense<0.000000e+00> : vector<56x128xf32>
      %63 = tpu.matmul %60, %51, %cst_52 {dimension_numbers = #tpu.dot_dimension_numbers<[1], [0], [0], [1], [0, 0, 1, 1], [], []>} : vector<56x64xbf16>, vector<64x128xbf16>, vector<56x128xf32> -> vector<56x128xf32>
      %64 = arith.addf %49, %63 : vector<56x128xf32>
      %c4 = arith.constant 4 : index
      %c0_53 = arith.constant 0 : index
      %c0_54 = arith.constant 0 : index
      %65 = vector.load %arg2[%c4, %c0_53, %c0_54] : memref<25x64x128xbf16, #tpu.memory_space<vmem>>, vector<1x64x128xbf16>
      %66 = vector.shape_cast %65 : vector<1x64x128xbf16> to vector<64x128xbf16>
      %c0_i32_55 = arith.constant 0 : i32
      %67 = arith.addi %2, %c0_i32_55 : i32
      %c0_56 = arith.constant 0 : index
      %68 = arith.index_cast %67 : i32 to index
      %c32 = arith.constant 32 : index
      %c0_57 = arith.constant 0 : index
      %69 = vector.load %arg1[%c0_56, %68, %c32, %c0_57] : memref<1x11x88x64xbf16, #tpu.memory_space<vmem>>, vector<1x1x56x64xbf16>
      %70 = vector.shape_cast %69 : vector<1x1x56x64xbf16> to vector<56x64xbf16>
      %c1_i32_58 = arith.constant 1 : i32
      %71 = arith.addi %2, %c1_i32_58 : i32
      %c0_i32_59 = arith.constant 0 : i32
      %72 = arith.addi %71, %c0_i32_59 : i32
      %c0_60 = arith.constant 0 : index
      %73 = arith.index_cast %72 : i32 to index
      %c32_61 = arith.constant 32 : index
      %c0_62 = arith.constant 0 : index
      %74 = vector.load %arg1[%c0_60, %73, %c32_61, %c0_62] : memref<1x11x88x64xbf16, #tpu.memory_space<vmem>>, vector<1x1x56x64xbf16>
      %75 = vector.shape_cast %74 : vector<1x1x56x64xbf16> to vector<56x64xbf16>
      %cst_63 = arith.constant dense<0.000000e+00> : vector<56x128xf32>
      %76 = tpu.matmul %70, %66, %cst_63 {dimension_numbers = #tpu.dot_dimension_numbers<[1], [0], [0], [1], [0, 0, 1, 1], [], []>} : vector<56x64xbf16>, vector<64x128xbf16>, vector<56x128xf32> -> vector<56x128xf32>
      %77 = arith.addf %62, %76 : vector<56x128xf32>
      %cst_64 = arith.constant dense<0.000000e+00> : vector<56x128xf32>
      %78 = tpu.matmul %75, %66, %cst_64 {dimension_numbers = #tpu.dot_dimension_numbers<[1], [0], [0], [1], [0, 0, 1, 1], [], []>} : vector<56x64xbf16>, vector<64x128xbf16>, vector<56x128xf32> -> vector<56x128xf32>
      %79 = arith.addf %64, %78 : vector<56x128xf32>
      %c5 = arith.constant 5 : index
      %c0_65 = arith.constant 0 : index
      %c0_66 = arith.constant 0 : index
      %80 = vector.load %arg2[%c5, %c0_65, %c0_66] : memref<25x64x128xbf16, #tpu.memory_space<vmem>>, vector<1x64x128xbf16>
      %81 = vector.shape_cast %80 : vector<1x64x128xbf16> to vector<64x128xbf16>
      %c1_i32_67 = arith.constant 1 : i32
      %82 = arith.addi %2, %c1_i32_67 : i32
      %c0_68 = arith.constant 0 : index
      %83 = arith.index_cast %82 : i32 to index
      %c0_69 = arith.constant 0 : index
      %c0_70 = arith.constant 0 : index
      %84 = vector.load %arg1[%c0_68, %83, %c0_69, %c0_70] : memref<1x11x88x64xbf16, #tpu.memory_space<vmem>>, vector<1x1x56x64xbf16>
      %85 = vector.shape_cast %84 : vector<1x1x56x64xbf16> to vector<56x64xbf16>
      %c1_i32_71 = arith.constant 1 : i32
      %86 = arith.addi %2, %c1_i32_71 : i32
      %c1_i32_72 = arith.constant 1 : i32
      %87 = arith.addi %86, %c1_i32_72 : i32
      %c0_73 = arith.constant 0 : index
      %88 = arith.index_cast %87 : i32 to index
      %c0_74 = arith.constant 0 : index
      %c0_75 = arith.constant 0 : index
      %89 = vector.load %arg1[%c0_73, %88, %c0_74, %c0_75] : memref<1x11x88x64xbf16, #tpu.memory_space<vmem>>, vector<1x1x56x64xbf16>
      %90 = vector.shape_cast %89 : vector<1x1x56x64xbf16> to vector<56x64xbf16>
      %cst_76 = arith.constant dense<0.000000e+00> : vector<56x128xf32>
      %91 = tpu.matmul %85, %81, %cst_76 {dimension_numbers = #tpu.dot_dimension_numbers<[1], [0], [0], [1], [0, 0, 1, 1], [], []>} : vector<56x64xbf16>, vector<64x128xbf16>, vector<56x128xf32> -> vector<56x128xf32>
      %92 = arith.addf %77, %91 : vector<56x128xf32>
      %cst_77 = arith.constant dense<0.000000e+00> : vector<56x128xf32>
      %93 = tpu.matmul %90, %81, %cst_77 {dimension_numbers = #tpu.dot_dimension_numbers<[1], [0], [0], [1], [0, 0, 1, 1], [], []>} : vector<56x64xbf16>, vector<64x128xbf16>, vector<56x128xf32> -> vector<56x128xf32>
      %94 = arith.addf %79, %93 : vector<56x128xf32>
      %c6 = arith.constant 6 : index
      %c0_78 = arith.constant 0 : index
      %c0_79 = arith.constant 0 : index
      %95 = vector.load %arg2[%c6, %c0_78, %c0_79] : memref<25x64x128xbf16, #tpu.memory_space<vmem>>, vector<1x64x128xbf16>
      %96 = vector.shape_cast %95 : vector<1x64x128xbf16> to vector<64x128xbf16>
      %c1_i32_80 = arith.constant 1 : i32
      %97 = arith.addi %2, %c1_i32_80 : i32
      %c0_81 = arith.constant 0 : index
      %98 = arith.index_cast %97 : i32 to index
      %c8_82 = arith.constant 8 : index
      %c0_83 = arith.constant 0 : index
      %99 = vector.load %arg1[%c0_81, %98, %c8_82, %c0_83] : memref<1x11x88x64xbf16, #tpu.memory_space<vmem>>, vector<1x1x56x64xbf16>
      %100 = vector.shape_cast %99 : vector<1x1x56x64xbf16> to vector<56x64xbf16>
      %c1_i32_84 = arith.constant 1 : i32
      %101 = arith.addi %2, %c1_i32_84 : i32
      %c1_i32_85 = arith.constant 1 : i32
      %102 = arith.addi %101, %c1_i32_85 : i32
      %c0_86 = arith.constant 0 : index
      %103 = arith.index_cast %102 : i32 to index
      %c8_87 = arith.constant 8 : index
      %c0_88 = arith.constant 0 : index
      %104 = vector.load %arg1[%c0_86, %103, %c8_87, %c0_88] : memref<1x11x88x64xbf16, #tpu.memory_space<vmem>>, vector<1x1x56x64xbf16>
      %105 = vector.shape_cast %104 : vector<1x1x56x64xbf16> to vector<56x64xbf16>
      %cst_89 = arith.constant dense<0.000000e+00> : vector<56x128xf32>
      %106 = tpu.matmul %100, %96, %cst_89 {dimension_numbers = #tpu.dot_dimension_numbers<[1], [0], [0], [1], [0, 0, 1, 1], [], []>} : vector<56x64xbf16>, vector<64x128xbf16>, vector<56x128xf32> -> vector<56x128xf32>
      %107 = arith.addf %92, %106 : vector<56x128xf32>
      %cst_90 = arith.constant dense<0.000000e+00> : vector<56x128xf32>
      %108 = tpu.matmul %105, %96, %cst_90 {dimension_numbers = #tpu.dot_dimension_numbers<[1], [0], [0], [1], [0, 0, 1, 1], [], []>} : vector<56x64xbf16>, vector<64x128xbf16>, vector<56x128xf32> -> vector<56x128xf32>
      %109 = arith.addf %94, %108 : vector<56x128xf32>
      %c7 = arith.constant 7 : index
      %c0_91 = arith.constant 0 : index
      %c0_92 = arith.constant 0 : index
      %110 = vector.load %arg2[%c7, %c0_91, %c0_92] : memref<25x64x128xbf16, #tpu.memory_space<vmem>>, vector<1x64x128xbf16>
      %111 = vector.shape_cast %110 : vector<1x64x128xbf16> to vector<64x128xbf16>
      %c1_i32_93 = arith.constant 1 : i32
      %112 = arith.addi %2, %c1_i32_93 : i32
      %c0_94 = arith.constant 0 : index
      %113 = arith.index_cast %112 : i32 to index
      %c16_95 = arith.constant 16 : index
      %c0_96 = arith.constant 0 : index
      %114 = vector.load %arg1[%c0_94, %113, %c16_95, %c0_96] : memref<1x11x88x64xbf16, #tpu.memory_space<vmem>>, vector<1x1x56x64xbf16>
      %115 = vector.shape_cast %114 : vector<1x1x56x64xbf16> to vector<56x64xbf16>
      %c1_i32_97 = arith.constant 1 : i32
      %116 = arith.addi %2, %c1_i32_97 : i32
      %c1_i32_98 = arith.constant 1 : i32
      %117 = arith.addi %116, %c1_i32_98 : i32
      %c0_99 = arith.constant 0 : index
      %118 = arith.index_cast %117 : i32 to index
      %c16_100 = arith.constant 16 : index
      %c0_101 = arith.constant 0 : index
      %119 = vector.load %arg1[%c0_99, %118, %c16_100, %c0_101] : memref<1x11x88x64xbf16, #tpu.memory_space<vmem>>, vector<1x1x56x64xbf16>
      %120 = vector.shape_cast %119 : vector<1x1x56x64xbf16> to vector<56x64xbf16>
      %cst_102 = arith.constant dense<0.000000e+00> : vector<56x128xf32>
      %121 = tpu.matmul %115, %111, %cst_102 {dimension_numbers = #tpu.dot_dimension_numbers<[1], [0], [0], [1], [0, 0, 1, 1], [], []>} : vector<56x64xbf16>, vector<64x128xbf16>, vector<56x128xf32> -> vector<56x128xf32>
      %122 = arith.addf %107, %121 : vector<56x128xf32>
      %cst_103 = arith.constant dense<0.000000e+00> : vector<56x128xf32>
      %123 = tpu.matmul %120, %111, %cst_103 {dimension_numbers = #tpu.dot_dimension_numbers<[1], [0], [0], [1], [0, 0, 1, 1], [], []>} : vector<56x64xbf16>, vector<64x128xbf16>, vector<56x128xf32> -> vector<56x128xf32>
      %124 = arith.addf %109, %123 : vector<56x128xf32>
      %c8_104 = arith.constant 8 : index
      %c0_105 = arith.constant 0 : index
      %c0_106 = arith.constant 0 : index
      %125 = vector.load %arg2[%c8_104, %c0_105, %c0_106] : memref<25x64x128xbf16, #tpu.memory_space<vmem>>, vector<1x64x128xbf16>
      %126 = vector.shape_cast %125 : vector<1x64x128xbf16> to vector<64x128xbf16>
      %c1_i32_107 = arith.constant 1 : i32
      %127 = arith.addi %2, %c1_i32_107 : i32
      %c0_108 = arith.constant 0 : index
      %128 = arith.index_cast %127 : i32 to index
      %c24_109 = arith.constant 24 : index
      %c0_110 = arith.constant 0 : index
      %129 = vector.load %arg1[%c0_108, %128, %c24_109, %c0_110] : memref<1x11x88x64xbf16, #tpu.memory_space<vmem>>, vector<1x1x56x64xbf16>
      %130 = vector.shape_cast %129 : vector<1x1x56x64xbf16> to vector<56x64xbf16>
      %c1_i32_111 = arith.constant 1 : i32
      %131 = arith.addi %2, %c1_i32_111 : i32
      %c1_i32_112 = arith.constant 1 : i32
      %132 = arith.addi %131, %c1_i32_112 : i32
      %c0_113 = arith.constant 0 : index
      %133 = arith.index_cast %132 : i32 to index
      %c24_114 = arith.constant 24 : index
      %c0_115 = arith.constant 0 : index
      %134 = vector.load %arg1[%c0_113, %133, %c24_114, %c0_115] : memref<1x11x88x64xbf16, #tpu.memory_space<vmem>>, vector<1x1x56x64xbf16>
      %135 = vector.shape_cast %134 : vector<1x1x56x64xbf16> to vector<56x64xbf16>
      %cst_116 = arith.constant dense<0.000000e+00> : vector<56x128xf32>
      %136 = tpu.matmul %130, %126, %cst_116 {dimension_numbers = #tpu.dot_dimension_numbers<[1], [0], [0], [1], [0, 0, 1, 1], [], []>} : vector<56x64xbf16>, vector<64x128xbf16>, vector<56x128xf32> -> vector<56x128xf32>
      %137 = arith.addf %122, %136 : vector<56x128xf32>
      %cst_117 = arith.constant dense<0.000000e+00> : vector<56x128xf32>
      %138 = tpu.matmul %135, %126, %cst_117 {dimension_numbers = #tpu.dot_dimension_numbers<[1], [0], [0], [1], [0, 0, 1, 1], [], []>} : vector<56x64xbf16>, vector<64x128xbf16>, vector<56x128xf32> -> vector<56x128xf32>
      %139 = arith.addf %124, %138 : vector<56x128xf32>
      %c9 = arith.constant 9 : index
      %c0_118 = arith.constant 0 : index
      %c0_119 = arith.constant 0 : index
      %140 = vector.load %arg2[%c9, %c0_118, %c0_119] : memref<25x64x128xbf16, #tpu.memory_space<vmem>>, vector<1x64x128xbf16>
      %141 = vector.shape_cast %140 : vector<1x64x128xbf16> to vector<64x128xbf16>
      %c1_i32_120 = arith.constant 1 : i32
      %142 = arith.addi %2, %c1_i32_120 : i32
      %c0_121 = arith.constant 0 : index
      %143 = arith.index_cast %142 : i32 to index
      %c32_122 = arith.constant 32 : index
      %c0_123 = arith.constant 0 : index
      %144 = vector.load %arg1[%c0_121, %143, %c32_122, %c0_123] : memref<1x11x88x64xbf16, #tpu.memory_space<vmem>>, vector<1x1x56x64xbf16>
      %145 = vector.shape_cast %144 : vector<1x1x56x64xbf16> to vector<56x64xbf16>
      %c1_i32_124 = arith.constant 1 : i32
      %146 = arith.addi %2, %c1_i32_124 : i32
      %c1_i32_125 = arith.constant 1 : i32
      %147 = arith.addi %146, %c1_i32_125 : i32
      %c0_126 = arith.constant 0 : index
      %148 = arith.index_cast %147 : i32 to index
      %c32_127 = arith.constant 32 : index
      %c0_128 = arith.constant 0 : index
      %149 = vector.load %arg1[%c0_126, %148, %c32_127, %c0_128] : memref<1x11x88x64xbf16, #tpu.memory_space<vmem>>, vector<1x1x56x64xbf16>
      %150 = vector.shape_cast %149 : vector<1x1x56x64xbf16> to vector<56x64xbf16>
      %cst_129 = arith.constant dense<0.000000e+00> : vector<56x128xf32>
      %151 = tpu.matmul %145, %141, %cst_129 {dimension_numbers = #tpu.dot_dimension_numbers<[1], [0], [0], [1], [0, 0, 1, 1], [], []>} : vector<56x64xbf16>, vector<64x128xbf16>, vector<56x128xf32> -> vector<56x128xf32>
      %152 = arith.addf %137, %151 : vector<56x128xf32>
      %cst_130 = arith.constant dense<0.000000e+00> : vector<56x128xf32>
      %153 = tpu.matmul %150, %141, %cst_130 {dimension_numbers = #tpu.dot_dimension_numbers<[1], [0], [0], [1], [0, 0, 1, 1], [], []>} : vector<56x64xbf16>, vector<64x128xbf16>, vector<56x128xf32> -> vector<56x128xf32>
      %154 = arith.addf %139, %153 : vector<56x128xf32>
      %c10 = arith.constant 10 : index
      %c0_131 = arith.constant 0 : index
      %c0_132 = arith.constant 0 : index
      %155 = vector.load %arg2[%c10, %c0_131, %c0_132] : memref<25x64x128xbf16, #tpu.memory_space<vmem>>, vector<1x64x128xbf16>
      %156 = vector.shape_cast %155 : vector<1x64x128xbf16> to vector<64x128xbf16>
      %c2_i32_133 = arith.constant 2 : i32
      %157 = arith.addi %2, %c2_i32_133 : i32
      %c0_134 = arith.constant 0 : index
      %158 = arith.index_cast %157 : i32 to index
      %c0_135 = arith.constant 0 : index
      %c0_136 = arith.constant 0 : index
      %159 = vector.load %arg1[%c0_134, %158, %c0_135, %c0_136] : memref<1x11x88x64xbf16, #tpu.memory_space<vmem>>, vector<1x1x56x64xbf16>
      %160 = vector.shape_cast %159 : vector<1x1x56x64xbf16> to vector<56x64xbf16>
      %c1_i32_137 = arith.constant 1 : i32
      %161 = arith.addi %2, %c1_i32_137 : i32
      %c2_i32_138 = arith.constant 2 : i32
      %162 = arith.addi %161, %c2_i32_138 : i32
      %c0_139 = arith.constant 0 : index
      %163 = arith.index_cast %162 : i32 to index
      %c0_140 = arith.constant 0 : index
      %c0_141 = arith.constant 0 : index
      %164 = vector.load %arg1[%c0_139, %163, %c0_140, %c0_141] : memref<1x11x88x64xbf16, #tpu.memory_space<vmem>>, vector<1x1x56x64xbf16>
      %165 = vector.shape_cast %164 : vector<1x1x56x64xbf16> to vector<56x64xbf16>
      %cst_142 = arith.constant dense<0.000000e+00> : vector<56x128xf32>
      %166 = tpu.matmul %160, %156, %cst_142 {dimension_numbers = #tpu.dot_dimension_numbers<[1], [0], [0], [1], [0, 0, 1, 1], [], []>} : vector<56x64xbf16>, vector<64x128xbf16>, vector<56x128xf32> -> vector<56x128xf32>
      %167 = arith.addf %152, %166 : vector<56x128xf32>
      %cst_143 = arith.constant dense<0.000000e+00> : vector<56x128xf32>
      %168 = tpu.matmul %165, %156, %cst_143 {dimension_numbers = #tpu.dot_dimension_numbers<[1], [0], [0], [1], [0, 0, 1, 1], [], []>} : vector<56x64xbf16>, vector<64x128xbf16>, vector<56x128xf32> -> vector<56x128xf32>
      %169 = arith.addf %154, %168 : vector<56x128xf32>
      %c11 = arith.constant 11 : index
      %c0_144 = arith.constant 0 : index
      %c0_145 = arith.constant 0 : index
      %170 = vector.load %arg2[%c11, %c0_144, %c0_145] : memref<25x64x128xbf16, #tpu.memory_space<vmem>>, vector<1x64x128xbf16>
      %171 = vector.shape_cast %170 : vector<1x64x128xbf16> to vector<64x128xbf16>
      %c2_i32_146 = arith.constant 2 : i32
      %172 = arith.addi %2, %c2_i32_146 : i32
      %c0_147 = arith.constant 0 : index
      %173 = arith.index_cast %172 : i32 to index
      %c8_148 = arith.constant 8 : index
      %c0_149 = arith.constant 0 : index
      %174 = vector.load %arg1[%c0_147, %173, %c8_148, %c0_149] : memref<1x11x88x64xbf16, #tpu.memory_space<vmem>>, vector<1x1x56x64xbf16>
      %175 = vector.shape_cast %174 : vector<1x1x56x64xbf16> to vector<56x64xbf16>
      %c1_i32_150 = arith.constant 1 : i32
      %176 = arith.addi %2, %c1_i32_150 : i32
      %c2_i32_151 = arith.constant 2 : i32
      %177 = arith.addi %176, %c2_i32_151 : i32
      %c0_152 = arith.constant 0 : index
      %178 = arith.index_cast %177 : i32 to index
      %c8_153 = arith.constant 8 : index
      %c0_154 = arith.constant 0 : index
      %179 = vector.load %arg1[%c0_152, %178, %c8_153, %c0_154] : memref<1x11x88x64xbf16, #tpu.memory_space<vmem>>, vector<1x1x56x64xbf16>
      %180 = vector.shape_cast %179 : vector<1x1x56x64xbf16> to vector<56x64xbf16>
      %cst_155 = arith.constant dense<0.000000e+00> : vector<56x128xf32>
      %181 = tpu.matmul %175, %171, %cst_155 {dimension_numbers = #tpu.dot_dimension_numbers<[1], [0], [0], [1], [0, 0, 1, 1], [], []>} : vector<56x64xbf16>, vector<64x128xbf16>, vector<56x128xf32> -> vector<56x128xf32>
      %182 = arith.addf %167, %181 : vector<56x128xf32>
      %cst_156 = arith.constant dense<0.000000e+00> : vector<56x128xf32>
      %183 = tpu.matmul %180, %171, %cst_156 {dimension_numbers = #tpu.dot_dimension_numbers<[1], [0], [0], [1], [0, 0, 1, 1], [], []>} : vector<56x64xbf16>, vector<64x128xbf16>, vector<56x128xf32> -> vector<56x128xf32>
      %184 = arith.addf %169, %183 : vector<56x128xf32>
      %c12 = arith.constant 12 : index
      %c0_157 = arith.constant 0 : index
      %c0_158 = arith.constant 0 : index
      %185 = vector.load %arg2[%c12, %c0_157, %c0_158] : memref<25x64x128xbf16, #tpu.memory_space<vmem>>, vector<1x64x128xbf16>
      %186 = vector.shape_cast %185 : vector<1x64x128xbf16> to vector<64x128xbf16>
      %c2_i32_159 = arith.constant 2 : i32
      %187 = arith.addi %2, %c2_i32_159 : i32
      %c0_160 = arith.constant 0 : index
      %188 = arith.index_cast %187 : i32 to index
      %c16_161 = arith.constant 16 : index
      %c0_162 = arith.constant 0 : index
      %189 = vector.load %arg1[%c0_160, %188, %c16_161, %c0_162] : memref<1x11x88x64xbf16, #tpu.memory_space<vmem>>, vector<1x1x56x64xbf16>
      %190 = vector.shape_cast %189 : vector<1x1x56x64xbf16> to vector<56x64xbf16>
      %c1_i32_163 = arith.constant 1 : i32
      %191 = arith.addi %2, %c1_i32_163 : i32
      %c2_i32_164 = arith.constant 2 : i32
      %192 = arith.addi %191, %c2_i32_164 : i32
      %c0_165 = arith.constant 0 : index
      %193 = arith.index_cast %192 : i32 to index
      %c16_166 = arith.constant 16 : index
      %c0_167 = arith.constant 0 : index
      %194 = vector.load %arg1[%c0_165, %193, %c16_166, %c0_167] : memref<1x11x88x64xbf16, #tpu.memory_space<vmem>>, vector<1x1x56x64xbf16>
      %195 = vector.shape_cast %194 : vector<1x1x56x64xbf16> to vector<56x64xbf16>
      %cst_168 = arith.constant dense<0.000000e+00> : vector<56x128xf32>
      %196 = tpu.matmul %190, %186, %cst_168 {dimension_numbers = #tpu.dot_dimension_numbers<[1], [0], [0], [1], [0, 0, 1, 1], [], []>} : vector<56x64xbf16>, vector<64x128xbf16>, vector<56x128xf32> -> vector<56x128xf32>
      %197 = arith.addf %182, %196 : vector<56x128xf32>
      %cst_169 = arith.constant dense<0.000000e+00> : vector<56x128xf32>
      %198 = tpu.matmul %195, %186, %cst_169 {dimension_numbers = #tpu.dot_dimension_numbers<[1], [0], [0], [1], [0, 0, 1, 1], [], []>} : vector<56x64xbf16>, vector<64x128xbf16>, vector<56x128xf32> -> vector<56x128xf32>
      %199 = arith.addf %184, %198 : vector<56x128xf32>
      %c13 = arith.constant 13 : index
      %c0_170 = arith.constant 0 : index
      %c0_171 = arith.constant 0 : index
      %200 = vector.load %arg2[%c13, %c0_170, %c0_171] : memref<25x64x128xbf16, #tpu.memory_space<vmem>>, vector<1x64x128xbf16>
      %201 = vector.shape_cast %200 : vector<1x64x128xbf16> to vector<64x128xbf16>
      %c2_i32_172 = arith.constant 2 : i32
      %202 = arith.addi %2, %c2_i32_172 : i32
      %c0_173 = arith.constant 0 : index
      %203 = arith.index_cast %202 : i32 to index
      %c24_174 = arith.constant 24 : index
      %c0_175 = arith.constant 0 : index
      %204 = vector.load %arg1[%c0_173, %203, %c24_174, %c0_175] : memref<1x11x88x64xbf16, #tpu.memory_space<vmem>>, vector<1x1x56x64xbf16>
      %205 = vector.shape_cast %204 : vector<1x1x56x64xbf16> to vector<56x64xbf16>
      %c1_i32_176 = arith.constant 1 : i32
      %206 = arith.addi %2, %c1_i32_176 : i32
      %c2_i32_177 = arith.constant 2 : i32
      %207 = arith.addi %206, %c2_i32_177 : i32
      %c0_178 = arith.constant 0 : index
      %208 = arith.index_cast %207 : i32 to index
      %c24_179 = arith.constant 24 : index
      %c0_180 = arith.constant 0 : index
      %209 = vector.load %arg1[%c0_178, %208, %c24_179, %c0_180] : memref<1x11x88x64xbf16, #tpu.memory_space<vmem>>, vector<1x1x56x64xbf16>
      %210 = vector.shape_cast %209 : vector<1x1x56x64xbf16> to vector<56x64xbf16>
      %cst_181 = arith.constant dense<0.000000e+00> : vector<56x128xf32>
      %211 = tpu.matmul %205, %201, %cst_181 {dimension_numbers = #tpu.dot_dimension_numbers<[1], [0], [0], [1], [0, 0, 1, 1], [], []>} : vector<56x64xbf16>, vector<64x128xbf16>, vector<56x128xf32> -> vector<56x128xf32>
      %212 = arith.addf %197, %211 : vector<56x128xf32>
      %cst_182 = arith.constant dense<0.000000e+00> : vector<56x128xf32>
      %213 = tpu.matmul %210, %201, %cst_182 {dimension_numbers = #tpu.dot_dimension_numbers<[1], [0], [0], [1], [0, 0, 1, 1], [], []>} : vector<56x64xbf16>, vector<64x128xbf16>, vector<56x128xf32> -> vector<56x128xf32>
      %214 = arith.addf %199, %213 : vector<56x128xf32>
      %c14 = arith.constant 14 : index
      %c0_183 = arith.constant 0 : index
      %c0_184 = arith.constant 0 : index
      %215 = vector.load %arg2[%c14, %c0_183, %c0_184] : memref<25x64x128xbf16, #tpu.memory_space<vmem>>, vector<1x64x128xbf16>
      %216 = vector.shape_cast %215 : vector<1x64x128xbf16> to vector<64x128xbf16>
      %c2_i32_185 = arith.constant 2 : i32
      %217 = arith.addi %2, %c2_i32_185 : i32
      %c0_186 = arith.constant 0 : index
      %218 = arith.index_cast %217 : i32 to index
      %c32_187 = arith.constant 32 : index
      %c0_188 = arith.constant 0 : index
      %219 = vector.load %arg1[%c0_186, %218, %c32_187, %c0_188] : memref<1x11x88x64xbf16, #tpu.memory_space<vmem>>, vector<1x1x56x64xbf16>
      %220 = vector.shape_cast %219 : vector<1x1x56x64xbf16> to vector<56x64xbf16>
      %c1_i32_189 = arith.constant 1 : i32
      %221 = arith.addi %2, %c1_i32_189 : i32
      %c2_i32_190 = arith.constant 2 : i32
      %222 = arith.addi %221, %c2_i32_190 : i32
      %c0_191 = arith.constant 0 : index
      %223 = arith.index_cast %222 : i32 to index
      %c32_192 = arith.constant 32 : index
      %c0_193 = arith.constant 0 : index
      %224 = vector.load %arg1[%c0_191, %223, %c32_192, %c0_193] : memref<1x11x88x64xbf16, #tpu.memory_space<vmem>>, vector<1x1x56x64xbf16>
      %225 = vector.shape_cast %224 : vector<1x1x56x64xbf16> to vector<56x64xbf16>
      %cst_194 = arith.constant dense<0.000000e+00> : vector<56x128xf32>
      %226 = tpu.matmul %220, %216, %cst_194 {dimension_numbers = #tpu.dot_dimension_numbers<[1], [0], [0], [1], [0, 0, 1, 1], [], []>} : vector<56x64xbf16>, vector<64x128xbf16>, vector<56x128xf32> -> vector<56x128xf32>
      %227 = arith.addf %212, %226 : vector<56x128xf32>
      %cst_195 = arith.constant dense<0.000000e+00> : vector<56x128xf32>
      %228 = tpu.matmul %225, %216, %cst_195 {dimension_numbers = #tpu.dot_dimension_numbers<[1], [0], [0], [1], [0, 0, 1, 1], [], []>} : vector<56x64xbf16>, vector<64x128xbf16>, vector<56x128xf32> -> vector<56x128xf32>
      %229 = arith.addf %214, %228 : vector<56x128xf32>
      %c15 = arith.constant 15 : index
      %c0_196 = arith.constant 0 : index
      %c0_197 = arith.constant 0 : index
      %230 = vector.load %arg2[%c15, %c0_196, %c0_197] : memref<25x64x128xbf16, #tpu.memory_space<vmem>>, vector<1x64x128xbf16>
      %231 = vector.shape_cast %230 : vector<1x64x128xbf16> to vector<64x128xbf16>
      %c3_i32_198 = arith.constant 3 : i32
      %232 = arith.addi %2, %c3_i32_198 : i32
      %c0_199 = arith.constant 0 : index
      %233 = arith.index_cast %232 : i32 to index
      %c0_200 = arith.constant 0 : index
      %c0_201 = arith.constant 0 : index
      %234 = vector.load %arg1[%c0_199, %233, %c0_200, %c0_201] : memref<1x11x88x64xbf16, #tpu.memory_space<vmem>>, vector<1x1x56x64xbf16>
      %235 = vector.shape_cast %234 : vector<1x1x56x64xbf16> to vector<56x64xbf16>
      %c1_i32_202 = arith.constant 1 : i32
      %236 = arith.addi %2, %c1_i32_202 : i32
      %c3_i32_203 = arith.constant 3 : i32
      %237 = arith.addi %236, %c3_i32_203 : i32
      %c0_204 = arith.constant 0 : index
      %238 = arith.index_cast %237 : i32 to index
      %c0_205 = arith.constant 0 : index
      %c0_206 = arith.constant 0 : index
      %239 = vector.load %arg1[%c0_204, %238, %c0_205, %c0_206] : memref<1x11x88x64xbf16, #tpu.memory_space<vmem>>, vector<1x1x56x64xbf16>
      %240 = vector.shape_cast %239 : vector<1x1x56x64xbf16> to vector<56x64xbf16>
      %cst_207 = arith.constant dense<0.000000e+00> : vector<56x128xf32>
      %241 = tpu.matmul %235, %231, %cst_207 {dimension_numbers = #tpu.dot_dimension_numbers<[1], [0], [0], [1], [0, 0, 1, 1], [], []>} : vector<56x64xbf16>, vector<64x128xbf16>, vector<56x128xf32> -> vector<56x128xf32>
      %242 = arith.addf %227, %241 : vector<56x128xf32>
      %cst_208 = arith.constant dense<0.000000e+00> : vector<56x128xf32>
      %243 = tpu.matmul %240, %231, %cst_208 {dimension_numbers = #tpu.dot_dimension_numbers<[1], [0], [0], [1], [0, 0, 1, 1], [], []>} : vector<56x64xbf16>, vector<64x128xbf16>, vector<56x128xf32> -> vector<56x128xf32>
      %244 = arith.addf %229, %243 : vector<56x128xf32>
      %c16_209 = arith.constant 16 : index
      %c0_210 = arith.constant 0 : index
      %c0_211 = arith.constant 0 : index
      %245 = vector.load %arg2[%c16_209, %c0_210, %c0_211] : memref<25x64x128xbf16, #tpu.memory_space<vmem>>, vector<1x64x128xbf16>
      %246 = vector.shape_cast %245 : vector<1x64x128xbf16> to vector<64x128xbf16>
      %c3_i32_212 = arith.constant 3 : i32
      %247 = arith.addi %2, %c3_i32_212 : i32
      %c0_213 = arith.constant 0 : index
      %248 = arith.index_cast %247 : i32 to index
      %c8_214 = arith.constant 8 : index
      %c0_215 = arith.constant 0 : index
      %249 = vector.load %arg1[%c0_213, %248, %c8_214, %c0_215] : memref<1x11x88x64xbf16, #tpu.memory_space<vmem>>, vector<1x1x56x64xbf16>
      %250 = vector.shape_cast %249 : vector<1x1x56x64xbf16> to vector<56x64xbf16>
      %c1_i32_216 = arith.constant 1 : i32
      %251 = arith.addi %2, %c1_i32_216 : i32
      %c3_i32_217 = arith.constant 3 : i32
      %252 = arith.addi %251, %c3_i32_217 : i32
      %c0_218 = arith.constant 0 : index
      %253 = arith.index_cast %252 : i32 to index
      %c8_219 = arith.constant 8 : index
      %c0_220 = arith.constant 0 : index
      %254 = vector.load %arg1[%c0_218, %253, %c8_219, %c0_220] : memref<1x11x88x64xbf16, #tpu.memory_space<vmem>>, vector<1x1x56x64xbf16>
      %255 = vector.shape_cast %254 : vector<1x1x56x64xbf16> to vector<56x64xbf16>
      %cst_221 = arith.constant dense<0.000000e+00> : vector<56x128xf32>
      %256 = tpu.matmul %250, %246, %cst_221 {dimension_numbers = #tpu.dot_dimension_numbers<[1], [0], [0], [1], [0, 0, 1, 1], [], []>} : vector<56x64xbf16>, vector<64x128xbf16>, vector<56x128xf32> -> vector<56x128xf32>
      %257 = arith.addf %242, %256 : vector<56x128xf32>
      %cst_222 = arith.constant dense<0.000000e+00> : vector<56x128xf32>
      %258 = tpu.matmul %255, %246, %cst_222 {dimension_numbers = #tpu.dot_dimension_numbers<[1], [0], [0], [1], [0, 0, 1, 1], [], []>} : vector<56x64xbf16>, vector<64x128xbf16>, vector<56x128xf32> -> vector<56x128xf32>
      %259 = arith.addf %244, %258 : vector<56x128xf32>
      %c17 = arith.constant 17 : index
      %c0_223 = arith.constant 0 : index
      %c0_224 = arith.constant 0 : index
      %260 = vector.load %arg2[%c17, %c0_223, %c0_224] : memref<25x64x128xbf16, #tpu.memory_space<vmem>>, vector<1x64x128xbf16>
      %261 = vector.shape_cast %260 : vector<1x64x128xbf16> to vector<64x128xbf16>
      %c3_i32_225 = arith.constant 3 : i32
      %262 = arith.addi %2, %c3_i32_225 : i32
      %c0_226 = arith.constant 0 : index
      %263 = arith.index_cast %262 : i32 to index
      %c16_227 = arith.constant 16 : index
      %c0_228 = arith.constant 0 : index
      %264 = vector.load %arg1[%c0_226, %263, %c16_227, %c0_228] : memref<1x11x88x64xbf16, #tpu.memory_space<vmem>>, vector<1x1x56x64xbf16>
      %265 = vector.shape_cast %264 : vector<1x1x56x64xbf16> to vector<56x64xbf16>
      %c1_i32_229 = arith.constant 1 : i32
      %266 = arith.addi %2, %c1_i32_229 : i32
      %c3_i32_230 = arith.constant 3 : i32
      %267 = arith.addi %266, %c3_i32_230 : i32
      %c0_231 = arith.constant 0 : index
      %268 = arith.index_cast %267 : i32 to index
      %c16_232 = arith.constant 16 : index
      %c0_233 = arith.constant 0 : index
      %269 = vector.load %arg1[%c0_231, %268, %c16_232, %c0_233] : memref<1x11x88x64xbf16, #tpu.memory_space<vmem>>, vector<1x1x56x64xbf16>
      %270 = vector.shape_cast %269 : vector<1x1x56x64xbf16> to vector<56x64xbf16>
      %cst_234 = arith.constant dense<0.000000e+00> : vector<56x128xf32>
      %271 = tpu.matmul %265, %261, %cst_234 {dimension_numbers = #tpu.dot_dimension_numbers<[1], [0], [0], [1], [0, 0, 1, 1], [], []>} : vector<56x64xbf16>, vector<64x128xbf16>, vector<56x128xf32> -> vector<56x128xf32>
      %272 = arith.addf %257, %271 : vector<56x128xf32>
      %cst_235 = arith.constant dense<0.000000e+00> : vector<56x128xf32>
      %273 = tpu.matmul %270, %261, %cst_235 {dimension_numbers = #tpu.dot_dimension_numbers<[1], [0], [0], [1], [0, 0, 1, 1], [], []>} : vector<56x64xbf16>, vector<64x128xbf16>, vector<56x128xf32> -> vector<56x128xf32>
      %274 = arith.addf %259, %273 : vector<56x128xf32>
      %c18 = arith.constant 18 : index
      %c0_236 = arith.constant 0 : index
      %c0_237 = arith.constant 0 : index
      %275 = vector.load %arg2[%c18, %c0_236, %c0_237] : memref<25x64x128xbf16, #tpu.memory_space<vmem>>, vector<1x64x128xbf16>
      %276 = vector.shape_cast %275 : vector<1x64x128xbf16> to vector<64x128xbf16>
      %c3_i32_238 = arith.constant 3 : i32
      %277 = arith.addi %2, %c3_i32_238 : i32
      %c0_239 = arith.constant 0 : index
      %278 = arith.index_cast %277 : i32 to index
      %c24_240 = arith.constant 24 : index
      %c0_241 = arith.constant 0 : index
      %279 = vector.load %arg1[%c0_239, %278, %c24_240, %c0_241] : memref<1x11x88x64xbf16, #tpu.memory_space<vmem>>, vector<1x1x56x64xbf16>
      %280 = vector.shape_cast %279 : vector<1x1x56x64xbf16> to vector<56x64xbf16>
      %c1_i32_242 = arith.constant 1 : i32
      %281 = arith.addi %2, %c1_i32_242 : i32
      %c3_i32_243 = arith.constant 3 : i32
      %282 = arith.addi %281, %c3_i32_243 : i32
      %c0_244 = arith.constant 0 : index
      %283 = arith.index_cast %282 : i32 to index
      %c24_245 = arith.constant 24 : index
      %c0_246 = arith.constant 0 : index
      %284 = vector.load %arg1[%c0_244, %283, %c24_245, %c0_246] : memref<1x11x88x64xbf16, #tpu.memory_space<vmem>>, vector<1x1x56x64xbf16>
      %285 = vector.shape_cast %284 : vector<1x1x56x64xbf16> to vector<56x64xbf16>
      %cst_247 = arith.constant dense<0.000000e+00> : vector<56x128xf32>
      %286 = tpu.matmul %280, %276, %cst_247 {dimension_numbers = #tpu.dot_dimension_numbers<[1], [0], [0], [1], [0, 0, 1, 1], [], []>} : vector<56x64xbf16>, vector<64x128xbf16>, vector<56x128xf32> -> vector<56x128xf32>
      %287 = arith.addf %272, %286 : vector<56x128xf32>
      %cst_248 = arith.constant dense<0.000000e+00> : vector<56x128xf32>
      %288 = tpu.matmul %285, %276, %cst_248 {dimension_numbers = #tpu.dot_dimension_numbers<[1], [0], [0], [1], [0, 0, 1, 1], [], []>} : vector<56x64xbf16>, vector<64x128xbf16>, vector<56x128xf32> -> vector<56x128xf32>
      %289 = arith.addf %274, %288 : vector<56x128xf32>
      %c19 = arith.constant 19 : index
      %c0_249 = arith.constant 0 : index
      %c0_250 = arith.constant 0 : index
      %290 = vector.load %arg2[%c19, %c0_249, %c0_250] : memref<25x64x128xbf16, #tpu.memory_space<vmem>>, vector<1x64x128xbf16>
      %291 = vector.shape_cast %290 : vector<1x64x128xbf16> to vector<64x128xbf16>
      %c3_i32_251 = arith.constant 3 : i32
      %292 = arith.addi %2, %c3_i32_251 : i32
      %c0_252 = arith.constant 0 : index
      %293 = arith.index_cast %292 : i32 to index
      %c32_253 = arith.constant 32 : index
      %c0_254 = arith.constant 0 : index
      %294 = vector.load %arg1[%c0_252, %293, %c32_253, %c0_254] : memref<1x11x88x64xbf16, #tpu.memory_space<vmem>>, vector<1x1x56x64xbf16>
      %295 = vector.shape_cast %294 : vector<1x1x56x64xbf16> to vector<56x64xbf16>
      %c1_i32_255 = arith.constant 1 : i32
      %296 = arith.addi %2, %c1_i32_255 : i32
      %c3_i32_256 = arith.constant 3 : i32
      %297 = arith.addi %296, %c3_i32_256 : i32
      %c0_257 = arith.constant 0 : index
      %298 = arith.index_cast %297 : i32 to index
      %c32_258 = arith.constant 32 : index
      %c0_259 = arith.constant 0 : index
      %299 = vector.load %arg1[%c0_257, %298, %c32_258, %c0_259] : memref<1x11x88x64xbf16, #tpu.memory_space<vmem>>, vector<1x1x56x64xbf16>
      %300 = vector.shape_cast %299 : vector<1x1x56x64xbf16> to vector<56x64xbf16>
      %cst_260 = arith.constant dense<0.000000e+00> : vector<56x128xf32>
      %301 = tpu.matmul %295, %291, %cst_260 {dimension_numbers = #tpu.dot_dimension_numbers<[1], [0], [0], [1], [0, 0, 1, 1], [], []>} : vector<56x64xbf16>, vector<64x128xbf16>, vector<56x128xf32> -> vector<56x128xf32>
      %302 = arith.addf %287, %301 : vector<56x128xf32>
      %cst_261 = arith.constant dense<0.000000e+00> : vector<56x128xf32>
      %303 = tpu.matmul %300, %291, %cst_261 {dimension_numbers = #tpu.dot_dimension_numbers<[1], [0], [0], [1], [0, 0, 1, 1], [], []>} : vector<56x64xbf16>, vector<64x128xbf16>, vector<56x128xf32> -> vector<56x128xf32>
      %304 = arith.addf %289, %303 : vector<56x128xf32>
      %c20 = arith.constant 20 : index
      %c0_262 = arith.constant 0 : index
      %c0_263 = arith.constant 0 : index
      %305 = vector.load %arg2[%c20, %c0_262, %c0_263] : memref<25x64x128xbf16, #tpu.memory_space<vmem>>, vector<1x64x128xbf16>
      %306 = vector.shape_cast %305 : vector<1x64x128xbf16> to vector<64x128xbf16>
      %c4_i32 = arith.constant 4 : i32
      %307 = arith.addi %2, %c4_i32 : i32
      %c0_264 = arith.constant 0 : index
      %308 = arith.index_cast %307 : i32 to index
      %c0_265 = arith.constant 0 : index
      %c0_266 = arith.constant 0 : index
      %309 = vector.load %arg1[%c0_264, %308, %c0_265, %c0_266] : memref<1x11x88x64xbf16, #tpu.memory_space<vmem>>, vector<1x1x56x64xbf16>
      %310 = vector.shape_cast %309 : vector<1x1x56x64xbf16> to vector<56x64xbf16>
      %c1_i32_267 = arith.constant 1 : i32
      %311 = arith.addi %2, %c1_i32_267 : i32
      %c4_i32_268 = arith.constant 4 : i32
      %312 = arith.addi %311, %c4_i32_268 : i32
      %c0_269 = arith.constant 0 : index
      %313 = arith.index_cast %312 : i32 to index
      %c0_270 = arith.constant 0 : index
      %c0_271 = arith.constant 0 : index
      %314 = vector.load %arg1[%c0_269, %313, %c0_270, %c0_271] : memref<1x11x88x64xbf16, #tpu.memory_space<vmem>>, vector<1x1x56x64xbf16>
      %315 = vector.shape_cast %314 : vector<1x1x56x64xbf16> to vector<56x64xbf16>
      %cst_272 = arith.constant dense<0.000000e+00> : vector<56x128xf32>
      %316 = tpu.matmul %310, %306, %cst_272 {dimension_numbers = #tpu.dot_dimension_numbers<[1], [0], [0], [1], [0, 0, 1, 1], [], []>} : vector<56x64xbf16>, vector<64x128xbf16>, vector<56x128xf32> -> vector<56x128xf32>
      %317 = arith.addf %302, %316 : vector<56x128xf32>
      %cst_273 = arith.constant dense<0.000000e+00> : vector<56x128xf32>
      %318 = tpu.matmul %315, %306, %cst_273 {dimension_numbers = #tpu.dot_dimension_numbers<[1], [0], [0], [1], [0, 0, 1, 1], [], []>} : vector<56x64xbf16>, vector<64x128xbf16>, vector<56x128xf32> -> vector<56x128xf32>
      %319 = arith.addf %304, %318 : vector<56x128xf32>
      %c21 = arith.constant 21 : index
      %c0_274 = arith.constant 0 : index
      %c0_275 = arith.constant 0 : index
      %320 = vector.load %arg2[%c21, %c0_274, %c0_275] : memref<25x64x128xbf16, #tpu.memory_space<vmem>>, vector<1x64x128xbf16>
      %321 = vector.shape_cast %320 : vector<1x64x128xbf16> to vector<64x128xbf16>
      %c4_i32_276 = arith.constant 4 : i32
      %322 = arith.addi %2, %c4_i32_276 : i32
      %c0_277 = arith.constant 0 : index
      %323 = arith.index_cast %322 : i32 to index
      %c8_278 = arith.constant 8 : index
      %c0_279 = arith.constant 0 : index
      %324 = vector.load %arg1[%c0_277, %323, %c8_278, %c0_279] : memref<1x11x88x64xbf16, #tpu.memory_space<vmem>>, vector<1x1x56x64xbf16>
      %325 = vector.shape_cast %324 : vector<1x1x56x64xbf16> to vector<56x64xbf16>
      %c1_i32_280 = arith.constant 1 : i32
      %326 = arith.addi %2, %c1_i32_280 : i32
      %c4_i32_281 = arith.constant 4 : i32
      %327 = arith.addi %326, %c4_i32_281 : i32
      %c0_282 = arith.constant 0 : index
      %328 = arith.index_cast %327 : i32 to index
      %c8_283 = arith.constant 8 : index
      %c0_284 = arith.constant 0 : index
      %329 = vector.load %arg1[%c0_282, %328, %c8_283, %c0_284] : memref<1x11x88x64xbf16, #tpu.memory_space<vmem>>, vector<1x1x56x64xbf16>
      %330 = vector.shape_cast %329 : vector<1x1x56x64xbf16> to vector<56x64xbf16>
      %cst_285 = arith.constant dense<0.000000e+00> : vector<56x128xf32>
      %331 = tpu.matmul %325, %321, %cst_285 {dimension_numbers = #tpu.dot_dimension_numbers<[1], [0], [0], [1], [0, 0, 1, 1], [], []>} : vector<56x64xbf16>, vector<64x128xbf16>, vector<56x128xf32> -> vector<56x128xf32>
      %332 = arith.addf %317, %331 : vector<56x128xf32>
      %cst_286 = arith.constant dense<0.000000e+00> : vector<56x128xf32>
      %333 = tpu.matmul %330, %321, %cst_286 {dimension_numbers = #tpu.dot_dimension_numbers<[1], [0], [0], [1], [0, 0, 1, 1], [], []>} : vector<56x64xbf16>, vector<64x128xbf16>, vector<56x128xf32> -> vector<56x128xf32>
      %334 = arith.addf %319, %333 : vector<56x128xf32>
      %c22 = arith.constant 22 : index
      %c0_287 = arith.constant 0 : index
      %c0_288 = arith.constant 0 : index
      %335 = vector.load %arg2[%c22, %c0_287, %c0_288] : memref<25x64x128xbf16, #tpu.memory_space<vmem>>, vector<1x64x128xbf16>
      %336 = vector.shape_cast %335 : vector<1x64x128xbf16> to vector<64x128xbf16>
      %c4_i32_289 = arith.constant 4 : i32
      %337 = arith.addi %2, %c4_i32_289 : i32
      %c0_290 = arith.constant 0 : index
      %338 = arith.index_cast %337 : i32 to index
      %c16_291 = arith.constant 16 : index
      %c0_292 = arith.constant 0 : index
      %339 = vector.load %arg1[%c0_290, %338, %c16_291, %c0_292] : memref<1x11x88x64xbf16, #tpu.memory_space<vmem>>, vector<1x1x56x64xbf16>
      %340 = vector.shape_cast %339 : vector<1x1x56x64xbf16> to vector<56x64xbf16>
      %c1_i32_293 = arith.constant 1 : i32
      %341 = arith.addi %2, %c1_i32_293 : i32
      %c4_i32_294 = arith.constant 4 : i32
      %342 = arith.addi %341, %c4_i32_294 : i32
      %c0_295 = arith.constant 0 : index
      %343 = arith.index_cast %342 : i32 to index
      %c16_296 = arith.constant 16 : index
      %c0_297 = arith.constant 0 : index
      %344 = vector.load %arg1[%c0_295, %343, %c16_296, %c0_297] : memref<1x11x88x64xbf16, #tpu.memory_space<vmem>>, vector<1x1x56x64xbf16>
      %345 = vector.shape_cast %344 : vector<1x1x56x64xbf16> to vector<56x64xbf16>
      %cst_298 = arith.constant dense<0.000000e+00> : vector<56x128xf32>
      %346 = tpu.matmul %340, %336, %cst_298 {dimension_numbers = #tpu.dot_dimension_numbers<[1], [0], [0], [1], [0, 0, 1, 1], [], []>} : vector<56x64xbf16>, vector<64x128xbf16>, vector<56x128xf32> -> vector<56x128xf32>
      %347 = arith.addf %332, %346 : vector<56x128xf32>
      %cst_299 = arith.constant dense<0.000000e+00> : vector<56x128xf32>
      %348 = tpu.matmul %345, %336, %cst_299 {dimension_numbers = #tpu.dot_dimension_numbers<[1], [0], [0], [1], [0, 0, 1, 1], [], []>} : vector<56x64xbf16>, vector<64x128xbf16>, vector<56x128xf32> -> vector<56x128xf32>
      %349 = arith.addf %334, %348 : vector<56x128xf32>
      %c23 = arith.constant 23 : index
      %c0_300 = arith.constant 0 : index
      %c0_301 = arith.constant 0 : index
      %350 = vector.load %arg2[%c23, %c0_300, %c0_301] : memref<25x64x128xbf16, #tpu.memory_space<vmem>>, vector<1x64x128xbf16>
      %351 = vector.shape_cast %350 : vector<1x64x128xbf16> to vector<64x128xbf16>
      %c4_i32_302 = arith.constant 4 : i32
      %352 = arith.addi %2, %c4_i32_302 : i32
      %c0_303 = arith.constant 0 : index
      %353 = arith.index_cast %352 : i32 to index
      %c24_304 = arith.constant 24 : index
      %c0_305 = arith.constant 0 : index
      %354 = vector.load %arg1[%c0_303, %353, %c24_304, %c0_305] : memref<1x11x88x64xbf16, #tpu.memory_space<vmem>>, vector<1x1x56x64xbf16>
      %355 = vector.shape_cast %354 : vector<1x1x56x64xbf16> to vector<56x64xbf16>
      %c1_i32_306 = arith.constant 1 : i32
      %356 = arith.addi %2, %c1_i32_306 : i32
      %c4_i32_307 = arith.constant 4 : i32
      %357 = arith.addi %356, %c4_i32_307 : i32
      %c0_308 = arith.constant 0 : index
      %358 = arith.index_cast %357 : i32 to index
      %c24_309 = arith.constant 24 : index
      %c0_310 = arith.constant 0 : index
      %359 = vector.load %arg1[%c0_308, %358, %c24_309, %c0_310] : memref<1x11x88x64xbf16, #tpu.memory_space<vmem>>, vector<1x1x56x64xbf16>
      %360 = vector.shape_cast %359 : vector<1x1x56x64xbf16> to vector<56x64xbf16>
      %cst_311 = arith.constant dense<0.000000e+00> : vector<56x128xf32>
      %361 = tpu.matmul %355, %351, %cst_311 {dimension_numbers = #tpu.dot_dimension_numbers<[1], [0], [0], [1], [0, 0, 1, 1], [], []>} : vector<56x64xbf16>, vector<64x128xbf16>, vector<56x128xf32> -> vector<56x128xf32>
      %362 = arith.addf %347, %361 : vector<56x128xf32>
      %cst_312 = arith.constant dense<0.000000e+00> : vector<56x128xf32>
      %363 = tpu.matmul %360, %351, %cst_312 {dimension_numbers = #tpu.dot_dimension_numbers<[1], [0], [0], [1], [0, 0, 1, 1], [], []>} : vector<56x64xbf16>, vector<64x128xbf16>, vector<56x128xf32> -> vector<56x128xf32>
      %364 = arith.addf %349, %363 : vector<56x128xf32>
      %c24_313 = arith.constant 24 : index
      %c0_314 = arith.constant 0 : index
      %c0_315 = arith.constant 0 : index
      %365 = vector.load %arg2[%c24_313, %c0_314, %c0_315] : memref<25x64x128xbf16, #tpu.memory_space<vmem>>, vector<1x64x128xbf16>
      %366 = vector.shape_cast %365 : vector<1x64x128xbf16> to vector<64x128xbf16>
      %c4_i32_316 = arith.constant 4 : i32
      %367 = arith.addi %2, %c4_i32_316 : i32
      %c0_317 = arith.constant 0 : index
      %368 = arith.index_cast %367 : i32 to index
      %c32_318 = arith.constant 32 : index
      %c0_319 = arith.constant 0 : index
      %369 = vector.load %arg1[%c0_317, %368, %c32_318, %c0_319] : memref<1x11x88x64xbf16, #tpu.memory_space<vmem>>, vector<1x1x56x64xbf16>
      %370 = vector.shape_cast %369 : vector<1x1x56x64xbf16> to vector<56x64xbf16>
      %c1_i32_320 = arith.constant 1 : i32
      %371 = arith.addi %2, %c1_i32_320 : i32
      %c4_i32_321 = arith.constant 4 : i32
      %372 = arith.addi %371, %c4_i32_321 : i32
      %c0_322 = arith.constant 0 : index
      %373 = arith.index_cast %372 : i32 to index
      %c32_323 = arith.constant 32 : index
      %c0_324 = arith.constant 0 : index
      %374 = vector.load %arg1[%c0_322, %373, %c32_323, %c0_324] : memref<1x11x88x64xbf16, #tpu.memory_space<vmem>>, vector<1x1x56x64xbf16>
      %375 = vector.shape_cast %374 : vector<1x1x56x64xbf16> to vector<56x64xbf16>
      %cst_325 = arith.constant dense<0.000000e+00> : vector<56x128xf32>
      %376 = tpu.matmul %370, %366, %cst_325 {dimension_numbers = #tpu.dot_dimension_numbers<[1], [0], [0], [1], [0, 0, 1, 1], [], []>} : vector<56x64xbf16>, vector<64x128xbf16>, vector<56x128xf32> -> vector<56x128xf32>
      %377 = arith.addf %362, %376 : vector<56x128xf32>
      %cst_326 = arith.constant dense<0.000000e+00> : vector<56x128xf32>
      %378 = tpu.matmul %375, %366, %cst_326 {dimension_numbers = #tpu.dot_dimension_numbers<[1], [0], [0], [1], [0, 0, 1, 1], [], []>} : vector<56x64xbf16>, vector<64x128xbf16>, vector<56x128xf32> -> vector<56x128xf32>
      %379 = arith.addf %364, %378 : vector<56x128xf32>
      %380 = arith.maximumf %377, %379 : vector<56x128xf32>
      %381 = vector.extract_strided_slice %380 {offsets = [0, 0], sizes = [8, 128], strides = [1, 1]} : vector<56x128xf32> to vector<8x128xf32>
      %382 = vector.extract_strided_slice %380 {offsets = [8, 0], sizes = [8, 128], strides = [1, 1]} : vector<56x128xf32> to vector<8x128xf32>
      %383 = arith.maximumf %381, %382 : vector<8x128xf32>
      %384 = vector.broadcast %0 : vector<1x128xf32> to vector<8x128xf32>
      %385 = arith.addf %383, %384 : vector<8x128xf32>
      %cst_327 = arith.constant 0.000000e+00 : f32
      %386 = vector.broadcast %cst_327 : f32 to vector<8x128xf32>
      %387 = arith.maximumf %385, %386 : vector<8x128xf32>
      %388 = arith.truncf %387 : vector<8x128xf32> to vector<8x128xbf16>
      %c0_i32_328 = arith.constant 0 : i32
      %389 = arith.addi %c0_i32_328, %arg5 : i32
      %c0_329 = arith.constant 0 : index
      %390 = arith.index_cast %389 : i32 to index
      %c0_330 = arith.constant 0 : index
      %c0_331 = arith.constant 0 : index
      %391 = vector.load %arg4[%c0_329, %390, %c0_330, %c0_331] : memref<1x3x24x128xbf16, #tpu.memory_space<vmem>>, vector<1x1x8x128xbf16>
      %392 = vector.shape_cast %391 : vector<1x1x8x128xbf16> to vector<8x128xbf16>
      %393 = vector.shape_cast %388 : vector<8x128xbf16> to vector<1x1x8x128xbf16>
      tpu.vector_store %arg4[%c0_329, %390, %c0_330, %c0_331], %393 {strides = array<i32>} : memref<1x3x24x128xbf16, #tpu.memory_space<vmem>>, vector<1x1x8x128xbf16>,
      %394 = vector.extract_strided_slice %380 {offsets = [16, 0], sizes = [8, 128], strides = [1, 1]} : vector<56x128xf32> to vector<8x128xf32>
      %395 = vector.extract_strided_slice %380 {offsets = [24, 0], sizes = [8, 128], strides = [1, 1]} : vector<56x128xf32> to vector<8x128xf32>
      %396 = arith.maximumf %394, %395 : vector<8x128xf32>
      %397 = vector.broadcast %0 : vector<1x128xf32> to vector<8x128xf32>
      %398 = arith.addf %396, %397 : vector<8x128xf32>
      %cst_332 = arith.constant 0.000000e+00 : f32
      %399 = vector.broadcast %cst_332 : f32 to vector<8x128xf32>
      %400 = arith.maximumf %398, %399 : vector<8x128xf32>
      %401 = arith.truncf %400 : vector<8x128xf32> to vector<8x128xbf16>
      %c0_i32_333 = arith.constant 0 : i32
      %402 = arith.addi %c0_i32_333, %arg5 : i32
      %c0_334 = arith.constant 0 : index
      %403 = arith.index_cast %402 : i32 to index
      %c8_335 = arith.constant 8 : index
      %c0_336 = arith.constant 0 : index
      %404 = vector.load %arg4[%c0_334, %403, %c8_335, %c0_336] : memref<1x3x24x128xbf16, #tpu.memory_space<vmem>>, vector<1x1x8x128xbf16>
      %405 = vector.shape_cast %404 : vector<1x1x8x128xbf16> to vector<8x128xbf16>
      %406 = vector.shape_cast %401 : vector<8x128xbf16> to vector<1x1x8x128xbf16>
      tpu.vector_store %arg4[%c0_334, %403, %c8_335, %c0_336], %406 {strides = array<i32>} : memref<1x3x24x128xbf16, #tpu.memory_space<vmem>>, vector<1x1x8x128xbf16>,
      %407 = vector.extract_strided_slice %380 {offsets = [32, 0], sizes = [8, 128], strides = [1, 1]} : vector<56x128xf32> to vector<8x128xf32>
      %408 = vector.extract_strided_slice %380 {offsets = [40, 0], sizes = [8, 128], strides = [1, 1]} : vector<56x128xf32> to vector<8x128xf32>
      %409 = arith.maximumf %407, %408 : vector<8x128xf32>
      %410 = vector.broadcast %0 : vector<1x128xf32> to vector<8x128xf32>
      %411 = arith.addf %409, %410 : vector<8x128xf32>
      %cst_337 = arith.constant 0.000000e+00 : f32
      %412 = vector.broadcast %cst_337 : f32 to vector<8x128xf32>
      %413 = arith.maximumf %411, %412 : vector<8x128xf32>
      %414 = arith.truncf %413 : vector<8x128xf32> to vector<8x128xbf16>
      %c0_i32_338 = arith.constant 0 : i32
      %415 = arith.addi %c0_i32_338, %arg5 : i32
      %c0_339 = arith.constant 0 : index
      %416 = arith.index_cast %415 : i32 to index
      %c16_340 = arith.constant 16 : index
      %c0_341 = arith.constant 0 : index
      %417 = vector.load %arg4[%c0_339, %416, %c16_340, %c0_341] : memref<1x3x24x128xbf16, #tpu.memory_space<vmem>>, vector<1x1x8x128xbf16>
      %418 = vector.shape_cast %417 : vector<1x1x8x128xbf16> to vector<8x128xbf16>
      %419 = vector.shape_cast %414 : vector<8x128xbf16> to vector<1x1x8x128xbf16>
      tpu.vector_store %arg4[%c0_339, %416, %c16_340, %c0_341], %419 {strides = array<i32>} : memref<1x3x24x128xbf16, #tpu.memory_space<vmem>>, vector<1x1x8x128xbf16>,
    }
    %c3_i32_1 = arith.constant 3 : i32
    return
  }
  func.func @transform_0(%arg0: i32) -> (i32, i32, i32, i32) {
    %c0_i32 = arith.constant 0 : i32
    %c0_i32_0 = arith.constant 0 : i32
    %c0_i32_1 = arith.constant 0 : i32
    %c0_i32_2 = arith.constant 0 : i32
    return %arg0, %c0_i32, %c0_i32_0, %c0_i32_1 : i32, i32, i32, i32
  }
  func.func @transform_1(%arg0: i32) -> (i32, i32, i32) {
    %c0_i32 = arith.constant 0 : i32
    %c0_i32_0 = arith.constant 0 : i32
    %c0_i32_1 = arith.constant 0 : i32
    %c0_i32_2 = arith.constant 0 : i32
    return %c0_i32, %c0_i32_0, %c0_i32_1 : i32, i32, i32
  }
  func.func @transform_2(%arg0: i32) -> (i32, i32) {
    %c0_i32 = arith.constant 0 : i32
    %c0_i32_0 = arith.constant 0 : i32
    %c0_i32_1 = arith.constant 0 : i32
    return %c0_i32, %c0_i32_0 : i32, i32
  }
  func.func @transform_3(%arg0: i32) -> (i32, i32, i32, i32) {
    %c0_i32 = arith.constant 0 : i32
    %c0_i32_0 = arith.constant 0 : i32
    %c0_i32_1 = arith.constant 0 : i32
    %c0_i32_2 = arith.constant 0 : i32
    return %arg0, %c0_i32, %c0_i32_0, %c0_i32_1 : i32, i32, i32, i32
  }
}

module attributes {stable_mosaic.version = 11 : i64} {
  func.func @_fc_head_kernel(%arg0: i32, %arg1: memref<1x3x24x128xbf16, #tpu.memory_space<vmem>>, %arg2: memref<9x128x512xbf16, #tpu.memory_space<vmem>>, %arg3: memref<1x512xf32, #tpu.memory_space<vmem>>, %arg4: memref<512x256xbf16, #tpu.memory_space<vmem>>, %arg5: memref<1x256xf32, #tpu.memory_space<vmem>>, %arg6: memref<256x10xbf16, #tpu.memory_space<vmem>>, %arg7: memref<1x10xf32, #tpu.memory_space<vmem>>, %arg8: memref<8x10xf32, #tpu.memory_space<vmem>>) attributes {dimension_semantics = [#tpu.dimension_semantics<parallel>], iteration_bounds = array<i64: 1>, scalar_prefetch = 0 : i64, scratch_operands = 0 : i64, tpu.core_type = #tpu.core_type<tc>, window_params = [{transform_indices = @transform_0, window_bounds = array<i64: 1, 3, 24, 128>}, {pipeline_mode = #tpu.pipeline_mode<synchronous>, transform_indices = @transform_1, window_bounds = array<i64: 9, 128, 512>}, {pipeline_mode = #tpu.pipeline_mode<synchronous>, transform_indices = @transform_2, window_bounds = array<i64: 1, 512>}, {pipeline_mode = #tpu.pipeline_mode<synchronous>, transform_indices = @transform_3, window_bounds = array<i64: 512, 256>}, {pipeline_mode = #tpu.pipeline_mode<synchronous>, transform_indices = @transform_4, window_bounds = array<i64: 1, 256>}, {pipeline_mode = #tpu.pipeline_mode<synchronous>, transform_indices = @transform_5, window_bounds = array<i64: 256, 10>}, {pipeline_mode = #tpu.pipeline_mode<synchronous>, transform_indices = @transform_6, window_bounds = array<i64: 1, 10>}, {transform_indices = @transform_7, window_bounds = array<i64: 8, 10>}]} {
    %cst = arith.constant 0.000000e+00 : f32
    %0 = vector.broadcast %cst : f32 to vector<8x512xf32>
    %c0 = arith.constant 0 : index
    %c0_0 = arith.constant 0 : index
    %c0_1 = arith.constant 0 : index
    %c0_2 = arith.constant 0 : index
    %1 = vector.load %arg1[%c0, %c0_0, %c0_1, %c0_2] : memref<1x3x24x128xbf16, #tpu.memory_space<vmem>>, vector<1x1x8x128xbf16>
    %2 = vector.shape_cast %1 : vector<1x1x8x128xbf16> to vector<8x128xbf16>
    %c0_3 = arith.constant 0 : index
    %c0_4 = arith.constant 0 : index
    %c0_5 = arith.constant 0 : index
    %3 = vector.load %arg2[%c0_3, %c0_4, %c0_5] : memref<9x128x512xbf16, #tpu.memory_space<vmem>>, vector<1x128x512xbf16>
    %4 = vector.shape_cast %3 : vector<1x128x512xbf16> to vector<128x512xbf16>
    %cst_6 = arith.constant dense<0.000000e+00> : vector<8x512xf32>
    %5 = tpu.matmul %2, %4, %cst_6 {dimension_numbers = #tpu.dot_dimension_numbers<[1], [0], [0], [1], [0, 0, 1, 1], [], []>} : vector<8x128xbf16>, vector<128x512xbf16>, vector<8x512xf32> -> vector<8x512xf32>
    %6 = arith.addf %0, %5 : vector<8x512xf32>
    %c0_7 = arith.constant 0 : index
    %c0_8 = arith.constant 0 : index
    %c8 = arith.constant 8 : index
    %c0_9 = arith.constant 0 : index
    %7 = vector.load %arg1[%c0_7, %c0_8, %c8, %c0_9] : memref<1x3x24x128xbf16, #tpu.memory_space<vmem>>, vector<1x1x8x128xbf16>
    %8 = vector.shape_cast %7 : vector<1x1x8x128xbf16> to vector<8x128xbf16>
    %c1 = arith.constant 1 : index
    %c0_10 = arith.constant 0 : index
    %c0_11 = arith.constant 0 : index
    %9 = vector.load %arg2[%c1, %c0_10, %c0_11] : memref<9x128x512xbf16, #tpu.memory_space<vmem>>, vector<1x128x512xbf16>
    %10 = vector.shape_cast %9 : vector<1x128x512xbf16> to vector<128x512xbf16>
    %cst_12 = arith.constant dense<0.000000e+00> : vector<8x512xf32>
    %11 = tpu.matmul %8, %10, %cst_12 {dimension_numbers = #tpu.dot_dimension_numbers<[1], [0], [0], [1], [0, 0, 1, 1], [], []>} : vector<8x128xbf16>, vector<128x512xbf16>, vector<8x512xf32> -> vector<8x512xf32>
    %12 = arith.addf %6, %11 : vector<8x512xf32>
    %c0_13 = arith.constant 0 : index
    %c0_14 = arith.constant 0 : index
    %c16 = arith.constant 16 : index
    %c0_15 = arith.constant 0 : index
    %13 = vector.load %arg1[%c0_13, %c0_14, %c16, %c0_15] : memref<1x3x24x128xbf16, #tpu.memory_space<vmem>>, vector<1x1x8x128xbf16>
    %14 = vector.shape_cast %13 : vector<1x1x8x128xbf16> to vector<8x128xbf16>
    %c2 = arith.constant 2 : index
    %c0_16 = arith.constant 0 : index
    %c0_17 = arith.constant 0 : index
    %15 = vector.load %arg2[%c2, %c0_16, %c0_17] : memref<9x128x512xbf16, #tpu.memory_space<vmem>>, vector<1x128x512xbf16>
    %16 = vector.shape_cast %15 : vector<1x128x512xbf16> to vector<128x512xbf16>
    %cst_18 = arith.constant dense<0.000000e+00> : vector<8x512xf32>
    %17 = tpu.matmul %14, %16, %cst_18 {dimension_numbers = #tpu.dot_dimension_numbers<[1], [0], [0], [1], [0, 0, 1, 1], [], []>} : vector<8x128xbf16>, vector<128x512xbf16>, vector<8x512xf32> -> vector<8x512xf32>
    %18 = arith.addf %12, %17 : vector<8x512xf32>
    %c0_19 = arith.constant 0 : index
    %c1_20 = arith.constant 1 : index
    %c0_21 = arith.constant 0 : index
    %c0_22 = arith.constant 0 : index
    %19 = vector.load %arg1[%c0_19, %c1_20, %c0_21, %c0_22] : memref<1x3x24x128xbf16, #tpu.memory_space<vmem>>, vector<1x1x8x128xbf16>
    %20 = vector.shape_cast %19 : vector<1x1x8x128xbf16> to vector<8x128xbf16>
    %c3 = arith.constant 3 : index
    %c0_23 = arith.constant 0 : index
    %c0_24 = arith.constant 0 : index
    %21 = vector.load %arg2[%c3, %c0_23, %c0_24] : memref<9x128x512xbf16, #tpu.memory_space<vmem>>, vector<1x128x512xbf16>
    %22 = vector.shape_cast %21 : vector<1x128x512xbf16> to vector<128x512xbf16>
    %cst_25 = arith.constant dense<0.000000e+00> : vector<8x512xf32>
    %23 = tpu.matmul %20, %22, %cst_25 {dimension_numbers = #tpu.dot_dimension_numbers<[1], [0], [0], [1], [0, 0, 1, 1], [], []>} : vector<8x128xbf16>, vector<128x512xbf16>, vector<8x512xf32> -> vector<8x512xf32>
    %24 = arith.addf %18, %23 : vector<8x512xf32>
    %c0_26 = arith.constant 0 : index
    %c1_27 = arith.constant 1 : index
    %c8_28 = arith.constant 8 : index
    %c0_29 = arith.constant 0 : index
    %25 = vector.load %arg1[%c0_26, %c1_27, %c8_28, %c0_29] : memref<1x3x24x128xbf16, #tpu.memory_space<vmem>>, vector<1x1x8x128xbf16>
    %26 = vector.shape_cast %25 : vector<1x1x8x128xbf16> to vector<8x128xbf16>
    %c4 = arith.constant 4 : index
    %c0_30 = arith.constant 0 : index
    %c0_31 = arith.constant 0 : index
    %27 = vector.load %arg2[%c4, %c0_30, %c0_31] : memref<9x128x512xbf16, #tpu.memory_space<vmem>>, vector<1x128x512xbf16>
    %28 = vector.shape_cast %27 : vector<1x128x512xbf16> to vector<128x512xbf16>
    %cst_32 = arith.constant dense<0.000000e+00> : vector<8x512xf32>
    %29 = tpu.matmul %26, %28, %cst_32 {dimension_numbers = #tpu.dot_dimension_numbers<[1], [0], [0], [1], [0, 0, 1, 1], [], []>} : vector<8x128xbf16>, vector<128x512xbf16>, vector<8x512xf32> -> vector<8x512xf32>
    %30 = arith.addf %24, %29 : vector<8x512xf32>
    %c0_33 = arith.constant 0 : index
    %c1_34 = arith.constant 1 : index
    %c16_35 = arith.constant 16 : index
    %c0_36 = arith.constant 0 : index
    %31 = vector.load %arg1[%c0_33, %c1_34, %c16_35, %c0_36] : memref<1x3x24x128xbf16, #tpu.memory_space<vmem>>, vector<1x1x8x128xbf16>
    %32 = vector.shape_cast %31 : vector<1x1x8x128xbf16> to vector<8x128xbf16>
    %c5 = arith.constant 5 : index
    %c0_37 = arith.constant 0 : index
    %c0_38 = arith.constant 0 : index
    %33 = vector.load %arg2[%c5, %c0_37, %c0_38] : memref<9x128x512xbf16, #tpu.memory_space<vmem>>, vector<1x128x512xbf16>
    %34 = vector.shape_cast %33 : vector<1x128x512xbf16> to vector<128x512xbf16>
    %cst_39 = arith.constant dense<0.000000e+00> : vector<8x512xf32>
    %35 = tpu.matmul %32, %34, %cst_39 {dimension_numbers = #tpu.dot_dimension_numbers<[1], [0], [0], [1], [0, 0, 1, 1], [], []>} : vector<8x128xbf16>, vector<128x512xbf16>, vector<8x512xf32> -> vector<8x512xf32>
    %36 = arith.addf %30, %35 : vector<8x512xf32>
    %c0_40 = arith.constant 0 : index
    %c2_41 = arith.constant 2 : index
    %c0_42 = arith.constant 0 : index
    %c0_43 = arith.constant 0 : index
    %37 = vector.load %arg1[%c0_40, %c2_41, %c0_42, %c0_43] : memref<1x3x24x128xbf16, #tpu.memory_space<vmem>>, vector<1x1x8x128xbf16>
    %38 = vector.shape_cast %37 : vector<1x1x8x128xbf16> to vector<8x128xbf16>
    %c6 = arith.constant 6 : index
    %c0_44 = arith.constant 0 : index
    %c0_45 = arith.constant 0 : index
    %39 = vector.load %arg2[%c6, %c0_44, %c0_45] : memref<9x128x512xbf16, #tpu.memory_space<vmem>>, vector<1x128x512xbf16>
    %40 = vector.shape_cast %39 : vector<1x128x512xbf16> to vector<128x512xbf16>
    %cst_46 = arith.constant dense<0.000000e+00> : vector<8x512xf32>
    %41 = tpu.matmul %38, %40, %cst_46 {dimension_numbers = #tpu.dot_dimension_numbers<[1], [0], [0], [1], [0, 0, 1, 1], [], []>} : vector<8x128xbf16>, vector<128x512xbf16>, vector<8x512xf32> -> vector<8x512xf32>
    %42 = arith.addf %36, %41 : vector<8x512xf32>
    %c0_47 = arith.constant 0 : index
    %c2_48 = arith.constant 2 : index
    %c8_49 = arith.constant 8 : index
    %c0_50 = arith.constant 0 : index
    %43 = vector.load %arg1[%c0_47, %c2_48, %c8_49, %c0_50] : memref<1x3x24x128xbf16, #tpu.memory_space<vmem>>, vector<1x1x8x128xbf16>
    %44 = vector.shape_cast %43 : vector<1x1x8x128xbf16> to vector<8x128xbf16>
    %c7 = arith.constant 7 : index
    %c0_51 = arith.constant 0 : index
    %c0_52 = arith.constant 0 : index
    %45 = vector.load %arg2[%c7, %c0_51, %c0_52] : memref<9x128x512xbf16, #tpu.memory_space<vmem>>, vector<1x128x512xbf16>
    %46 = vector.shape_cast %45 : vector<1x128x512xbf16> to vector<128x512xbf16>
    %cst_53 = arith.constant dense<0.000000e+00> : vector<8x512xf32>
    %47 = tpu.matmul %44, %46, %cst_53 {dimension_numbers = #tpu.dot_dimension_numbers<[1], [0], [0], [1], [0, 0, 1, 1], [], []>} : vector<8x128xbf16>, vector<128x512xbf16>, vector<8x512xf32> -> vector<8x512xf32>
    %48 = arith.addf %42, %47 : vector<8x512xf32>
    %c0_54 = arith.constant 0 : index
    %c2_55 = arith.constant 2 : index
    %c16_56 = arith.constant 16 : index
    %c0_57 = arith.constant 0 : index
    %49 = vector.load %arg1[%c0_54, %c2_55, %c16_56, %c0_57] : memref<1x3x24x128xbf16, #tpu.memory_space<vmem>>, vector<1x1x8x128xbf16>
    %50 = vector.shape_cast %49 : vector<1x1x8x128xbf16> to vector<8x128xbf16>
    %c8_58 = arith.constant 8 : index
    %c0_59 = arith.constant 0 : index
    %c0_60 = arith.constant 0 : index
    %51 = vector.load %arg2[%c8_58, %c0_59, %c0_60] : memref<9x128x512xbf16, #tpu.memory_space<vmem>>, vector<1x128x512xbf16>
    %52 = vector.shape_cast %51 : vector<1x128x512xbf16> to vector<128x512xbf16>
    %cst_61 = arith.constant dense<0.000000e+00> : vector<8x512xf32>
    %53 = tpu.matmul %50, %52, %cst_61 {dimension_numbers = #tpu.dot_dimension_numbers<[1], [0], [0], [1], [0, 0, 1, 1], [], []>} : vector<8x128xbf16>, vector<128x512xbf16>, vector<8x512xf32> -> vector<8x512xf32>
    %54 = arith.addf %48, %53 : vector<8x512xf32>
    %c0_62 = arith.constant 0 : index
    %c0_63 = arith.constant 0 : index
    %55 = vector.load %arg3[%c0_62, %c0_63] : memref<1x512xf32, #tpu.memory_space<vmem>>, vector<1x512xf32>
    %56 = vector.broadcast %55 : vector<1x512xf32> to vector<8x512xf32>
    %57 = arith.addf %54, %56 : vector<8x512xf32>
    %cst_64 = arith.constant 0.000000e+00 : f32
    %58 = vector.broadcast %cst_64 : f32 to vector<8x512xf32>
    %59 = arith.maximumf %57, %58 : vector<8x512xf32>
    %60 = arith.truncf %59 : vector<8x512xf32> to vector<8x512xbf16>
    %c0_65 = arith.constant 0 : index
    %c0_66 = arith.constant 0 : index
    %61 = vector.load %arg4[%c0_65, %c0_66] : memref<512x256xbf16, #tpu.memory_space<vmem>>, vector<512x256xbf16>
    %cst_67 = arith.constant dense<0.000000e+00> : vector<8x256xf32>
    %62 = tpu.matmul %60, %61, %cst_67 {dimension_numbers = #tpu.dot_dimension_numbers<[1], [0], [0], [1], [0, 0, 1, 1], [], []>} : vector<8x512xbf16>, vector<512x256xbf16>, vector<8x256xf32> -> vector<8x256xf32>
    %c0_68 = arith.constant 0 : index
    %c0_69 = arith.constant 0 : index
    %63 = vector.load %arg5[%c0_68, %c0_69] : memref<1x256xf32, #tpu.memory_space<vmem>>, vector<1x256xf32>
    %64 = vector.broadcast %63 : vector<1x256xf32> to vector<8x256xf32>
    %65 = arith.addf %62, %64 : vector<8x256xf32>
    %cst_70 = arith.constant 0.000000e+00 : f32
    %66 = vector.broadcast %cst_70 : f32 to vector<8x256xf32>
    %67 = arith.maximumf %65, %66 : vector<8x256xf32>
    %68 = arith.truncf %67 : vector<8x256xf32> to vector<8x256xbf16>
    %c0_71 = arith.constant 0 : index
    %c0_72 = arith.constant 0 : index
    %69 = vector.load %arg6[%c0_71, %c0_72] : memref<256x10xbf16, #tpu.memory_space<vmem>>, vector<256x10xbf16>
    %cst_73 = arith.constant dense<0.000000e+00> : vector<8x10xf32>
    %70 = tpu.matmul %68, %69, %cst_73 {dimension_numbers = #tpu.dot_dimension_numbers<[1], [0], [0], [1], [0, 0, 1, 1], [], []>} : vector<8x256xbf16>, vector<256x10xbf16>, vector<8x10xf32> -> vector<8x10xf32>
    %c0_74 = arith.constant 0 : index
    %c0_75 = arith.constant 0 : index
    %71 = vector.load %arg7[%c0_74, %c0_75] : memref<1x10xf32, #tpu.memory_space<vmem>>, vector<1x10xf32>
    %72 = vector.broadcast %71 : vector<1x10xf32> to vector<8x10xf32>
    %73 = arith.addf %70, %72 : vector<8x10xf32>
    %cst_76 = arith.constant dense<0xFF800000> : vector<8xf32>
    %74 = vector.multi_reduction <maximumf>, %73, %cst_76 [1] : vector<8x10xf32> to vector<8xf32>
    %75 = vector.shape_cast %74 : vector<8xf32> to vector<8x1xf32>
    %76 = vector.broadcast %75 : vector<8x1xf32> to vector<8x10xf32>
    %77 = arith.subf %73, %76 : vector<8x10xf32>
    %78 = math.exp %77 : vector<8x10xf32>
    %cst_77 = arith.constant dense<0.000000e+00> : vector<8xf32>
    %79 = vector.multi_reduction <add>, %78, %cst_77 [1] : vector<8x10xf32> to vector<8xf32>
    %80 = vector.shape_cast %79 : vector<8xf32> to vector<8x1xf32>
    %81 = math.log %80 : vector<8x1xf32>
    %82 = arith.addf %75, %81 : vector<8x1xf32>
    %83 = vector.broadcast %82 : vector<8x1xf32> to vector<8x10xf32>
    %84 = arith.subf %73, %83 : vector<8x10xf32>
    %c0_78 = arith.constant 0 : index
    %c0_79 = arith.constant 0 : index
    %85 = vector.load %arg8[%c0_78, %c0_79] : memref<8x10xf32, #tpu.memory_space<vmem>>, vector<8x10xf32>
    tpu.vector_store %arg8[%c0_78, %c0_79], %84 {strides = array<i32>} : memref<8x10xf32, #tpu.memory_space<vmem>>, vector<8x10xf32>,
    return
  }
  func.func @transform_0(%arg0: i32) -> (i32, i32, i32, i32) {
    %c0_i32 = arith.constant 0 : i32
    %c0_i32_0 = arith.constant 0 : i32
    %c0_i32_1 = arith.constant 0 : i32
    %c0_i32_2 = arith.constant 0 : i32
    return %arg0, %c0_i32, %c0_i32_0, %c0_i32_1 : i32, i32, i32, i32
  }
  func.func @transform_1(%arg0: i32) -> (i32, i32, i32) {
    %c0_i32 = arith.constant 0 : i32
    %c0_i32_0 = arith.constant 0 : i32
    %c0_i32_1 = arith.constant 0 : i32
    %c0_i32_2 = arith.constant 0 : i32
    return %c0_i32, %c0_i32_0, %c0_i32_1 : i32, i32, i32
  }
  func.func @transform_2(%arg0: i32) -> (i32, i32) {
    %c0_i32 = arith.constant 0 : i32
    %c0_i32_0 = arith.constant 0 : i32
    %c0_i32_1 = arith.constant 0 : i32
    return %c0_i32, %c0_i32_0 : i32, i32
  }
  func.func @transform_3(%arg0: i32) -> (i32, i32) {
    %c0_i32 = arith.constant 0 : i32
    %c0_i32_0 = arith.constant 0 : i32
    %c0_i32_1 = arith.constant 0 : i32
    return %c0_i32, %c0_i32_0 : i32, i32
  }
  func.func @transform_4(%arg0: i32) -> (i32, i32) {
    %c0_i32 = arith.constant 0 : i32
    %c0_i32_0 = arith.constant 0 : i32
    %c0_i32_1 = arith.constant 0 : i32
    return %c0_i32, %c0_i32_0 : i32, i32
  }
  func.func @transform_5(%arg0: i32) -> (i32, i32) {
    %c0_i32 = arith.constant 0 : i32
    %c0_i32_0 = arith.constant 0 : i32
    %c0_i32_1 = arith.constant 0 : i32
    return %c0_i32, %c0_i32_0 : i32, i32
  }
  func.func @transform_6(%arg0: i32) -> (i32, i32) {
    %c0_i32 = arith.constant 0 : i32
    %c0_i32_0 = arith.constant 0 : i32
    %c0_i32_1 = arith.constant 0 : i32
    return %c0_i32, %c0_i32_0 : i32, i32
  }
  func.func @transform_7(%arg0: i32) -> (i32, i32) {
    %c0_i32 = arith.constant 0 : i32
    %c0_i32_0 = arith.constant 0 : i32
    return %arg0, %c0_i32 : i32, i32
  }
}

</mosaic_0001>

<bundles_post_ra>
// kernel: net_forward.4
= control target key start
LH: loop header
LB: loop body
LE: loop exit
PB: predicated region body
PF: predicated region fallthrough
CT: control target
= control target key end

     0   :  { %vm16_vm0 = vcmask 257024   ;;  %v1325_v1 = vmov 0   ;;  %s2972_s18 = smov 0   ;;  %s3096_s0 = inlined_call_operand.vmem [shape: bf16[1,28,224,25], index: 0, kind: input, shape index: {}]   ;;  %s3097_s1 = inlined_call_operand.vmem [shape: bf16[1,25,32], index: 1, kind: input, shape index: {}]   ;;  %s3098_s2 = inlined_call_operand.vmem [shape: f32[1,32], index: 2, kind: input, shape index: {}]   ;;  %s3099_s3 = inlined_call_operand.vmem [shape: bf16[1,18,144,32], index: 3, kind: output, shape index: {}]  }
   0x1   :  { %v1350_v0 = vld [vmem:[%s3098_s2] ss:$0 sm:$0xff]  ;;  %17 = vst.msk [vmem:[%s3099_s3] sm:$0xf] %vm16_vm0, %v1325_v1  ;;  %18 = vst.msk [vmem:[%s3099_s3 + $0x4] sm:$0xf] %vm16_vm0, %v1325_v1 }
   0x2   :  { %19 = vst.msk [vmem:[%s3099_s3 + $0x8] sm:$0xf] %vm16_vm0, %v1325_v1  ;;  %20 = vst.msk [vmem:[%s3099_s3 + $0xc] sm:$0xf] %vm16_vm0, %v1325_v1 }
   0x3   :  { %21 = vst.msk [vmem:[%s3099_s3 + $0x10] sm:$0xf] %vm16_vm0, %v1325_v1  ;;  %22 = vst.msk [vmem:[%s3099_s3 + $0x14] sm:$0xf] %vm16_vm0, %v1325_v1 }
   0x4   :  { %23 = vst.msk [vmem:[%s3099_s3 + $0x18] sm:$0xf] %vm16_vm0, %v1325_v1  ;;  %24 = vst.msk [vmem:[%s3099_s3 + $0x1c] sm:$0xf] %vm16_vm0, %v1325_v1 }
   0x5   :  { %25 = vst.msk [vmem:[%s3099_s3 + $0x20] sm:$0xf] %vm16_vm0, %v1325_v1  ;;  %26 = vst.msk [vmem:[%s3099_s3 + $0x24] sm:$0xf] %vm16_vm0, %v1325_v1 }
   0x6   :  { %27 = vst.msk [vmem:[%s3099_s3 + $0x28] sm:$0xf] %vm16_vm0, %v1325_v1  ;;  %28 = vst.msk [vmem:[%s3099_s3 + $0x2c] sm:$0xf] %vm16_vm0, %v1325_v1 }
   0x7   :  { %29 = vst.msk [vmem:[%s3099_s3 + $0x30] sm:$0xf] %vm16_vm0, %v1325_v1  ;;  %30 = vst.msk [vmem:[%s3099_s3 + $0x34] sm:$0xf] %vm16_vm0, %v1325_v1 }
   0x8   :  { %31 = vst.msk [vmem:[%s3099_s3 + $0x38] sm:$0xf] %vm16_vm0, %v1325_v1  ;;  %32 = vst.msk [vmem:[%s3099_s3 + $0x3c] sm:$0xf] %vm16_vm0, %v1325_v1 }
   0x9   :  { %33 = vst.msk [vmem:[%s3099_s3 + $0x40] sm:$0xf] %vm16_vm0, %v1325_v1  ;;  %34 = vst.msk [vmem:[%s3099_s3 + $0x44] sm:$0xf] %vm16_vm0, %v1325_v1 }
   0xa   :  { %35 = vst.msk [vmem:[%s3099_s3 + $0x48] sm:$0xf] %vm16_vm0, %v1325_v1  ;;  %36 = vst.msk [vmem:[%s3099_s3 + $0x4c] sm:$0xf] %vm16_vm0, %v1325_v1 }
   0xb   :  { %37 = vst.msk [vmem:[%s3099_s3 + $0x50] sm:$0xf] %vm16_vm0, %v1325_v1  ;;  %38 = vst.msk [vmem:[%s3099_s3 + $0x54] sm:$0xf] %vm16_vm0, %v1325_v1 }
   0xc   :  { %39 = vst.msk [vmem:[%s3099_s3 + $0x58] sm:$0xf] %vm16_vm0, %v1325_v1  ;;  %40 = vst.msk [vmem:[%s3099_s3 + $0x5c] sm:$0xf] %vm16_vm0, %v1325_v1 }
   0xd   :  { %41 = vst.msk [vmem:[%s3099_s3 + $0x60] sm:$0xf] %vm16_vm0, %v1325_v1  ;;  %42 = vst.msk [vmem:[%s3099_s3 + $0x64] sm:$0xf] %vm16_vm0, %v1325_v1 }
   0xe   :  { %43 = vst.msk [vmem:[%s3099_s3 + $0x68] sm:$0xf] %vm16_vm0, %v1325_v1  ;;  %44 = vst.msk [vmem:[%s3099_s3 + $0x6c] sm:$0xf] %vm16_vm0, %v1325_v1 }
   0xf   :  { %45 = vst.msk [vmem:[%s3099_s3 + $0x70] sm:$0xf] %vm16_vm0, %v1325_v1  ;;  %46 = vst.msk [vmem:[%s3099_s3 + $0x74] sm:$0xf] %vm16_vm0, %v1325_v1 }
  0x10   :  { %47 = vst.msk [vmem:[%s3099_s3 + $0x78] sm:$0xf] %vm16_vm0, %v1325_v1  ;;  %48 = vst.msk [vmem:[%s3099_s3 + $0x7c] sm:$0xf] %vm16_vm0, %v1325_v1 }
  0x11   :  { %49 = vst.msk [vmem:[%s3099_s3 + $0x80] sm:$0xf] %vm16_vm0, %v1325_v1  ;;  %50 = vst.msk [vmem:[%s3099_s3 + $0x84] sm:$0xf] %vm16_vm0, %v1325_v1 }
  0x12   :  { %51 = vst.msk [vmem:[%s3099_s3 + $0x88] sm:$0xf] %vm16_vm0, %v1325_v1  ;;  %52 = vst.msk [vmem:[%s3099_s3 + $0x8c] sm:$0xf] %vm16_vm0, %v1325_v1 }
  0x13   :  { %53 = vst.msk [vmem:[%s3099_s3 + $0x90] sm:$0xf] %vm16_vm0, %v1325_v1  ;;  %54 = vst.msk [vmem:[%s3099_s3 + $0x94] sm:$0xf] %vm16_vm0, %v1325_v1 }
  0x14   :  { %55 = vst.msk [vmem:[%s3099_s3 + $0x98] sm:$0xf] %vm16_vm0, %v1325_v1  ;;  %56 = vst.msk [vmem:[%s3099_s3 + $0x9c] sm:$0xf] %vm16_vm0, %v1325_v1 }
  0x15   :  { %57 = vst.msk [vmem:[%s3099_s3 + $0xa0] sm:$0xf] %vm16_vm0, %v1325_v1  ;;  %58 = vst.msk [vmem:[%s3099_s3 + $0xa4] sm:$0xf] %vm16_vm0, %v1325_v1 }
  0x16   :  { %59 = vst.msk [vmem:[%s3099_s3 + $0xa8] sm:$0xf] %vm16_vm0, %v1325_v1  ;;  %60 = vst.msk [vmem:[%s3099_s3 + $0xac] sm:$0xf] %vm16_vm0, %v1325_v1 }
  0x17   :  { %61 = vst.msk [vmem:[%s3099_s3 + $0xb0] sm:$0xf] %vm16_vm0, %v1325_v1  ;;  %62 = vst.msk [vmem:[%s3099_s3 + $0xb4] sm:$0xf] %vm16_vm0, %v1325_v1 }
  0x18   :  { %63 = vst.msk [vmem:[%s3099_s3 + $0xb8] sm:$0xf] %vm16_vm0, %v1325_v1  ;;  %64 = vst.msk [vmem:[%s3099_s3 + $0xbc] sm:$0xf] %vm16_vm0, %v1325_v1 }
  0x19   :  { %65 = vst.msk [vmem:[%s3099_s3 + $0xc0] sm:$0xf] %vm16_vm0, %v1325_v1  ;;  %66 = vst.msk [vmem:[%s3099_s3 + $0xc4] sm:$0xf] %vm16_vm0, %v1325_v1 }
  0x1a   :  { %67 = vst.msk [vmem:[%s3099_s3 + $0xc8] sm:$0xf] %vm16_vm0, %v1325_v1  ;;  %68 = vst.msk [vmem:[%s3099_s3 + $0xcc] sm:$0xf] %vm16_vm0, %v1325_v1 }
  0x1b   :  { %69 = vst.msk [vmem:[%s3099_s3 + $0xd0] sm:$0xf] %vm16_vm0, %v1325_v1  ;;  %70 = vst.msk [vmem:[%s3099_s3 + $0xd4] sm:$0xf] %vm16_vm0, %v1325_v1 }
  0x1c   :  { %71 = vst.msk [vmem:[%s3099_s3 + $0xd8] sm:$0xf] %vm16_vm0, %v1325_v1  ;;  %72 = vst.msk [vmem:[%s3099_s3 + $0xdc] sm:$0xf] %vm16_vm0, %v1325_v1 }
  0x1d   :  { %73 = vst.msk [vmem:[%s3099_s3 + $0xe0] sm:$0xf] %vm16_vm0, %v1325_v1  ;;  %74 = vst.msk [vmem:[%s3099_s3 + $0xe4] sm:$0xf] %vm16_vm0, %v1325_v1 }
  0x1e   :  { %75 = vst.msk [vmem:[%s3099_s3 + $0xe8] sm:$0xf] %vm16_vm0, %v1325_v1  ;;  %76 = vst.msk [vmem:[%s3099_s3 + $0xec] sm:$0xf] %vm16_vm0, %v1325_v1 }
  0x1f   :  { %77 = vst.msk [vmem:[%s3099_s3 + $0xf0] sm:$0xf] %vm16_vm0, %v1325_v1  ;;  %78 = vst.msk [vmem:[%s3099_s3 + $0xf4] sm:$0xf] %vm16_vm0, %v1325_v1 }
  0x20   :  { %79 = vst.msk [vmem:[%s3099_s3 + $0xf8] sm:$0xf] %vm16_vm0, %v1325_v1  ;;  %80 = vst.msk [vmem:[%s3099_s3 + $0xfc] sm:$0xf] %vm16_vm0, %v1325_v1 }
  0x21   :  { %81 = vst.msk [vmem:[%s3099_s3 + $0x100] sm:$0xf] %vm16_vm0, %v1325_v1  ;;  %82 = vst.msk [vmem:[%s3099_s3 + $0x104] sm:$0xf] %vm16_vm0, %v1325_v1 }
  0x22   :  { %83 = vst.msk [vmem:[%s3099_s3 + $0x108] sm:$0xf] %vm16_vm0, %v1325_v1  ;;  %84 = vst.msk [vmem:[%s3099_s3 + $0x10c] sm:$0xf] %vm16_vm0, %v1325_v1 }
  0x23   :  { %85 = vst.msk [vmem:[%s3099_s3 + $0x110] sm:$0xf] %vm16_vm0, %v1325_v1  ;;  %86 = vst.msk [vmem:[%s3099_s3 + $0x114] sm:$0xf] %vm16_vm0, %v1325_v1 }
  0x24   :  { %87 = vst.msk [vmem:[%s3099_s3 + $0x118] sm:$0xf] %vm16_vm0, %v1325_v1  ;;  %88 = vst.msk [vmem:[%s3099_s3 + $0x11c] sm:$0xf] %vm16_vm0, %v1325_v1 }
  0x25   :  { %89 = vst.msk [vmem:[%s3099_s3 + $0x120] sm:$0xf] %vm16_vm0, %v1325_v1  ;;  %90 = vst.msk [vmem:[%s3099_s3 + $0x124] sm:$0xf] %vm16_vm0, %v1325_v1 }
  0x26   :  { %91 = vst.msk [vmem:[%s3099_s3 + $0x128] sm:$0xf] %vm16_vm0, %v1325_v1  ;;  %92 = vst.msk [vmem:[%s3099_s3 + $0x12c] sm:$0xf] %vm16_vm0, %v1325_v1 }
  0x27   :  { %93 = vst.msk [vmem:[%s3099_s3 + $0x130] sm:$0xf] %vm16_vm0, %v1325_v1  ;;  %94 = vst.msk [vmem:[%s3099_s3 + $0x134] sm:$0xf] %vm16_vm0, %v1325_v1 }
  0x28   :  { %95 = vst.msk [vmem:[%s3099_s3 + $0x138] sm:$0xf] %vm16_vm0, %v1325_v1  ;;  %96 = vst.msk [vmem:[%s3099_s3 + $0x13c] sm:$0xf] %vm16_vm0, %v1325_v1 }
  0x29   :  { %97 = vst.msk [vmem:[%s3099_s3 + $0x140] sm:$0xf] %vm16_vm0, %v1325_v1  ;;  %98 = vst.msk [vmem:[%s3099_s3 + $0x144] sm:$0xf] %vm16_vm0, %v1325_v1 }
  0x2a   :  { %99 = vst.msk [vmem:[%s3099_s3 + $0x148] sm:$0xf] %vm16_vm0, %v1325_v1  ;;  %100 = vst.msk [vmem:[%s3099_s3 + $0x14c] sm:$0xf] %vm16_vm0, %v1325_v1 }
  0x2b   :  { %101 = vst.msk [vmem:[%s3099_s3 + $0x150] sm:$0xf] %vm16_vm0, %v1325_v1  ;;  %102 = vst.msk [vmem:[%s3099_s3 + $0x154] sm:$0xf] %vm16_vm0, %v1325_v1 }
  0x2c   :  { %103 = vst.msk [vmem:[%s3099_s3 + $0x158] sm:$0xf] %vm16_vm0, %v1325_v1  ;;  %104 = vst.msk [vmem:[%s3099_s3 + $0x15c] sm:$0xf] %vm16_vm0, %v1325_v1 }
  0x2d   :  { %105 = vst.msk [vmem:[%s3099_s3 + $0x160] sm:$0xf] %vm16_vm0, %v1325_v1  ;;  %106 = vst.msk [vmem:[%s3099_s3 + $0x164] sm:$0xf] %vm16_vm0, %v1325_v1 }
  0x2e   :  { %107 = vst.msk [vmem:[%s3099_s3 + $0x168] sm:$0xf] %vm16_vm0, %v1325_v1  ;;  %108 = vst.msk [vmem:[%s3099_s3 + $0x16c] sm:$0xf] %vm16_vm0, %v1325_v1 }
  0x2f   :  { %109 = vst.msk [vmem:[%s3099_s3 + $0x170] sm:$0xf] %vm16_vm0, %v1325_v1  ;;  %110 = vst.msk [vmem:[%s3099_s3 + $0x174] sm:$0xf] %vm16_vm0, %v1325_v1 }
  0x30   :  { %111 = vst.msk [vmem:[%s3099_s3 + $0x178] sm:$0xf] %vm16_vm0, %v1325_v1  ;;  %112 = vst.msk [vmem:[%s3099_s3 + $0x17c] sm:$0xf] %vm16_vm0, %v1325_v1 }
  0x31   :  { %113 = vst.msk [vmem:[%s3099_s3 + $0x180] sm:$0xf] %vm16_vm0, %v1325_v1  ;;  %114 = vst.msk [vmem:[%s3099_s3 + $0x184] sm:$0xf] %vm16_vm0, %v1325_v1 }
  0x32   :  { %115 = vst.msk [vmem:[%s3099_s3 + $0x188] sm:$0xf] %vm16_vm0, %v1325_v1  ;;  %116 = vst.msk [vmem:[%s3099_s3 + $0x18c] sm:$0xf] %vm16_vm0, %v1325_v1 }
  0x33   :  { %117 = vst.msk [vmem:[%s3099_s3 + $0x190] sm:$0xf] %vm16_vm0, %v1325_v1  ;;  %118 = vst.msk [vmem:[%s3099_s3 + $0x194] sm:$0xf] %vm16_vm0, %v1325_v1 }
  0x34   :  { %119 = vst.msk [vmem:[%s3099_s3 + $0x198] sm:$0xf] %vm16_vm0, %v1325_v1  ;;  %120 = vst.msk [vmem:[%s3099_s3 + $0x19c] sm:$0xf] %vm16_vm0, %v1325_v1 }
  0x35   :  { %121 = vst.msk [vmem:[%s3099_s3 + $0x1a0] sm:$0xf] %vm16_vm0, %v1325_v1  ;;  %122 = vst.msk [vmem:[%s3099_s3 + $0x1a4] sm:$0xf] %vm16_vm0, %v1325_v1 }
  0x36   :  { %123 = vst.msk [vmem:[%s3099_s3 + $0x1a8] sm:$0xf] %vm16_vm0, %v1325_v1  ;;  %124 = vst.msk [vmem:[%s3099_s3 + $0x1ac] sm:$0xf] %vm16_vm0, %v1325_v1 }
  0x37   :  { %125 = vst.msk [vmem:[%s3099_s3 + $0x1b0] sm:$0xf] %vm16_vm0, %v1325_v1  ;;  %126 = vst.msk [vmem:[%s3099_s3 + $0x1b4] sm:$0xf] %vm16_vm0, %v1325_v1 }
  0x38   :  { %127 = vst.msk [vmem:[%s3099_s3 + $0x1b8] sm:$0xf] %vm16_vm0, %v1325_v1  ;;  %128 = vst.msk [vmem:[%s3099_s3 + $0x1bc] sm:$0xf] %vm16_vm0, %v1325_v1 }
  0x39   :  { %129 = vst.msk [vmem:[%s3099_s3 + $0x1c0] sm:$0xf] %vm16_vm0, %v1325_v1  ;;  %130 = vst.msk [vmem:[%s3099_s3 + $0x1c4] sm:$0xf] %vm16_vm0, %v1325_v1 }
  0x3a   :  { %131 = vst.msk [vmem:[%s3099_s3 + $0x1c8] sm:$0xf] %vm16_vm0, %v1325_v1  ;;  %132 = vst.msk [vmem:[%s3099_s3 + $0x1cc] sm:$0xf] %vm16_vm0, %v1325_v1 }
  0x3b   :  { %133 = vst.msk [vmem:[%s3099_s3 + $0x1d0] sm:$0xf] %vm16_vm0, %v1325_v1  ;;  %134 = vst.msk [vmem:[%s3099_s3 + $0x1d4] sm:$0xf] %vm16_vm0, %v1325_v1 }
  0x3c   :  { %135 = vst.msk [vmem:[%s3099_s3 + $0x1d8] sm:$0xf] %vm16_vm0, %v1325_v1  ;;  %136 = vst.msk [vmem:[%s3099_s3 + $0x1dc] sm:$0xf] %vm16_vm0, %v1325_v1 }
  0x3d   :  { %137 = vst.msk [vmem:[%s3099_s3 + $0x1e0] sm:$0xf] %vm16_vm0, %v1325_v1  ;;  %138 = vst.msk [vmem:[%s3099_s3 + $0x1e4] sm:$0xf] %vm16_vm0, %v1325_v1 }
  0x3e   :  { %139 = vst.msk [vmem:[%s3099_s3 + $0x1e8] sm:$0xf] %vm16_vm0, %v1325_v1  ;;  %140 = vst.msk [vmem:[%s3099_s3 + $0x1ec] sm:$0xf] %vm16_vm0, %v1325_v1 }
  0x3f   :  { %141 = vst.msk [vmem:[%s3099_s3 + $0x1f0] sm:$0xf] %vm16_vm0, %v1325_v1  ;;  %142 = vst.msk [vmem:[%s3099_s3 + $0x1f4] sm:$0xf] %vm16_vm0, %v1325_v1 }
  0x40   :  { %143 = vst.msk [vmem:[%s3099_s3 + $0x1f8] sm:$0xf] %vm16_vm0, %v1325_v1  ;;  %144 = vst.msk [vmem:[%s3099_s3 + $0x1fc] sm:$0xf] %vm16_vm0, %v1325_v1 }
  0x41   :  { %145 = vst.msk [vmem:[%s3099_s3 + $0x200] sm:$0xf] %vm16_vm0, %v1325_v1  ;;  %146 = vst.msk [vmem:[%s3099_s3 + $0x204] sm:$0xf] %vm16_vm0, %v1325_v1 }
  0x42   :  { %147 = vst.msk [vmem:[%s3099_s3 + $0x208] sm:$0xf] %vm16_vm0, %v1325_v1  ;;  %148 = vst.msk [vmem:[%s3099_s3 + $0x20c] sm:$0xf] %vm16_vm0, %v1325_v1 }
  0x43   :  { %149 = vst.msk [vmem:[%s3099_s3 + $0x210] sm:$0xf] %vm16_vm0, %v1325_v1  ;;  %150 = vst.msk [vmem:[%s3099_s3 + $0x214] sm:$0xf] %vm16_vm0, %v1325_v1 }
  0x44   :  { %151 = vst.msk [vmem:[%s3099_s3 + $0x218] sm:$0xf] %vm16_vm0, %v1325_v1  ;;  %152 = vst.msk [vmem:[%s3099_s3 + $0x21c] sm:$0xf] %vm16_vm0, %v1325_v1 }
  0x45   :  { %153 = vst.msk [vmem:[%s3099_s3 + $0x220] sm:$0xf] %vm16_vm0, %v1325_v1  ;;  %154 = vst.msk [vmem:[%s3099_s3 + $0x224] sm:$0xf] %vm16_vm0, %v1325_v1 }
  0x46   :  { %155 = vst.msk [vmem:[%s3099_s3 + $0x228] sm:$0xf] %vm16_vm0, %v1325_v1  ;;  %156 = vst.msk [vmem:[%s3099_s3 + $0x22c] sm:$0xf] %vm16_vm0, %v1325_v1 }
  0x47   :  { %157 = vst.msk [vmem:[%s3099_s3 + $0x230] sm:$0xf] %vm16_vm0, %v1325_v1  ;;  %158 = vst.msk [vmem:[%s3099_s3 + $0x234] sm:$0xf] %vm16_vm0, %v1325_v1 }
  0x48   :  { %159 = vst.msk [vmem:[%s3099_s3 + $0x238] sm:$0xf] %vm16_vm0, %v1325_v1  ;;  %160 = vst.msk [vmem:[%s3099_s3 + $0x23c] sm:$0xf] %vm16_vm0, %v1325_v1 }
  0x49   :  { %161 = vst.msk [vmem:[%s3099_s3 + $0x240] sm:$0xf] %vm16_vm0, %v1325_v1  ;;  %162 = vst.msk [vmem:[%s3099_s3 + $0x244] sm:$0xf] %vm16_vm0, %v1325_v1 }
  0x4a   :  { %163 = vst.msk [vmem:[%s3099_s3 + $0x248] sm:$0xf] %vm16_vm0, %v1325_v1  ;;  %164 = vst.msk [vmem:[%s3099_s3 + $0x24c] sm:$0xf] %vm16_vm0, %v1325_v1 }
  0x4b   :  { %165 = vst.msk [vmem:[%s3099_s3 + $0x250] sm:$0xf] %vm16_vm0, %v1325_v1  ;;  %166 = vst.msk [vmem:[%s3099_s3 + $0x254] sm:$0xf] %vm16_vm0, %v1325_v1 }
  0x4c   :  { %167 = vst.msk [vmem:[%s3099_s3 + $0x258] sm:$0xf] %vm16_vm0, %v1325_v1  ;;  %168 = vst.msk [vmem:[%s3099_s3 + $0x25c] sm:$0xf] %vm16_vm0, %v1325_v1 }
  0x4d   :  { %169 = vst.msk [vmem:[%s3099_s3 + $0x260] sm:$0xf] %vm16_vm0, %v1325_v1  ;;  %170 = vst.msk [vmem:[%s3099_s3 + $0x264] sm:$0xf] %vm16_vm0, %v1325_v1 }
  0x4e   :  { %171 = vst.msk [vmem:[%s3099_s3 + $0x268] sm:$0xf] %vm16_vm0, %v1325_v1  ;;  %172 = vst.msk [vmem:[%s3099_s3 + $0x26c] sm:$0xf] %vm16_vm0, %v1325_v1 }
  0x4f   :  { %173 = vst.msk [vmem:[%s3099_s3 + $0x270] sm:$0xf] %vm16_vm0, %v1325_v1  ;;  %174 = vst.msk [vmem:[%s3099_s3 + $0x274] sm:$0xf] %vm16_vm0, %v1325_v1 }
  0x50   :  { %175 = vst.msk [vmem:[%s3099_s3 + $0x278] sm:$0xf] %vm16_vm0, %v1325_v1  ;;  %176 = vst.msk [vmem:[%s3099_s3 + $0x27c] sm:$0xf] %vm16_vm0, %v1325_v1 }
  0x51   :  { %177 = vst.msk [vmem:[%s3099_s3 + $0x280] sm:$0xf] %vm16_vm0, %v1325_v1  ;;  %178 = vst.msk [vmem:[%s3099_s3 + $0x284] sm:$0xf] %vm16_vm0, %v1325_v1 }
  0x52   :  { %179 = vst.msk [vmem:[%s3099_s3 + $0x288] sm:$0xf] %vm16_vm0, %v1325_v1  ;;  %180 = vst.msk [vmem:[%s3099_s3 + $0x28c] sm:$0xf] %vm16_vm0, %v1325_v1 }
  0x53   :  { %181 = vst.msk [vmem:[%s3099_s3 + $0x290] sm:$0xf] %vm16_vm0, %v1325_v1  ;;  %182 = vst.msk [vmem:[%s3099_s3 + $0x294] sm:$0xf] %vm16_vm0, %v1325_v1 }
  0x54   :  { %183 = vst.msk [vmem:[%s3099_s3 + $0x298] sm:$0xf] %vm16_vm0, %v1325_v1  ;;  %184 = vst.msk [vmem:[%s3099_s3 + $0x29c] sm:$0xf] %vm16_vm0, %v1325_v1 }
  0x55   :  { %185 = vst.msk [vmem:[%s3099_s3 + $0x2a0] sm:$0xf] %vm16_vm0, %v1325_v1  ;;  %186 = vst.msk [vmem:[%s3099_s3 + $0x2a4] sm:$0xf] %vm16_vm0, %v1325_v1 }
  0x56   :  { %187 = vst.msk [vmem:[%s3099_s3 + $0x2a8] sm:$0xf] %vm16_vm0, %v1325_v1  ;;  %188 = vst.msk [vmem:[%s3099_s3 + $0x2ac] sm:$0xf] %vm16_vm0, %v1325_v1 }
  0x57   :  { %189 = vst.msk [vmem:[%s3099_s3 + $0x2b0] sm:$0xf] %vm16_vm0, %v1325_v1  ;;  %190 = vst.msk [vmem:[%s3099_s3 + $0x2b4] sm:$0xf] %vm16_vm0, %v1325_v1 }
  0x58   :  { %191 = vst.msk [vmem:[%s3099_s3 + $0x2b8] sm:$0xf] %vm16_vm0, %v1325_v1  ;;  %192 = vst.msk [vmem:[%s3099_s3 + $0x2bc] sm:$0xf] %vm16_vm0, %v1325_v1 }
  0x59   :  { %193 = vst.msk [vmem:[%s3099_s3 + $0x2c0] sm:$0xf] %vm16_vm0, %v1325_v1  ;;  %194 = vst.msk [vmem:[%s3099_s3 + $0x2c4] sm:$0xf] %vm16_vm0, %v1325_v1 }
  0x5a   :  { %195 = vst.msk [vmem:[%s3099_s3 + $0x2c8] sm:$0xf] %vm16_vm0, %v1325_v1  ;;  %196 = vst.msk [vmem:[%s3099_s3 + $0x2cc] sm:$0xf] %vm16_vm0, %v1325_v1 }
  0x5b   :  { %197 = vst.msk [vmem:[%s3099_s3 + $0x2d0] sm:$0xf] %vm16_vm0, %v1325_v1  ;;  %198 = vst.msk [vmem:[%s3099_s3 + $0x2d4] sm:$0xf] %vm16_vm0, %v1325_v1 }
  0x5c   :  { %199 = vst.msk [vmem:[%s3099_s3 + $0x2d8] sm:$0xf] %vm16_vm0, %v1325_v1  ;;  %200 = vst.msk [vmem:[%s3099_s3 + $0x2dc] sm:$0xf] %vm16_vm0, %v1325_v1 }
  0x5d   :  { %201 = vst.msk [vmem:[%s3099_s3 + $0x2e0] sm:$0xf] %vm16_vm0, %v1325_v1  ;;  %202 = vst.msk [vmem:[%s3099_s3 + $0x2e4] sm:$0xf] %vm16_vm0, %v1325_v1 }
  0x5e   :  { %203 = vst.msk [vmem:[%s3099_s3 + $0x2e8] sm:$0xf] %vm16_vm0, %v1325_v1  ;;  %204 = vst.msk [vmem:[%s3099_s3 + $0x2ec] sm:$0xf] %vm16_vm0, %v1325_v1 }
  0x5f   :  { %205 = vst.msk [vmem:[%s3099_s3 + $0x2f0] sm:$0xf] %vm16_vm0, %v1325_v1  ;;  %206 = vst.msk [vmem:[%s3099_s3 + $0x2f4] sm:$0xf] %vm16_vm0, %v1325_v1 }
  0x60   :  { %207 = vst.msk [vmem:[%s3099_s3 + $0x2f8] sm:$0xf] %vm16_vm0, %v1325_v1  ;;  %208 = vst.msk [vmem:[%s3099_s3 + $0x2fc] sm:$0xf] %vm16_vm0, %v1325_v1 }
  0x61   :  { %209 = vst.msk [vmem:[%s3099_s3 + $0x300] sm:$0xf] %vm16_vm0, %v1325_v1  ;;  %210 = vst.msk [vmem:[%s3099_s3 + $0x304] sm:$0xf] %vm16_vm0, %v1325_v1 }
  0x62   :  { %211 = vst.msk [vmem:[%s3099_s3 + $0x308] sm:$0xf] %vm16_vm0, %v1325_v1  ;;  %212 = vst.msk [vmem:[%s3099_s3 + $0x30c] sm:$0xf] %vm16_vm0, %v1325_v1 }
  0x63   :  { %213 = vst.msk [vmem:[%s3099_s3 + $0x310] sm:$0xf] %vm16_vm0, %v1325_v1  ;;  %214 = vst.msk [vmem:[%s3099_s3 + $0x314] sm:$0xf] %vm16_vm0, %v1325_v1 }
  0x64   :  { %215 = vst.msk [vmem:[%s3099_s3 + $0x318] sm:$0xf] %vm16_vm0, %v1325_v1  ;;  %216 = vst.msk [vmem:[%s3099_s3 + $0x31c] sm:$0xf] %vm16_vm0, %v1325_v1 }
  0x65   :  { %217 = vst.msk [vmem:[%s3099_s3 + $0x320] sm:$0xf] %vm16_vm0, %v1325_v1  ;;  %218 = vst.msk [vmem:[%s3099_s3 + $0x324] sm:$0xf] %vm16_vm0, %v1325_v1 }
  0x66   :  { %219 = vst.msk [vmem:[%s3099_s3 + $0x328] sm:$0xf] %vm16_vm0, %v1325_v1  ;;  %220 = vst.msk [vmem:[%s3099_s3 + $0x32c] sm:$0xf] %vm16_vm0, %v1325_v1 }
  0x67   :  { %221 = vst.msk [vmem:[%s3099_s3 + $0x330] sm:$0xf] %vm16_vm0, %v1325_v1  ;;  %222 = vst.msk [vmem:[%s3099_s3 + $0x334] sm:$0xf] %vm16_vm0, %v1325_v1 }
  0x68   :  { %223 = vst.msk [vmem:[%s3099_s3 + $0x338] sm:$0xf] %vm16_vm0, %v1325_v1  ;;  %224 = vst.msk [vmem:[%s3099_s3 + $0x33c] sm:$0xf] %vm16_vm0, %v1325_v1 }
  0x69   :  { %225 = vst.msk [vmem:[%s3099_s3 + $0x340] sm:$0xf] %vm16_vm0, %v1325_v1  ;;  %226 = vst.msk [vmem:[%s3099_s3 + $0x344] sm:$0xf] %vm16_vm0, %v1325_v1 }
  0x6a   :  { %227 = vst.msk [vmem:[%s3099_s3 + $0x348] sm:$0xf] %vm16_vm0, %v1325_v1  ;;  %228 = vst.msk [vmem:[%s3099_s3 + $0x34c] sm:$0xf] %vm16_vm0, %v1325_v1 }
  0x6b   :  { %229 = vst.msk [vmem:[%s3099_s3 + $0x350] sm:$0xf] %vm16_vm0, %v1325_v1  ;;  %230 = vst.msk [vmem:[%s3099_s3 + $0x354] sm:$0xf] %vm16_vm0, %v1325_v1 }
  0x6c   :  { %231 = vst.msk [vmem:[%s3099_s3 + $0x358] sm:$0xf] %vm16_vm0, %v1325_v1  ;;  %232 = vst.msk [vmem:[%s3099_s3 + $0x35c] sm:$0xf] %vm16_vm0, %v1325_v1 }
  0x6d   :  { %233 = vst.msk [vmem:[%s3099_s3 + $0x360] sm:$0xf] %vm16_vm0, %v1325_v1  ;;  %234 = vst.msk [vmem:[%s3099_s3 + $0x364] sm:$0xf] %vm16_vm0, %v1325_v1 }
  0x6e   :  { %235 = vst.msk [vmem:[%s3099_s3 + $0x368] sm:$0xf] %vm16_vm0, %v1325_v1  ;;  %236 = vst.msk [vmem:[%s3099_s3 + $0x36c] sm:$0xf] %vm16_vm0, %v1325_v1 }
  0x6f   :  { %237 = vst.msk [vmem:[%s3099_s3 + $0x370] sm:$0xf] %vm16_vm0, %v1325_v1  ;;  %238 = vst.msk [vmem:[%s3099_s3 + $0x374] sm:$0xf] %vm16_vm0, %v1325_v1 }
  0x70   :  { %239 = vst.msk [vmem:[%s3099_s3 + $0x378] sm:$0xf] %vm16_vm0, %v1325_v1  ;;  %240 = vst.msk [vmem:[%s3099_s3 + $0x37c] sm:$0xf] %vm16_vm0, %v1325_v1 }
  0x71   :  { %241 = vst.msk [vmem:[%s3099_s3 + $0x380] sm:$0xf] %vm16_vm0, %v1325_v1  ;;  %242 = vst.msk [vmem:[%s3099_s3 + $0x384] sm:$0xf] %vm16_vm0, %v1325_v1 }
  0x72   :  { %243 = vst.msk [vmem:[%s3099_s3 + $0x388] sm:$0xf] %vm16_vm0, %v1325_v1  ;;  %244 = vst.msk [vmem:[%s3099_s3 + $0x38c] sm:$0xf] %vm16_vm0, %v1325_v1 }
  0x73   :  { %245 = vst.msk [vmem:[%s3099_s3 + $0x390] sm:$0xf] %vm16_vm0, %v1325_v1  ;;  %246 = vst.msk [vmem:[%s3099_s3 + $0x394] sm:$0xf] %vm16_vm0, %v1325_v1 }
  0x74   :  { %247 = vst.msk [vmem:[%s3099_s3 + $0x398] sm:$0xf] %vm16_vm0, %v1325_v1  ;;  %248 = vst.msk [vmem:[%s3099_s3 + $0x39c] sm:$0xf] %vm16_vm0, %v1325_v1 }
  0x75   :  { %249 = vst.msk [vmem:[%s3099_s3 + $0x3a0] sm:$0xf] %vm16_vm0, %v1325_v1  ;;  %250 = vst.msk [vmem:[%s3099_s3 + $0x3a4] sm:$0xf] %vm16_vm0, %v1325_v1 }
  0x76   :  { %251 = vst.msk [vmem:[%s3099_s3 + $0x3a8] sm:$0xf] %vm16_vm0, %v1325_v1  ;;  %252 = vst.msk [vmem:[%s3099_s3 + $0x3ac] sm:$0xf] %vm16_vm0, %v1325_v1 }
  0x77   :  { %253 = vst.msk [vmem:[%s3099_s3 + $0x3b0] sm:$0xf] %vm16_vm0, %v1325_v1  ;;  %254 = vst.msk [vmem:[%s3099_s3 + $0x3b4] sm:$0xf] %vm16_vm0, %v1325_v1 }
  0x78   :  { %255 = vst.msk [vmem:[%s3099_s3 + $0x3b8] sm:$0xf] %vm16_vm0, %v1325_v1  ;;  %256 = vst.msk [vmem:[%s3099_s3 + $0x3bc] sm:$0xf] %vm16_vm0, %v1325_v1 }
  0x79   :  { %257 = vst.msk [vmem:[%s3099_s3 + $0x3c0] sm:$0xf] %vm16_vm0, %v1325_v1  ;;  %258 = vst.msk [vmem:[%s3099_s3 + $0x3c4] sm:$0xf] %vm16_vm0, %v1325_v1 }
  0x7a   :  { %259 = vst.msk [vmem:[%s3099_s3 + $0x3c8] sm:$0xf] %vm16_vm0, %v1325_v1  ;;  %260 = vst.msk [vmem:[%s3099_s3 + $0x3cc] sm:$0xf] %vm16_vm0, %v1325_v1 }
  0x7b   :  { %261 = vst.msk [vmem:[%s3099_s3 + $0x3d0] sm:$0xf] %vm16_vm0, %v1325_v1  ;;  %262 = vst.msk [vmem:[%s3099_s3 + $0x3d4] sm:$0xf] %vm16_vm0, %v1325_v1 }
  0x7c   :  { %263 = vst.msk [vmem:[%s3099_s3 + $0x3d8] sm:$0xf] %vm16_vm0, %v1325_v1  ;;  %264 = vst.msk [vmem:[%s3099_s3 + $0x3dc] sm:$0xf] %vm16_vm0, %v1325_v1 }
  0x7d   :  { %265 = vst.msk [vmem:[%s3099_s3 + $0x3e0] sm:$0xf] %vm16_vm0, %v1325_v1  ;;  %266 = vst.msk [vmem:[%s3099_s3 + $0x3e4] sm:$0xf] %vm16_vm0, %v1325_v1 }
  0x7e   :  { %267 = vst.msk [vmem:[%s3099_s3 + $0x3e8] sm:$0xf] %vm16_vm0, %v1325_v1  ;;  %268 = vst.msk [vmem:[%s3099_s3 + $0x3ec] sm:$0xf] %vm16_vm0, %v1325_v1 }
  0x7f   :  { %269 = vst.msk [vmem:[%s3099_s3 + $0x3f0] sm:$0xf] %vm16_vm0, %v1325_v1  ;;  %270 = vst.msk [vmem:[%s3099_s3 + $0x3f4] sm:$0xf] %vm16_vm0, %v1325_v1 }
  0x80   :  { %271 = vst.msk [vmem:[%s3099_s3 + $0x3f8] sm:$0xf] %vm16_vm0, %v1325_v1  ;;  %272 = vst.msk [vmem:[%s3099_s3 + $0x3fc] sm:$0xf] %vm16_vm0, %v1325_v1 }
  0x81   :  { %273 = vst.msk [vmem:[%s3099_s3 + $0x400] sm:$0xf] %vm16_vm0, %v1325_v1  ;;  %274 = vst.msk [vmem:[%s3099_s3 + $0x404] sm:$0xf] %vm16_vm0, %v1325_v1 }
  0x82   :  { %275 = vst.msk [vmem:[%s3099_s3 + $0x408] sm:$0xf] %vm16_vm0, %v1325_v1  ;;  %276 = vst.msk [vmem:[%s3099_s3 + $0x40c] sm:$0xf] %vm16_vm0, %v1325_v1 }
  0x83   :  { %277 = vst.msk [vmem:[%s3099_s3 + $0x410] sm:$0xf] %vm16_vm0, %v1325_v1  ;;  %278 = vst.msk [vmem:[%s3099_s3 + $0x414] sm:$0xf] %vm16_vm0, %v1325_v1 }
  0x84   :  { %279 = vst.msk [vmem:[%s3099_s3 + $0x418] sm:$0xf] %vm16_vm0, %v1325_v1  ;;  %280 = vst.msk [vmem:[%s3099_s3 + $0x41c] sm:$0xf] %vm16_vm0, %v1325_v1 }
  0x85   :  { %281 = vst.msk [vmem:[%s3099_s3 + $0x420] sm:$0xf] %vm16_vm0, %v1325_v1  ;;  %282 = vst.msk [vmem:[%s3099_s3 + $0x424] sm:$0xf] %vm16_vm0, %v1325_v1 }
  0x86   :  { %283 = vst.msk [vmem:[%s3099_s3 + $0x428] sm:$0xf] %vm16_vm0, %v1325_v1  ;;  %284 = vst.msk [vmem:[%s3099_s3 + $0x42c] sm:$0xf] %vm16_vm0, %v1325_v1 }
  0x87   :  { %285 = vst.msk [vmem:[%s3099_s3 + $0x430] sm:$0xf] %vm16_vm0, %v1325_v1  ;;  %286 = vst.msk [vmem:[%s3099_s3 + $0x434] sm:$0xf] %vm16_vm0, %v1325_v1 }
  0x88   :  { %287 = vst.msk [vmem:[%s3099_s3 + $0x438] sm:$0xf] %vm16_vm0, %v1325_v1  ;;  %288 = vst.msk [vmem:[%s3099_s3 + $0x43c] sm:$0xf] %vm16_vm0, %v1325_v1 }
  0x89   :  { %289 = vst.msk [vmem:[%s3099_s3 + $0x440] sm:$0xf] %vm16_vm0, %v1325_v1  ;;  %290 = vst.msk [vmem:[%s3099_s3 + $0x444] sm:$0xf] %vm16_vm0, %v1325_v1 }
  0x8a   :  { %291 = vst.msk [vmem:[%s3099_s3 + $0x448] sm:$0xf] %vm16_vm0, %v1325_v1  ;;  %292 = vst.msk [vmem:[%s3099_s3 + $0x44c] sm:$0xf] %vm16_vm0, %v1325_v1 }
  0x8b   :  { %293 = vst.msk [vmem:[%s3099_s3 + $0x450] sm:$0xf] %vm16_vm0, %v1325_v1  ;;  %294 = vst.msk [vmem:[%s3099_s3 + $0x454] sm:$0xf] %vm16_vm0, %v1325_v1 }
  0x8c   :  { %295 = vst.msk [vmem:[%s3099_s3 + $0x458] sm:$0xf] %vm16_vm0, %v1325_v1  ;;  %296 = vst.msk [vmem:[%s3099_s3 + $0x45c] sm:$0xf] %vm16_vm0, %v1325_v1 }
  0x8d   :  { %297 = vst.msk [vmem:[%s3099_s3 + $0x460] sm:$0xf] %vm16_vm0, %v1325_v1  ;;  %298 = vst.msk [vmem:[%s3099_s3 + $0x464] sm:$0xf] %vm16_vm0, %v1325_v1 }
  0x8e   :  { %299 = vst.msk [vmem:[%s3099_s3 + $0x468] sm:$0xf] %vm16_vm0, %v1325_v1  ;;  %300 = vst.msk [vmem:[%s3099_s3 + $0x46c] sm:$0xf] %vm16_vm0, %v1325_v1 }
  0x8f   :  { %301 = vst.msk [vmem:[%s3099_s3 + $0x470] sm:$0xf] %vm16_vm0, %v1325_v1  ;;  %302 = vst.msk [vmem:[%s3099_s3 + $0x474] sm:$0xf] %vm16_vm0, %v1325_v1 }
  0x90   :  { %303 = vst.msk [vmem:[%s3099_s3 + $0x478] sm:$0xf] %vm16_vm0, %v1325_v1  ;;  %304 = vst.msk [vmem:[%s3099_s3 + $0x47c] sm:$0xf] %vm16_vm0, %v1325_v1 }
  0x91   :  { %305 = vst.msk [vmem:[%s3099_s3 + $0x480] sm:$0xf] %vm16_vm0, %v1325_v1  ;;  %306 = vst.msk [vmem:[%s3099_s3 + $0x484] sm:$0xf] %vm16_vm0, %v1325_v1 }
  0x92   :  { %307 = vst.msk [vmem:[%s3099_s3 + $0x488] sm:$0xf] %vm16_vm0, %v1325_v1  ;;  %308 = vst.msk [vmem:[%s3099_s3 + $0x48c] sm:$0xf] %vm16_vm0, %v1325_v1 }
  0x93   :  { %309 = vst.msk [vmem:[%s3099_s3 + $0x490] sm:$0xf] %vm16_vm0, %v1325_v1  ;;  %310 = vst.msk [vmem:[%s3099_s3 + $0x494] sm:$0xf] %vm16_vm0, %v1325_v1 }
  0x94   :  { %311 = vst.msk [vmem:[%s3099_s3 + $0x498] sm:$0xf] %vm16_vm0, %v1325_v1  ;;  %312 = vst.msk [vmem:[%s3099_s3 + $0x49c] sm:$0xf] %vm16_vm0, %v1325_v1 }
  0x95   :  { %313 = vst.msk [vmem:[%s3099_s3 + $0x4a0] sm:$0xf] %vm16_vm0, %v1325_v1  ;;  %314 = vst.msk [vmem:[%s3099_s3 + $0x4a4] sm:$0xf] %vm16_vm0, %v1325_v1 }
  0x96   :  { %315 = vst.msk [vmem:[%s3099_s3 + $0x4a8] sm:$0xf] %vm16_vm0, %v1325_v1  ;;  %316 = vst.msk [vmem:[%s3099_s3 + $0x4ac] sm:$0xf] %vm16_vm0, %v1325_v1 }
  0x97   :  { %317 = vst.msk [vmem:[%s3099_s3 + $0x4b0] sm:$0xf] %vm16_vm0, %v1325_v1  ;;  %318 = vst.msk [vmem:[%s3099_s3 + $0x4b4] sm:$0xf] %vm16_vm0, %v1325_v1 }
  0x98   :  { %319 = vst.msk [vmem:[%s3099_s3 + $0x4b8] sm:$0xf] %vm16_vm0, %v1325_v1  ;;  %320 = vst.msk [vmem:[%s3099_s3 + $0x4bc] sm:$0xf] %vm16_vm0, %v1325_v1 }
  0x99   :  { %321 = vst.msk [vmem:[%s3099_s3 + $0x4c0] sm:$0xf] %vm16_vm0, %v1325_v1  ;;  %322 = vst.msk [vmem:[%s3099_s3 + $0x4c4] sm:$0xf] %vm16_vm0, %v1325_v1 }
  0x9a   :  { %323 = vst.msk [vmem:[%s3099_s3 + $0x4c8] sm:$0xf] %vm16_vm0, %v1325_v1  ;;  %324 = vst.msk [vmem:[%s3099_s3 + $0x4cc] sm:$0xf] %vm16_vm0, %v1325_v1 }
  0x9b   :  { %325 = vst.msk [vmem:[%s3099_s3 + $0x4d0] sm:$0xf] %vm16_vm0, %v1325_v1  ;;  %326 = vst.msk [vmem:[%s3099_s3 + $0x4d4] sm:$0xf] %vm16_vm0, %v1325_v1 }
  0x9c   :  { %327 = vst.msk [vmem:[%s3099_s3 + $0x4d8] sm:$0xf] %vm16_vm0, %v1325_v1  ;;  %328 = vst.msk [vmem:[%s3099_s3 + $0x4dc] sm:$0xf] %vm16_vm0, %v1325_v1 }
  0x9d   :  { %329 = vst.msk [vmem:[%s3099_s3 + $0x4e0] sm:$0xf] %vm16_vm0, %v1325_v1  ;;  %330 = vst.msk [vmem:[%s3099_s3 + $0x4e4] sm:$0xf] %vm16_vm0, %v1325_v1 }
  0x9e   :  { %331 = vst.msk [vmem:[%s3099_s3 + $0x4e8] sm:$0xf] %vm16_vm0, %v1325_v1  ;;  %332 = vst.msk [vmem:[%s3099_s3 + $0x4ec] sm:$0xf] %vm16_vm0, %v1325_v1 }
  0x9f   :  { %333 = vst.msk [vmem:[%s3099_s3 + $0x4f0] sm:$0xf] %vm16_vm0, %v1325_v1  ;;  %334 = vst.msk [vmem:[%s3099_s3 + $0x4f4] sm:$0xf] %vm16_vm0, %v1325_v1 }
  0xa0   :  { %335 = vst.msk [vmem:[%s3099_s3 + $0x4f8] sm:$0xf] %vm16_vm0, %v1325_v1  ;;  %336 = vst.msk [vmem:[%s3099_s3 + $0x4fc] sm:$0xf] %vm16_vm0, %v1325_v1 }
  0xa1   :  { %337 = vst.msk [vmem:[%s3099_s3 + $0x500] sm:$0xf] %vm16_vm0, %v1325_v1  ;;  %338 = vst.msk [vmem:[%s3099_s3 + $0x504] sm:$0xf] %vm16_vm0, %v1325_v1 }
  0xa2   :  { %339 = vst.msk [vmem:[%s3099_s3 + $0x508] sm:$0xf] %vm16_vm0, %v1325_v1  ;;  %340 = vst.msk [vmem:[%s3099_s3 + $0x50c] sm:$0xf] %vm16_vm0, %v1325_v1 }
  0xa3 LB: > { %v1287_v2 = vld [vmem:[%s3097_s1] sm:$0xff]   ;;  %vm539_vm1 = vcmask 1043456   ;;  %v1288_v3 = vld [vmem:[%s3097_s1 + $0x8] sm:$0x1f]   ;;  %vm540_vm2 = vcmask 1044480   ;;  %s1180_s22 = smul.u32 224, %s1323_s18  ;;  %s1323_s18 = sphi %s2972_s18, %s346_s18  }
  0xa4   : > { %1213 = vmatprep.subr.bf16.mxu0 %v1287_v2  ;;  %1245 = vmatprep.subr.bf16.mxu1 %v1287_v2  ;;  %v1326_v4 = vmov 65535   ;;  %vm496_vm3 = vcmask 203776   ;;  %s1066_s26 = smul.u32 72, %s1323_s18  ;;  %s346_s18 = sadd.s32 1, %s1323_s18  }
  0xa5   : > { %1214 = vmatpush3.bf16.msra.mxu0 %v1287_v2  ;;  %1246 = vmatpush3.bf16.msra.mxu1 %v1287_v2  ;;  %v541_v5 = vsel %vm539_vm1, 4294967295, %v1326_v4  ;;  %s2987_s25 = scalar_lea.vmem %s3096_s0, %s1180_s22  ;;  %p343_p0 = scmp.ge.s32.totalorder %s346_s18, 14  }
  0xa6   : > { %v542_v6 = vsel %vm540_vm2, %v541_v5, 0  ;;  %v1289_v8 = vld [vmem:[%s2987_s25] sm:$0xff]   ;;  %v1290_v9 = vld [vmem:[%s2987_s25 + $0x70] sm:$0xff]   ;;  %v1291_v10 = vld [vmem:[%s2987_s25 + $0x8] sm:$0xff]   ;;  %s3051_s29 = scalar_lea.vmem %s3099_s3, %s1066_s26 }
  0xa7   : > { %v544_v7 = vand.u32 %v1288_v3, %v542_v6  ;;  %v1292_v11 = vld [vmem:[%s2987_s25 + $0x78] sm:$0xff]   ;;  %1217 = vmatprep.mubr.msk.bf16.mxu0 %vm496_vm3, %v1289_v8  ;;  %1249 = vmatprep.mubr.msk.bf16.mxu1 %vm496_vm3, %v1290_v9  ;;  %v1293_v12 = vld [vmem:[%s2987_s25 + $0x10] sm:$0xff]   ;;  %v1294_v13 = vld [vmem:[%s2987_s25 + $0x80] sm:$0xff]  }
  0xa8   : > { %v1295_v14 = vld [vmem:[%s2987_s25 + $0x18] sm:$0xff]   ;;  %v1296_v15 = vld [vmem:[%s2987_s25 + $0x88] sm:$0xff]   ;;  %v1297_v16 = vld [vmem:[%s2987_s25 + $0x20] sm:$0xff]  }
  0xa9   : > { %1215 = vmatprep.subr.bf16.mxu0 %v544_v7  ;;  %1247 = vmatprep.subr.bf16.mxu1 %v544_v7  ;;  %v1298_v17 = vld [vmem:[%s2987_s25 + $0x90] sm:$0xff]   ;;  %v1299_v18 = vld [vmem:[%s2987_s25 + $0x28] sm:$0xff]   ;;  %v1300_v19 = vld [vmem:[%s2987_s25 + $0x98] sm:$0xff]  }
  0xaa   : > { %1216 = vmatpush3.bf16.msra.mxu0 %v544_v7  ;;  %1248 = vmatpush3.bf16.msra.mxu1 %v544_v7  ;;  %v1301_v20 = vld [vmem:[%s2987_s25 + $0x30] sm:$0xff]   ;;  %v1302_v21 = vld [vmem:[%s2987_s25 + $0xa0] sm:$0xff]   ;;  %v1303_v22 = vld [vmem:[%s2987_s25 + $0x38] sm:$0xff]  }
  0xab   : > { %v1304_v23 = vld [vmem:[%s2987_s25 + $0xa8] sm:$0xff]   ;;  %v1305_v24 = vld [vmem:[%s2987_s25 + $0x40] sm:$0xff]   ;;  %v1306_v25 = vld [vmem:[%s2987_s25 + $0xb0] sm:$0xff]  }
  0xac   : > { %v1307_v26 = vld [vmem:[%s2987_s25 + $0x48] sm:$0xff]   ;;  %v1308_v27 = vld [vmem:[%s2987_s25 + $0xb8] sm:$0xff]   ;;  %v1309_v28 = vld [vmem:[%s2987_s25 + $0x50] sm:$0xff]  }
  0xad   : > { %1218 = vmatmul.mubr.msk.bf16.vlgmr.msra.gmra.mrb[0].mxu0 %vm496_vm3, %v1291_v10  ;;  %1250 = vmatmul.mubr.msk.bf16.vlgmr.msra.gmra.mrb[0].mxu1 %vm496_vm3, %v1292_v11  ;;  %v1310_v29 = vld [vmem:[%s2987_s25 + $0xc0] sm:$0xff]   ;;  %v1311_v30 = vld [vmem:[%s2987_s25 + $0x58] sm:$0xff]   ;;  %v1312_v31 = vld [vmem:[%s2987_s25 + $0xc8] sm:$0xff]  }
  0xae   : > { %1221 = vmatprep.mubr.msk.bf16.mxu0 %vm496_vm3, %v1293_v12  ;;  %1253 = vmatprep.mubr.msk.bf16.mxu1 %vm496_vm3, %v1294_v13  ;;  %v1313_v32 = vld [vmem:[%s2987_s25 + $0x60] sm:$0xff]   ;;  %v1314_v33 = vld [vmem:[%s2987_s25 + $0xd0] sm:$0xff]   ;;  %v1315_v34 = vld [vmem:[%s2987_s25 + $0x68] sm:$0xff]  }
  0xaf   : > { %v1316_v35 = vld [vmem:[%s2987_s25 + $0xd8] sm:$0xff]  }
  0xb5   : > { %1222 = vmatmul.mubr.msk.bf16.gmra.mrb[4].mxu0 %vm496_vm3, %v1295_v14  ;;  %1254 = vmatmul.mubr.msk.bf16.gmra.mrb[4].mxu1 %vm496_vm3, %v1296_v15 }
  0xb6   : > { %1225 = vmatprep.mubr.msk.bf16.mxu0 %vm496_vm3, %v1297_v16  ;;  %1257 = vmatprep.mubr.msk.bf16.mxu1 %vm496_vm3, %v1298_v17 }
  0xbd   : > { %1226 = vmatmul.mubr.msk.bf16.gmra.mrb[8].mxu0 %vm496_vm3, %v1299_v18  ;;  %1258 = vmatmul.mubr.msk.bf16.gmra.mrb[8].mxu1 %vm496_vm3, %v1300_v19 }
  0xbe   : > { %1229 = vmatprep.mubr.msk.bf16.mxu0 %vm496_vm3, %v1301_v20  ;;  %1261 = vmatprep.mubr.msk.bf16.mxu1 %vm496_vm3, %v1302_v21 }
  0xc5   : > { %1230 = vmatmul.mubr.msk.bf16.gmra.mrb[12].mxu0 %vm496_vm3, %v1303_v22  ;;  %1262 = vmatmul.mubr.msk.bf16.gmra.mrb[12].mxu1 %vm496_vm3, %v1304_v23 }
  0xc6   : > { %1233 = vmatprep.mubr.msk.bf16.mxu0 %vm496_vm3, %v1305_v24  ;;  %1265 = vmatprep.mubr.msk.bf16.mxu1 %vm496_vm3, %v1306_v25 }
  0xcd   : > { %1234 = vmatmul.mubr.msk.bf16.gmra.mrb[16].mxu0 %vm496_vm3, %v1307_v26  ;;  %1266 = vmatmul.mubr.msk.bf16.gmra.mrb[16].mxu1 %vm496_vm3, %v1308_v27 }
  0xce   : > { %1237 = vmatprep.mubr.msk.bf16.mxu0 %vm496_vm3, %v1309_v28  ;;  %1269 = vmatprep.mubr.msk.bf16.mxu1 %vm496_vm3, %v1310_v29 }
  0xd5   : > { %1238 = vmatmul.mubr.msk.bf16.gmra.mrb[20].mxu0 %vm496_vm3, %v1311_v30  ;;  %1270 = vmatmul.mubr.msk.bf16.gmra.mrb[20].mxu1 %vm496_vm3, %v1312_v31 }
  0xd6   : > { %1241 = vmatprep.mubr.msk.bf16.mxu0 %vm496_vm3, %v1313_v32  ;;  %1273 = vmatprep.mubr.msk.bf16.mxu1 %vm496_vm3, %v1314_v33 }
  0xdd   : > { %1242 = vmatmul.mubr.msk.bf16.gmra.mrb[24].mxu0 %vm496_vm3, %v1315_v34  ;;  %1274 = vmatmul.mubr.msk.bf16.gmra.mrb[24].mxu1 %vm496_vm3, %v1316_v35 }
 0x180   : > { %v1219_v36 = vpop.f32.mrb[0].mxu0  ;;  %v1251_v37 = vpop.f32.mrb[0].mxu1 }
 0x181   : > { %v950_v38 = vmax.f32 %v1219_v36, %v1251_v37  ;;  %v580_v39 = vpop.f32.mrb[1].mxu0  ;;  %v837_v40 = vpop.f32.mrb[1].mxu1 }
 0x182   : > { %v948_v41 = vmax.f32 %v580_v39, %v837_v40  ;;  %v1220_v42 = vpop.f32.mrb[2].mxu0  ;;  %v1252_v43 = vpop.f32.mrb[2].mxu1 }
 0x183   : > { %v951_v44 = vmax.f32 %v1220_v42, %v1252_v43  ;;  %v583_v45 = vpop.f32.mrb[3].mxu0  ;;  %v840_v46 = vpop.f32.mrb[3].mxu1 }
 0x184   : > { %v949_v47 = vmax.f32 %v583_v45, %v840_v46 }
 0x185   : > { %v991_v48 = vmax.f32 %v950_v38, %v951_v44 }
 0x186   : > { %v976_v49 = vmax.f32 %v948_v41, %v949_v47 }
 0x187   : > { %v992_v50 = vadd.f32 %v1350_v0, %v991_v48 }
 0x188   : > { %v983_v51 = vadd.f32 %v1350_v0, %v976_v49  ;;  %v1223_v52 = vpop.f32.mrb[4].mxu0  ;;  %v1255_v53 = vpop.f32.mrb[4].mxu1 }
 0x189   : > { %v993_v54 = vmax.f32 %v992_v50, 0.0  ;;  %v954_v55 = vmax.f32 %v1223_v52, %v1255_v53  ;;  %v596_v56 = vpop.f32.mrb[5].mxu0  ;;  %v853_v57 = vpop.f32.mrb[5].mxu1 }
 0x18a   : > { %v984_v58 = vmax.f32 %v983_v51, 0.0  ;;  %v952_v59 = vmax.f32 %v596_v56, %v853_v57  ;;  %v1224_v60 = vpop.f32.mrb[6].mxu0  ;;  %v1256_v61 = vpop.f32.mrb[6].mxu1 }
 0x18b   : > { %v994_v62 = vpack.c.bf16 %v993_v54, %v993_v54  ;;  %v955_v63 = vmax.f32 %v1224_v60, %v1256_v61  ;;  %v599_v1 = vpop.f32.mrb[7].mxu0  ;;  %v856_v2 = vpop.f32.mrb[7].mxu1 }
 0x18c   : > { %v985_v3 = vpack.c.bf16 %v984_v58, %v984_v58  ;;  %v953_v4 = vmax.f32 %v599_v1, %v856_v2 }
 0x18d   : > { %1167 = vst.msk [vmem:[%s3051_s29 + $0x9c] sm:$0xf] %vm16_vm0, %v994_v62  ;;  %v1001_v5 = vmax.f32 %v954_v55, %v955_v63 }
 0x18e   : > { %1166 = vst.msk [vmem:[%s3051_s29 + $0x98] sm:$0xf] %vm16_vm0, %v985_v3  ;;  %v996_v6 = vmax.f32 %v952_v59, %v953_v4 }
 0x18f   : > { %v1002_v7 = vadd.f32 %v1350_v0, %v1001_v5 }
 0x190   : > { %v997_v8 = vadd.f32 %v1350_v0, %v996_v6  ;;  %v1227_v9 = vpop.f32.mrb[8].mxu0  ;;  %v1259_v10 = vpop.f32.mrb[8].mxu1 }
 0x191   : > { %v1003_v11 = vmax.f32 %v1002_v7, 0.0  ;;  %v958_v12 = vmax.f32 %v1227_v9, %v1259_v10  ;;  %v612_v13 = vpop.f32.mrb[9].mxu0  ;;  %v869_v14 = vpop.f32.mrb[9].mxu1 }
 0x192   : > { %v998_v15 = vmax.f32 %v997_v8, 0.0  ;;  %v956_v16 = vmax.f32 %v612_v13, %v869_v14  ;;  %v1228_v17 = vpop.f32.mrb[10].mxu0  ;;  %v1260_v18 = vpop.f32.mrb[10].mxu1 }
 0x193   : > { %v1004_v19 = vpack.c.bf16 %v1003_v11, %v1003_v11  ;;  %v959_v20 = vmax.f32 %v1228_v17, %v1260_v18  ;;  %v615_v21 = vpop.f32.mrb[11].mxu0  ;;  %v872_v22 = vpop.f32.mrb[11].mxu1 }
 0x194   : > { %v999_v23 = vpack.c.bf16 %v998_v15, %v998_v15  ;;  %v957_v24 = vmax.f32 %v615_v21, %v872_v22 }
 0x195   : > { %1169 = vst.msk [vmem:[%s3051_s29 + $0xa4] sm:$0xf] %vm16_vm0, %v1004_v19  ;;  %v1011_v25 = vmax.f32 %v958_v12, %v959_v20 }
 0x196   : > { %1168 = vst.msk [vmem:[%s3051_s29 + $0xa0] sm:$0xf] %vm16_vm0, %v999_v23  ;;  %v1006_v26 = vmax.f32 %v956_v16, %v957_v24 }
 0x197   : > { %v1012_v27 = vadd.f32 %v1350_v0, %v1011_v25 }
 0x198   : > { %v1007_v28 = vadd.f32 %v1350_v0, %v1006_v26  ;;  %v1231_v29 = vpop.f32.mrb[12].mxu0  ;;  %v1263_v30 = vpop.f32.mrb[12].mxu1 }
 0x199   : > { %v1013_v31 = vmax.f32 %v1012_v27, 0.0  ;;  %v962_v32 = vmax.f32 %v1231_v29, %v1263_v30  ;;  %v628_v33 = vpop.f32.mrb[13].mxu0  ;;  %v885_v34 = vpop.f32.mrb[13].mxu1 }
 0x19a   : > { %v1008_v35 = vmax.f32 %v1007_v28, 0.0  ;;  %v960_v36 = vmax.f32 %v628_v33, %v885_v34  ;;  %v1232_v37 = vpop.f32.mrb[14].mxu0  ;;  %v1264_v38 = vpop.f32.mrb[14].mxu1 }
 0x19b   : > { %v1014_v39 = vpack.c.bf16 %v1013_v31, %v1013_v31  ;;  %v963_v40 = vmax.f32 %v1232_v37, %v1264_v38  ;;  %v631_v41 = vpop.f32.mrb[15].mxu0  ;;  %v888_v42 = vpop.f32.mrb[15].mxu1 }
 0x19c   : > { %v1009_v43 = vpack.c.bf16 %v1008_v35, %v1008_v35  ;;  %v961_v44 = vmax.f32 %v631_v41, %v888_v42 }
 0x19d   : > { %1171 = vst.msk [vmem:[%s3051_s29 + $0xac] sm:$0xf] %vm16_vm0, %v1014_v39  ;;  %v1021_v45 = vmax.f32 %v962_v32, %v963_v40 }
 0x19e   : > { %1170 = vst.msk [vmem:[%s3051_s29 + $0xa8] sm:$0xf] %vm16_vm0, %v1009_v43  ;;  %v1016_v46 = vmax.f32 %v960_v36, %v961_v44 }
 0x19f   : > { %v1022_v47 = vadd.f32 %v1350_v0, %v1021_v45 }
 0x1a0   : > { %v1017_v48 = vadd.f32 %v1350_v0, %v1016_v46  ;;  %v1235_v49 = vpop.f32.mrb[16].mxu0  ;;  %v1267_v50 = vpop.f32.mrb[16].mxu1 }
 0x1a1   : > { %v1023_v51 = vmax.f32 %v1022_v47, 0.0  ;;  %v966_v52 = vmax.f32 %v1235_v49, %v1267_v50  ;;  %v644_v53 = vpop.f32.mrb[17].mxu0  ;;  %v901_v54 = vpop.f32.mrb[17].mxu1 }
 0x1a2   : > { %v1018_v55 = vmax.f32 %v1017_v48, 0.0  ;;  %v964_v56 = vmax.f32 %v644_v53, %v901_v54  ;;  %v1236_v57 = vpop.f32.mrb[18].mxu0  ;;  %v1268_v58 = vpop.f32.mrb[18].mxu1 }
 0x1a3   : > { %v1024_v59 = vpack.c.bf16 %v1023_v51, %v1023_v51  ;;  %v967_v60 = vmax.f32 %v1236_v57, %v1268_v58  ;;  %v647_v61 = vpop.f32.mrb[19].mxu0  ;;  %v904_v62 = vpop.f32.mrb[19].mxu1 }
 0x1a4   : > { %v1019_v63 = vpack.c.bf16 %v1018_v55, %v1018_v55  ;;  %v965_v1 = vmax.f32 %v647_v61, %v904_v62 }
 0x1a5   : > { %1173 = vst.msk [vmem:[%s3051_s29 + $0xb4] sm:$0xf] %vm16_vm0, %v1024_v59  ;;  %v1031_v2 = vmax.f32 %v966_v52, %v967_v60 }
 0x1a6   : > { %1172 = vst.msk [vmem:[%s3051_s29 + $0xb0] sm:$0xf] %vm16_vm0, %v1019_v63  ;;  %v1026_v3 = vmax.f32 %v964_v56, %v965_v1 }
 0x1a7   : > { %v1032_v4 = vadd.f32 %v1350_v0, %v1031_v2 }
 0x1a8   : > { %v1027_v5 = vadd.f32 %v1350_v0, %v1026_v3  ;;  %v1239_v6 = vpop.f32.mrb[20].mxu0  ;;  %v1271_v7 = vpop.f32.mrb[20].mxu1 }
 0x1a9   : > { %v1033_v8 = vmax.f32 %v1032_v4, 0.0  ;;  %v970_v9 = vmax.f32 %v1239_v6, %v1271_v7  ;;  %v660_v10 = vpop.f32.mrb[21].mxu0  ;;  %v917_v11 = vpop.f32.mrb[21].mxu1 }
 0x1aa   : > { %v1028_v12 = vmax.f32 %v1027_v5, 0.0  ;;  %v968_v13 = vmax.f32 %v660_v10, %v917_v11  ;;  %v1240_v14 = vpop.f32.mrb[22].mxu0  ;;  %v1272_v15 = vpop.f32.mrb[22].mxu1 }
 0x1ab   : > { %v1034_v16 = vpack.c.bf16 %v1033_v8, %v1033_v8  ;;  %v971_v17 = vmax.f32 %v1240_v14, %v1272_v15  ;;  %v663_v18 = vpop.f32.mrb[23].mxu0  ;;  %v920_v19 = vpop.f32.mrb[23].mxu1 }
 0x1ac   : > { %v1029_v20 = vpack.c.bf16 %v1028_v12, %v1028_v12  ;;  %v969_v21 = vmax.f32 %v663_v18, %v920_v19 }
 0x1ad   : > { %1175 = vst.msk [vmem:[%s3051_s29 + $0xbc] sm:$0xf] %vm16_vm0, %v1034_v16  ;;  %v1041_v22 = vmax.f32 %v970_v9, %v971_v17 }
 0x1ae   : > { %1174 = vst.msk [vmem:[%s3051_s29 + $0xb8] sm:$0xf] %vm16_vm0, %v1029_v20  ;;  %v1036_v23 = vmax.f32 %v968_v13, %v969_v21 }
 0x1af   : > { %v1042_v24 = vadd.f32 %v1350_v0, %v1041_v22 }
 0x1b0   : > { %v1037_v25 = vadd.f32 %v1350_v0, %v1036_v23  ;;  %v1243_v26 = vpop.f32.mrb[24].mxu0  ;;  %v1275_v27 = vpop.f32.mrb[24].mxu1 }
 0x1b1   : > { %v1043_v28 = vmax.f32 %v1042_v24, 0.0  ;;  %v974_v29 = vmax.f32 %v1243_v26, %v1275_v27  ;;  %v676_v30 = vpop.f32.mrb[25].mxu0  ;;  %v933_v31 = vpop.f32.mrb[25].mxu1 }
 0x1b2   : > { %v1038_v32 = vmax.f32 %v1037_v25, 0.0  ;;  %v972_v33 = vmax.f32 %v676_v30, %v933_v31  ;;  %v1244_v34 = vpop.f32.mrb[26].mxu0  ;;  %v1276_v35 = vpop.f32.mrb[26].mxu1 }
 0x1b3   : > { %v1044_v36 = vpack.c.bf16 %v1043_v28, %v1043_v28  ;;  %v975_v37 = vmax.f32 %v1244_v34, %v1276_v35  ;;  %v679_v38 = vpop.f32.mrb[27].mxu0  ;;  %v936_v39 = vpop.f32.mrb[27].mxu1 }
 0x1b4   : > { %v1039_v40 = vpack.c.bf16 %v1038_v32, %v1038_v32  ;;  %v973_v41 = vmax.f32 %v679_v38, %v936_v39 }
 0x1b5   : > { %1177 = vst.msk [vmem:[%s3051_s29 + $0xc4] sm:$0xf] %vm16_vm0, %v1044_v36  ;;  %v1051_v42 = vmax.f32 %v974_v29, %v975_v37 }
 0x1b6   : > { %1176 = vst.msk [vmem:[%s3051_s29 + $0xc0] sm:$0xf] %vm16_vm0, %v1039_v40  ;;  %v1046_v43 = vmax.f32 %v972_v33, %v973_v41 }
 0x1b7   : > { %v1052_v44 = vadd.f32 %v1350_v0, %v1051_v42 }
 0x1b8   : > { %v1047_v45 = vadd.f32 %v1350_v0, %v1046_v43  ;;  %345 = sbr.rel (!%p343_p0) target bundleno = 163 (0xa3), region = 42 }
 0x1b9   : > { %v1053_v46 = vmax.f32 %v1052_v44, 0.0 }
 0x1ba   : > { %v1048_v47 = vmax.f32 %v1047_v45, 0.0 }
 0x1bb   : > { %v1054_v48 = vpack.c.bf16 %v1053_v46, %v1053_v46 }
 0x1bc   : > { %v1049_v49 = vpack.c.bf16 %v1048_v47, %v1048_v47 }
 0x1bd   : > { %1179 = vst.msk [vmem:[%s3051_s29 + $0xcc] sm:$0xf] %vm16_vm0, %v1054_v48 }
 0x1be   : > { %1178 = vst.msk [vmem:[%s3051_s29 + $0xc8] sm:$0xf] %vm16_vm0, %v1049_v49 }

// kernel: net_forward.6
= control target key start
LH: loop header
LB: loop body
LE: loop exit
PB: predicated region body
PF: predicated region fallthrough
CT: control target
= control target key end

     0   :  { %s8077_s14 = smov 0   ;;  %s9059_s0 = inlined_call_operand.vmem [shape: bf16[1,11,88,64], index: 0, kind: input, shape index: {}]   ;;  %s9060_s1 = inlined_call_operand.vmem [shape: bf16[25,64,128], index: 1, kind: input, shape index: {}]   ;;  %s9061_s2 = inlined_call_operand.vmem [shape: f32[1,128], index: 2, kind: input, shape index: {}]   ;;  %s9062_s3 = inlined_call_operand.vmem [shape: bf16[1,3,24,128], index: 3, kind: output, shape index: {}]  }
   0x1   :  { %v8075_v0 = vld [vmem:[%s9061_s2] ss:$0 sm:$0xff] }
   0x2 LB: > { %v7824_v1 = vld [vmem:[%s9060_s1 + $0x20] sm:$0xff]   ;;  %v7825_v2 = vld [vmem:[%s9060_s1 + $0x28] sm:$0xff]   ;;  %s6230_s2 = smul.u32 88, %s8050_s14  ;;  %v7826_v3 = vld [vmem:[%s9060_s1 + $0x30] sm:$0xff]   ;;  %vm105_vm0 = vcmask 523264   ;;  %s8050_s14 = sphi %s8077_s14, %s21_s14  }
   0x3   : > { %6632 = vmatprep.subr.bf16.mxu0 %v7824_v1  ;;  %6664 = vmatprep.subr.bf16.mxu1 %v7824_v1  ;;  %v7827_v9 = vld [vmem:[%s9060_s1 + $0x38] sm:$0xff]   ;;  %v7836_v14 = vld [vmem:[%s9060_s1] sm:$0xff]   ;;  %v7837_v22 = vld [vmem:[%s9060_s1 + $0x8] sm:$0xff]  }
   0x4   : > { %6633 = vmatpush3.bf16.msra.mxu0 %v7824_v1  ;;  %6665 = vmatpush3.bf16.msra.mxu1 %v7824_v1  ;;  %s8095_s23 = scalar_lea.vmem %s9059_s0, %s6230_s2  ;;  %v7841_v27 = vld [vmem:[%s9060_s1 + $0x10] sm:$0xff]   ;;  %v7843_v30 = vld [vmem:[%s9060_s1 + $0x18] sm:$0xff]   ;;  %v7844_v33 = vld [vmem:[%s9060_s1 + $0x40] sm:$0xff]  }
   0x5   : > { %6634 = vmatprep.subr.bf16.mxu0 %v7825_v2  ;;  %6666 = vmatprep.subr.bf16.mxu1 %v7825_v2  ;;  %v8098_v4 = vld [vmem:[%s8095_s23 + $0x4] sm:$0xf]  ;;  %v8101_v5 = vld [vmem:[%s8095_s23 + $0x8] sm:$0xf]  ;;  %v5440_v7 = vld [vmem:[%s8095_s23 + $0x30] sm:$0xf] }
   0x6   : > { %v5455_v6 = vcombine.low %v8098_v4, %v8101_v5  ;;  %v5441_v8 = vld [vmem:[%s8095_s23 + $0x34] sm:$0xf]  ;;  %v8113_v11 = vld [vmem:[%s8095_s23 + $0xc] sm:$0xf]  ;;  %v8117_v12 = vld [vmem:[%s8095_s23 + $0x10] sm:$0xf] }
   0x7   : > { %v8110_v10 = vcombine.low %v5440_v7, %v5441_v8  ;;  %v5442_v13 = vld [vmem:[%s8095_s23 + $0x38] sm:$0xf]  ;;  %v5443_v15 = vld [vmem:[%s8095_s23 + $0x3c] sm:$0xf]  ;;  %v39_v16 = vld [vmem:[%s8095_s23 + $0x14] sm:$0xf]  ;;  %v5456_v19 = vcombine.low %v8113_v11, %v8117_v12  ;;  %v5468_v34 = vcombine.low %v8101_v5, %v8113_v11 }
   0x8   : > { %6635 = vmatpush3.bf16.msra.mxu0 %v7825_v2  ;;  %6667 = vmatpush3.bf16.msra.mxu1 %v7825_v2  ;;  %v8128_v17 = vld [vmem:[%s8095_s23 + $0x18] sm:$0xf]  ;;  %v5444_v18 = vld [vmem:[%s8095_s23 + $0x40] sm:$0xf]  ;;  %v8133_v20 = vcombine.low %v5442_v13, %v5443_v15  ;;  %v5445_v21 = vld [vmem:[%s8095_s23 + $0x44] sm:$0xf]  ;;  %v8174_v35 = vcombine.low %v5441_v8, %v5442_v13  ;;  %v5469_v37 = vcombine.low %v8117_v12, %v39_v16 }
   0x9   : > { %6636 = vmatprep.subr.bf16.mxu0 %v7826_v3  ;;  %6668 = vmatprep.subr.bf16.mxu1 %v7826_v3  ;;  %v5457_v23 = vcombine.low %v39_v16, %v8128_v17  ;;  %v8140_v24 = vcombine.low %v5444_v18, %v5445_v21  ;;  %v34_v25 = vld [vmem:[%s8095_s23] sm:$0xf]  ;;  %v5439_v26 = vld [vmem:[%s8095_s23 + $0x2c] sm:$0xf]  ;;  %v7840_v28 = vld [vmem:[%s8095_s23 + $0x1c] ss:$0 sps:$4 sm:$0xff]   ;;  %v8180_v38 = vcombine.low %v5443_v15, %v5444_v18 }
   0xa   : > { %6640 = vmatprep.mubr.msk.bf16.mxu0 %vm105_vm0, %v5455_v6  ;;  %6672 = vmatprep.mubr.msk.bf16.mxu1 %vm105_vm0, %v8110_v10  ;;  %v8155_v29 = vld [vmem:[%s8095_s23 + $0x48] ss:$0 sps:$4 sm:$0xff]   ;;  %v5467_v31 = vcombine.low %v34_v25, %v8098_v4  ;;  %v8161_v32 = vcombine.low %v5439_v26, %v5440_v7  ;;  %v7850_v39 = vld [vmem:[%s9060_s1 + $0x50] sm:$0xff]   ;;  %v5470_v40 = vcombine.low %v8128_v17, %v8128_v17  ;;  %v7851_v42 = vld [vmem:[%s9060_s1 + $0x58] sm:$0xff]  }
   0xb   : > { %v7845_v36 = vld [vmem:[%s9060_s1 + $0x48] sm:$0xff]   ;;  %v8193_v41 = vcombine.low %v5445_v21, %v5445_v21  ;;  %v8200_v44 = vld [vmem:[%s8095_s23 + $0x34] sm:$0xff]   ;;  %v7856_v45 = vld [vmem:[%s9060_s1 + $0x60] sm:$0xff]  }
   0xc   : > { %6637 = vmatpush3.bf16.msra.mxu0 %v7826_v3  ;;  %6669 = vmatpush3.bf16.msra.mxu1 %v7826_v3  ;;  %v7852_v43 = vld [vmem:[%s8095_s23 + $0x8] sm:$0xff]   ;;  %v7854_v46 = vld [vmem:[%s8095_s23 + $0x10] sm:$0xff]   ;;  %v8213_v47 = vld [vmem:[%s8095_s23 + $0x3c] sm:$0xff]  }
   0xd   : > { %6638 = vmatprep.subr.bf16.mxu0 %v7827_v9  ;;  %6670 = vmatprep.subr.bf16.mxu1 %v7827_v9  ;;  %v7857_v48 = vld [vmem:[%s9060_s1 + $0x68] sm:$0xff]   ;;  %v7858_v49 = vld [vmem:[%s8095_s23 + $0x18] sm:$0xff]   ;;  %v7862_v51 = vld [vmem:[%s9060_s1 + $0x70] sm:$0xff]  }
   0xe   : > { %v8220_v50 = vld [vmem:[%s8095_s23 + $0x44] sm:$0xff]   ;;  %v7860_v52 = vld [vmem:[%s8095_s23 + $0x20] ss:$0 sps:$4 sm:$0xff]   ;;  %v8233_v53 = vld [vmem:[%s8095_s23 + $0x4c] ss:$0 sps:$4 sm:$0xff]  }
   0xf   : > { %v7863_v54 = vld [vmem:[%s9060_s1 + $0x78] sm:$0xff]   ;;  %v7864_v55 = vld [vmem:[%s8095_s23 + $0xc] sm:$0xff]   ;;  %v7868_v57 = vld [vmem:[%s9060_s1 + $0x80] sm:$0xff]  }
  0x10   : > { %6639 = vmatpush3.bf16.msra.mxu0 %v7827_v9  ;;  %6671 = vmatpush3.bf16.msra.mxu1 %v7827_v9  ;;  %v8240_v56 = vld [vmem:[%s8095_s23 + $0x38] sm:$0xff]   ;;  %v8253_v59 = vld [vmem:[%s8095_s23 + $0x40] sm:$0xff]   ;;  %v7869_v60 = vld [vmem:[%s9060_s1 + $0x88] sm:$0xff]  }
  0x11   : > { %6648 = vmatprep.subr.bf16.mxu0 %v7836_v14  ;;  %6680 = vmatprep.subr.bf16.mxu1 %v7836_v14  ;;  %v7866_v58 = vld [vmem:[%s8095_s23 + $0x14] sm:$0xff]   ;;  %v7870_v61 = vld [vmem:[%s8095_s23 + $0x1c] sm:$0xff]   ;;  %v8260_v62 = vld [vmem:[%s8095_s23 + $0x48] sm:$0xff]  }
  0x12   : > { %v7874_v63 = vld [vmem:[%s9060_s1 + $0x90] sm:$0xff]   ;;  %v7872_v1 = vld [vmem:[%s8095_s23 + $0x24] ss:$0 sps:$4 sm:$0xff]   ;;  %v7875_v3 = vld [vmem:[%s9060_s1 + $0x98] sm:$0xff]  }
  0x13   : > { %6641 = vmatmul.mubr.msk.bf16.vlgmr.msra.gmra.mrb[0].mxu0 %vm105_vm0, %v5456_v19  ;;  %6673 = vmatmul.mubr.msk.bf16.vlgmr.msra.gmra.mrb[0].mxu1 %vm105_vm0, %v8133_v20  ;;  %v8273_v2 = vld [vmem:[%s8095_s23 + $0x50] ss:$0 sps:$4 sm:$0xff]   ;;  %v8280_v5 = vld [vmem:[%s8095_s23 + $0x3c] sm:$0xff]   ;;  %v8293_v8 = vld [vmem:[%s8095_s23 + $0x44] sm:$0xff]  }
  0x14   : > { %6649 = vmatpush3.bf16.msra.mxu0 %v7836_v14  ;;  %6681 = vmatpush3.bf16.msra.mxu1 %v7836_v14  ;;  %v7876_v4 = vld [vmem:[%s8095_s23 + $0x10] sm:$0xff]   ;;  %v7880_v6 = vld [vmem:[%s9060_s1 + $0xa0] sm:$0xff]   ;;  %v7878_v7 = vld [vmem:[%s8095_s23 + $0x18] sm:$0xff]  }
  0x15   : > { %6650 = vmatprep.subr.bf16.mxu0 %v7837_v22  ;;  %6682 = vmatprep.subr.bf16.mxu1 %v7837_v22  ;;  %v7881_v9 = vld [vmem:[%s9060_s1 + $0xa8] sm:$0xff]   ;;  %v7882_v11 = vld [vmem:[%s8095_s23 + $0x20] sm:$0xff]   ;;  %v7886_v13 = vld [vmem:[%s9060_s1 + $0xb0] sm:$0xff]  }
  0x16   : > { %6644 = vmatprep.mubr.msk.bf16.mxu0 %vm105_vm0, %v5457_v23  ;;  %6676 = vmatprep.mubr.msk.bf16.mxu1 %vm105_vm0, %v8140_v24  ;;  %v8300_v12 = vld [vmem:[%s8095_s23 + $0x4c] sm:$0xff]   ;;  %v7884_v14 = vld [vmem:[%s8095_s23 + $0x28] ss:$0 sps:$4 sm:$0xff]   ;;  %v8313_v15 = vld [vmem:[%s8095_s23 + $0x54] ss:$0 sps:$4 sm:$0xff]  }
  0x17   : > { %v7887_v16 = vld [vmem:[%s9060_s1 + $0xb8] sm:$0xff]   ;;  %v7890_v18 = vld [vmem:[%s9060_s1 + $0xc0] sm:$0xff]   ;;  %v7891_v21 = vld [vmem:[%s9060_s1 + $0xc8] sm:$0xff]  }
  0x18   : > { %6651 = vmatpush3.bf16.msra.mxu0 %v7837_v22  ;;  %6683 = vmatpush3.bf16.msra.mxu1 %v7837_v22  ;;  %v8319_v17 = vld [vmem:[%s8095_s23 + $0x58] sm:$0xff]   ;;  %v8332_v19 = vld [vmem:[%s8095_s23 + $0x60] sm:$0xff]   ;;  %v8338_v22 = vld [vmem:[%s8095_s23 + $0x68] sm:$0xff]  }
  0x19   : > { %6652 = vmatprep.subr.bf16.mxu0 %v7841_v27  ;;  %6684 = vmatprep.subr.bf16.mxu1 %v7841_v27  ;;  %v7894_v23 = vld [vmem:[%s9060_s1 + $0xd0] sm:$0xff]   ;;  %v7895_v26 = vld [vmem:[%s9060_s1 + $0xd8] sm:$0xff]  }
  0x1a   : > { %v8352_v25 = vld [vmem:[%s8095_s23 + $0x70] ss:$0 sps:$4 sm:$0xff]  }
  0x1b   : > { %6645 = vmatmul.mubr.msk.bf16.gmra.mrb[4].mxu0 %vm105_vm0, %v7840_v28  ;;  %6677 = vmatmul.mubr.msk.bf16.gmra.mrb[4].mxu1 %vm105_vm0, %v8155_v29  ;;  %v7898_v28 = vld [vmem:[%s9060_s1 + $0xe0] sm:$0xff]  }
  0x1c   : > { %6653 = vmatpush3.bf16.msra.mxu0 %v7841_v27  ;;  %6685 = vmatpush3.bf16.msra.mxu1 %v7841_v27  ;;  %v8358_v27 = vld [vmem:[%s8095_s23 + $0x5c] sm:$0xff]  }
  0x1d   : > { %6654 = vmatprep.subr.bf16.mxu0 %v7843_v30  ;;  %6686 = vmatprep.subr.bf16.mxu1 %v7843_v30 }
  0x1e   : > { %6656 = vmatprep.mubr.msk.bf16.mxu0 %vm105_vm0, %v5467_v31  ;;  %6688 = vmatprep.mubr.msk.bf16.mxu1 %vm105_vm0, %v8161_v32  ;;  %v7899_v31 = vld [vmem:[%s9060_s1 + $0xe8] sm:$0xff]  }
  0x20   : > { %6655 = vmatpush3.bf16.msra.mxu0 %v7843_v30  ;;  %6687 = vmatpush3.bf16.msra.mxu1 %v7843_v30  ;;  %v8372_v30 = vld [vmem:[%s8095_s23 + $0x64] sm:$0xff]  }
  0x21   : > { %6696 = vmatprep.subr.bf16.mxu0 %v7844_v33  ;;  %6712 = vmatprep.subr.bf16.mxu1 %v7844_v33 }
  0x23   : > { %6657 = vmatmul.mubr.msk.bf16.vlgmr.msra.gmra.mrb[0].mxu0 %vm105_vm0, %v5468_v34  ;;  %6689 = vmatmul.mubr.msk.bf16.vlgmr.msra.gmra.mrb[0].mxu1 %vm105_vm0, %v8174_v35  ;;  %v8398_v34 = vld [vmem:[%s8095_s23 + $0x60] sm:$0xff]  }
  0x24   : > { %6697 = vmatpush3.bf16.msra.mxu0 %v7844_v33  ;;  %6713 = vmatpush3.bf16.msra.mxu1 %v7844_v33  ;;  %v8392_v33 = vld [vmem:[%s8095_s23 + $0x74] ss:$0 sps:$4 sm:$0xff]  }
  0x25   : > { %6698 = vmatprep.subr.bf16.mxu0 %v7845_v36  ;;  %6714 = vmatprep.subr.bf16.mxu1 %v7845_v36 }
  0x26   : > { %6660 = vmatprep.mubr.msk.bf16.mxu0 %vm105_vm0, %v5469_v37  ;;  %6692 = vmatprep.mubr.msk.bf16.mxu1 %vm105_vm0, %v8180_v38  ;;  %v8425_v37 = vld [vmem:[%s8095_s23 + $0x78] ss:$0 sps:$4 sm:$0xff]  }
  0x28   : > { %6699 = vmatpush3.bf16.msra.mxu0 %v7845_v36  ;;  %6715 = vmatpush3.bf16.msra.mxu1 %v7845_v36  ;;  %v8418_v36 = vld [vmem:[%s8095_s23 + $0x70] sm:$0xff]  }
  0x29   : > { %6700 = vmatprep.subr.bf16.mxu0 %v7850_v39  ;;  %6716 = vmatprep.subr.bf16.mxu1 %v7850_v39 }
  0x2b   : > { %6661 = vmatmul.mubr.msk.bf16.gmra.mrb[4].mxu0 %vm105_vm0, %v5470_v40  ;;  %6693 = vmatmul.mubr.msk.bf16.gmra.mrb[4].mxu1 %vm105_vm0, %v8193_v41  ;;  %v8438_v40 = vld [vmem:[%s8095_s23 + $0x64] sm:$0xff]  }
  0x2c   : > { %6701 = vmatpush3.bf16.msra.mxu0 %v7850_v39  ;;  %6717 = vmatpush3.bf16.msra.mxu1 %v7850_v39  ;;  %v7911_v39 = vld [vmem:[%s9060_s1 + $0x118] sm:$0xff]  }
  0x2d   : > { %6702 = vmatprep.subr.bf16.mxu0 %v7851_v42  ;;  %6718 = vmatprep.subr.bf16.mxu1 %v7851_v42 }
  0x2e   : > { %6704 = vmatprep.mubr.msk.bf16.mxu0 %vm105_vm0, %v7852_v43  ;;  %6720 = vmatprep.mubr.msk.bf16.mxu1 %vm105_vm0, %v8200_v44  ;;  %v7915_v43 = vld [vmem:[%s9060_s1 + $0x128] sm:$0xff]  }
  0x30   : > { %6703 = vmatpush3.bf16.msra.mxu0 %v7851_v42  ;;  %6719 = vmatpush3.bf16.msra.mxu1 %v7851_v42  ;;  %v8448_v42 = vld [vmem:[%s8095_s23 + $0x6c] sm:$0xff]  }
  0x31   : > { %6728 = vmatprep.subr.bf16.mxu0 %v7856_v45  ;;  %6744 = vmatprep.subr.bf16.mxu1 %v7856_v45 }
  0x33   : > { %6705 = vmatmul.mubr.msk.bf16.vlgmr.msra.gmra.mrb[0].mxu0 %vm105_vm0, %v7854_v46  ;;  %6721 = vmatmul.mubr.msk.bf16.vlgmr.msra.gmra.mrb[0].mxu1 %vm105_vm0, %v8213_v47  ;;  %v8468_v46 = vld [vmem:[%s8095_s23 + $0x7c] ss:$0 sps:$4 sm:$0xff]  }
  0x34   : > { %6729 = vmatpush3.bf16.msra.mxu0 %v7856_v45  ;;  %6745 = vmatpush3.bf16.msra.mxu1 %v7856_v45  ;;  %v7918_v45 = vld [vmem:[%s9060_s1 + $0x130] sm:$0xff]  }
  0x35   : > { %6730 = vmatprep.subr.bf16.mxu0 %v7857_v48  ;;  %6746 = vmatprep.subr.bf16.mxu1 %v7857_v48 }
  0x36   : > { %6708 = vmatprep.mubr.msk.bf16.mxu0 %vm105_vm0, %v7858_v49  ;;  %6724 = vmatprep.mubr.msk.bf16.mxu1 %vm105_vm0, %v8220_v50  ;;  %v7922_v49 = vld [vmem:[%s9060_s1 + $0x140] sm:$0xff]  }
  0x38   : > { %6731 = vmatpush3.bf16.msra.mxu0 %v7857_v48  ;;  %6747 = vmatpush3.bf16.msra.mxu1 %v7857_v48  ;;  %v8478_v48 = vld [vmem:[%s8095_s23 + $0x68] sm:$0xff]  }
  0x39   : > { %6732 = vmatprep.subr.bf16.mxu0 %v7862_v51  ;;  %6748 = vmatprep.subr.bf16.mxu1 %v7862_v51 }
  0x3b   : > { %6709 = vmatmul.mubr.msk.bf16.gmra.mrb[4].mxu0 %vm105_vm0, %v7860_v52  ;;  %6725 = vmatmul.mubr.msk.bf16.gmra.mrb[4].mxu1 %vm105_vm0, %v8233_v53  ;;  %v8498_v52 = vld [vmem:[%s8095_s23 + $0x78] sm:$0xff]  }
  0x3c   : > { %6733 = vmatpush3.bf16.msra.mxu0 %v7862_v51  ;;  %6749 = vmatpush3.bf16.msra.mxu1 %v7862_v51  ;;  %v7923_v51 = vld [vmem:[%s9060_s1 + $0x148] sm:$0xff]  }
  0x3d   : > { %6734 = vmatprep.subr.bf16.mxu0 %v7863_v54  ;;  %6750 = vmatprep.subr.bf16.mxu1 %v7863_v54 }
  0x3e   : > { %6736 = vmatprep.mubr.msk.bf16.mxu0 %vm105_vm0, %v7864_v55  ;;  %6752 = vmatprep.mubr.msk.bf16.mxu1 %vm105_vm0, %v8240_v56  ;;  %v7927_v55 = vld [vmem:[%s9060_s1 + $0x158] sm:$0xff]  }
  0x40   : > { %6735 = vmatpush3.bf16.msra.mxu0 %v7863_v54  ;;  %6751 = vmatpush3.bf16.msra.mxu1 %v7863_v54  ;;  %v8508_v54 = vld [vmem:[%s8095_s23 + $0x80] ss:$0 sps:$4 sm:$0xff]  }
  0x41   : > { %6760 = vmatprep.subr.bf16.mxu0 %v7868_v57  ;;  %6776 = vmatprep.subr.bf16.mxu1 %v7868_v57 }
  0x43   : > { %6737 = vmatmul.mubr.msk.bf16.vlgmr.msra.gmra.mrb[0].mxu0 %vm105_vm0, %v7866_v58  ;;  %6753 = vmatmul.mubr.msk.bf16.vlgmr.msra.gmra.mrb[0].mxu1 %vm105_vm0, %v8253_v59  ;;  %v8528_v58 = vld [vmem:[%s8095_s23 + $0x8c] sm:$0xff]  }
  0x44   : > { %6761 = vmatpush3.bf16.msra.mxu0 %v7868_v57  ;;  %6777 = vmatpush3.bf16.msra.mxu1 %v7868_v57  ;;  %v7930_v57 = vld [vmem:[%s9060_s1 + $0x160] sm:$0xff]  }
  0x45   : > { %6762 = vmatprep.subr.bf16.mxu0 %v7869_v60  ;;  %6778 = vmatprep.subr.bf16.mxu1 %v7869_v60 }
  0x46   : > { %6740 = vmatprep.mubr.msk.bf16.mxu0 %vm105_vm0, %v7870_v61  ;;  %6756 = vmatprep.mubr.msk.bf16.mxu1 %vm105_vm0, %v8260_v62  ;;  %v7934_v61 = vld [vmem:[%s9060_s1 + $0x170] sm:$0xff]  }
  0x48   : > { %6763 = vmatpush3.bf16.msra.mxu0 %v7869_v60  ;;  %6779 = vmatpush3.bf16.msra.mxu1 %v7869_v60  ;;  %v8538_v60 = vld [vmem:[%s8095_s23 + $0x94] sm:$0xff]  }
  0x49   : > { %6764 = vmatprep.subr.bf16.mxu0 %v7874_v63  ;;  %6780 = vmatprep.subr.bf16.mxu1 %v7874_v63 }
  0x4b   : > { %6741 = vmatmul.mubr.msk.bf16.gmra.mrb[4].mxu0 %vm105_vm0, %v7872_v1  ;;  %6757 = vmatmul.mubr.msk.bf16.gmra.mrb[4].mxu1 %vm105_vm0, %v8273_v2  ;;  %v8558_v1 = vld [vmem:[%s8095_s23 + $0x88] sm:$0xff]  }
  0x4c   : > { %6765 = vmatpush3.bf16.msra.mxu0 %v7874_v63  ;;  %6781 = vmatpush3.bf16.msra.mxu1 %v7874_v63  ;;  %v7935_v63 = vld [vmem:[%s9060_s1 + $0x178] sm:$0xff]  }
  0x4d   : > { %6766 = vmatprep.subr.bf16.mxu0 %v7875_v3  ;;  %6782 = vmatprep.subr.bf16.mxu1 %v7875_v3 }
  0x4e   : > { %6768 = vmatprep.mubr.msk.bf16.mxu0 %vm105_vm0, %v7876_v4  ;;  %6784 = vmatprep.mubr.msk.bf16.mxu1 %vm105_vm0, %v8280_v5  ;;  %v7939_v4 = vld [vmem:[%s9060_s1 + $0x188] sm:$0xff]  }
  0x50   : > { %6767 = vmatpush3.bf16.msra.mxu0 %v7875_v3  ;;  %6783 = vmatpush3.bf16.msra.mxu1 %v7875_v3  ;;  %v8572_v3 = vld [vmem:[%s8095_s23 + $0x90] sm:$0xff]  }
  0x51   : > { %6792 = vmatprep.subr.bf16.mxu0 %v7880_v6  ;;  %6808 = vmatprep.subr.bf16.mxu1 %v7880_v6 }
  0x53   : > { %6769 = vmatmul.mubr.msk.bf16.vlgmr.msra.gmra.mrb[0].mxu0 %vm105_vm0, %v7878_v7  ;;  %6785 = vmatmul.mubr.msk.bf16.vlgmr.msra.gmra.mrb[0].mxu1 %vm105_vm0, %v8293_v8  ;;  %v8592_v7 = vld [vmem:[%s8095_s23 + $0xa0] ss:$0 sps:$4 sm:$0xff]  }
  0x54   : > { %6793 = vmatpush3.bf16.msra.mxu0 %v7880_v6  ;;  %6809 = vmatpush3.bf16.msra.mxu1 %v7880_v6  ;;  %v7942_v6 = vld [vmem:[%s9060_s1 + $0x190] sm:$0xff]  }
  0x55   : > { %6794 = vmatprep.subr.bf16.mxu0 %v7881_v9  ;;  %6810 = vmatprep.subr.bf16.mxu1 %v7881_v9 }
  0x56   : > { %6772 = vmatprep.mubr.msk.bf16.mxu0 %vm105_vm0, %v7882_v11  ;;  %6788 = vmatprep.mubr.msk.bf16.mxu1 %vm105_vm0, %v8300_v12  ;;  %v7946_v11 = vld [vmem:[%s9060_s1 + $0x1a0] sm:$0xff]  }
  0x58   : > { %6795 = vmatpush3.bf16.msra.mxu0 %v7881_v9  ;;  %6811 = vmatpush3.bf16.msra.mxu1 %v7881_v9  ;;  %v8598_v9 = vld [vmem:[%s8095_s23 + $0x8c] sm:$0xff]  }
  0x59   : > { %6796 = vmatprep.subr.bf16.mxu0 %v7886_v13  ;;  %6812 = vmatprep.subr.bf16.mxu1 %v7886_v13 }
  0x5b   : > { %6773 = vmatmul.mubr.msk.bf16.gmra.mrb[4].mxu0 %vm105_vm0, %v7884_v14  ;;  %6789 = vmatmul.mubr.msk.bf16.gmra.mrb[4].mxu1 %vm105_vm0, %v8313_v15  ;;  %v8618_v14 = vld [vmem:[%s8095_s23 + $0x9c] sm:$0xff]  }
  0x5c   : > { %6797 = vmatpush3.bf16.msra.mxu0 %v7886_v13  ;;  %6813 = vmatpush3.bf16.msra.mxu1 %v7886_v13  ;;  %v7947_v13 = vld [vmem:[%s9060_s1 + $0x1a8] sm:$0xff]  }
  0x5d   : > { %6798 = vmatprep.subr.bf16.mxu0 %v7887_v16  ;;  %6814 = vmatprep.subr.bf16.mxu1 %v7887_v16 }
  0x5e   : > { %6800 = vmatprep.mubr.msk.bf16.mxu0 %vm105_vm0, %v8161_v32  ;;  %6816 = vmatprep.mubr.msk.bf16.mxu1 %vm105_vm0, %v8319_v17  ;;  %v8378_v32 = vld [vmem:[%s8095_s23 + $0x6c] sm:$0xff]  }
  0x60   : > { %6799 = vmatpush3.bf16.msra.mxu0 %v7887_v16  ;;  %6815 = vmatpush3.bf16.msra.mxu1 %v7887_v16  ;;  %v8632_v16 = vld [vmem:[%s8095_s23 + $0xa4] ss:$0 sps:$4 sm:$0xff]  }
  0x61   : > { %6824 = vmatprep.subr.bf16.mxu0 %v7890_v18  ;;  %6840 = vmatprep.subr.bf16.mxu1 %v7890_v18 }
  0x63   : > { %6801 = vmatmul.mubr.msk.bf16.vlgmr.msra.gmra.mrb[0].mxu0 %vm105_vm0, %v8174_v35  ;;  %6817 = vmatmul.mubr.msk.bf16.vlgmr.msra.gmra.mrb[0].mxu1 %vm105_vm0, %v8332_v19  ;;  %v8412_v35 = vld [vmem:[%s8095_s23 + $0x68] sm:$0xff]  }
  0x64   : > { %6825 = vmatpush3.bf16.msra.mxu0 %v7890_v18  ;;  %6841 = vmatpush3.bf16.msra.mxu1 %v7890_v18  ;;  %v8638_v18 = vld [vmem:[%s8095_s23 + $0x90] sm:$0xff]  }
  0x65   : > { %6826 = vmatprep.subr.bf16.mxu0 %v7891_v21  ;;  %6842 = vmatprep.subr.bf16.mxu1 %v7891_v21 }
  0x66   : > { %6804 = vmatprep.mubr.msk.bf16.mxu0 %vm105_vm0, %v8180_v38  ;;  %6820 = vmatprep.mubr.msk.bf16.mxu1 %vm105_vm0, %v8338_v22  ;;  %v7910_v38 = vld [vmem:[%s9060_s1 + $0x110] sm:$0xff]  }
  0x68   : > { %6827 = vmatpush3.bf16.msra.mxu0 %v7891_v21  ;;  %6843 = vmatpush3.bf16.msra.mxu1 %v7891_v21  ;;  %v8652_v21 = vld [vmem:[%s8095_s23 + $0x98] sm:$0xff]  }
  0x69   : > { %6828 = vmatprep.subr.bf16.mxu0 %v7894_v23  ;;  %6844 = vmatprep.subr.bf16.mxu1 %v7894_v23 }
  0x6b   : > { %6805 = vmatmul.mubr.msk.bf16.gmra.mrb[4].mxu0 %vm105_vm0, %v8193_v41  ;;  %6821 = vmatmul.mubr.msk.bf16.gmra.mrb[4].mxu1 %vm105_vm0, %v8352_v25  ;;  %v7914_v41 = vld [vmem:[%s9060_s1 + $0x120] sm:$0xff]  }
  0x6c   : > { %6829 = vmatpush3.bf16.msra.mxu0 %v7894_v23  ;;  %6845 = vmatpush3.bf16.msra.mxu1 %v7894_v23  ;;  %v8658_v23 = vld [vmem:[%s8095_s23 + $0xa0] sm:$0xff]  }
  0x6d   : > { %6830 = vmatprep.subr.bf16.mxu0 %v7895_v26  ;;  %6846 = vmatprep.subr.bf16.mxu1 %v7895_v26 }
  0x6e   : > { %6832 = vmatprep.mubr.msk.bf16.mxu0 %vm105_vm0, %v8110_v10  ;;  %6848 = vmatprep.mubr.msk.bf16.mxu1 %vm105_vm0, %v8358_v27  ;;  %v7902_v10 = vld [vmem:[%s9060_s1 + $0xf0] sm:$0xff]  }
  0x70   : > { %6831 = vmatpush3.bf16.msra.mxu0 %v7895_v26  ;;  %6847 = vmatpush3.bf16.msra.mxu1 %v7895_v26  ;;  %v8672_v26 = vld [vmem:[%s8095_s23 + $0xa8] ss:$0 sps:$4 sm:$0xff]  }
  0x71   : > { %6856 = vmatprep.subr.bf16.mxu0 %v7898_v28  ;;  %6872 = vmatprep.subr.bf16.mxu1 %v7898_v28 }
  0x73   : > { %6833 = vmatmul.mubr.msk.bf16.vlgmr.msra.gmra.mrb[0].mxu0 %vm105_vm0, %v8133_v20  ;;  %6849 = vmatmul.mubr.msk.bf16.vlgmr.msra.gmra.mrb[0].mxu1 %vm105_vm0, %v8372_v30  ;;  %v7903_v20 = vld [vmem:[%s9060_s1 + $0xf8] sm:$0xff]  }
  0x74   : > { %6857 = vmatpush3.bf16.msra.mxu0 %v7898_v28  ;;  %6873 = vmatpush3.bf16.msra.mxu1 %v7898_v28  ;;  %v8678_v28 = vld [vmem:[%s8095_s23 + $0x94] sm:$0xff]  }
  0x75   : > { %6858 = vmatprep.subr.bf16.mxu0 %v7899_v31  ;;  %6874 = vmatprep.subr.bf16.mxu1 %v7899_v31 }
  0x76   : > { %6836 = vmatprep.mubr.msk.bf16.mxu0 %vm105_vm0, %v8140_v24  ;;  %6852 = vmatprep.mubr.msk.bf16.mxu1 %vm105_vm0, %v8378_v32  ;;  %v7906_v24 = vld [vmem:[%s9060_s1 + $0x100] sm:$0xff]  }
  0x78   : > { %6859 = vmatpush3.bf16.msra.mxu0 %v7899_v31  ;;  %6875 = vmatpush3.bf16.msra.mxu1 %v7899_v31  ;;  %v8692_v31 = vld [vmem:[%s8095_s23 + $0x9c] sm:$0xff]  }
  0x79   : > { %6860 = vmatprep.subr.bf16.mxu0 %v7902_v10  ;;  %6876 = vmatprep.subr.bf16.mxu1 %v7902_v10 }
  0x7b   : > { %6837 = vmatmul.mubr.msk.bf16.gmra.mrb[4].mxu0 %vm105_vm0, %v8155_v29  ;;  %6853 = vmatmul.mubr.msk.bf16.gmra.mrb[4].mxu1 %vm105_vm0, %v8392_v33  ;;  %v7907_v29 = vld [vmem:[%s9060_s1 + $0x108] sm:$0xff]  }
  0x7c   : > { %6861 = vmatpush3.bf16.msra.mxu0 %v7902_v10  ;;  %6877 = vmatpush3.bf16.msra.mxu1 %v7902_v10  ;;  %v8698_v10 = vld [vmem:[%s8095_s23 + $0xa4] sm:$0xff]  }
  0x7d   : > { %6862 = vmatprep.subr.bf16.mxu0 %v7903_v20  ;;  %6878 = vmatprep.subr.bf16.mxu1 %v7903_v20 }
  0x7e   : > { %6864 = vmatprep.mubr.msk.bf16.mxu0 %vm105_vm0, %v8200_v44  ;;  %6880 = vmatprep.mubr.msk.bf16.mxu1 %vm105_vm0, %v8398_v34  ;;  %v8458_v44 = vld [vmem:[%s8095_s23 + $0x74] sm:$0xff]  }
  0x80   : > { %6863 = vmatpush3.bf16.msra.mxu0 %v7903_v20  ;;  %6879 = vmatpush3.bf16.msra.mxu1 %v7903_v20  ;;  %v8712_v20 = vld [vmem:[%s8095_s23 + $0xac] ss:$0 sps:$4 sm:$0xff]  }
  0x81   : > { %6888 = vmatprep.subr.bf16.mxu0 %v7906_v24  ;;  %6904 = vmatprep.subr.bf16.mxu1 %v7906_v24 }
  0x83   : > { %6865 = vmatmul.mubr.msk.bf16.vlgmr.msra.gmra.mrb[0].mxu0 %vm105_vm0, %v8213_v47  ;;  %6881 = vmatmul.mubr.msk.bf16.vlgmr.msra.gmra.mrb[0].mxu1 %vm105_vm0, %v8412_v35  ;;  %v7919_v47 = vld [vmem:[%s9060_s1 + $0x138] sm:$0xff]  }
  0x84   : > { %6889 = vmatpush3.bf16.msra.mxu0 %v7906_v24  ;;  %6905 = vmatpush3.bf16.msra.mxu1 %v7906_v24  ;;  %v8718_v24 = vld [vmem:[%s8095_s23 + $0xb0] sm:$0xff]  }
  0x85   : > { %6890 = vmatprep.subr.bf16.mxu0 %v7907_v29  ;;  %6906 = vmatprep.subr.bf16.mxu1 %v7907_v29 }
  0x86   : > { %6868 = vmatprep.mubr.msk.bf16.mxu0 %vm105_vm0, %v8220_v50  ;;  %6884 = vmatprep.mubr.msk.bf16.mxu1 %vm105_vm0, %v8418_v36  ;;  %v8488_v50 = vld [vmem:[%s8095_s23 + $0x70] sm:$0xff]  }
  0x88   : > { %6891 = vmatpush3.bf16.msra.mxu0 %v7907_v29  ;;  %6907 = vmatpush3.bf16.msra.mxu1 %v7907_v29  ;;  %v8732_v29 = vld [vmem:[%s8095_s23 + $0xb8] sm:$0xff]  }
  0x89   : > { %6892 = vmatprep.subr.bf16.mxu0 %v7910_v38  ;;  %6908 = vmatprep.subr.bf16.mxu1 %v7910_v38 }
  0x8b   : > { %6869 = vmatmul.mubr.msk.bf16.gmra.mrb[4].mxu0 %vm105_vm0, %v8233_v53  ;;  %6885 = vmatmul.mubr.msk.bf16.gmra.mrb[4].mxu1 %vm105_vm0, %v8425_v37  ;;  %v7926_v53 = vld [vmem:[%s9060_s1 + $0x150] sm:$0xff]  }
  0x8c   : > { %6893 = vmatpush3.bf16.msra.mxu0 %v7910_v38  ;;  %6909 = vmatpush3.bf16.msra.mxu1 %v7910_v38  ;;  %v7974_v38 = vld [vmem:[%s9060_s1 + $0x210] sm:$0xff]  }
  0x8d   : > { %6894 = vmatprep.subr.bf16.mxu0 %v7911_v39  ;;  %6910 = vmatprep.subr.bf16.mxu1 %v7911_v39 }
  0x8e   : > { %6896 = vmatprep.mubr.msk.bf16.mxu0 %vm105_vm0, %v8240_v56  ;;  %6912 = vmatprep.mubr.msk.bf16.mxu1 %vm105_vm0, %v8438_v40  ;;  %v8518_v56 = vld [vmem:[%s8095_s23 + $0x84] sm:$0xff]  }
  0x90   : > { %6895 = vmatpush3.bf16.msra.mxu0 %v7911_v39  ;;  %6911 = vmatpush3.bf16.msra.mxu1 %v7911_v39  ;;  %v8752_v39 = vld [vmem:[%s8095_s23 + $0xc8] ss:$0 sps:$4 sm:$0xff]  }
  0x91   : > { %6920 = vmatprep.subr.bf16.mxu0 %v7914_v41  ;;  %6936 = vmatprep.subr.bf16.mxu1 %v7914_v41 }
  0x93   : > { %6897 = vmatmul.mubr.msk.bf16.vlgmr.msra.gmra.mrb[0].mxu0 %vm105_vm0, %v8253_v59  ;;  %6913 = vmatmul.mubr.msk.bf16.vlgmr.msra.gmra.mrb[0].mxu1 %vm105_vm0, %v8448_v42  ;;  %v7931_v59 = vld [vmem:[%s9060_s1 + $0x168] sm:$0xff]  }
  0x94   : > { %6921 = vmatpush3.bf16.msra.mxu0 %v7914_v41  ;;  %6937 = vmatpush3.bf16.msra.mxu1 %v7914_v41  ;;  %v8758_v41 = vld [vmem:[%s8095_s23 + $0xb4] sm:$0xff]  }
  0x95   : > { %6922 = vmatprep.subr.bf16.mxu0 %v7915_v43  ;;  %6938 = vmatprep.subr.bf16.mxu1 %v7915_v43 }
  0x96   : > { %6900 = vmatprep.mubr.msk.bf16.mxu0 %vm105_vm0, %v8260_v62  ;;  %6916 = vmatprep.mubr.msk.bf16.mxu1 %vm105_vm0, %v8458_v44  ;;  %v8548_v62 = vld [vmem:[%s8095_s23 + $0x9c] ss:$0 sps:$4 sm:$0xff]  }
  0x98   : > { %6923 = vmatpush3.bf16.msra.mxu0 %v7915_v43  ;;  %6939 = vmatpush3.bf16.msra.mxu1 %v7915_v43  ;;  %v8772_v43 = vld [vmem:[%s8095_s23 + $0xbc] sm:$0xff]  }
  0x99   : > { %6924 = vmatprep.subr.bf16.mxu0 %v7918_v45  ;;  %6940 = vmatprep.subr.bf16.mxu1 %v7918_v45 }
  0x9b   : > { %6901 = vmatmul.mubr.msk.bf16.gmra.mrb[4].mxu0 %vm105_vm0, %v8273_v2  ;;  %6917 = vmatmul.mubr.msk.bf16.gmra.mrb[4].mxu1 %vm105_vm0, %v8468_v46  ;;  %v7938_v2 = vld [vmem:[%s9060_s1 + $0x180] sm:$0xff]  }
  0x9c   : > { %6925 = vmatpush3.bf16.msra.mxu0 %v7918_v45  ;;  %6941 = vmatpush3.bf16.msra.mxu1 %v7918_v45  ;;  %v8778_v45 = vld [vmem:[%s8095_s23 + $0xc4] sm:$0xff]  }
  0x9d   : > { %6926 = vmatprep.subr.bf16.mxu0 %v7919_v47  ;;  %6942 = vmatprep.subr.bf16.mxu1 %v7919_v47 }
  0x9e   : > { %6928 = vmatprep.mubr.msk.bf16.mxu0 %vm105_vm0, %v8280_v5  ;;  %6944 = vmatprep.mubr.msk.bf16.mxu1 %vm105_vm0, %v8478_v48  ;;  %v8578_v5 = vld [vmem:[%s8095_s23 + $0x98] sm:$0xff]  }
  0xa0   : > { %6927 = vmatpush3.bf16.msra.mxu0 %v7919_v47  ;;  %6943 = vmatpush3.bf16.msra.mxu1 %v7919_v47  ;;  %v8792_v47 = vld [vmem:[%s8095_s23 + $0xcc] ss:$0 sps:$4 sm:$0xff]  }
  0xa1   : > { %6952 = vmatprep.subr.bf16.mxu0 %v7922_v49  ;;  %6968 = vmatprep.subr.bf16.mxu1 %v7922_v49 }
  0xa3   : > { %6929 = vmatmul.mubr.msk.bf16.vlgmr.msra.gmra.mrb[0].mxu0 %vm105_vm0, %v8293_v8  ;;  %6945 = vmatmul.mubr.msk.bf16.vlgmr.msra.gmra.mrb[0].mxu1 %vm105_vm0, %v8488_v50  ;;  %v7943_v8 = vld [vmem:[%s9060_s1 + $0x198] sm:$0xff]  }
  0xa4   : > { %6953 = vmatpush3.bf16.msra.mxu0 %v7922_v49  ;;  %6969 = vmatpush3.bf16.msra.mxu1 %v7922_v49  ;;  %v8798_v49 = vld [vmem:[%s8095_s23 + $0xb8] sm:$0xff]  }
  0xa5   : > { %6954 = vmatprep.subr.bf16.mxu0 %v7923_v51  ;;  %6970 = vmatprep.subr.bf16.mxu1 %v7923_v51 }
  0xa6   : > { %6932 = vmatprep.mubr.msk.bf16.mxu0 %vm105_vm0, %v8300_v12  ;;  %6948 = vmatprep.mubr.msk.bf16.mxu1 %vm105_vm0, %v8498_v52  ;;  %v8612_v12 = vld [vmem:[%s8095_s23 + $0x94] sm:$0xff]  }
  0xa8   : > { %6955 = vmatpush3.bf16.msra.mxu0 %v7923_v51  ;;  %6971 = vmatpush3.bf16.msra.mxu1 %v7923_v51  ;;  %v8812_v51 = vld [vmem:[%s8095_s23 + $0xc0] sm:$0xff]  }
  0xa9   : > { %6956 = vmatprep.subr.bf16.mxu0 %v7926_v53  ;;  %6972 = vmatprep.subr.bf16.mxu1 %v7926_v53 }
  0xab   : > { %6933 = vmatmul.mubr.msk.bf16.gmra.mrb[4].mxu0 %vm105_vm0, %v8313_v15  ;;  %6949 = vmatmul.mubr.msk.bf16.gmra.mrb[4].mxu1 %vm105_vm0, %v8508_v54  ;;  %v7950_v15 = vld [vmem:[%s9060_s1 + $0x1b0] sm:$0xff]  }
  0xac   : > { %6957 = vmatpush3.bf16.msra.mxu0 %v7926_v53  ;;  %6973 = vmatpush3.bf16.msra.mxu1 %v7926_v53  ;;  %v8818_v53 = vld [vmem:[%s8095_s23 + $0xc8] sm:$0xff]  }
  0xad   : > { %6958 = vmatprep.subr.bf16.mxu0 %v7927_v55  ;;  %6974 = vmatprep.subr.bf16.mxu1 %v7927_v55 }
  0xae   : > { %6960 = vmatprep.mubr.msk.bf16.mxu0 %vm105_vm0, %v8319_v17  ;;  %6976 = vmatprep.mubr.msk.bf16.mxu1 %vm105_vm0, %v8518_v56  ;;  %v7951_v17 = vld [vmem:[%s9060_s1 + $0x1b8] sm:$0xff]  }
  0xb0   : > { %6959 = vmatpush3.bf16.msra.mxu0 %v7927_v55  ;;  %6975 = vmatpush3.bf16.msra.mxu1 %v7927_v55  ;;  %v8832_v55 = vld [vmem:[%s8095_s23 + $0xd0] ss:$0 sps:$4 sm:$0xff]  }
  0xb1   : > { %6984 = vmatprep.subr.bf16.mxu0 %v7930_v57  ;;  %7000 = vmatprep.subr.bf16.mxu1 %v7930_v57 }
  0xb3   : > { %6961 = vmatmul.mubr.msk.bf16.vlgmr.msra.gmra.mrb[0].mxu0 %vm105_vm0, %v8332_v19  ;;  %6977 = vmatmul.mubr.msk.bf16.vlgmr.msra.gmra.mrb[0].mxu1 %vm105_vm0, %v8528_v58  ;;  %v7954_v19 = vld [vmem:[%s9060_s1 + $0x1c0] sm:$0xff]  }
  0xb4   : > { %6985 = vmatpush3.bf16.msra.mxu0 %v7930_v57  ;;  %7001 = vmatpush3.bf16.msra.mxu1 %v7930_v57  ;;  %v8838_v57 = vld [vmem:[%s8095_s23 + $0xbc] sm:$0xff]  }
  0xb5   : > { %6986 = vmatprep.subr.bf16.mxu0 %v7931_v59  ;;  %7002 = vmatprep.subr.bf16.mxu1 %v7931_v59 }
  0xb6   : > { %6964 = vmatprep.mubr.msk.bf16.mxu0 %vm105_vm0, %v8338_v22  ;;  %6980 = vmatprep.mubr.msk.bf16.mxu1 %vm105_vm0, %v8538_v60  ;;  %v7955_v22 = vld [vmem:[%s9060_s1 + $0x1c8] sm:$0xff]  }
  0xb8   : > { %6987 = vmatpush3.bf16.msra.mxu0 %v7931_v59  ;;  %7003 = vmatpush3.bf16.msra.mxu1 %v7931_v59  ;;  %v8852_v59 = vld [vmem:[%s8095_s23 + $0xc4] sm:$0xff]  }
  0xb9   : > { %6988 = vmatprep.subr.bf16.mxu0 %v7934_v61  ;;  %7004 = vmatprep.subr.bf16.mxu1 %v7934_v61 }
  0xbb   : > { %6965 = vmatmul.mubr.msk.bf16.gmra.mrb[4].mxu0 %vm105_vm0, %v8352_v25  ;;  %6981 = vmatmul.mubr.msk.bf16.gmra.mrb[4].mxu1 %vm105_vm0, %v8548_v62  ;;  %v7958_v25 = vld [vmem:[%s9060_s1 + $0x1d0] sm:$0xff]  }
  0xbc   : > { %6989 = vmatpush3.bf16.msra.mxu0 %v7934_v61  ;;  %7005 = vmatpush3.bf16.msra.mxu1 %v7934_v61  ;;  %v8858_v61 = vld [vmem:[%s8095_s23 + $0xcc] sm:$0xff]  }
  0xbd   : > { %6990 = vmatprep.subr.bf16.mxu0 %v7935_v63  ;;  %7006 = vmatprep.subr.bf16.mxu1 %v7935_v63 }
  0xbe   : > { %6992 = vmatprep.mubr.msk.bf16.mxu0 %vm105_vm0, %v8358_v27  ;;  %7008 = vmatprep.mubr.msk.bf16.mxu1 %vm105_vm0, %v8558_v1  ;;  %v7959_v27 = vld [vmem:[%s9060_s1 + $0x1d8] sm:$0xff]  }
  0xc0   : > { %6991 = vmatpush3.bf16.msra.mxu0 %v7935_v63  ;;  %7007 = vmatpush3.bf16.msra.mxu1 %v7935_v63  ;;  %v8872_v63 = vld [vmem:[%s8095_s23 + $0xd4] ss:$0 sps:$4 sm:$0xff]  }
  0xc1   : > { %7016 = vmatprep.subr.bf16.mxu0 %v7938_v2  ;;  %7032 = vmatprep.subr.bf16.mxu1 %v7938_v2 }
  0xc3   : > { %6993 = vmatmul.mubr.msk.bf16.vlgmr.msra.gmra.mrb[0].mxu0 %vm105_vm0, %v8372_v30  ;;  %7009 = vmatmul.mubr.msk.bf16.vlgmr.msra.gmra.mrb[0].mxu1 %vm105_vm0, %v8572_v3  ;;  %v7962_v30 = vld [vmem:[%s9060_s1 + $0x1e0] sm:$0xff]  }
  0xc4   : > { %7017 = vmatpush3.bf16.msra.mxu0 %v7938_v2  ;;  %7033 = vmatpush3.bf16.msra.mxu1 %v7938_v2  ;;  %v8878_v2 = vld [vmem:[%s8095_s23 + $0xc0] sm:$0xff]  }
  0xc5   : > { %7018 = vmatprep.subr.bf16.mxu0 %v7939_v4  ;;  %7034 = vmatprep.subr.bf16.mxu1 %v7939_v4 }
  0xc6   : > { %6996 = vmatprep.mubr.msk.bf16.mxu0 %vm105_vm0, %v8378_v32  ;;  %7012 = vmatprep.mubr.msk.bf16.mxu1 %vm105_vm0, %v8578_v5  ;;  %v7963_v32 = vld [vmem:[%s9060_s1 + $0x1e8] sm:$0xff]  }
  0xc8   : > { %7019 = vmatpush3.bf16.msra.mxu0 %v7939_v4  ;;  %7035 = vmatpush3.bf16.msra.mxu1 %v7939_v4  ;;  %v8892_v4 = vld [vmem:[%s8095_s23 + $0xc8] sm:$0xff]  }
  0xc9   : > { %7020 = vmatprep.subr.bf16.mxu0 %v7942_v6  ;;  %7036 = vmatprep.subr.bf16.mxu1 %v7942_v6 }
  0xcb   : > { %6997 = vmatmul.mubr.msk.bf16.gmra.mrb[4].mxu0 %vm105_vm0, %v8392_v33  ;;  %7013 = vmatmul.mubr.msk.bf16.gmra.mrb[4].mxu1 %vm105_vm0, %v8592_v7  ;;  %v7966_v33 = vld [vmem:[%s9060_s1 + $0x1f0] sm:$0xff]  }
  0xcc   : > { %7021 = vmatpush3.bf16.msra.mxu0 %v7942_v6  ;;  %7037 = vmatpush3.bf16.msra.mxu1 %v7942_v6  ;;  %v8898_v6 = vld [vmem:[%s8095_s23 + $0xd0] sm:$0xff]  }
  0xcd   : > { %7022 = vmatprep.subr.bf16.mxu0 %v7943_v8  ;;  %7038 = vmatprep.subr.bf16.mxu1 %v7943_v8 }
  0xce   : > { %7024 = vmatprep.mubr.msk.bf16.mxu0 %vm105_vm0, %v8398_v34  ;;  %7040 = vmatprep.mubr.msk.bf16.mxu1 %vm105_vm0, %v8598_v9  ;;  %v7967_v34 = vld [vmem:[%s9060_s1 + $0x1f8] sm:$0xff]  }
  0xd0   : > { %7023 = vmatpush3.bf16.msra.mxu0 %v7943_v8  ;;  %7039 = vmatpush3.bf16.msra.mxu1 %v7943_v8  ;;  %v8912_v8 = vld [vmem:[%s8095_s23 + $0xd8] ss:$0 sps:$4 sm:$0xff]  }
  0xd1   : > { %7048 = vmatprep.subr.bf16.mxu0 %v7946_v11  ;;  %7064 = vmatprep.subr.bf16.mxu1 %v7946_v11 }
  0xd3   : > { %7025 = vmatmul.mubr.msk.bf16.vlgmr.msra.gmra.mrb[0].mxu0 %vm105_vm0, %v8412_v35  ;;  %7041 = vmatmul.mubr.msk.bf16.vlgmr.msra.gmra.mrb[0].mxu1 %vm105_vm0, %v8612_v12  ;;  %v7970_v35 = vld [vmem:[%s9060_s1 + $0x200] sm:$0xff]  }
  0xd4   : > { %7049 = vmatpush3.bf16.msra.mxu0 %v7946_v11  ;;  %7065 = vmatpush3.bf16.msra.mxu1 %v7946_v11  ;;  %v8008_v11 = vld [vmem:[%s8095_s23 + $0xdc] sm:$0xff]  }
  0xd5   : > { %7050 = vmatprep.subr.bf16.mxu0 %v7947_v13  ;;  %7066 = vmatprep.subr.bf16.mxu1 %v7947_v13 }
  0xd6   : > { %7028 = vmatprep.mubr.msk.bf16.mxu0 %vm105_vm0, %v8418_v36  ;;  %7044 = vmatprep.mubr.msk.bf16.mxu1 %vm105_vm0, %v8618_v14  ;;  %v7971_v36 = vld [vmem:[%s9060_s1 + $0x208] sm:$0xff]  }
  0xd8   : > { %7051 = vmatpush3.bf16.msra.mxu0 %v7947_v13  ;;  %7067 = vmatpush3.bf16.msra.mxu1 %v7947_v13  ;;  %v8009_v13 = vld [vmem:[%s8095_s23 + $0xe4] sm:$0xff]  }
  0xd9   : > { %7052 = vmatprep.subr.bf16.mxu0 %v7950_v15  ;;  %7068 = vmatprep.subr.bf16.mxu1 %v7950_v15 }
  0xdb   : > { %7029 = vmatmul.mubr.msk.bf16.gmra.mrb[4].mxu0 %vm105_vm0, %v8425_v37  ;;  %7045 = vmatmul.mubr.msk.bf16.gmra.mrb[4].mxu1 %vm105_vm0, %v8632_v16  ;;  %v8738_v37 = vld [vmem:[%s8095_s23 + $0xc0] sm:$0xff]  }
  0xdc   : > { %7053 = vmatpush3.bf16.msra.mxu0 %v7950_v15  ;;  %7069 = vmatpush3.bf16.msra.mxu1 %v7950_v15  ;;  %v8012_v15 = vld [vmem:[%s8095_s23 + $0xec] sm:$0xff]  }
  0xdd   : > { %7054 = vmatprep.subr.bf16.mxu0 %v7951_v17  ;;  %7070 = vmatprep.subr.bf16.mxu1 %v7951_v17 }
  0xde   : > { %7056 = vmatprep.mubr.msk.bf16.mxu0 %vm105_vm0, %v8438_v40  ;;  %7072 = vmatprep.mubr.msk.bf16.mxu1 %vm105_vm0, %v8638_v18  ;;  %v7975_v40 = vld [vmem:[%s9060_s1 + $0x218] sm:$0xff]  }
  0xe0   : > { %7055 = vmatpush3.bf16.msra.mxu0 %v7951_v17  ;;  %7071 = vmatpush3.bf16.msra.mxu1 %v7951_v17  ;;  %v8013_v17 = vld [vmem:[%s8095_s23 + $0xf4] ss:$0 sps:$4 sm:$0xff]  }
  0xe1   : > { %7080 = vmatprep.subr.bf16.mxu0 %v7954_v19  ;;  %7096 = vmatprep.subr.bf16.mxu1 %v7954_v19 }
  0xe3   : > { %7057 = vmatmul.mubr.msk.bf16.vlgmr.msra.gmra.mrb[0].mxu0 %vm105_vm0, %v8448_v42  ;;  %7073 = vmatmul.mubr.msk.bf16.vlgmr.msra.gmra.mrb[0].mxu1 %vm105_vm0, %v8652_v21  ;;  %v7978_v42 = vld [vmem:[%s9060_s1 + $0x220] sm:$0xff]  }
  0xe4   : > { %7081 = vmatpush3.bf16.msra.mxu0 %v7954_v19  ;;  %7097 = vmatpush3.bf16.msra.mxu1 %v7954_v19  ;;  %v8016_v19 = vld [vmem:[%s8095_s23 + $0xe0] sm:$0xff]  }
  0xe5   : > { %7082 = vmatprep.subr.bf16.mxu0 %v7955_v22  ;;  %7098 = vmatprep.subr.bf16.mxu1 %v7955_v22 }
  0xe6   : > { %7060 = vmatprep.mubr.msk.bf16.mxu0 %vm105_vm0, %v8458_v44  ;;  %7076 = vmatprep.mubr.msk.bf16.mxu1 %vm105_vm0, %v8658_v23  ;;  %v7979_v44 = vld [vmem:[%s9060_s1 + $0x228] sm:$0xff]  }
  0xe8   : > { %7083 = vmatpush3.bf16.msra.mxu0 %v7955_v22  ;;  %7099 = vmatpush3.bf16.msra.mxu1 %v7955_v22  ;;  %v8017_v22 = vld [vmem:[%s8095_s23 + $0xe8] sm:$0xff]  }
  0xe9   : > { %7084 = vmatprep.subr.bf16.mxu0 %v7958_v25  ;;  %7100 = vmatprep.subr.bf16.mxu1 %v7958_v25 }
  0xeb   : > { %7061 = vmatmul.mubr.msk.bf16.gmra.mrb[4].mxu0 %vm105_vm0, %v8468_v46  ;;  %7077 = vmatmul.mubr.msk.bf16.gmra.mrb[4].mxu1 %vm105_vm0, %v8672_v26  ;;  %v7982_v46 = vld [vmem:[%s9060_s1 + $0x230] sm:$0xff]  }
  0xec   : > { %7085 = vmatpush3.bf16.msra.mxu0 %v7958_v25  ;;  %7101 = vmatpush3.bf16.msra.mxu1 %v7958_v25  ;;  %v8020_v25 = vld [vmem:[%s8095_s23 + $0xf0] sm:$0xff]  }
  0xed   : > { %7086 = vmatprep.subr.bf16.mxu0 %v7959_v27  ;;  %7102 = vmatprep.subr.bf16.mxu1 %v7959_v27 }
  0xee   : > { %7088 = vmatprep.mubr.msk.bf16.mxu0 %vm105_vm0, %v8478_v48  ;;  %7104 = vmatprep.mubr.msk.bf16.mxu1 %vm105_vm0, %v8678_v28  ;;  %v7983_v48 = vld [vmem:[%s9060_s1 + $0x238] sm:$0xff]  }
  0xf0   : > { %7087 = vmatpush3.bf16.msra.mxu0 %v7959_v27  ;;  %7103 = vmatpush3.bf16.msra.mxu1 %v7959_v27  ;;  %v8021_v27 = vld [vmem:[%s8095_s23 + $0xf8] ss:$0 sps:$4 sm:$0xff]  }
  0xf1   : > { %7112 = vmatprep.subr.bf16.mxu0 %v7962_v30  ;;  %7128 = vmatprep.subr.bf16.mxu1 %v7962_v30 }
  0xf3   : > { %7089 = vmatmul.mubr.msk.bf16.vlgmr.msra.gmra.mrb[0].mxu0 %vm105_vm0, %v8488_v50  ;;  %7105 = vmatmul.mubr.msk.bf16.vlgmr.msra.gmra.mrb[0].mxu1 %vm105_vm0, %v8692_v31  ;;  %v7986_v50 = vld [vmem:[%s9060_s1 + $0x240] sm:$0xff]  }
  0xf4   : > { %7113 = vmatpush3.bf16.msra.mxu0 %v7962_v30  ;;  %7129 = vmatpush3.bf16.msra.mxu1 %v7962_v30  ;;  %v8024_v30 = vld [vmem:[%s8095_s23 + $0xe4] sm:$0xff]  }
  0xf5   : > { %7114 = vmatprep.subr.bf16.mxu0 %v7963_v32  ;;  %7130 = vmatprep.subr.bf16.mxu1 %v7963_v32 }
  0xf6   : > { %7092 = vmatprep.mubr.msk.bf16.mxu0 %vm105_vm0, %v8498_v52  ;;  %7108 = vmatprep.mubr.msk.bf16.mxu1 %vm105_vm0, %v8698_v10  ;;  %v7987_v52 = vld [vmem:[%s9060_s1 + $0x248] sm:$0xff]  }
  0xf8   : > { %7115 = vmatpush3.bf16.msra.mxu0 %v7963_v32  ;;  %7131 = vmatpush3.bf16.msra.mxu1 %v7963_v32  ;;  %v8025_v32 = vld [vmem:[%s8095_s23 + $0xec] sm:$0xff]  }
  0xf9   : > { %7116 = vmatprep.subr.bf16.mxu0 %v7966_v33  ;;  %7132 = vmatprep.subr.bf16.mxu1 %v7966_v33 }
  0xfb   : > { %7093 = vmatmul.mubr.msk.bf16.gmra.mrb[4].mxu0 %vm105_vm0, %v8508_v54  ;;  %7109 = vmatmul.mubr.msk.bf16.gmra.mrb[4].mxu1 %vm105_vm0, %v8712_v20  ;;  %v7990_v54 = vld [vmem:[%s9060_s1 + $0x250] sm:$0xff]  }
  0xfc   : > { %7117 = vmatpush3.bf16.msra.mxu0 %v7966_v33  ;;  %7133 = vmatpush3.bf16.msra.mxu1 %v7966_v33  ;;  %v8028_v33 = vld [vmem:[%s8095_s23 + $0xf4] sm:$0xff]  }
  0xfd   : > { %7118 = vmatprep.subr.bf16.mxu0 %v7967_v34  ;;  %7134 = vmatprep.subr.bf16.mxu1 %v7967_v34 }
  0xfe   : > { %7120 = vmatprep.mubr.msk.bf16.mxu0 %vm105_vm0, %v8518_v56  ;;  %7136 = vmatprep.mubr.msk.bf16.mxu1 %vm105_vm0, %v8718_v24  ;;  %v7991_v56 = vld [vmem:[%s9060_s1 + $0x258] sm:$0xff]  }
 0x100   : > { %7119 = vmatpush3.bf16.msra.mxu0 %v7967_v34  ;;  %7135 = vmatpush3.bf16.msra.mxu1 %v7967_v34  ;;  %v8029_v34 = vld [vmem:[%s8095_s23 + $0xfc] ss:$0 sps:$4 sm:$0xff]  }
 0x101   : > { %7144 = vmatprep.subr.bf16.mxu0 %v7970_v35  ;;  %7160 = vmatprep.subr.bf16.mxu1 %v7970_v35 }
 0x103   : > { %7121 = vmatmul.mubr.msk.bf16.vlgmr.msra.gmra.mrb[0].mxu0 %vm105_vm0, %v8528_v58  ;;  %7137 = vmatmul.mubr.msk.bf16.vlgmr.msra.gmra.mrb[0].mxu1 %vm105_vm0, %v8732_v29  ;;  %v7994_v58 = vld [vmem:[%s9060_s1 + $0x260] sm:$0xff]  }
 0x104   : > { %7145 = vmatpush3.bf16.msra.mxu0 %v7970_v35  ;;  %7161 = vmatpush3.bf16.msra.mxu1 %v7970_v35  ;;  %v8032_v35 = vld [vmem:[%s8095_s23 + $0xe8] sm:$0xff]  }
 0x105   : > { %7146 = vmatprep.subr.bf16.mxu0 %v7971_v36  ;;  %7162 = vmatprep.subr.bf16.mxu1 %v7971_v36 }
 0x106   : > { %7124 = vmatprep.mubr.msk.bf16.mxu0 %vm105_vm0, %v8538_v60  ;;  %7140 = vmatprep.mubr.msk.bf16.mxu1 %vm105_vm0, %v8738_v37  ;;  %v7995_v60 = vld [vmem:[%s9060_s1 + $0x268] sm:$0xff]  }
 0x108   : > { %7147 = vmatpush3.bf16.msra.mxu0 %v7971_v36  ;;  %7163 = vmatpush3.bf16.msra.mxu1 %v7971_v36  ;;  %v8033_v36 = vld [vmem:[%s8095_s23 + $0xf0] sm:$0xff]  }
 0x109   : > { %7148 = vmatprep.subr.bf16.mxu0 %v7974_v38  ;;  %7164 = vmatprep.subr.bf16.mxu1 %v7974_v38 }
 0x10b   : > { %7125 = vmatmul.mubr.msk.bf16.gmra.mrb[4].mxu0 %vm105_vm0, %v8548_v62  ;;  %7141 = vmatmul.mubr.msk.bf16.gmra.mrb[4].mxu1 %vm105_vm0, %v8752_v39  ;;  %v7998_v62 = vld [vmem:[%s9060_s1 + $0x270] sm:$0xff]  }
 0x10c   : > { %7149 = vmatpush3.bf16.msra.mxu0 %v7974_v38  ;;  %7165 = vmatpush3.bf16.msra.mxu1 %v7974_v38  ;;  %v8036_v38 = vld [vmem:[%s8095_s23 + $0xf8] sm:$0xff]  }
 0x10d   : > { %7150 = vmatprep.subr.bf16.mxu0 %v7975_v40  ;;  %7166 = vmatprep.subr.bf16.mxu1 %v7975_v40 }
 0x10e   : > { %7152 = vmatprep.mubr.msk.bf16.mxu0 %vm105_vm0, %v8558_v1  ;;  %7168 = vmatprep.mubr.msk.bf16.mxu1 %vm105_vm0, %v8758_v41  ;;  %v7999_v1 = vld [vmem:[%s9060_s1 + $0x278] sm:$0xff]  }
 0x110   : > { %7151 = vmatpush3.bf16.msra.mxu0 %v7975_v40  ;;  %7167 = vmatpush3.bf16.msra.mxu1 %v7975_v40  ;;  %v8037_v40 = vld [vmem:[%s8095_s23 + $0x100] ss:$0 sps:$4 sm:$0xff]  }
 0x111   : > { %7176 = vmatprep.subr.bf16.mxu0 %v7978_v42  ;;  %7192 = vmatprep.subr.bf16.mxu1 %v7978_v42 }
 0x113   : > { %7153 = vmatmul.mubr.msk.bf16.vlgmr.msra.gmra.mrb[0].mxu0 %vm105_vm0, %v8572_v3  ;;  %7169 = vmatmul.mubr.msk.bf16.vlgmr.msra.gmra.mrb[0].mxu1 %vm105_vm0, %v8772_v43  ;;  %v8002_v3 = vld [vmem:[%s9060_s1 + $0x280] sm:$0xff]  }
 0x114   : > { %7177 = vmatpush3.bf16.msra.mxu0 %v7978_v42  ;;  %7193 = vmatpush3.bf16.msra.mxu1 %v7978_v42  ;;  %v8040_v42 = vld [vmem:[%s8095_s23 + $0xec] sm:$0xff]  }
 0x115   : > { %7178 = vmatprep.subr.bf16.mxu0 %v7979_v44  ;;  %7194 = vmatprep.subr.bf16.mxu1 %v7979_v44 }
 0x116   : > { %7156 = vmatprep.mubr.msk.bf16.mxu0 %vm105_vm0, %v8578_v5  ;;  %7172 = vmatprep.mubr.msk.bf16.mxu1 %vm105_vm0, %v8778_v45  ;;  %v8003_v5 = vld [vmem:[%s9060_s1 + $0x288] sm:$0xff]  }
 0x118   : > { %7179 = vmatpush3.bf16.msra.mxu0 %v7979_v44  ;;  %7195 = vmatpush3.bf16.msra.mxu1 %v7979_v44  ;;  %v8042_v44 = vld [vmem:[%s8095_s23 + $0xfc] sm:$0xff]  }
 0x119   : > { %7180 = vmatprep.subr.bf16.mxu0 %v7982_v46  ;;  %7196 = vmatprep.subr.bf16.mxu1 %v7982_v46 }
 0x11b   : > { %7157 = vmatmul.mubr.msk.bf16.gmra.mrb[4].mxu0 %vm105_vm0, %v8592_v7  ;;  %7173 = vmatmul.mubr.msk.bf16.gmra.mrb[4].mxu1 %vm105_vm0, %v8792_v47  ;;  %v8006_v7 = vld [vmem:[%s9060_s1 + $0x290] sm:$0xff]  }
 0x11c   : > { %7181 = vmatpush3.bf16.msra.mxu0 %v7982_v46  ;;  %7197 = vmatpush3.bf16.msra.mxu1 %v7982_v46 }
 0x11d   : > { %7182 = vmatprep.subr.bf16.mxu0 %v7983_v48  ;;  %7198 = vmatprep.subr.bf16.mxu1 %v7983_v48 }
 0x11e   : > { %7184 = vmatprep.mubr.msk.bf16.mxu0 %vm105_vm0, %v8598_v9  ;;  %7200 = vmatprep.mubr.msk.bf16.mxu1 %vm105_vm0, %v8798_v49  ;;  %v8007_v9 = vld [vmem:[%s9060_s1 + $0x298] sm:$0xff]  }
 0x120   : > { %7183 = vmatpush3.bf16.msra.mxu0 %v7983_v48  ;;  %7199 = vmatpush3.bf16.msra.mxu1 %v7983_v48 }
 0x121   : > { %7208 = vmatprep.subr.bf16.mxu0 %v7986_v50  ;;  %7224 = vmatprep.subr.bf16.mxu1 %v7986_v50 }
 0x123   : > { %7185 = vmatmul.mubr.msk.bf16.vlgmr.msra.gmra.mrb[0].mxu0 %vm105_vm0, %v8612_v12  ;;  %7201 = vmatmul.mubr.msk.bf16.vlgmr.msra.gmra.mrb[0].mxu1 %vm105_vm0, %v8812_v51  ;;  %v8010_v12 = vld [vmem:[%s9060_s1 + $0x2a0] sm:$0xff]  }
 0x124   : > { %7209 = vmatpush3.bf16.msra.mxu0 %v7986_v50  ;;  %7225 = vmatpush3.bf16.msra.mxu1 %v7986_v50 }
 0x125   : > { %7210 = vmatprep.subr.bf16.mxu0 %v7987_v52  ;;  %7226 = vmatprep.subr.bf16.mxu1 %v7987_v52 }
 0x126   : > { %7188 = vmatprep.mubr.msk.bf16.mxu0 %vm105_vm0, %v8618_v14  ;;  %7204 = vmatprep.mubr.msk.bf16.mxu1 %vm105_vm0, %v8818_v53  ;;  %v8011_v14 = vld [vmem:[%s9060_s1 + $0x2a8] sm:$0xff]  }
 0x128   : > { %7211 = vmatpush3.bf16.msra.mxu0 %v7987_v52  ;;  %7227 = vmatpush3.bf16.msra.mxu1 %v7987_v52 }
 0x129   : > { %7212 = vmatprep.subr.bf16.mxu0 %v7990_v54  ;;  %7228 = vmatprep.subr.bf16.mxu1 %v7990_v54 }
 0x12b   : > { %7189 = vmatmul.mubr.msk.bf16.gmra.mrb[4].mxu0 %vm105_vm0, %v8632_v16  ;;  %7205 = vmatmul.mubr.msk.bf16.gmra.mrb[4].mxu1 %vm105_vm0, %v8832_v55  ;;  %v8014_v16 = vld [vmem:[%s9060_s1 + $0x2b0] sm:$0xff]  }
 0x12c   : > { %7213 = vmatpush3.bf16.msra.mxu0 %v7990_v54  ;;  %7229 = vmatpush3.bf16.msra.mxu1 %v7990_v54 }
 0x12d   : > { %7214 = vmatprep.subr.bf16.mxu0 %v7991_v56  ;;  %7230 = vmatprep.subr.bf16.mxu1 %v7991_v56 }
 0x12e   : > { %7216 = vmatprep.mubr.msk.bf16.mxu0 %vm105_vm0, %v8638_v18  ;;  %7232 = vmatprep.mubr.msk.bf16.mxu1 %vm105_vm0, %v8838_v57  ;;  %v8015_v18 = vld [vmem:[%s9060_s1 + $0x2b8] sm:$0xff]  }
 0x130   : > { %7215 = vmatpush3.bf16.msra.mxu0 %v7991_v56  ;;  %7231 = vmatpush3.bf16.msra.mxu1 %v7991_v56 }
 0x131   : > { %7240 = vmatprep.subr.bf16.mxu0 %v7994_v58  ;;  %7256 = vmatprep.subr.bf16.mxu1 %v7994_v58 }
 0x133   : > { %7217 = vmatmul.mubr.msk.bf16.vlgmr.msra.gmra.mrb[0].mxu0 %vm105_vm0, %v8652_v21  ;;  %7233 = vmatmul.mubr.msk.bf16.vlgmr.msra.gmra.mrb[0].mxu1 %vm105_vm0, %v8852_v59  ;;  %v8018_v21 = vld [vmem:[%s9060_s1 + $0x2c0] sm:$0xff]  }
 0x134   : > { %7241 = vmatpush3.bf16.msra.mxu0 %v7994_v58  ;;  %7257 = vmatpush3.bf16.msra.mxu1 %v7994_v58 }
 0x135   : > { %7242 = vmatprep.subr.bf16.mxu0 %v7995_v60  ;;  %7258 = vmatprep.subr.bf16.mxu1 %v7995_v60 }
 0x136   : > { %7220 = vmatprep.mubr.msk.bf16.mxu0 %vm105_vm0, %v8658_v23  ;;  %7236 = vmatprep.mubr.msk.bf16.mxu1 %vm105_vm0, %v8858_v61  ;;  %v8019_v23 = vld [vmem:[%s9060_s1 + $0x2c8] sm:$0xff]  }
 0x138   : > { %7243 = vmatpush3.bf16.msra.mxu0 %v7995_v60  ;;  %7259 = vmatpush3.bf16.msra.mxu1 %v7995_v60 }
 0x139   : > { %7244 = vmatprep.subr.bf16.mxu0 %v7998_v62  ;;  %7260 = vmatprep.subr.bf16.mxu1 %v7998_v62 }
 0x13b   : > { %7221 = vmatmul.mubr.msk.bf16.gmra.mrb[4].mxu0 %vm105_vm0, %v8672_v26  ;;  %7237 = vmatmul.mubr.msk.bf16.gmra.mrb[4].mxu1 %vm105_vm0, %v8872_v63  ;;  %v8022_v26 = vld [vmem:[%s9060_s1 + $0x2d0] sm:$0xff]  }
 0x13c   : > { %7245 = vmatpush3.bf16.msra.mxu0 %v7998_v62  ;;  %7261 = vmatpush3.bf16.msra.mxu1 %v7998_v62 }
 0x13d   : > { %7246 = vmatprep.subr.bf16.mxu0 %v7999_v1  ;;  %7262 = vmatprep.subr.bf16.mxu1 %v7999_v1 }
 0x13e   : > { %7248 = vmatprep.mubr.msk.bf16.mxu0 %vm105_vm0, %v8678_v28  ;;  %7264 = vmatprep.mubr.msk.bf16.mxu1 %vm105_vm0, %v8878_v2  ;;  %v8023_v28 = vld [vmem:[%s9060_s1 + $0x2d8] sm:$0xff]  }
 0x140   : > { %7247 = vmatpush3.bf16.msra.mxu0 %v7999_v1  ;;  %7263 = vmatpush3.bf16.msra.mxu1 %v7999_v1 }
 0x141   : > { %7272 = vmatprep.subr.bf16.mxu0 %v8002_v3  ;;  %7288 = vmatprep.subr.bf16.mxu1 %v8002_v3 }
 0x143   : > { %7249 = vmatmul.mubr.msk.bf16.vlgmr.msra.gmra.mrb[0].mxu0 %vm105_vm0, %v8692_v31  ;;  %7265 = vmatmul.mubr.msk.bf16.vlgmr.msra.gmra.mrb[0].mxu1 %vm105_vm0, %v8892_v4  ;;  %v8026_v31 = vld [vmem:[%s9060_s1 + $0x2e0] sm:$0xff]  }
 0x144   : > { %7273 = vmatpush3.bf16.msra.mxu0 %v8002_v3  ;;  %7289 = vmatpush3.bf16.msra.mxu1 %v8002_v3 }
 0x145   : > { %7274 = vmatprep.subr.bf16.mxu0 %v8003_v5  ;;  %7290 = vmatprep.subr.bf16.mxu1 %v8003_v5 }
 0x146   : > { %7252 = vmatprep.mubr.msk.bf16.mxu0 %vm105_vm0, %v8698_v10  ;;  %7268 = vmatprep.mubr.msk.bf16.mxu1 %vm105_vm0, %v8898_v6  ;;  %v8027_v10 = vld [vmem:[%s9060_s1 + $0x2e8] sm:$0xff]  }
 0x148   : > { %7275 = vmatpush3.bf16.msra.mxu0 %v8003_v5  ;;  %7291 = vmatpush3.bf16.msra.mxu1 %v8003_v5 }
 0x149   : > { %7276 = vmatprep.subr.bf16.mxu0 %v8006_v7  ;;  %7292 = vmatprep.subr.bf16.mxu1 %v8006_v7 }
 0x14b   : > { %7253 = vmatmul.mubr.msk.bf16.gmra.mrb[4].mxu0 %vm105_vm0, %v8712_v20  ;;  %7269 = vmatmul.mubr.msk.bf16.gmra.mrb[4].mxu1 %vm105_vm0, %v8912_v8  ;;  %v8030_v20 = vld [vmem:[%s9060_s1 + $0x2f0] sm:$0xff]  }
 0x14c   : > { %7277 = vmatpush3.bf16.msra.mxu0 %v8006_v7  ;;  %7293 = vmatpush3.bf16.msra.mxu1 %v8006_v7 }
 0x14d   : > { %7278 = vmatprep.subr.bf16.mxu0 %v8007_v9  ;;  %7294 = vmatprep.subr.bf16.mxu1 %v8007_v9 }
 0x14e   : > { %7280 = vmatprep.mubr.msk.bf16.mxu0 %vm105_vm0, %v8718_v24  ;;  %7296 = vmatprep.mubr.msk.bf16.mxu1 %vm105_vm0, %v8008_v11  ;;  %v8031_v24 = vld [vmem:[%s9060_s1 + $0x2f8] sm:$0xff]  }
 0x150   : > { %7279 = vmatpush3.bf16.msra.mxu0 %v8007_v9  ;;  %7295 = vmatpush3.bf16.msra.mxu1 %v8007_v9 }
 0x151   : > { %7304 = vmatprep.subr.bf16.mxu0 %v8010_v12  ;;  %7320 = vmatprep.subr.bf16.mxu1 %v8010_v12 }
 0x153   : > { %7281 = vmatmul.mubr.msk.bf16.vlgmr.msra.gmra.mrb[0].mxu0 %vm105_vm0, %v8732_v29  ;;  %7297 = vmatmul.mubr.msk.bf16.vlgmr.msra.gmra.mrb[0].mxu1 %vm105_vm0, %v8009_v13  ;;  %v8034_v29 = vld [vmem:[%s9060_s1 + $0x300] sm:$0xff]  }
 0x154   : > { %7305 = vmatpush3.bf16.msra.mxu0 %v8010_v12  ;;  %7321 = vmatpush3.bf16.msra.mxu1 %v8010_v12 }
 0x155   : > { %7306 = vmatprep.subr.bf16.mxu0 %v8011_v14  ;;  %7322 = vmatprep.subr.bf16.mxu1 %v8011_v14 }
 0x156   : > { %7284 = vmatprep.mubr.msk.bf16.mxu0 %vm105_vm0, %v8738_v37  ;;  %7300 = vmatprep.mubr.msk.bf16.mxu1 %vm105_vm0, %v8012_v15  ;;  %v8035_v37 = vld [vmem:[%s9060_s1 + $0x308] sm:$0xff]  }
 0x158   : > { %7307 = vmatpush3.bf16.msra.mxu0 %v8011_v14  ;;  %7323 = vmatpush3.bf16.msra.mxu1 %v8011_v14 }
 0x159   : > { %7308 = vmatprep.subr.bf16.mxu0 %v8014_v16  ;;  %7324 = vmatprep.subr.bf16.mxu1 %v8014_v16 }
 0x15b   : > { %7285 = vmatmul.mubr.msk.bf16.gmra.mrb[4].mxu0 %vm105_vm0, %v8752_v39  ;;  %7301 = vmatmul.mubr.msk.bf16.gmra.mrb[4].mxu1 %vm105_vm0, %v8013_v17  ;;  %v8038_v39 = vld [vmem:[%s9060_s1 + $0x310] sm:$0xff]  }
 0x15c   : > { %7309 = vmatpush3.bf16.msra.mxu0 %v8014_v16  ;;  %7325 = vmatpush3.bf16.msra.mxu1 %v8014_v16 }
 0x15d   : > { %7310 = vmatprep.subr.bf16.mxu0 %v8015_v18  ;;  %7326 = vmatprep.subr.bf16.mxu1 %v8015_v18 }
 0x15e   : > { %7312 = vmatprep.mubr.msk.bf16.mxu0 %vm105_vm0, %v8758_v41  ;;  %7328 = vmatprep.mubr.msk.bf16.mxu1 %vm105_vm0, %v8016_v19  ;;  %v8039_v41 = vld [vmem:[%s9060_s1 + $0x318] sm:$0xff]  }
 0x160   : > { %7311 = vmatpush3.bf16.msra.mxu0 %v8015_v18  ;;  %7327 = vmatpush3.bf16.msra.mxu1 %v8015_v18 }
 0x161   : > { %7336 = vmatprep.subr.bf16.mxu0 %v8018_v21  ;;  %7352 = vmatprep.subr.bf16.mxu1 %v8018_v21 }
 0x163   : > { %7313 = vmatmul.mubr.msk.bf16.vlgmr.msra.gmra.mrb[0].mxu0 %vm105_vm0, %v8772_v43  ;;  %7329 = vmatmul.mubr.msk.bf16.vlgmr.msra.gmra.mrb[0].mxu1 %vm105_vm0, %v8017_v22  ;;  %v8041_v43 = vld [vmem:[%s8095_s23 + $0xf4] sm:$0xff]  }
 0x164   : > { %7337 = vmatpush3.bf16.msra.mxu0 %v8018_v21  ;;  %7353 = vmatpush3.bf16.msra.mxu1 %v8018_v21 }
 0x165   : > { %7338 = vmatprep.subr.bf16.mxu0 %v8019_v23  ;;  %7354 = vmatprep.subr.bf16.mxu1 %v8019_v23 }
 0x166   : > { %7316 = vmatprep.mubr.msk.bf16.mxu0 %vm105_vm0, %v8778_v45  ;;  %7332 = vmatprep.mubr.msk.bf16.mxu1 %vm105_vm0, %v8020_v25  ;;  %v8043_v45 = vld [vmem:[%s8095_s23 + $0x104] ss:$0 sps:$4 sm:$0xff]   ;;  %s6231_s23 = smul.u32 12, %s8050_s14  ;;  %s21_s14 = sadd.s32 1, %s8050_s14  }
 0x167   : > { %p18_p0 = scmp.ge.s32.totalorder %s21_s14, 3  }
 0x168   : > { %7339 = vmatpush3.bf16.msra.mxu0 %v8019_v23  ;;  %7355 = vmatpush3.bf16.msra.mxu1 %v8019_v23  ;;  %s5389_s11 = scalar_lea.vmem %s9062_s3, %s6231_s23 }
 0x169   : > { %7340 = vmatprep.subr.bf16.mxu0 %v8022_v26  ;;  %7356 = vmatprep.subr.bf16.mxu1 %v8022_v26 }
 0x16b   : > { %7317 = vmatmul.mubr.msk.bf16.gmra.mrb[4].mxu0 %vm105_vm0, %v8792_v47  ;;  %7333 = vmatmul.mubr.msk.bf16.gmra.mrb[4].mxu1 %vm105_vm0, %v8021_v27 }
 0x16c   : > { %7341 = vmatpush3.bf16.msra.mxu0 %v8022_v26  ;;  %7357 = vmatpush3.bf16.msra.mxu1 %v8022_v26 }
 0x16d   : > { %7342 = vmatprep.subr.bf16.mxu0 %v8023_v28  ;;  %7358 = vmatprep.subr.bf16.mxu1 %v8023_v28 }
 0x16e   : > { %7344 = vmatprep.mubr.msk.bf16.mxu0 %vm105_vm0, %v8798_v49  ;;  %7360 = vmatprep.mubr.msk.bf16.mxu1 %vm105_vm0, %v8024_v30 }
 0x170   : > { %7343 = vmatpush3.bf16.msra.mxu0 %v8023_v28  ;;  %7359 = vmatpush3.bf16.msra.mxu1 %v8023_v28 }
 0x171   : > { %7368 = vmatprep.subr.bf16.mxu0 %v8026_v31  ;;  %7384 = vmatprep.subr.bf16.mxu1 %v8026_v31 }
 0x173   : > { %7345 = vmatmul.mubr.msk.bf16.vlgmr.msra.gmra.mrb[0].mxu0 %vm105_vm0, %v8812_v51  ;;  %7361 = vmatmul.mubr.msk.bf16.vlgmr.msra.gmra.mrb[0].mxu1 %vm105_vm0, %v8025_v32 }
 0x174   : > { %7369 = vmatpush3.bf16.msra.mxu0 %v8026_v31  ;;  %7385 = vmatpush3.bf16.msra.mxu1 %v8026_v31 }
 0x175   : > { %7370 = vmatprep.subr.bf16.mxu0 %v8027_v10  ;;  %7386 = vmatprep.subr.bf16.mxu1 %v8027_v10 }
 0x176   : > { %7348 = vmatprep.mubr.msk.bf16.mxu0 %vm105_vm0, %v8818_v53  ;;  %7364 = vmatprep.mubr.msk.bf16.mxu1 %vm105_vm0, %v8028_v33 }
 0x178   : > { %7371 = vmatpush3.bf16.msra.mxu0 %v8027_v10  ;;  %7387 = vmatpush3.bf16.msra.mxu1 %v8027_v10 }
 0x179   : > { %7372 = vmatprep.subr.bf16.mxu0 %v8030_v20  ;;  %7388 = vmatprep.subr.bf16.mxu1 %v8030_v20 }
 0x17b   : > { %7349 = vmatmul.mubr.msk.bf16.gmra.mrb[4].mxu0 %vm105_vm0, %v8832_v55  ;;  %7365 = vmatmul.mubr.msk.bf16.gmra.mrb[4].mxu1 %vm105_vm0, %v8029_v34 }
 0x17c   : > { %7373 = vmatpush3.bf16.msra.mxu0 %v8030_v20  ;;  %7389 = vmatpush3.bf16.msra.mxu1 %v8030_v20 }
 0x17d   : > { %7374 = vmatprep.subr.bf16.mxu0 %v8031_v24  ;;  %7390 = vmatprep.subr.bf16.mxu1 %v8031_v24 }
 0x17e   : > { %7376 = vmatprep.mubr.msk.bf16.mxu0 %vm105_vm0, %v8838_v57  ;;  %7392 = vmatprep.mubr.msk.bf16.mxu1 %vm105_vm0, %v8032_v35 }
 0x180   : > { %7375 = vmatpush3.bf16.msra.mxu0 %v8031_v24  ;;  %7391 = vmatpush3.bf16.msra.mxu1 %v8031_v24 }
 0x181   : > { %7400 = vmatprep.subr.bf16.mxu0 %v8034_v29  ;;  %7416 = vmatprep.subr.bf16.mxu1 %v8034_v29 }
 0x183   : > { %7377 = vmatmul.mubr.msk.bf16.vlgmr.msra.gmra.mrb[0].mxu0 %vm105_vm0, %v8852_v59  ;;  %7393 = vmatmul.mubr.msk.bf16.vlgmr.msra.gmra.mrb[0].mxu1 %vm105_vm0, %v8033_v36 }
 0x184   : > { %7401 = vmatpush3.bf16.msra.mxu0 %v8034_v29  ;;  %7417 = vmatpush3.bf16.msra.mxu1 %v8034_v29 }
 0x185   : > { %7402 = vmatprep.subr.bf16.mxu0 %v8035_v37  ;;  %7418 = vmatprep.subr.bf16.mxu1 %v8035_v37 }
 0x186   : > { %7380 = vmatprep.mubr.msk.bf16.mxu0 %vm105_vm0, %v8858_v61  ;;  %7396 = vmatprep.mubr.msk.bf16.mxu1 %vm105_vm0, %v8036_v38 }
 0x188   : > { %7403 = vmatpush3.bf16.msra.mxu0 %v8035_v37  ;;  %7419 = vmatpush3.bf16.msra.mxu1 %v8035_v37 }
 0x189   : > { %7404 = vmatprep.subr.bf16.mxu0 %v8038_v39  ;;  %7420 = vmatprep.subr.bf16.mxu1 %v8038_v39 }
 0x18b   : > { %7381 = vmatmul.mubr.msk.bf16.gmra.mrb[4].mxu0 %vm105_vm0, %v8872_v63  ;;  %7397 = vmatmul.mubr.msk.bf16.gmra.mrb[4].mxu1 %vm105_vm0, %v8037_v40 }
 0x18c   : > { %7405 = vmatpush3.bf16.msra.mxu0 %v8038_v39  ;;  %7421 = vmatpush3.bf16.msra.mxu1 %v8038_v39 }
 0x18d   : > { %7406 = vmatprep.subr.bf16.mxu0 %v8039_v41  ;;  %7422 = vmatprep.subr.bf16.mxu1 %v8039_v41 }
 0x18e   : > { %7408 = vmatprep.mubr.msk.bf16.mxu0 %vm105_vm0, %v8878_v2  ;;  %7424 = vmatprep.mubr.msk.bf16.mxu1 %vm105_vm0, %v8040_v42 }
 0x190   : > { %7407 = vmatpush3.bf16.msra.mxu0 %v8039_v41  ;;  %7423 = vmatpush3.bf16.msra.mxu1 %v8039_v41 }
 0x193   : > { %7409 = vmatmul.mubr.msk.bf16.vlgmr.msra.gmra.mrb[0].mxu0 %vm105_vm0, %v8892_v4  ;;  %7425 = vmatmul.mubr.msk.bf16.vlgmr.msra.gmra.mrb[0].mxu1 %vm105_vm0, %v8041_v43 }
 0x194   : > { %7412 = vmatprep.mubr.msk.bf16.mxu0 %vm105_vm0, %v8898_v6  ;;  %7428 = vmatprep.mubr.msk.bf16.mxu1 %vm105_vm0, %v8042_v44 }
 0x19b   : > { %7413 = vmatmul.mubr.msk.bf16.gmra.mrb[4].mxu0 %vm105_vm0, %v8912_v8  ;;  %7429 = vmatmul.mubr.msk.bf16.gmra.mrb[4].mxu1 %vm105_vm0, %v8043_v45 }
 0x266   : > { %v7410_v46 = vpop.f32.mrb[0].mxu0  ;;  %v7426_v47 = vpop.f32.mrb[0].mxu1 }
 0x267   : > { %v5373_v48 = vmax.f32 %v7410_v46, %v7426_v47  ;;  %v5237_v49 = vpop.f32.mrb[1].mxu0  ;;  %v5336_v50 = vpop.f32.mrb[1].mxu1 }
 0x268   : > { %v5371_v51 = vmax.f32 %v5237_v49, %v5336_v50  ;;  %v7411_v52 = vpop.f32.mrb[2].mxu0  ;;  %v7427_v53 = vpop.f32.mrb[2].mxu1 }
 0x269   : > { %v5374_v54 = vmax.f32 %v7411_v52, %v7427_v53  ;;  %v5240_v55 = vpop.f32.mrb[3].mxu0  ;;  %v5339_v56 = vpop.f32.mrb[3].mxu1 }
 0x26a   : > { %v5372_v57 = vmax.f32 %v5240_v55, %v5339_v56 }
 0x26b   : > { %v5391_v58 = vmax.f32 %v5373_v48, %v5374_v54 }
 0x26c   : > { %v5377_v59 = vmax.f32 %v5371_v51, %v5372_v57 }
 0x26d   : > { %v5392_v60 = vadd.f32 %v8075_v0, %v5391_v58 }
 0x26e   : > { %v5384_v61 = vadd.f32 %v8075_v0, %v5377_v59  ;;  %v7414_v62 = vpop.f32.mrb[4].mxu0  ;;  %v7430_v63 = vpop.f32.mrb[4].mxu1 }
 0x26f   : > { %v5393_v1 = vmax.f32 %v5392_v60, 0.0  ;;  %v5253_v2 = vpop.f32.mrb[5].mxu0  ;;  %v5352_v3 = vpop.f32.mrb[5].mxu1 }
 0x270   : > { %v5385_v4 = vmax.f32 %v5384_v61, 0.0  ;;  %v5375_v5 = vmax.f32 %v5253_v2, %v5352_v3  ;;  %v7415_v6 = vpop.f32.mrb[6].mxu0  ;;  %v7431_v7 = vpop.f32.mrb[6].mxu1 }
 0x271   : > { %v5394_v8 = vpack.c.bf16 %v5393_v1, %v5393_v1  ;;  %v5256_v9 = vpop.f32.mrb[7].mxu0  ;;  %v5355_v11 = vpop.f32.mrb[7].mxu1 }
 0x272   : > { %v5386_v12 = vpack.c.bf16 %v5385_v4, %v5385_v4  ;;  %v5376_v13 = vmax.f32 %v5256_v9, %v5355_v11 }
 0x273   : > { %5395 = vst [vmem:[%s5389_s11 + $0x4] sm:$0xf] %v5394_v8 }
 0x274   : > { %5390 = vst [vmem:[%s5389_s11] sm:$0xf] %v5386_v12  ;;  %v5396_v14 = vmax.f32 %v5375_v5, %v5376_v13 }
 0x276   : > { %v5397_v15 = vadd.f32 %v8075_v0, %v5396_v14  ;;  %20 = sbr.rel (!%p18_p0) target bundleno = 2 (0x2), region = 70 }
 0x278   : > { %v5398_v16 = vmax.f32 %v5397_v15, 0.0 }
 0x27a   : > { %v5399_v17 = vpack.c.bf16 %v5398_v16, %v5398_v16 }
 0x27c   : > { %5400 = vst [vmem:[%s5389_s11 + $0x8] sm:$0xf] %v5399_v17 }

// kernel: net_forward.5
= control target key start
LH: loop header
LB: loop body
LE: loop exit
PB: predicated region body
PF: predicated region fallthrough
CT: control target
= control target key end

     0   :  { %vm16_vm0 = vcmask 519168   ;;  %v12540_v1 = vmov 0   ;;  %s13173_s4 = smov 0   ;;  %s15386_s0 = inlined_call_operand.vmem [shape: bf16[1,18,144,32], index: 0, kind: input, shape index: {}]   ;;  %s15387_s1 = inlined_call_operand.vmem [shape: bf16[25,32,64], index: 1, kind: input, shape index: {}]   ;;  %s15388_s2 = inlined_call_operand.vmem [shape: f32[1,64], index: 2, kind: input, shape index: {}]   ;;  %s15389_s3 = inlined_call_operand.vmem [shape: bf16[1,11,88,64], index: 3, kind: output, shape index: {}]  }
   0x1   :  { %v12566_v0 = vld [vmem:[%s15388_s2] ss:$0 sm:$0xff]  ;;  %17 = vst.msk [vmem:[%s15389_s3] sm:$0xf] %vm16_vm0, %v12540_v1  ;;  %18 = vst.msk [vmem:[%s15389_s3 + $0x4] sm:$0xf] %vm16_vm0, %v12540_v1 }
   0x2   :  { %19 = vst.msk [vmem:[%s15389_s3 + $0x8] sm:$0xf] %vm16_vm0, %v12540_v1  ;;  %20 = vst.msk [vmem:[%s15389_s3 + $0xc] sm:$0xf] %vm16_vm0, %v12540_v1 }
   0x3   :  { %21 = vst.msk [vmem:[%s15389_s3 + $0x10] sm:$0xf] %vm16_vm0, %v12540_v1  ;;  %22 = vst.msk [vmem:[%s15389_s3 + $0x14] sm:$0xf] %vm16_vm0, %v12540_v1 }
   0x4   :  { %23 = vst.msk [vmem:[%s15389_s3 + $0x18] sm:$0xf] %vm16_vm0, %v12540_v1  ;;  %24 = vst.msk [vmem:[%s15389_s3 + $0x1c] sm:$0xf] %vm16_vm0, %v12540_v1 }
   0x5   :  { %25 = vst.msk [vmem:[%s15389_s3 + $0x20] sm:$0xf] %vm16_vm0, %v12540_v1  ;;  %26 = vst.msk [vmem:[%s15389_s3 + $0x24] sm:$0xf] %vm16_vm0, %v12540_v1 }
   0x6   :  { %27 = vst.msk [vmem:[%s15389_s3 + $0x28] sm:$0xf] %vm16_vm0, %v12540_v1  ;;  %28 = vst.msk [vmem:[%s15389_s3 + $0x2c] sm:$0xf] %vm16_vm0, %v12540_v1 }
   0x7   :  { %29 = vst.msk [vmem:[%s15389_s3 + $0x30] sm:$0xf] %vm16_vm0, %v12540_v1  ;;  %30 = vst.msk [vmem:[%s15389_s3 + $0x34] sm:$0xf] %vm16_vm0, %v12540_v1 }
   0x8   :  { %31 = vst.msk [vmem:[%s15389_s3 + $0x38] sm:$0xf] %vm16_vm0, %v12540_v1  ;;  %32 = vst.msk [vmem:[%s15389_s3 + $0x3c] sm:$0xf] %vm16_vm0, %v12540_v1 }
   0x9   :  { %33 = vst.msk [vmem:[%s15389_s3 + $0x40] sm:$0xf] %vm16_vm0, %v12540_v1  ;;  %34 = vst.msk [vmem:[%s15389_s3 + $0x44] sm:$0xf] %vm16_vm0, %v12540_v1 }
   0xa   :  { %35 = vst.msk [vmem:[%s15389_s3 + $0x48] sm:$0xf] %vm16_vm0, %v12540_v1  ;;  %36 = vst.msk [vmem:[%s15389_s3 + $0x4c] sm:$0xf] %vm16_vm0, %v12540_v1 }
   0xb   :  { %37 = vst.msk [vmem:[%s15389_s3 + $0x50] sm:$0xf] %vm16_vm0, %v12540_v1  ;;  %38 = vst.msk [vmem:[%s15389_s3 + $0x54] sm:$0xf] %vm16_vm0, %v12540_v1 }
   0xc   :  { %39 = vst.msk [vmem:[%s15389_s3 + $0x58] sm:$0xf] %vm16_vm0, %v12540_v1  ;;  %40 = vst.msk [vmem:[%s15389_s3 + $0x5c] sm:$0xf] %vm16_vm0, %v12540_v1 }
   0xd   :  { %41 = vst.msk [vmem:[%s15389_s3 + $0x60] sm:$0xf] %vm16_vm0, %v12540_v1  ;;  %42 = vst.msk [vmem:[%s15389_s3 + $0x64] sm:$0xf] %vm16_vm0, %v12540_v1 }
   0xe   :  { %43 = vst.msk [vmem:[%s15389_s3 + $0x68] sm:$0xf] %vm16_vm0, %v12540_v1  ;;  %44 = vst.msk [vmem:[%s15389_s3 + $0x6c] sm:$0xf] %vm16_vm0, %v12540_v1 }
   0xf   :  { %45 = vst.msk [vmem:[%s15389_s3 + $0x70] sm:$0xf] %vm16_vm0, %v12540_v1  ;;  %46 = vst.msk [vmem:[%s15389_s3 + $0x74] sm:$0xf] %vm16_vm0, %v12540_v1 }
  0x10   :  { %47 = vst.msk [vmem:[%s15389_s3 + $0x78] sm:$0xf] %vm16_vm0, %v12540_v1  ;;  %48 = vst.msk [vmem:[%s15389_s3 + $0x7c] sm:$0xf] %vm16_vm0, %v12540_v1 }
  0x11   :  { %49 = vst.msk [vmem:[%s15389_s3 + $0x80] sm:$0xf] %vm16_vm0, %v12540_v1  ;;  %50 = vst.msk [vmem:[%s15389_s3 + $0x84] sm:$0xf] %vm16_vm0, %v12540_v1 }
  0x12   :  { %51 = vst.msk [vmem:[%s15389_s3 + $0x88] sm:$0xf] %vm16_vm0, %v12540_v1  ;;  %52 = vst.msk [vmem:[%s15389_s3 + $0x8c] sm:$0xf] %vm16_vm0, %v12540_v1 }
  0x13   :  { %53 = vst.msk [vmem:[%s15389_s3 + $0x90] sm:$0xf] %vm16_vm0, %v12540_v1  ;;  %54 = vst.msk [vmem:[%s15389_s3 + $0x94] sm:$0xf] %vm16_vm0, %v12540_v1 }
  0x14   :  { %55 = vst.msk [vmem:[%s15389_s3 + $0x98] sm:$0xf] %vm16_vm0, %v12540_v1  ;;  %56 = vst.msk [vmem:[%s15389_s3 + $0x9c] sm:$0xf] %vm16_vm0, %v12540_v1 }
  0x15   :  { %57 = vst.msk [vmem:[%s15389_s3 + $0xa0] sm:$0xf] %vm16_vm0, %v12540_v1  ;;  %58 = vst.msk [vmem:[%s15389_s3 + $0xa4] sm:$0xf] %vm16_vm0, %v12540_v1 }
  0x16   :  { %59 = vst.msk [vmem:[%s15389_s3 + $0xa8] sm:$0xf] %vm16_vm0, %v12540_v1  ;;  %60 = vst.msk [vmem:[%s15389_s3 + $0xac] sm:$0xf] %vm16_vm0, %v12540_v1 }
  0x17   :  { %61 = vst.msk [vmem:[%s15389_s3 + $0xb0] sm:$0xf] %vm16_vm0, %v12540_v1  ;;  %62 = vst.msk [vmem:[%s15389_s3 + $0xb4] sm:$0xf] %vm16_vm0, %v12540_v1 }
  0x18   :  { %63 = vst.msk [vmem:[%s15389_s3 + $0xb8] sm:$0xf] %vm16_vm0, %v12540_v1  ;;  %64 = vst.msk [vmem:[%s15389_s3 + $0xbc] sm:$0xf] %vm16_vm0, %v12540_v1 }
  0x19   :  { %65 = vst.msk [vmem:[%s15389_s3 + $0xc0] sm:$0xf] %vm16_vm0, %v12540_v1  ;;  %66 = vst.msk [vmem:[%s15389_s3 + $0xc4] sm:$0xf] %vm16_vm0, %v12540_v1 }
  0x1a   :  { %67 = vst.msk [vmem:[%s15389_s3 + $0xc8] sm:$0xf] %vm16_vm0, %v12540_v1  ;;  %68 = vst.msk [vmem:[%s15389_s3 + $0xcc] sm:$0xf] %vm16_vm0, %v12540_v1 }
  0x1b   :  { %69 = vst.msk [vmem:[%s15389_s3 + $0xd0] sm:$0xf] %vm16_vm0, %v12540_v1  ;;  %70 = vst.msk [vmem:[%s15389_s3 + $0xd4] sm:$0xf] %vm16_vm0, %v12540_v1 }
  0x1c   :  { %71 = vst.msk [vmem:[%s15389_s3 + $0xd8] sm:$0xf] %vm16_vm0, %v12540_v1  ;;  %72 = vst.msk [vmem:[%s15389_s3 + $0xdc] sm:$0xf] %vm16_vm0, %v12540_v1 }
  0x1d   :  { %73 = vst.msk [vmem:[%s15389_s3 + $0xe0] sm:$0xf] %vm16_vm0, %v12540_v1  ;;  %74 = vst.msk [vmem:[%s15389_s3 + $0xe4] sm:$0xf] %vm16_vm0, %v12540_v1 }
  0x1e   :  { %75 = vst.msk [vmem:[%s15389_s3 + $0xe8] sm:$0xf] %vm16_vm0, %v12540_v1  ;;  %76 = vst.msk [vmem:[%s15389_s3 + $0xec] sm:$0xf] %vm16_vm0, %v12540_v1 }
  0x1f   :  { %77 = vst.msk [vmem:[%s15389_s3 + $0xf0] sm:$0xf] %vm16_vm0, %v12540_v1  ;;  %78 = vst.msk [vmem:[%s15389_s3 + $0xf4] sm:$0xf] %vm16_vm0, %v12540_v1 }
  0x20   :  { %79 = vst.msk [vmem:[%s15389_s3 + $0xf8] sm:$0xf] %vm16_vm0, %v12540_v1  ;;  %80 = vst.msk [vmem:[%s15389_s3 + $0xfc] sm:$0xf] %vm16_vm0, %v12540_v1 }
  0x21   :  { %81 = vst.msk [vmem:[%s15389_s3 + $0x100] sm:$0xf] %vm16_vm0, %v12540_v1  ;;  %82 = vst.msk [vmem:[%s15389_s3 + $0x104] sm:$0xf] %vm16_vm0, %v12540_v1 }
  0x22   :  { %83 = vst.msk [vmem:[%s15389_s3 + $0x108] sm:$0xf] %vm16_vm0, %v12540_v1  ;;  %84 = vst.msk [vmem:[%s15389_s3 + $0x10c] sm:$0xf] %vm16_vm0, %v12540_v1 }
  0x23   :  { %85 = vst.msk [vmem:[%s15389_s3 + $0x110] sm:$0xf] %vm16_vm0, %v12540_v1  ;;  %86 = vst.msk [vmem:[%s15389_s3 + $0x114] sm:$0xf] %vm16_vm0, %v12540_v1 }
  0x24   :  { %87 = vst.msk [vmem:[%s15389_s3 + $0x118] sm:$0xf] %vm16_vm0, %v12540_v1  ;;  %88 = vst.msk [vmem:[%s15389_s3 + $0x11c] sm:$0xf] %vm16_vm0, %v12540_v1 }
  0x25   :  { %89 = vst.msk [vmem:[%s15389_s3 + $0x120] sm:$0xf] %vm16_vm0, %v12540_v1  ;;  %90 = vst.msk [vmem:[%s15389_s3 + $0x124] sm:$0xf] %vm16_vm0, %v12540_v1 }
  0x26   :  { %91 = vst.msk [vmem:[%s15389_s3 + $0x128] sm:$0xf] %vm16_vm0, %v12540_v1  ;;  %92 = vst.msk [vmem:[%s15389_s3 + $0x12c] sm:$0xf] %vm16_vm0, %v12540_v1 }
  0x27   :  { %93 = vst.msk [vmem:[%s15389_s3 + $0x130] sm:$0xf] %vm16_vm0, %v12540_v1  ;;  %94 = vst.msk [vmem:[%s15389_s3 + $0x134] sm:$0xf] %vm16_vm0, %v12540_v1 }
  0x28   :  { %95 = vst.msk [vmem:[%s15389_s3 + $0x138] sm:$0xf] %vm16_vm0, %v12540_v1  ;;  %96 = vst.msk [vmem:[%s15389_s3 + $0x13c] sm:$0xf] %vm16_vm0, %v12540_v1 }
  0x29   :  { %97 = vst.msk [vmem:[%s15389_s3 + $0x140] sm:$0xf] %vm16_vm0, %v12540_v1  ;;  %98 = vst.msk [vmem:[%s15389_s3 + $0x144] sm:$0xf] %vm16_vm0, %v12540_v1 }
  0x2a   :  { %99 = vst.msk [vmem:[%s15389_s3 + $0x148] sm:$0xf] %vm16_vm0, %v12540_v1  ;;  %100 = vst.msk [vmem:[%s15389_s3 + $0x14c] sm:$0xf] %vm16_vm0, %v12540_v1 }
  0x2b   :  { %101 = vst.msk [vmem:[%s15389_s3 + $0x150] sm:$0xf] %vm16_vm0, %v12540_v1  ;;  %102 = vst.msk [vmem:[%s15389_s3 + $0x154] sm:$0xf] %vm16_vm0, %v12540_v1 }
  0x2c   :  { %103 = vst.msk [vmem:[%s15389_s3 + $0x158] sm:$0xf] %vm16_vm0, %v12540_v1  ;;  %104 = vst.msk [vmem:[%s15389_s3 + $0x15c] sm:$0xf] %vm16_vm0, %v12540_v1 }
  0x2d   :  { %105 = vst.msk [vmem:[%s15389_s3 + $0x160] sm:$0xf] %vm16_vm0, %v12540_v1  ;;  %106 = vst.msk [vmem:[%s15389_s3 + $0x164] sm:$0xf] %vm16_vm0, %v12540_v1 }
  0x2e   :  { %107 = vst.msk [vmem:[%s15389_s3 + $0x168] sm:$0xf] %vm16_vm0, %v12540_v1  ;;  %108 = vst.msk [vmem:[%s15389_s3 + $0x16c] sm:$0xf] %vm16_vm0, %v12540_v1 }
  0x2f   :  { %109 = vst.msk [vmem:[%s15389_s3 + $0x170] sm:$0xf] %vm16_vm0, %v12540_v1  ;;  %110 = vst.msk [vmem:[%s15389_s3 + $0x174] sm:$0xf] %vm16_vm0, %v12540_v1 }
  0x30   :  { %111 = vst.msk [vmem:[%s15389_s3 + $0x178] sm:$0xf] %vm16_vm0, %v12540_v1  ;;  %112 = vst.msk [vmem:[%s15389_s3 + $0x17c] sm:$0xf] %vm16_vm0, %v12540_v1 }
  0x31   :  { %113 = vst.msk [vmem:[%s15389_s3 + $0x180] sm:$0xf] %vm16_vm0, %v12540_v1  ;;  %114 = vst.msk [vmem:[%s15389_s3 + $0x184] sm:$0xf] %vm16_vm0, %v12540_v1 }
  0x32   :  { %115 = vst.msk [vmem:[%s15389_s3 + $0x188] sm:$0xf] %vm16_vm0, %v12540_v1  ;;  %116 = vst.msk [vmem:[%s15389_s3 + $0x18c] sm:$0xf] %vm16_vm0, %v12540_v1 }
  0x33   :  { %117 = vst.msk [vmem:[%s15389_s3 + $0x190] sm:$0xf] %vm16_vm0, %v12540_v1  ;;  %118 = vst.msk [vmem:[%s15389_s3 + $0x194] sm:$0xf] %vm16_vm0, %v12540_v1 }
  0x34   :  { %119 = vst.msk [vmem:[%s15389_s3 + $0x198] sm:$0xf] %vm16_vm0, %v12540_v1  ;;  %120 = vst.msk [vmem:[%s15389_s3 + $0x19c] sm:$0xf] %vm16_vm0, %v12540_v1 }
  0x35   :  { %121 = vst.msk [vmem:[%s15389_s3 + $0x1a0] sm:$0xf] %vm16_vm0, %v12540_v1  ;;  %122 = vst.msk [vmem:[%s15389_s3 + $0x1a4] sm:$0xf] %vm16_vm0, %v12540_v1 }
  0x36   :  { %123 = vst.msk [vmem:[%s15389_s3 + $0x1a8] sm:$0xf] %vm16_vm0, %v12540_v1  ;;  %124 = vst.msk [vmem:[%s15389_s3 + $0x1ac] sm:$0xf] %vm16_vm0, %v12540_v1 }
  0x37   :  { %125 = vst.msk [vmem:[%s15389_s3 + $0x1b0] sm:$0xf] %vm16_vm0, %v12540_v1  ;;  %126 = vst.msk [vmem:[%s15389_s3 + $0x1b4] sm:$0xf] %vm16_vm0, %v12540_v1 }
  0x38   :  { %127 = vst.msk [vmem:[%s15389_s3 + $0x1b8] sm:$0xf] %vm16_vm0, %v12540_v1  ;;  %128 = vst.msk [vmem:[%s15389_s3 + $0x1bc] sm:$0xf] %vm16_vm0, %v12540_v1 }
  0x39   :  { %129 = vst.msk [vmem:[%s15389_s3 + $0x1c0] sm:$0xf] %vm16_vm0, %v12540_v1  ;;  %130 = vst.msk [vmem:[%s15389_s3 + $0x1c4] sm:$0xf] %vm16_vm0, %v12540_v1 }
  0x3a   :  { %131 = vst.msk [vmem:[%s15389_s3 + $0x1c8] sm:$0xf] %vm16_vm0, %v12540_v1  ;;  %132 = vst.msk [vmem:[%s15389_s3 + $0x1cc] sm:$0xf] %vm16_vm0, %v12540_v1 }
  0x3b   :  { %133 = vst.msk [vmem:[%s15389_s3 + $0x1d0] sm:$0xf] %vm16_vm0, %v12540_v1  ;;  %134 = vst.msk [vmem:[%s15389_s3 + $0x1d4] sm:$0xf] %vm16_vm0, %v12540_v1 }
  0x3c   :  { %135 = vst.msk [vmem:[%s15389_s3 + $0x1d8] sm:$0xf] %vm16_vm0, %v12540_v1  ;;  %136 = vst.msk [vmem:[%s15389_s3 + $0x1dc] sm:$0xf] %vm16_vm0, %v12540_v1 }
  0x3d   :  { %137 = vst.msk [vmem:[%s15389_s3 + $0x1e0] sm:$0xf] %vm16_vm0, %v12540_v1 }
  0x3e LB: > { %v12272_v2 = vld [vmem:[%s15387_s1 + $0x10] sm:$0xff]   ;;  %v12541_v3 = vmov 0.0   ;;  %v12273_v4 = vld [vmem:[%s15387_s1 + $0x18] sm:$0xff]   ;;  %s8866_s9 = smul.u32 144, %s12538_s4  ;;  %vm12542_vm1 = vmmov 0   ;;  %vm238_vm2 = vcmask 261120   ;;  %s12538_s4 = sphi %s13173_s4, %s143_s4  }
  0x3f   : > { %9317 = vmatprep.subr.bf16.mxu0 %v12541_v3  ;;  %9381 = vmatprep.subr.bf16.mxu1 %v12541_v3  ;;  %v12278_v10 = vld [vmem:[%s15387_s1] sm:$0xff]   ;;  %v12285_v13 = vld [vmem:[%s15387_s1 + $0x8] sm:$0xff]   ;;  %s7794_s30 = smul.u32 44, %s12538_s4  ;;  %s143_s4 = sadd.s32 1, %s12538_s4  }
  0x40   : > { %9318 = vmatpush3.bf16.msra.mxu0 %v12272_v2  ;;  %9382 = vmatpush3.bf16.msra.mxu1 %v12272_v2  ;;  %s13196_s12 = scalar_lea.vmem %s15386_s0, %s8866_s9  ;;  %v12292_v51 = vld [vmem:[%s15387_s1 + $0x20] sm:$0xff]   ;;  %v12299_v54 = vld [vmem:[%s15387_s1 + $0x28] sm:$0xff]   ;;  %p140_p0 = scmp.ge.s32.totalorder %s143_s4, 7  }
  0x41   : > { %9319 = vmatprep.subr.bf16.mxu0 %v12541_v3  ;;  %9383 = vmatprep.subr.bf16.mxu1 %v12541_v3  ;;  %v13199_v5 = vld [vmem:[%s13196_s12 + $0x4] sm:$0xf]  ;;  %v13202_v6 = vld [vmem:[%s13196_s12 + $0x8] sm:$0xf]  ;;  %v13207_v8 = vld [vmem:[%s13196_s12 + $0x4c] sm:$0xf]  ;;  %s15361_s6 = scalar_lea.vmem %s15389_s3, %s7794_s30 }
  0x42   : > { %9321 = vmatprep.mubr.msk.bf16.mxu0 %vm12542_vm1, %v12541_v3  ;;  %9385 = vmatprep.mubr.msk.bf16.mxu1 %vm12542_vm1, %v12541_v3  ;;  %v7826_v7 = vcombine.low %v13199_v5, %v13202_v6  ;;  %v13210_v9 = vld [vmem:[%s13196_s12 + $0x50] sm:$0xf]  ;;  %v13225_v12 = vld [vmem:[%s13196_s12 + $0xc] sm:$0xf]  ;;  %v13234_v15 = vld [vmem:[%s13196_s12 + $0x54] sm:$0xf] }
  0x43   : > { %v13218_v11 = vcombine.low %v13207_v8, %v13210_v9  ;;  %v13231_v14 = vld [vmem:[%s13196_s12 + $0x10] sm:$0xf]  ;;  %v13237_v16 = vld [vmem:[%s13196_s12 + $0x58] sm:$0xf]  ;;  %v13254_v19 = vld [vmem:[%s13196_s12 + $0x14] sm:$0xf]  ;;  %v7843_v55 = vcombine.low %v13202_v6, %v13225_v12  ;;  %v13401_v56 = vcombine.low %v13210_v9, %v13234_v15 }
  0x44   : > { %9320 = vmatpush3.bf16.msra.mxu0 %v12273_v4  ;;  %9384 = vmatpush3.bf16.msra.mxu1 %v12273_v4  ;;  %v7827_v17 = vcombine.low %v13225_v12, %v13231_v14  ;;  %v13249_v18 = vcombine.low %v13234_v15, %v13237_v16  ;;  %v13257_v20 = vld [vmem:[%s13196_s12 + $0x18] sm:$0xf]  ;;  %v13263_v21 = vld [vmem:[%s13196_s12 + $0x5c] sm:$0xf]  ;;  %v13270_v22 = vld [vmem:[%s13196_s12 + $0x60] sm:$0xf]  ;;  %v7844_v57 = vcombine.low %v13231_v14, %v13254_v19 }
  0x45   : > { %9349 = vmatprep.subr.bf16.mxu0 %v12541_v3  ;;  %9413 = vmatprep.subr.bf16.mxu1 %v12541_v3  ;;  %v7828_v23 = vcombine.low %v13254_v19, %v13257_v20  ;;  %v13276_v24 = vcombine.low %v13263_v21, %v13270_v22  ;;  %v13279_v25 = vld [vmem:[%s13196_s12 + $0x1c] sm:$0xf]  ;;  %v13282_v26 = vld [vmem:[%s13196_s12 + $0x20] sm:$0xf]  ;;  %v13288_v27 = vld [vmem:[%s13196_s12 + $0x64] sm:$0xf]  ;;  %v13416_v58 = vcombine.low %v13237_v16, %v13263_v21 }
  0x46   : > { %v13295_v28 = vld [vmem:[%s13196_s12 + $0x68] sm:$0xf]  ;;  %v7829_v29 = vcombine.low %v13279_v25, %v13282_v26  ;;  %v13304_v31 = vld [vmem:[%s13196_s12 + $0x24] sm:$0xf]  ;;  %v13310_v33 = vld [vmem:[%s13196_s12 + $0x6c] sm:$0xf]  ;;  %v7845_v59 = vcombine.low %v13257_v20, %v13279_v25  ;;  %v13429_v60 = vcombine.low %v13270_v22, %v13288_v27 }
  0x47   : > { %9322 = vmatmul.mubr.msk.bf16.vlgmr.msra.gmra.mrb[0].mxu0 %vm238_vm2, %v7826_v7  ;;  %9386 = vmatmul.mubr.msk.bf16.vlgmr.msra.gmra.mrb[0].mxu1 %vm238_vm2, %v13218_v11  ;;  %v13301_v30 = vcombine.low %v13288_v27, %v13295_v28  ;;  %v13307_v32 = vld [vmem:[%s13196_s12 + $0x28] sm:$0xf]  ;;  %v13320_v34 = vld [vmem:[%s13196_s12 + $0x70] sm:$0xf]  ;;  %v13329_v37 = vld [vmem:[%s13196_s12 + $0x2c] sm:$0xf]  ;;  %v7846_v61 = vcombine.low %v13282_v26, %v13304_v31  ;;  %v13442_v62 = vcombine.low %v13295_v28, %v13310_v33 }
  0x48   : > { %9350 = vmatpush3.bf16.msra.mxu0 %v12278_v10  ;;  %9414 = vmatpush3.bf16.msra.mxu1 %v12278_v10  ;;  %v7830_v35 = vcombine.low %v13304_v31, %v13307_v32  ;;  %v13326_v36 = vcombine.low %v13310_v33, %v13320_v34  ;;  %v13332_v38 = vld [vmem:[%s13196_s12 + $0x30] sm:$0xf]  ;;  %v13335_v39 = vld [vmem:[%s13196_s12 + $0x74] sm:$0xf]  ;;  %v13345_v40 = vld [vmem:[%s13196_s12 + $0x78] sm:$0xf]  ;;  %v7847_v63 = vcombine.low %v13307_v32, %v13329_v37 }
  0x49   : > { %9325 = vmatprep.mubr.msk.bf16.mxu0 %vm12542_vm1, %v12541_v3  ;;  %9389 = vmatprep.mubr.msk.bf16.mxu1 %vm12542_vm1, %v12541_v3  ;;  %v7831_v41 = vcombine.low %v13329_v37, %v13332_v38  ;;  %v13351_v42 = vcombine.low %v13335_v39, %v13345_v40  ;;  %v13354_v43 = vld [vmem:[%s13196_s12 + $0x34] sm:$0xf]  ;;  %v189_v44 = vld [vmem:[%s13196_s12 + $0x38] sm:$0xf]  ;;  %v7820_v45 = vld [vmem:[%s13196_s12 + $0x7c] sm:$0xf]  ;;  %v13455_v1 = vcombine.low %v13320_v34, %v13335_v39 }
  0x4a   : > { %9351 = vmatprep.subr.bf16.mxu0 %v12541_v3  ;;  %9415 = vmatprep.subr.bf16.mxu1 %v12541_v3  ;;  %v7825_v46 = vld [vmem:[%s13196_s12 + $0x80] sm:$0xf]  ;;  %v7832_v47 = vcombine.low %v13354_v43, %v189_v44  ;;  %v7807_v50 = vld [vmem:[%s13196_s12 + $0x48] sm:$0xf]  ;;  %v7848_v2 = vcombine.low %v13332_v38, %v13354_v43  ;;  %v13467_v4 = vcombine.low %v13345_v40, %v7820_v45  ;;  %v13478_v6 = vld [vmem:[%s13196_s12 + $0x50] sm:$0xff]  }
  0x4b   : > { %v13367_v48 = vcombine.low %v7820_v45, %v7825_v46  ;;  %v152_v49 = vld [vmem:[%s13196_s12] sm:$0xf]  ;;  %v13383_v53 = vcombine.low %v7807_v50, %v13207_v8  ;;  %v12308_v7 = vld [vmem:[%s15387_s1 + $0x30] sm:$0xff]   ;;  %v12315_v8 = vld [vmem:[%s15387_s1 + $0x38] sm:$0xff]  }
  0x4c   : > { %9352 = vmatpush3.bf16.msra.mxu0 %v12285_v13  ;;  %9416 = vmatpush3.bf16.msra.mxu1 %v12285_v13  ;;  %v7842_v52 = vcombine.low %v152_v49, %v13199_v5  ;;  %v12306_v5 = vld [vmem:[%s13196_s12 + $0x8] sm:$0xff]   ;;  %v12309_v9 = vld [vmem:[%s13196_s12 + $0x10] sm:$0xff]   ;;  %v13495_v10 = vld [vmem:[%s13196_s12 + $0x58] sm:$0xff]  }
  0x4d   : > { %9445 = vmatprep.subr.bf16.mxu0 %v12541_v3  ;;  %9477 = vmatprep.subr.bf16.mxu1 %v12541_v3  ;;  %v12311_v12 = vld [vmem:[%s13196_s12 + $0x18] sm:$0xff]   ;;  %v13510_v13 = vld [vmem:[%s13196_s12 + $0x60] sm:$0xff]   ;;  %v13521_v15 = vld [vmem:[%s13196_s12 + $0x68] sm:$0xff]  }
  0x4e   : > { %v12313_v14 = vld [vmem:[%s13196_s12 + $0x20] sm:$0xff]   ;;  %v12316_v16 = vld [vmem:[%s13196_s12 + $0x28] sm:$0xff]   ;;  %v12318_v19 = vld [vmem:[%s13196_s12 + $0x30] sm:$0xff]  }
  0x4f   : > { %9326 = vmatmul.mubr.msk.bf16.gmra.mrb[4].mxu0 %vm238_vm2, %v7827_v17  ;;  %9390 = vmatmul.mubr.msk.bf16.gmra.mrb[4].mxu1 %vm238_vm2, %v13249_v18  ;;  %v13532_v17 = vld [vmem:[%s13196_s12 + $0x70] sm:$0xff]   ;;  %v13543_v20 = vld [vmem:[%s13196_s12 + $0x78] sm:$0xff]   ;;  %v13554_v22 = vld [vmem:[%s13196_s12 + $0x80] sm:$0xff]  }
  0x50   : > { %9329 = vmatprep.mubr.msk.bf16.mxu0 %vm12542_vm1, %v12541_v3  ;;  %9393 = vmatprep.mubr.msk.bf16.mxu1 %vm12542_vm1, %v12541_v3  ;;  %v12320_v21 = vld [vmem:[%s13196_s12 + $0x38] sm:$0xff]   ;;  %v12324_v26 = vld [vmem:[%s15387_s1 + $0x40] sm:$0xff]   ;;  %v12331_v27 = vld [vmem:[%s15387_s1 + $0x48] sm:$0xff]  }
  0x51   : > { %v13565_v25 = vld [vmem:[%s13196_s12 + $0x54] sm:$0xff]   ;;  %v12327_v31 = vld [vmem:[%s13196_s12 + $0x1c] sm:$0xff]   ;;  %v13597_v32 = vld [vmem:[%s13196_s12 + $0x64] sm:$0xff]  }
  0x52   : > { %v12325_v28 = vld [vmem:[%s13196_s12 + $0x14] sm:$0xff]   ;;  %v12329_v33 = vld [vmem:[%s13196_s12 + $0x24] sm:$0xff]   ;;  %v13608_v34 = vld [vmem:[%s13196_s12 + $0x6c] sm:$0xff]  }
  0x53   : > { %v13619_v37 = vld [vmem:[%s13196_s12 + $0x74] sm:$0xff]   ;;  %v13630_v39 = vld [vmem:[%s13196_s12 + $0x7c] sm:$0xff]  }
  0x54   : > { %v12334_v38 = vld [vmem:[%s13196_s12 + $0x34] sm:$0xff]   ;;  %v12336_v40 = vld [vmem:[%s13196_s12 + $0x3c] sm:$0xff]  }
  0x55   : > { %v12338_v43 = vld [vmem:[%s13196_s12 + $0x10] sm:$0xff]   ;;  %v13652_v44 = vld [vmem:[%s13196_s12 + $0x58] sm:$0xff]   ;;  %v13671_v49 = vld [vmem:[%s13196_s12 + $0x60] sm:$0xff]  }
  0x56   : > { %v12340_v45 = vld [vmem:[%s15387_s1 + $0x50] sm:$0xff]   ;;  %v12347_v46 = vld [vmem:[%s15387_s1 + $0x58] sm:$0xff]   ;;  %v12343_v50 = vld [vmem:[%s13196_s12 + $0x20] sm:$0xff]  }
  0x57   : > { %9330 = vmatmul.mubr.msk.bf16.gmra.mrb[8].mxu0 %vm238_vm2, %v7828_v23  ;;  %9394 = vmatmul.mubr.msk.bf16.gmra.mrb[8].mxu1 %vm238_vm2, %v13276_v24  ;;  %v12322_v23 = vld [vmem:[%s13196_s12 + $0xc] sm:$0xff]  }
  0x58   : > { %9333 = vmatprep.mubr.msk.bf16.mxu0 %vm12542_vm1, %v12541_v3  ;;  %9397 = vmatprep.mubr.msk.bf16.mxu1 %vm12542_vm1, %v12541_v3 }
  0x5f   : > { %9334 = vmatmul.mubr.msk.bf16.gmra.mrb[12].mxu0 %vm238_vm2, %v7829_v29  ;;  %9398 = vmatmul.mubr.msk.bf16.gmra.mrb[12].mxu1 %vm238_vm2, %v13301_v30  ;;  %v13582_v29 = vld [vmem:[%s13196_s12 + $0x5c] sm:$0xff]  }
  0x60   : > { %9337 = vmatprep.mubr.msk.bf16.mxu0 %vm12542_vm1, %v12541_v3  ;;  %9401 = vmatprep.mubr.msk.bf16.mxu1 %vm12542_vm1, %v12541_v3 }
  0x67   : > { %9338 = vmatmul.mubr.msk.bf16.gmra.mrb[16].mxu0 %vm238_vm2, %v7830_v35  ;;  %9402 = vmatmul.mubr.msk.bf16.gmra.mrb[16].mxu1 %vm238_vm2, %v13326_v36  ;;  %v12332_v35 = vld [vmem:[%s13196_s12 + $0x2c] sm:$0xff]  }
  0x68   : > { %9341 = vmatprep.mubr.msk.bf16.mxu0 %vm12542_vm1, %v12541_v3  ;;  %9405 = vmatprep.mubr.msk.bf16.mxu1 %vm12542_vm1, %v12541_v3 }
  0x6f   : > { %9342 = vmatmul.mubr.msk.bf16.gmra.mrb[20].mxu0 %vm238_vm2, %v7831_v41  ;;  %9406 = vmatmul.mubr.msk.bf16.gmra.mrb[20].mxu1 %vm238_vm2, %v13351_v42  ;;  %v13641_v41 = vld [vmem:[%s13196_s12 + $0x84] sm:$0xff]  }
  0x70   : > { %9345 = vmatprep.mubr.msk.bf16.mxu0 %vm12542_vm1, %v12541_v3  ;;  %9409 = vmatprep.mubr.msk.bf16.mxu1 %vm12542_vm1, %v12541_v3 }
  0x77   : > { %9346 = vmatmul.mubr.msk.bf16.gmra.mrb[24].mxu0 %vm238_vm2, %v7832_v47  ;;  %9410 = vmatmul.mubr.msk.bf16.gmra.mrb[24].mxu1 %vm238_vm2, %v13367_v48  ;;  %v12341_v47 = vld [vmem:[%s13196_s12 + $0x18] sm:$0xff]  }
  0x78   : > { %9353 = vmatprep.mubr.msk.bf16.mxu0 %vm12542_vm1, %v12541_v3  ;;  %9417 = vmatprep.mubr.msk.bf16.mxu1 %vm12542_vm1, %v12541_v3 }
  0x7f   : > { %9354 = vmatmul.mubr.msk.bf16.vlgmr.msra.gmra.mrb[0].mxu0 %vm238_vm2, %v7842_v52  ;;  %9418 = vmatmul.mubr.msk.bf16.vlgmr.msra.gmra.mrb[0].mxu1 %vm238_vm2, %v13383_v53  ;;  %v12345_v52 = vld [vmem:[%s13196_s12 + $0x28] sm:$0xff]  }
  0x80   : > { %9446 = vmatpush3.bf16.msra.mxu0 %v12292_v51  ;;  %9478 = vmatpush3.bf16.msra.mxu1 %v12292_v51  ;;  %v13684_v51 = vld [vmem:[%s13196_s12 + $0x68] sm:$0xff]  }
  0x81   : > { %9357 = vmatprep.mubr.msk.bf16.mxu0 %vm12542_vm1, %v12541_v3  ;;  %9421 = vmatprep.mubr.msk.bf16.mxu1 %vm12542_vm1, %v12541_v3 }
  0x82   : > { %9447 = vmatprep.subr.bf16.mxu0 %v12541_v3  ;;  %9479 = vmatprep.subr.bf16.mxu1 %v12541_v3 }
  0x84   : > { %9448 = vmatpush3.bf16.msra.mxu0 %v12299_v54  ;;  %9480 = vmatpush3.bf16.msra.mxu1 %v12299_v54  ;;  %v13695_v54 = vld [vmem:[%s13196_s12 + $0x70] sm:$0xff]  }
  0x85   : > { %9509 = vmatprep.subr.bf16.mxu0 %v12541_v3  ;;  %9541 = vmatprep.subr.bf16.mxu1 %v12541_v3 }
  0x87   : > { %9358 = vmatmul.mubr.msk.bf16.gmra.mrb[4].mxu0 %vm238_vm2, %v7843_v55  ;;  %9422 = vmatmul.mubr.msk.bf16.gmra.mrb[4].mxu1 %vm238_vm2, %v13401_v56  ;;  %v12348_v55 = vld [vmem:[%s13196_s12 + $0x30] sm:$0xff]  }
  0x88   : > { %9361 = vmatprep.mubr.msk.bf16.mxu0 %vm12542_vm1, %v12541_v3  ;;  %9425 = vmatprep.mubr.msk.bf16.mxu1 %vm12542_vm1, %v12541_v3 }
  0x8f   : > { %9362 = vmatmul.mubr.msk.bf16.gmra.mrb[8].mxu0 %vm238_vm2, %v7844_v57  ;;  %9426 = vmatmul.mubr.msk.bf16.gmra.mrb[8].mxu1 %vm238_vm2, %v13416_v58  ;;  %v13706_v57 = vld [vmem:[%s13196_s12 + $0x78] sm:$0xff]  }
  0x90   : > { %9365 = vmatprep.mubr.msk.bf16.mxu0 %vm12542_vm1, %v12541_v3  ;;  %9429 = vmatprep.mubr.msk.bf16.mxu1 %vm12542_vm1, %v12541_v3 }
  0x97   : > { %9366 = vmatmul.mubr.msk.bf16.gmra.mrb[12].mxu0 %vm238_vm2, %v7845_v59  ;;  %9430 = vmatmul.mubr.msk.bf16.gmra.mrb[12].mxu1 %vm238_vm2, %v13429_v60  ;;  %v12350_v59 = vld [vmem:[%s13196_s12 + $0x38] sm:$0xff]  }
  0x98   : > { %9369 = vmatprep.mubr.msk.bf16.mxu0 %vm12542_vm1, %v12541_v3  ;;  %9433 = vmatprep.mubr.msk.bf16.mxu1 %vm12542_vm1, %v12541_v3 }
  0x9f   : > { %9370 = vmatmul.mubr.msk.bf16.gmra.mrb[16].mxu0 %vm238_vm2, %v7846_v61  ;;  %9434 = vmatmul.mubr.msk.bf16.gmra.mrb[16].mxu1 %vm238_vm2, %v13442_v62  ;;  %v13717_v61 = vld [vmem:[%s13196_s12 + $0x80] sm:$0xff]  }
  0xa0   : > { %9373 = vmatprep.mubr.msk.bf16.mxu0 %vm12542_vm1, %v12541_v3  ;;  %9437 = vmatprep.mubr.msk.bf16.mxu1 %vm12542_vm1, %v12541_v3 }
  0xa7   : > { %9374 = vmatmul.mubr.msk.bf16.gmra.mrb[20].mxu0 %vm238_vm2, %v7847_v63  ;;  %9438 = vmatmul.mubr.msk.bf16.gmra.mrb[20].mxu1 %vm238_vm2, %v13455_v1  ;;  %v12352_v63 = vld [vmem:[%s13196_s12 + $0x40] sm:$0xff]  }
  0xa8   : > { %9377 = vmatprep.mubr.msk.bf16.mxu0 %vm12542_vm1, %v12541_v3  ;;  %9441 = vmatprep.mubr.msk.bf16.mxu1 %vm12542_vm1, %v12541_v3 }
  0xaf   : > { %9378 = vmatmul.mubr.msk.bf16.gmra.mrb[24].mxu0 %vm238_vm2, %v7848_v2  ;;  %9442 = vmatmul.mubr.msk.bf16.gmra.mrb[24].mxu1 %vm238_vm2, %v13467_v4  ;;  %v13728_v2 = vld [vmem:[%s13196_s12 + $0x88] sm:$0xff]  }
  0xb0   : > { %9449 = vmatprep.mubr.msk.bf16.mxu0 %vm12542_vm1, %v12541_v3  ;;  %9481 = vmatprep.mubr.msk.bf16.mxu1 %vm12542_vm1, %v12541_v3 }
  0xb7   : > { %9450 = vmatmul.mubr.msk.bf16.vlgmr.msra.gmra.mrb[0].mxu0 %vm238_vm2, %v12306_v5  ;;  %9482 = vmatmul.mubr.msk.bf16.vlgmr.msra.gmra.mrb[0].mxu1 %vm238_vm2, %v13478_v6  ;;  %v13738_v5 = vld [vmem:[%s13196_s12 + $0x90] sm:$0xff]  }
  0xb8   : > { %9510 = vmatpush3.bf16.msra.mxu0 %v12308_v7  ;;  %9542 = vmatpush3.bf16.msra.mxu1 %v12308_v7  ;;  %v12355_v7 = vld [vmem:[%s15387_s1 + $0x60] sm:$0xff]  }
  0xb9   : > { %9453 = vmatprep.mubr.msk.bf16.mxu0 %vm12542_vm1, %v12541_v3  ;;  %9485 = vmatprep.mubr.msk.bf16.mxu1 %vm12542_vm1, %v12541_v3 }
  0xba   : > { %9511 = vmatprep.subr.bf16.mxu0 %v12541_v3  ;;  %9543 = vmatprep.subr.bf16.mxu1 %v12541_v3 }
  0xbc   : > { %9512 = vmatpush3.bf16.msra.mxu0 %v12315_v8  ;;  %9544 = vmatpush3.bf16.msra.mxu1 %v12315_v8  ;;  %v12359_v8 = vld [vmem:[%s15387_s1 + $0x68] sm:$0xff]  }
  0xbd   : > { %9573 = vmatprep.subr.bf16.mxu0 %v12541_v3  ;;  %9605 = vmatprep.subr.bf16.mxu1 %v12541_v3 }
  0xbf   : > { %9454 = vmatmul.mubr.msk.bf16.gmra.mrb[4].mxu0 %vm238_vm2, %v12309_v9  ;;  %9486 = vmatmul.mubr.msk.bf16.gmra.mrb[4].mxu1 %vm238_vm2, %v13495_v10  ;;  %v13770_v9 = vld [vmem:[%s13196_s12 + $0xa0] sm:$0xff]  }
  0xc0   : > { %9457 = vmatprep.mubr.msk.bf16.mxu0 %vm12542_vm1, %v12541_v3  ;;  %9489 = vmatprep.mubr.msk.bf16.mxu1 %vm12542_vm1, %v12541_v3 }
  0xc7   : > { %9458 = vmatmul.mubr.msk.bf16.gmra.mrb[8].mxu0 %vm238_vm2, %v12311_v12  ;;  %9490 = vmatmul.mubr.msk.bf16.gmra.mrb[8].mxu1 %vm238_vm2, %v13510_v13  ;;  %v12364_v12 = vld [vmem:[%s15387_s1 + $0x70] sm:$0xff]  }
  0xc8   : > { %9461 = vmatprep.mubr.msk.bf16.mxu0 %vm12542_vm1, %v12541_v3  ;;  %9493 = vmatprep.mubr.msk.bf16.mxu1 %vm12542_vm1, %v12541_v3 }
  0xcf   : > { %9462 = vmatmul.mubr.msk.bf16.gmra.mrb[12].mxu0 %vm238_vm2, %v12313_v14  ;;  %9494 = vmatmul.mubr.msk.bf16.gmra.mrb[12].mxu1 %vm238_vm2, %v13521_v15  ;;  %v13857_v14 = vld [vmem:[%s13196_s12 + $0xa4] sm:$0xff]  }
  0xd0   : > { %9465 = vmatprep.mubr.msk.bf16.mxu0 %vm12542_vm1, %v12541_v3  ;;  %9497 = vmatprep.mubr.msk.bf16.mxu1 %vm12542_vm1, %v12541_v3 }
  0xd7   : > { %9466 = vmatmul.mubr.msk.bf16.gmra.mrb[16].mxu0 %vm238_vm2, %v12316_v16  ;;  %9498 = vmatmul.mubr.msk.bf16.gmra.mrb[16].mxu1 %vm238_vm2, %v13532_v17  ;;  %v12373_v16 = vld [vmem:[%s15387_s1 + $0x80] sm:$0xff]  }
  0xd8   : > { %9469 = vmatprep.mubr.msk.bf16.mxu0 %vm12542_vm1, %v12541_v3  ;;  %9501 = vmatprep.mubr.msk.bf16.mxu1 %vm12542_vm1, %v12541_v3 }
  0xdf   : > { %9470 = vmatmul.mubr.msk.bf16.gmra.mrb[20].mxu0 %vm238_vm2, %v12318_v19  ;;  %9502 = vmatmul.mubr.msk.bf16.gmra.mrb[20].mxu1 %vm238_vm2, %v13543_v20  ;;  %v13944_v19 = vld [vmem:[%s13196_s12 + $0xa8] sm:$0xff]  }
  0xe0   : > { %9473 = vmatprep.mubr.msk.bf16.mxu0 %vm12542_vm1, %v12541_v3  ;;  %9505 = vmatprep.mubr.msk.bf16.mxu1 %vm12542_vm1, %v12541_v3 }
  0xe7   : > { %9474 = vmatmul.mubr.msk.bf16.gmra.mrb[24].mxu0 %vm238_vm2, %v12320_v21  ;;  %9506 = vmatmul.mubr.msk.bf16.gmra.mrb[24].mxu1 %vm238_vm2, %v13554_v22  ;;  %v12382_v21 = vld [vmem:[%s15387_s1 + $0x90] sm:$0xff]  }
  0xe8   : > { %9513 = vmatprep.mubr.msk.bf16.mxu0 %vm12542_vm1, %v12541_v3  ;;  %9545 = vmatprep.mubr.msk.bf16.mxu1 %vm12542_vm1, %v12541_v3 }
  0xef   : > { %9514 = vmatmul.mubr.msk.bf16.vlgmr.msra.gmra.mrb[0].mxu0 %vm238_vm2, %v12322_v23  ;;  %9546 = vmatmul.mubr.msk.bf16.vlgmr.msra.gmra.mrb[0].mxu1 %vm238_vm2, %v13565_v25  ;;  %v14018_v23 = vld [vmem:[%s13196_s12 + $0xa4] sm:$0xff]  }
  0xf0   : > { %9574 = vmatpush3.bf16.msra.mxu0 %v12324_v26  ;;  %9606 = vmatpush3.bf16.msra.mxu1 %v12324_v26  ;;  %v14042_v26 = vld [vmem:[%s13196_s12 + $0xb4] sm:$0xff]  }
  0xf1   : > { %9517 = vmatprep.mubr.msk.bf16.mxu0 %vm12542_vm1, %v12541_v3  ;;  %9549 = vmatprep.mubr.msk.bf16.mxu1 %vm12542_vm1, %v12541_v3 }
  0xf2   : > { %9575 = vmatprep.subr.bf16.mxu0 %v12541_v3  ;;  %9607 = vmatprep.subr.bf16.mxu1 %v12541_v3 }
  0xf4   : > { %9576 = vmatpush3.bf16.msra.mxu0 %v12331_v27  ;;  %9608 = vmatpush3.bf16.msra.mxu1 %v12331_v27  ;;  %v14053_v27 = vld [vmem:[%s13196_s12 + $0xbc] sm:$0xff]  }
  0xf5   : > { %9637 = vmatprep.subr.bf16.mxu0 %v12541_v3  ;;  %9669 = vmatprep.subr.bf16.mxu1 %v12541_v3 }
  0xf7   : > { %9518 = vmatmul.mubr.msk.bf16.gmra.mrb[4].mxu0 %vm238_vm2, %v12325_v28  ;;  %9550 = vmatmul.mubr.msk.bf16.gmra.mrb[4].mxu1 %vm238_vm2, %v13582_v29  ;;  %v14064_v28 = vld [vmem:[%s13196_s12 + $0xc4] sm:$0xff]  }
  0xf8   : > { %9521 = vmatprep.mubr.msk.bf16.mxu0 %vm12542_vm1, %v12541_v3  ;;  %9553 = vmatprep.mubr.msk.bf16.mxu1 %vm12542_vm1, %v12541_v3 }
  0xff   : > { %9522 = vmatmul.mubr.msk.bf16.gmra.mrb[8].mxu0 %vm238_vm2, %v12327_v31  ;;  %9554 = vmatmul.mubr.msk.bf16.gmra.mrb[8].mxu1 %vm238_vm2, %v13597_v32  ;;  %v14086_v31 = vld [vmem:[%s13196_s12 + $0xa0] sm:$0xff]  }
 0x100   : > { %9525 = vmatprep.mubr.msk.bf16.mxu0 %vm12542_vm1, %v12541_v3  ;;  %9557 = vmatprep.mubr.msk.bf16.mxu1 %vm12542_vm1, %v12541_v3 }
 0x107   : > { %9526 = vmatmul.mubr.msk.bf16.gmra.mrb[12].mxu0 %vm238_vm2, %v12329_v33  ;;  %9558 = vmatmul.mubr.msk.bf16.gmra.mrb[12].mxu1 %vm238_vm2, %v13608_v34  ;;  %v12395_v33 = vld [vmem:[%s15387_s1 + $0xa8] sm:$0xff]  }
 0x108   : > { %9529 = vmatprep.mubr.msk.bf16.mxu0 %vm12542_vm1, %v12541_v3  ;;  %9561 = vmatprep.mubr.msk.bf16.mxu1 %vm12542_vm1, %v12541_v3 }
 0x10f   : > { %9530 = vmatmul.mubr.msk.bf16.gmra.mrb[16].mxu0 %vm238_vm2, %v12332_v35  ;;  %9562 = vmatmul.mubr.msk.bf16.gmra.mrb[16].mxu1 %vm238_vm2, %v13619_v37  ;;  %v14118_v35 = vld [vmem:[%s13196_s12 + $0xb0] sm:$0xff]  }
 0x110   : > { %9533 = vmatprep.mubr.msk.bf16.mxu0 %vm12542_vm1, %v12541_v3  ;;  %9565 = vmatprep.mubr.msk.bf16.mxu1 %vm12542_vm1, %v12541_v3 }
 0x117   : > { %9534 = vmatmul.mubr.msk.bf16.gmra.mrb[20].mxu0 %vm238_vm2, %v12334_v38  ;;  %9566 = vmatmul.mubr.msk.bf16.gmra.mrb[20].mxu1 %vm238_vm2, %v13630_v39  ;;  %v14140_v38 = vld [vmem:[%s13196_s12 + $0xc0] sm:$0xff]  }
 0x118   : > { %9537 = vmatprep.mubr.msk.bf16.mxu0 %vm12542_vm1, %v12541_v3  ;;  %9569 = vmatprep.mubr.msk.bf16.mxu1 %vm12542_vm1, %v12541_v3 }
 0x11f   : > { %9538 = vmatmul.mubr.msk.bf16.gmra.mrb[24].mxu0 %vm238_vm2, %v12336_v40  ;;  %9570 = vmatmul.mubr.msk.bf16.gmra.mrb[24].mxu1 %vm238_vm2, %v13641_v41  ;;  %v14162_v40 = vld [vmem:[%s13196_s12 + $0xd0] sm:$0xff]  }
 0x120   : > { %9577 = vmatprep.mubr.msk.bf16.mxu0 %vm12542_vm1, %v12541_v3  ;;  %9609 = vmatprep.mubr.msk.bf16.mxu1 %vm12542_vm1, %v12541_v3 }
 0x127   : > { %9578 = vmatmul.mubr.msk.bf16.vlgmr.msra.gmra.mrb[0].mxu0 %vm238_vm2, %v12338_v43  ;;  %9610 = vmatmul.mubr.msk.bf16.vlgmr.msra.gmra.mrb[0].mxu1 %vm238_vm2, %v13652_v44  ;;  %v12400_v43 = vld [vmem:[%s15387_s1 + $0xb0] sm:$0xff]  }
 0x128   : > { %9638 = vmatpush3.bf16.msra.mxu0 %v12340_v45  ;;  %9670 = vmatpush3.bf16.msra.mxu1 %v12340_v45  ;;  %v14192_v45 = vld [vmem:[%s13196_s12 + $0xe0] sm:$0xff]  }
 0x129   : > { %9581 = vmatprep.mubr.msk.bf16.mxu0 %vm12542_vm1, %v12541_v3  ;;  %9613 = vmatprep.mubr.msk.bf16.mxu1 %vm12542_vm1, %v12541_v3 }
 0x12a   : > { %9639 = vmatprep.subr.bf16.mxu0 %v12541_v3  ;;  %9671 = vmatprep.subr.bf16.mxu1 %v12541_v3 }
 0x12c   : > { %9640 = vmatpush3.bf16.msra.mxu0 %v12347_v46  ;;  %9672 = vmatpush3.bf16.msra.mxu1 %v12347_v46  ;;  %v14205_v46 = vld [vmem:[%s13196_s12 + $0xe8] sm:$0xff]  }
 0x12d   : > { %9701 = vmatprep.subr.bf16.mxu0 %v12541_v3  ;;  %9733 = vmatprep.subr.bf16.mxu1 %v12541_v3 }
 0x12f   : > { %9582 = vmatmul.mubr.msk.bf16.gmra.mrb[4].mxu0 %vm238_vm2, %v12341_v47  ;;  %9614 = vmatmul.mubr.msk.bf16.gmra.mrb[4].mxu1 %vm238_vm2, %v13671_v49  ;;  %v14216_v47 = vld [vmem:[%s13196_s12 + $0xf0] sm:$0xff]  }
 0x130   : > { %9585 = vmatprep.mubr.msk.bf16.mxu0 %vm12542_vm1, %v12541_v3  ;;  %9617 = vmatprep.mubr.msk.bf16.mxu1 %vm12542_vm1, %v12541_v3 }
 0x137   : > { %9586 = vmatmul.mubr.msk.bf16.gmra.mrb[8].mxu0 %vm238_vm2, %v12343_v50  ;;  %9618 = vmatmul.mubr.msk.bf16.gmra.mrb[8].mxu1 %vm238_vm2, %v13684_v51  ;;  %v14238_v50 = vld [vmem:[%s13196_s12 + $0x100] sm:$0xff]  }
 0x138   : > { %9589 = vmatprep.mubr.msk.bf16.mxu0 %vm12542_vm1, %v12541_v3  ;;  %9621 = vmatprep.mubr.msk.bf16.mxu1 %vm12542_vm1, %v12541_v3 }
 0x13f   : > { %9590 = vmatmul.mubr.msk.bf16.gmra.mrb[12].mxu0 %vm238_vm2, %v12345_v52  ;;  %9622 = vmatmul.mubr.msk.bf16.gmra.mrb[12].mxu1 %vm238_vm2, %v13695_v54  ;;  %v14260_v52 = vld [vmem:[%s13196_s12 + $0xdc] sm:$0xff]  }
 0x140   : > { %9593 = vmatprep.mubr.msk.bf16.mxu0 %vm12542_vm1, %v12541_v3  ;;  %9625 = vmatprep.mubr.msk.bf16.mxu1 %vm12542_vm1, %v12541_v3 }
 0x147   : > { %9594 = vmatmul.mubr.msk.bf16.gmra.mrb[16].mxu0 %vm238_vm2, %v12348_v55  ;;  %9626 = vmatmul.mubr.msk.bf16.gmra.mrb[16].mxu1 %vm238_vm2, %v13706_v57  ;;  %v12413_v55 = vld [vmem:[%s15387_s1 + $0xc8] sm:$0xff]  }
 0x148   : > { %9597 = vmatprep.mubr.msk.bf16.mxu0 %vm12542_vm1, %v12541_v3  ;;  %9629 = vmatprep.mubr.msk.bf16.mxu1 %vm12542_vm1, %v12541_v3 }
 0x14f   : > { %9598 = vmatmul.mubr.msk.bf16.gmra.mrb[20].mxu0 %vm238_vm2, %v12350_v59  ;;  %9630 = vmatmul.mubr.msk.bf16.gmra.mrb[20].mxu1 %vm238_vm2, %v13717_v61  ;;  %v14292_v59 = vld [vmem:[%s13196_s12 + $0xec] sm:$0xff]  }
 0x150   : > { %9601 = vmatprep.mubr.msk.bf16.mxu0 %vm12542_vm1, %v12541_v3  ;;  %9633 = vmatprep.mubr.msk.bf16.mxu1 %vm12542_vm1, %v12541_v3 }
 0x157   : > { %9602 = vmatmul.mubr.msk.bf16.gmra.mrb[24].mxu0 %vm238_vm2, %v12352_v63  ;;  %9634 = vmatmul.mubr.msk.bf16.gmra.mrb[24].mxu1 %vm238_vm2, %v13728_v2  ;;  %v14314_v63 = vld [vmem:[%s13196_s12 + $0xfc] sm:$0xff]  }
 0x158   : > { %9641 = vmatprep.mubr.msk.bf16.mxu0 %vm12542_vm1, %v12541_v3  ;;  %9673 = vmatprep.mubr.msk.bf16.mxu1 %vm12542_vm1, %v12541_v3 }
 0x15f   : > { %9642 = vmatmul.mubr.msk.bf16.vlgmr.msra.gmra.mrb[0].mxu0 %vm238_vm2, %v13383_v53  ;;  %9674 = vmatmul.mubr.msk.bf16.vlgmr.msra.gmra.mrb[0].mxu1 %vm238_vm2, %v13738_v5  ;;  %v13757_v53 = vld [vmem:[%s13196_s12 + $0x98] sm:$0xff]  }
 0x160   : > { %9702 = vmatpush3.bf16.msra.mxu0 %v12355_v7  ;;  %9734 = vmatpush3.bf16.msra.mxu1 %v12355_v7  ;;  %v14347_v7 = vld [vmem:[%s13196_s12 + $0xe0] sm:$0xff]  }
 0x161   : > { %9645 = vmatprep.mubr.msk.bf16.mxu0 %vm12542_vm1, %v12541_v3  ;;  %9677 = vmatprep.mubr.msk.bf16.mxu1 %vm12542_vm1, %v12541_v3 }
 0x162   : > { %9703 = vmatprep.subr.bf16.mxu0 %v12541_v3  ;;  %9735 = vmatprep.subr.bf16.mxu1 %v12541_v3 }
 0x164   : > { %9704 = vmatpush3.bf16.msra.mxu0 %v12359_v8  ;;  %9736 = vmatpush3.bf16.msra.mxu1 %v12359_v8  ;;  %v12418_v8 = vld [vmem:[%s15387_s1 + $0xd0] sm:$0xff]  }
 0x165   : > { %9765 = vmatprep.subr.bf16.mxu0 %v12541_v3  ;;  %9797 = vmatprep.subr.bf16.mxu1 %v12541_v3 }
 0x167   : > { %9646 = vmatmul.mubr.msk.bf16.gmra.mrb[4].mxu0 %vm238_vm2, %v13401_v56  ;;  %9678 = vmatmul.mubr.msk.bf16.gmra.mrb[4].mxu1 %vm238_vm2, %v13757_v53  ;;  %v13781_v56 = vld [vmem:[%s13196_s12 + $0xa8] sm:$0xff]  }
 0x168   : > { %9649 = vmatprep.mubr.msk.bf16.mxu0 %vm12542_vm1, %v12541_v3  ;;  %9681 = vmatprep.mubr.msk.bf16.mxu1 %vm12542_vm1, %v12541_v3 }
 0x16f   : > { %9650 = vmatmul.mubr.msk.bf16.gmra.mrb[8].mxu0 %vm238_vm2, %v13416_v58  ;;  %9682 = vmatmul.mubr.msk.bf16.gmra.mrb[8].mxu1 %vm238_vm2, %v13770_v9  ;;  %v13792_v58 = vld [vmem:[%s13196_s12 + $0xb0] sm:$0xff]  }
 0x170   : > { %9653 = vmatprep.mubr.msk.bf16.mxu0 %vm12542_vm1, %v12541_v3  ;;  %9685 = vmatprep.mubr.msk.bf16.mxu1 %vm12542_vm1, %v12541_v3 }
 0x177   : > { %9654 = vmatmul.mubr.msk.bf16.gmra.mrb[12].mxu0 %vm238_vm2, %v13429_v60  ;;  %9686 = vmatmul.mubr.msk.bf16.gmra.mrb[12].mxu1 %vm238_vm2, %v13781_v56  ;;  %v13803_v60 = vld [vmem:[%s13196_s12 + $0xb8] sm:$0xff]  }
 0x178   : > { %9657 = vmatprep.mubr.msk.bf16.mxu0 %vm12542_vm1, %v12541_v3  ;;  %9689 = vmatprep.mubr.msk.bf16.mxu1 %vm12542_vm1, %v12541_v3 }
 0x17f   : > { %9658 = vmatmul.mubr.msk.bf16.gmra.mrb[16].mxu0 %vm238_vm2, %v13442_v62  ;;  %9690 = vmatmul.mubr.msk.bf16.gmra.mrb[16].mxu1 %vm238_vm2, %v13792_v58  ;;  %v13814_v62 = vld [vmem:[%s13196_s12 + $0xc0] sm:$0xff]  }
 0x180   : > { %9661 = vmatprep.mubr.msk.bf16.mxu0 %vm12542_vm1, %v12541_v3  ;;  %9693 = vmatprep.mubr.msk.bf16.mxu1 %vm12542_vm1, %v12541_v3 }
 0x187   : > { %9662 = vmatmul.mubr.msk.bf16.gmra.mrb[20].mxu0 %vm238_vm2, %v13455_v1  ;;  %9694 = vmatmul.mubr.msk.bf16.gmra.mrb[20].mxu1 %vm238_vm2, %v13803_v60  ;;  %v13825_v1 = vld [vmem:[%s13196_s12 + $0x94] sm:$0xff]  }
 0x188   : > { %9665 = vmatprep.mubr.msk.bf16.mxu0 %vm12542_vm1, %v12541_v3  ;;  %9697 = vmatprep.mubr.msk.bf16.mxu1 %vm12542_vm1, %v12541_v3 }
 0x18f   : > { %9666 = vmatmul.mubr.msk.bf16.gmra.mrb[24].mxu0 %vm238_vm2, %v13467_v4  ;;  %9698 = vmatmul.mubr.msk.bf16.gmra.mrb[24].mxu1 %vm238_vm2, %v13814_v62  ;;  %v12368_v4 = vld [vmem:[%s15387_s1 + $0x78] sm:$0xff]  }
 0x190   : > { %9705 = vmatprep.mubr.msk.bf16.mxu0 %vm12542_vm1, %v12541_v3  ;;  %9737 = vmatprep.mubr.msk.bf16.mxu1 %vm12542_vm1, %v12541_v3 }
 0x197   : > { %9706 = vmatmul.mubr.msk.bf16.vlgmr.msra.gmra.mrb[0].mxu0 %vm238_vm2, %v13218_v11  ;;  %9738 = vmatmul.mubr.msk.bf16.vlgmr.msra.gmra.mrb[0].mxu1 %vm238_vm2, %v13825_v1  ;;  %v13844_v11 = vld [vmem:[%s13196_s12 + $0x9c] sm:$0xff]  }
 0x198   : > { %9766 = vmatpush3.bf16.msra.mxu0 %v12364_v12  ;;  %9798 = vmatpush3.bf16.msra.mxu1 %v12364_v12  ;;  %v14434_v12 = vld [vmem:[%s13196_s12 + $0xe4] sm:$0xff]  }
 0x199   : > { %9709 = vmatprep.mubr.msk.bf16.mxu0 %vm12542_vm1, %v12541_v3  ;;  %9741 = vmatprep.mubr.msk.bf16.mxu1 %vm12542_vm1, %v12541_v3 }
 0x19a   : > { %9767 = vmatprep.subr.bf16.mxu0 %v12541_v3  ;;  %9799 = vmatprep.subr.bf16.mxu1 %v12541_v3 }
 0x19c   : > { %9768 = vmatpush3.bf16.msra.mxu0 %v12368_v4  ;;  %9800 = vmatpush3.bf16.msra.mxu1 %v12368_v4  ;;  %v12427_v4 = vld [vmem:[%s15387_s1 + $0xe0] sm:$0xff]  }
 0x19d   : > { %9829 = vmatprep.subr.bf16.mxu0 %v12541_v3  ;;  %9861 = vmatprep.subr.bf16.mxu1 %v12541_v3 }
 0x19f   : > { %9710 = vmatmul.mubr.msk.bf16.gmra.mrb[4].mxu0 %vm238_vm2, %v13249_v18  ;;  %9742 = vmatmul.mubr.msk.bf16.gmra.mrb[4].mxu1 %vm238_vm2, %v13844_v11  ;;  %v13868_v18 = vld [vmem:[%s13196_s12 + $0xac] sm:$0xff]  }
 0x1a0   : > { %9713 = vmatprep.mubr.msk.bf16.mxu0 %vm12542_vm1, %v12541_v3  ;;  %9745 = vmatprep.mubr.msk.bf16.mxu1 %vm12542_vm1, %v12541_v3 }
 0x1a7   : > { %9714 = vmatmul.mubr.msk.bf16.gmra.mrb[8].mxu0 %vm238_vm2, %v13276_v24  ;;  %9746 = vmatmul.mubr.msk.bf16.gmra.mrb[8].mxu1 %vm238_vm2, %v13857_v14  ;;  %v13879_v24 = vld [vmem:[%s13196_s12 + $0xb4] sm:$0xff]  }
 0x1a8   : > { %9717 = vmatprep.mubr.msk.bf16.mxu0 %vm12542_vm1, %v12541_v3  ;;  %9749 = vmatprep.mubr.msk.bf16.mxu1 %vm12542_vm1, %v12541_v3 }
 0x1af   : > { %9718 = vmatmul.mubr.msk.bf16.gmra.mrb[12].mxu0 %vm238_vm2, %v13301_v30  ;;  %9750 = vmatmul.mubr.msk.bf16.gmra.mrb[12].mxu1 %vm238_vm2, %v13868_v18  ;;  %v13890_v30 = vld [vmem:[%s13196_s12 + $0xbc] sm:$0xff]  }
 0x1b0   : > { %9721 = vmatprep.mubr.msk.bf16.mxu0 %vm12542_vm1, %v12541_v3  ;;  %9753 = vmatprep.mubr.msk.bf16.mxu1 %vm12542_vm1, %v12541_v3 }
 0x1b7   : > { %9722 = vmatmul.mubr.msk.bf16.gmra.mrb[16].mxu0 %vm238_vm2, %v13326_v36  ;;  %9754 = vmatmul.mubr.msk.bf16.gmra.mrb[16].mxu1 %vm238_vm2, %v13879_v24  ;;  %v13901_v36 = vld [vmem:[%s13196_s12 + $0xc4] sm:$0xff]  }
 0x1b8   : > { %9725 = vmatprep.mubr.msk.bf16.mxu0 %vm12542_vm1, %v12541_v3  ;;  %9757 = vmatprep.mubr.msk.bf16.mxu1 %vm12542_vm1, %v12541_v3 }
 0x1bf   : > { %9726 = vmatmul.mubr.msk.bf16.gmra.mrb[20].mxu0 %vm238_vm2, %v13351_v42  ;;  %9758 = vmatmul.mubr.msk.bf16.gmra.mrb[20].mxu1 %vm238_vm2, %v13890_v30  ;;  %v13912_v42 = vld [vmem:[%s13196_s12 + $0x98] sm:$0xff]  }
 0x1c0   : > { %9729 = vmatprep.mubr.msk.bf16.mxu0 %vm12542_vm1, %v12541_v3  ;;  %9761 = vmatprep.mubr.msk.bf16.mxu1 %vm12542_vm1, %v12541_v3 }
 0x1c7   : > { %9730 = vmatmul.mubr.msk.bf16.gmra.mrb[24].mxu0 %vm238_vm2, %v13367_v48  ;;  %9762 = vmatmul.mubr.msk.bf16.gmra.mrb[24].mxu1 %vm238_vm2, %v13901_v36  ;;  %v12377_v48 = vld [vmem:[%s15387_s1 + $0x88] sm:$0xff]  }
 0x1c8   : > { %9769 = vmatprep.mubr.msk.bf16.mxu0 %vm12542_vm1, %v12541_v3  ;;  %9801 = vmatprep.mubr.msk.bf16.mxu1 %vm12542_vm1, %v12541_v3 }
 0x1cf   : > { %9770 = vmatmul.mubr.msk.bf16.vlgmr.msra.gmra.mrb[0].mxu0 %vm238_vm2, %v13478_v6  ;;  %9802 = vmatmul.mubr.msk.bf16.vlgmr.msra.gmra.mrb[0].mxu1 %vm238_vm2, %v13912_v42  ;;  %v13931_v6 = vld [vmem:[%s13196_s12 + $0xa0] sm:$0xff]  }
 0x1d0   : > { %9830 = vmatpush3.bf16.msra.mxu0 %v12373_v16  ;;  %9862 = vmatpush3.bf16.msra.mxu1 %v12373_v16  ;;  %v14521_v16 = vld [vmem:[%s13196_s12 + $0xe8] sm:$0xff]  }
 0x1d1   : > { %9773 = vmatprep.mubr.msk.bf16.mxu0 %vm12542_vm1, %v12541_v3  ;;  %9805 = vmatprep.mubr.msk.bf16.mxu1 %vm12542_vm1, %v12541_v3 }
 0x1d2   : > { %9831 = vmatprep.subr.bf16.mxu0 %v12541_v3  ;;  %9863 = vmatprep.subr.bf16.mxu1 %v12541_v3 }
 0x1d4   : > { %9832 = vmatpush3.bf16.msra.mxu0 %v12377_v48  ;;  %9864 = vmatpush3.bf16.msra.mxu1 %v12377_v48  ;;  %v12436_v48 = vld [vmem:[%s15387_s1 + $0xf0] sm:$0xff]  }
 0x1d5   : > { %9893 = vmatprep.subr.bf16.mxu0 %v12541_v3  ;;  %9925 = vmatprep.subr.bf16.mxu1 %v12541_v3 }
 0x1d7   : > { %9774 = vmatmul.mubr.msk.bf16.gmra.mrb[4].mxu0 %vm238_vm2, %v13495_v10  ;;  %9806 = vmatmul.mubr.msk.bf16.gmra.mrb[4].mxu1 %vm238_vm2, %v13931_v6  ;;  %v13955_v10 = vld [vmem:[%s13196_s12 + $0xb0] sm:$0xff]  }
 0x1d8   : > { %9777 = vmatprep.mubr.msk.bf16.mxu0 %vm12542_vm1, %v12541_v3  ;;  %9809 = vmatprep.mubr.msk.bf16.mxu1 %vm12542_vm1, %v12541_v3 }
 0x1df   : > { %9778 = vmatmul.mubr.msk.bf16.gmra.mrb[8].mxu0 %vm238_vm2, %v13510_v13  ;;  %9810 = vmatmul.mubr.msk.bf16.gmra.mrb[8].mxu1 %vm238_vm2, %v13944_v19  ;;  %v13966_v13 = vld [vmem:[%s13196_s12 + $0xb8] sm:$0xff]  }
 0x1e0   : > { %9781 = vmatprep.mubr.msk.bf16.mxu0 %vm12542_vm1, %v12541_v3  ;;  %9813 = vmatprep.mubr.msk.bf16.mxu1 %vm12542_vm1, %v12541_v3 }
 0x1e7   : > { %9782 = vmatmul.mubr.msk.bf16.gmra.mrb[12].mxu0 %vm238_vm2, %v13521_v15  ;;  %9814 = vmatmul.mubr.msk.bf16.gmra.mrb[12].mxu1 %vm238_vm2, %v13955_v10  ;;  %v13977_v15 = vld [vmem:[%s13196_s12 + $0xc0] sm:$0xff]  }
 0x1e8   : > { %9785 = vmatprep.mubr.msk.bf16.mxu0 %vm12542_vm1, %v12541_v3  ;;  %9817 = vmatprep.mubr.msk.bf16.mxu1 %vm12542_vm1, %v12541_v3 }
 0x1ef   : > { %9786 = vmatmul.mubr.msk.bf16.gmra.mrb[16].mxu0 %vm238_vm2, %v13532_v17  ;;  %9818 = vmatmul.mubr.msk.bf16.gmra.mrb[16].mxu1 %vm238_vm2, %v13966_v13  ;;  %v13988_v17 = vld [vmem:[%s13196_s12 + $0xc8] sm:$0xff]  }
 0x1f0   : > { %9789 = vmatprep.mubr.msk.bf16.mxu0 %vm12542_vm1, %v12541_v3  ;;  %9821 = vmatprep.mubr.msk.bf16.mxu1 %vm12542_vm1, %v12541_v3 }
 0x1f7   : > { %9790 = vmatmul.mubr.msk.bf16.gmra.mrb[20].mxu0 %vm238_vm2, %v13543_v20  ;;  %9822 = vmatmul.mubr.msk.bf16.gmra.mrb[20].mxu1 %vm238_vm2, %v13977_v15  ;;  %v13999_v20 = vld [vmem:[%s13196_s12 + $0x9c] sm:$0xff]  }
 0x1f8   : > { %9793 = vmatprep.mubr.msk.bf16.mxu0 %vm12542_vm1, %v12541_v3  ;;  %9825 = vmatprep.mubr.msk.bf16.mxu1 %vm12542_vm1, %v12541_v3 }
 0x1ff   : > { %9794 = vmatmul.mubr.msk.bf16.gmra.mrb[24].mxu0 %vm238_vm2, %v13554_v22  ;;  %9826 = vmatmul.mubr.msk.bf16.gmra.mrb[24].mxu1 %vm238_vm2, %v13988_v17  ;;  %v12386_v22 = vld [vmem:[%s15387_s1 + $0x98] sm:$0xff]  }
 0x200   : > { %9833 = vmatprep.mubr.msk.bf16.mxu0 %vm12542_vm1, %v12541_v3  ;;  %9865 = vmatprep.mubr.msk.bf16.mxu1 %vm12542_vm1, %v12541_v3 }
 0x207   : > { %9834 = vmatmul.mubr.msk.bf16.vlgmr.msra.gmra.mrb[0].mxu0 %vm238_vm2, %v13565_v25  ;;  %9866 = vmatmul.mubr.msk.bf16.vlgmr.msra.gmra.mrb[0].mxu1 %vm238_vm2, %v13999_v20  ;;  %v14031_v25 = vld [vmem:[%s13196_s12 + $0xac] sm:$0xff]  }
 0x208   : > { %9894 = vmatpush3.bf16.msra.mxu0 %v12382_v21  ;;  %9926 = vmatpush3.bf16.msra.mxu1 %v12382_v21  ;;  %v14608_v21 = vld [vmem:[%s13196_s12 + $0x120] sm:$0xff]  }
 0x209   : > { %9837 = vmatprep.mubr.msk.bf16.mxu0 %vm12542_vm1, %v12541_v3  ;;  %9869 = vmatprep.mubr.msk.bf16.mxu1 %vm12542_vm1, %v12541_v3 }
 0x20a   : > { %9895 = vmatprep.subr.bf16.mxu0 %v12541_v3  ;;  %9927 = vmatprep.subr.bf16.mxu1 %v12541_v3 }
 0x20c   : > { %9896 = vmatpush3.bf16.msra.mxu0 %v12386_v22  ;;  %9928 = vmatpush3.bf16.msra.mxu1 %v12386_v22  ;;  %v12445_v22 = vld [vmem:[%s15387_s1 + $0x100] sm:$0xff]  }
 0x20d   : > { %9957 = vmatprep.subr.bf16.mxu0 %v12541_v3  ;;  %9989 = vmatprep.subr.bf16.mxu1 %v12541_v3 }
 0x20f   : > { %9838 = vmatmul.mubr.msk.bf16.gmra.mrb[4].mxu0 %vm238_vm2, %v13582_v29  ;;  %9870 = vmatmul.mubr.msk.bf16.gmra.mrb[4].mxu1 %vm238_vm2, %v14018_v23  ;;  %v14075_v29 = vld [vmem:[%s13196_s12 + $0xcc] sm:$0xff]  }
 0x210   : > { %9841 = vmatprep.mubr.msk.bf16.mxu0 %vm12542_vm1, %v12541_v3  ;;  %9873 = vmatprep.mubr.msk.bf16.mxu1 %vm12542_vm1, %v12541_v3 }
 0x217   : > { %9842 = vmatmul.mubr.msk.bf16.gmra.mrb[8].mxu0 %vm238_vm2, %v13597_v32  ;;  %9874 = vmatmul.mubr.msk.bf16.gmra.mrb[8].mxu1 %vm238_vm2, %v14031_v25  ;;  %v12391_v32 = vld [vmem:[%s15387_s1 + $0xa0] sm:$0xff]  }
 0x218   : > { %9845 = vmatprep.mubr.msk.bf16.mxu0 %vm12542_vm1, %v12541_v3  ;;  %9877 = vmatprep.mubr.msk.bf16.mxu1 %vm12542_vm1, %v12541_v3 }
 0x21f   : > { %9846 = vmatmul.mubr.msk.bf16.gmra.mrb[12].mxu0 %vm238_vm2, %v13608_v34  ;;  %9878 = vmatmul.mubr.msk.bf16.gmra.mrb[12].mxu1 %vm238_vm2, %v14042_v26  ;;  %v14105_v34 = vld [vmem:[%s13196_s12 + $0xa8] sm:$0xff]  }
 0x220   : > { %9849 = vmatprep.mubr.msk.bf16.mxu0 %vm12542_vm1, %v12541_v3  ;;  %9881 = vmatprep.mubr.msk.bf16.mxu1 %vm12542_vm1, %v12541_v3 }
 0x227   : > { %9850 = vmatmul.mubr.msk.bf16.gmra.mrb[16].mxu0 %vm238_vm2, %v13619_v37  ;;  %9882 = vmatmul.mubr.msk.bf16.gmra.mrb[16].mxu1 %vm238_vm2, %v14053_v27  ;;  %v14129_v37 = vld [vmem:[%s13196_s12 + $0xb8] sm:$0xff]  }
 0x228   : > { %9853 = vmatprep.mubr.msk.bf16.mxu0 %vm12542_vm1, %v12541_v3  ;;  %9885 = vmatprep.mubr.msk.bf16.mxu1 %vm12542_vm1, %v12541_v3 }
 0x22f   : > { %9854 = vmatmul.mubr.msk.bf16.gmra.mrb[20].mxu0 %vm238_vm2, %v13630_v39  ;;  %9886 = vmatmul.mubr.msk.bf16.gmra.mrb[20].mxu1 %vm238_vm2, %v14064_v28  ;;  %v14151_v39 = vld [vmem:[%s13196_s12 + $0xc8] sm:$0xff]  }
 0x230   : > { %9857 = vmatprep.mubr.msk.bf16.mxu0 %vm12542_vm1, %v12541_v3  ;;  %9889 = vmatprep.mubr.msk.bf16.mxu1 %vm12542_vm1, %v12541_v3 }
 0x237   : > { %9858 = vmatmul.mubr.msk.bf16.gmra.mrb[24].mxu0 %vm238_vm2, %v13641_v41  ;;  %9890 = vmatmul.mubr.msk.bf16.gmra.mrb[24].mxu1 %vm238_vm2, %v14075_v29  ;;  %v14173_v41 = vld [vmem:[%s13196_s12 + $0xd8] sm:$0xff]  }
 0x238   : > { %9897 = vmatprep.mubr.msk.bf16.mxu0 %vm12542_vm1, %v12541_v3  ;;  %9929 = vmatprep.mubr.msk.bf16.mxu1 %vm12542_vm1, %v12541_v3 }
 0x23f   : > { %9898 = vmatmul.mubr.msk.bf16.vlgmr.msra.gmra.mrb[0].mxu0 %vm238_vm2, %v13652_v44  ;;  %9930 = vmatmul.mubr.msk.bf16.vlgmr.msra.gmra.mrb[0].mxu1 %vm238_vm2, %v14086_v31  ;;  %v12404_v44 = vld [vmem:[%s15387_s1 + $0xb8] sm:$0xff]  }
 0x240   : > { %9958 = vmatpush3.bf16.msra.mxu0 %v12391_v32  ;;  %9990 = vmatpush3.bf16.msra.mxu1 %v12391_v32  ;;  %v14695_v32 = vld [vmem:[%s13196_s12 + $0x124] sm:$0xff]  }
 0x241   : > { %9901 = vmatprep.mubr.msk.bf16.mxu0 %vm12542_vm1, %v12541_v3  ;;  %9933 = vmatprep.mubr.msk.bf16.mxu1 %vm12542_vm1, %v12541_v3 }
 0x242   : > { %9959 = vmatprep.subr.bf16.mxu0 %v12541_v3  ;;  %9991 = vmatprep.subr.bf16.mxu1 %v12541_v3 }
 0x244   : > { %9960 = vmatpush3.bf16.msra.mxu0 %v12395_v33  ;;  %9992 = vmatpush3.bf16.msra.mxu1 %v12395_v33  ;;  %v12454_v33 = vld [vmem:[%s15387_s1 + $0x110] sm:$0xff]  }
 0x245   : > { %10021 = vmatprep.subr.bf16.mxu0 %v12541_v3  ;;  %10053 = vmatprep.subr.bf16.mxu1 %v12541_v3 }
 0x247   : > { %9902 = vmatmul.mubr.msk.bf16.gmra.mrb[4].mxu0 %vm238_vm2, %v13671_v49  ;;  %9934 = vmatmul.mubr.msk.bf16.gmra.mrb[4].mxu1 %vm238_vm2, %v14105_v34  ;;  %v14227_v49 = vld [vmem:[%s13196_s12 + $0xf8] sm:$0xff]  }
 0x248   : > { %9905 = vmatprep.mubr.msk.bf16.mxu0 %vm12542_vm1, %v12541_v3  ;;  %9937 = vmatprep.mubr.msk.bf16.mxu1 %vm12542_vm1, %v12541_v3 }
 0x24f   : > { %9906 = vmatmul.mubr.msk.bf16.gmra.mrb[8].mxu0 %vm238_vm2, %v13684_v51  ;;  %9938 = vmatmul.mubr.msk.bf16.gmra.mrb[8].mxu1 %vm238_vm2, %v14118_v35  ;;  %v14249_v51 = vld [vmem:[%s13196_s12 + $0x108] sm:$0xff]  }
 0x250   : > { %9909 = vmatprep.mubr.msk.bf16.mxu0 %vm12542_vm1, %v12541_v3  ;;  %9941 = vmatprep.mubr.msk.bf16.mxu1 %vm12542_vm1, %v12541_v3 }
 0x257   : > { %9910 = vmatmul.mubr.msk.bf16.gmra.mrb[12].mxu0 %vm238_vm2, %v13695_v54  ;;  %9942 = vmatmul.mubr.msk.bf16.gmra.mrb[12].mxu1 %vm238_vm2, %v14129_v37  ;;  %v12409_v54 = vld [vmem:[%s15387_s1 + $0xc0] sm:$0xff]  }
 0x258   : > { %9913 = vmatprep.mubr.msk.bf16.mxu0 %vm12542_vm1, %v12541_v3  ;;  %9945 = vmatprep.mubr.msk.bf16.mxu1 %vm12542_vm1, %v12541_v3 }
 0x25f   : > { %9914 = vmatmul.mubr.msk.bf16.gmra.mrb[16].mxu0 %vm238_vm2, %v13706_v57  ;;  %9946 = vmatmul.mubr.msk.bf16.gmra.mrb[16].mxu1 %vm238_vm2, %v14140_v38  ;;  %v14279_v57 = vld [vmem:[%s13196_s12 + $0xe4] sm:$0xff]  }
 0x260   : > { %9917 = vmatprep.mubr.msk.bf16.mxu0 %vm12542_vm1, %v12541_v3  ;;  %9949 = vmatprep.mubr.msk.bf16.mxu1 %vm12542_vm1, %v12541_v3 }
 0x267   : > { %9918 = vmatmul.mubr.msk.bf16.gmra.mrb[20].mxu0 %vm238_vm2, %v13717_v61  ;;  %9950 = vmatmul.mubr.msk.bf16.gmra.mrb[20].mxu1 %vm238_vm2, %v14151_v39  ;;  %v14303_v61 = vld [vmem:[%s13196_s12 + $0xf4] sm:$0xff]  }
 0x268   : > { %9921 = vmatprep.mubr.msk.bf16.mxu0 %vm12542_vm1, %v12541_v3  ;;  %9953 = vmatprep.mubr.msk.bf16.mxu1 %vm12542_vm1, %v12541_v3 }
 0x26f   : > { %9922 = vmatmul.mubr.msk.bf16.gmra.mrb[24].mxu0 %vm238_vm2, %v13728_v2  ;;  %9954 = vmatmul.mubr.msk.bf16.gmra.mrb[24].mxu1 %vm238_vm2, %v14162_v40  ;;  %v14325_v2 = vld [vmem:[%s13196_s12 + $0x104] sm:$0xff]  }
 0x270   : > { %9961 = vmatprep.mubr.msk.bf16.mxu0 %vm12542_vm1, %v12541_v3  ;;  %9993 = vmatprep.mubr.msk.bf16.mxu1 %vm12542_vm1, %v12541_v3 }
 0x277   : > { %9962 = vmatmul.mubr.msk.bf16.vlgmr.msra.gmra.mrb[0].mxu0 %vm238_vm2, %v13738_v5  ;;  %9994 = vmatmul.mubr.msk.bf16.vlgmr.msra.gmra.mrb[0].mxu1 %vm238_vm2, %v14173_v41  ;;  %v14336_v5 = vld [vmem:[%s13196_s12 + $0x10c] sm:$0xff]  }
 0x278   : > { %10022 = vmatpush3.bf16.msra.mxu0 %v12400_v43  ;;  %10054 = vmatpush3.bf16.msra.mxu1 %v12400_v43  ;;  %v14782_v43 = vld [vmem:[%s13196_s12 + $0x128] sm:$0xff]  }
 0x279   : > { %9965 = vmatprep.mubr.msk.bf16.mxu0 %vm12542_vm1, %v12541_v3  ;;  %9997 = vmatprep.mubr.msk.bf16.mxu1 %vm12542_vm1, %v12541_v3 }
 0x27a   : > { %10023 = vmatprep.subr.bf16.mxu0 %v12541_v3  ;;  %10055 = vmatprep.subr.bf16.mxu1 %v12541_v3 }
 0x27c   : > { %10024 = vmatpush3.bf16.msra.mxu0 %v12404_v44  ;;  %10056 = vmatpush3.bf16.msra.mxu1 %v12404_v44  ;;  %v12463_v44 = vld [vmem:[%s15387_s1 + $0x120] sm:$0xff]  }
 0x27d   : > { %10085 = vmatprep.subr.bf16.mxu0 %v12541_v3  ;;  %10117 = vmatprep.subr.bf16.mxu1 %v12541_v3 }
 0x27f   : > { %9966 = vmatmul.mubr.msk.bf16.gmra.mrb[4].mxu0 %vm238_vm2, %v13757_v53  ;;  %9998 = vmatmul.mubr.msk.bf16.gmra.mrb[4].mxu1 %vm238_vm2, %v14192_v45  ;;  %v12422_v53 = vld [vmem:[%s15387_s1 + $0xd8] sm:$0xff]  }
 0x280   : > { %9969 = vmatprep.mubr.msk.bf16.mxu0 %vm12542_vm1, %v12541_v3  ;;  %10001 = vmatprep.mubr.msk.bf16.mxu1 %vm12542_vm1, %v12541_v3 }
 0x287   : > { %9970 = vmatmul.mubr.msk.bf16.gmra.mrb[8].mxu0 %vm238_vm2, %v13770_v9  ;;  %10002 = vmatmul.mubr.msk.bf16.gmra.mrb[8].mxu1 %vm238_vm2, %v14205_v46  ;;  %v14366_v9 = vld [vmem:[%s13196_s12 + $0xe8] sm:$0xff]  }
 0x288   : > { %9973 = vmatprep.mubr.msk.bf16.mxu0 %vm12542_vm1, %v12541_v3  ;;  %10005 = vmatprep.mubr.msk.bf16.mxu1 %vm12542_vm1, %v12541_v3 }
 0x28f   : > { %9974 = vmatmul.mubr.msk.bf16.gmra.mrb[12].mxu0 %vm238_vm2, %v13781_v56  ;;  %10006 = vmatmul.mubr.msk.bf16.gmra.mrb[12].mxu1 %vm238_vm2, %v14216_v47  ;;  %v14379_v56 = vld [vmem:[%s13196_s12 + $0xf0] sm:$0xff]  }
 0x290   : > { %9977 = vmatprep.mubr.msk.bf16.mxu0 %vm12542_vm1, %v12541_v3  ;;  %10009 = vmatprep.mubr.msk.bf16.mxu1 %vm12542_vm1, %v12541_v3 }
 0x297   : > { %9978 = vmatmul.mubr.msk.bf16.gmra.mrb[16].mxu0 %vm238_vm2, %v13792_v58  ;;  %10010 = vmatmul.mubr.msk.bf16.gmra.mrb[16].mxu1 %vm238_vm2, %v14227_v49  ;;  %v14390_v58 = vld [vmem:[%s13196_s12 + $0xf8] sm:$0xff]  }
 0x298   : > { %9981 = vmatprep.mubr.msk.bf16.mxu0 %vm12542_vm1, %v12541_v3  ;;  %10013 = vmatprep.mubr.msk.bf16.mxu1 %vm12542_vm1, %v12541_v3 }
 0x29f   : > { %9982 = vmatmul.mubr.msk.bf16.gmra.mrb[20].mxu0 %vm238_vm2, %v13803_v60  ;;  %10014 = vmatmul.mubr.msk.bf16.gmra.mrb[20].mxu1 %vm238_vm2, %v14238_v50  ;;  %v14401_v60 = vld [vmem:[%s13196_s12 + $0x100] sm:$0xff]  }
 0x2a0   : > { %9985 = vmatprep.mubr.msk.bf16.mxu0 %vm12542_vm1, %v12541_v3  ;;  %10017 = vmatprep.mubr.msk.bf16.mxu1 %vm12542_vm1, %v12541_v3 }
 0x2a7   : > { %9986 = vmatmul.mubr.msk.bf16.gmra.mrb[24].mxu0 %vm238_vm2, %v13814_v62  ;;  %10018 = vmatmul.mubr.msk.bf16.gmra.mrb[24].mxu1 %vm238_vm2, %v14249_v51  ;;  %v14412_v62 = vld [vmem:[%s13196_s12 + $0x108] sm:$0xff]  }
 0x2a8   : > { %10025 = vmatprep.mubr.msk.bf16.mxu0 %vm12542_vm1, %v12541_v3  ;;  %10057 = vmatprep.mubr.msk.bf16.mxu1 %vm12542_vm1, %v12541_v3 }
 0x2af   : > { %10026 = vmatmul.mubr.msk.bf16.vlgmr.msra.gmra.mrb[0].mxu0 %vm238_vm2, %v13825_v1  ;;  %10058 = vmatmul.mubr.msk.bf16.vlgmr.msra.gmra.mrb[0].mxu1 %vm238_vm2, %v14260_v52  ;;  %v14423_v1 = vld [vmem:[%s13196_s12 + $0x110] sm:$0xff]  }
 0x2b0   : > { %10086 = vmatpush3.bf16.msra.mxu0 %v12409_v54  ;;  %10118 = vmatpush3.bf16.msra.mxu1 %v12409_v54  ;;  %v14869_v54 = vld [vmem:[%s13196_s12 + $0x12c] sm:$0xff]  }
 0x2b1   : > { %10029 = vmatprep.mubr.msk.bf16.mxu0 %vm12542_vm1, %v12541_v3  ;;  %10061 = vmatprep.mubr.msk.bf16.mxu1 %vm12542_vm1, %v12541_v3 }
 0x2b2   : > { %10087 = vmatprep.subr.bf16.mxu0 %v12541_v3  ;;  %10119 = vmatprep.subr.bf16.mxu1 %v12541_v3 }
 0x2b4   : > { %10088 = vmatpush3.bf16.msra.mxu0 %v12413_v55  ;;  %10120 = vmatpush3.bf16.msra.mxu1 %v12413_v55  ;;  %v12472_v55 = vld [vmem:[%s15387_s1 + $0x130] sm:$0xff]  }
 0x2b5   : > { %10149 = vmatprep.subr.bf16.mxu0 %v12541_v3  ;;  %10181 = vmatprep.subr.bf16.mxu1 %v12541_v3 }
 0x2b7   : > { %10030 = vmatmul.mubr.msk.bf16.gmra.mrb[4].mxu0 %vm238_vm2, %v13844_v11  ;;  %10062 = vmatmul.mubr.msk.bf16.gmra.mrb[4].mxu1 %vm238_vm2, %v14279_v57  ;;  %v12431_v11 = vld [vmem:[%s15387_s1 + $0xe8] sm:$0xff]  }
 0x2b8   : > { %10033 = vmatprep.mubr.msk.bf16.mxu0 %vm12542_vm1, %v12541_v3  ;;  %10065 = vmatprep.mubr.msk.bf16.mxu1 %vm12542_vm1, %v12541_v3 }
 0x2bf   : > { %10034 = vmatmul.mubr.msk.bf16.gmra.mrb[8].mxu0 %vm238_vm2, %v13857_v14  ;;  %10066 = vmatmul.mubr.msk.bf16.gmra.mrb[8].mxu1 %vm238_vm2, %v14292_v59  ;;  %v14453_v14 = vld [vmem:[%s13196_s12 + $0xec] sm:$0xff]  }
 0x2c0   : > { %10037 = vmatprep.mubr.msk.bf16.mxu0 %vm12542_vm1, %v12541_v3  ;;  %10069 = vmatprep.mubr.msk.bf16.mxu1 %vm12542_vm1, %v12541_v3 }
 0x2c7   : > { %10038 = vmatmul.mubr.msk.bf16.gmra.mrb[12].mxu0 %vm238_vm2, %v13868_v18  ;;  %10070 = vmatmul.mubr.msk.bf16.gmra.mrb[12].mxu1 %vm238_vm2, %v14303_v61  ;;  %v14466_v18 = vld [vmem:[%s13196_s12 + $0xf4] sm:$0xff]  }
 0x2c8   : > { %10041 = vmatprep.mubr.msk.bf16.mxu0 %vm12542_vm1, %v12541_v3  ;;  %10073 = vmatprep.mubr.msk.bf16.mxu1 %vm12542_vm1, %v12541_v3 }
 0x2cf   : > { %10042 = vmatmul.mubr.msk.bf16.gmra.mrb[16].mxu0 %vm238_vm2, %v13879_v24  ;;  %10074 = vmatmul.mubr.msk.bf16.gmra.mrb[16].mxu1 %vm238_vm2, %v14314_v63  ;;  %v14477_v24 = vld [vmem:[%s13196_s12 + $0xfc] sm:$0xff]  }
 0x2d0   : > { %10045 = vmatprep.mubr.msk.bf16.mxu0 %vm12542_vm1, %v12541_v3  ;;  %10077 = vmatprep.mubr.msk.bf16.mxu1 %vm12542_vm1, %v12541_v3 }
 0x2d7   : > { %10046 = vmatmul.mubr.msk.bf16.gmra.mrb[20].mxu0 %vm238_vm2, %v13890_v30  ;;  %10078 = vmatmul.mubr.msk.bf16.gmra.mrb[20].mxu1 %vm238_vm2, %v14325_v2  ;;  %v14488_v30 = vld [vmem:[%s13196_s12 + $0x104] sm:$0xff]  }
 0x2d8   : > { %10049 = vmatprep.mubr.msk.bf16.mxu0 %vm12542_vm1, %v12541_v3  ;;  %10081 = vmatprep.mubr.msk.bf16.mxu1 %vm12542_vm1, %v12541_v3 }
 0x2df   : > { %10050 = vmatmul.mubr.msk.bf16.gmra.mrb[24].mxu0 %vm238_vm2, %v13901_v36  ;;  %10082 = vmatmul.mubr.msk.bf16.gmra.mrb[24].mxu1 %vm238_vm2, %v14336_v5  ;;  %v14499_v36 = vld [vmem:[%s13196_s12 + $0x10c] sm:$0xff]  }
 0x2e0   : > { %10089 = vmatprep.mubr.msk.bf16.mxu0 %vm12542_vm1, %v12541_v3  ;;  %10121 = vmatprep.mubr.msk.bf16.mxu1 %vm12542_vm1, %v12541_v3 }
 0x2e7   : > { %10090 = vmatmul.mubr.msk.bf16.vlgmr.msra.gmra.mrb[0].mxu0 %vm238_vm2, %v13912_v42  ;;  %10122 = vmatmul.mubr.msk.bf16.vlgmr.msra.gmra.mrb[0].mxu1 %vm238_vm2, %v14347_v7  ;;  %v14510_v42 = vld [vmem:[%s13196_s12 + $0x114] sm:$0xff]  }
 0x2e8   : > { %10150 = vmatpush3.bf16.msra.mxu0 %v12418_v8  ;;  %10182 = vmatpush3.bf16.msra.mxu1 %v12418_v8  ;;  %v14956_v8 = vld [vmem:[%s13196_s12 + $0x130] sm:$0xff]  }
 0x2e9   : > { %10093 = vmatprep.mubr.msk.bf16.mxu0 %vm12542_vm1, %v12541_v3  ;;  %10125 = vmatprep.mubr.msk.bf16.mxu1 %vm12542_vm1, %v12541_v3 }
 0x2ea   : > { %10151 = vmatprep.subr.bf16.mxu0 %v12541_v3  ;;  %10183 = vmatprep.subr.bf16.mxu1 %v12541_v3 }
 0x2ec   : > { %10152 = vmatpush3.bf16.msra.mxu0 %v12422_v53  ;;  %10184 = vmatpush3.bf16.msra.mxu1 %v12422_v53  ;;  %v12481_v53 = vld [vmem:[%s15387_s1 + $0x140] sm:$0xff]  }
 0x2ed   : > { %10213 = vmatprep.subr.bf16.mxu0 %v12541_v3  ;;  %10245 = vmatprep.subr.bf16.mxu1 %v12541_v3 }
 0x2ef   : > { %10094 = vmatmul.mubr.msk.bf16.gmra.mrb[4].mxu0 %vm238_vm2, %v13931_v6  ;;  %10126 = vmatmul.mubr.msk.bf16.gmra.mrb[4].mxu1 %vm238_vm2, %v14366_v9  ;;  %v12440_v6 = vld [vmem:[%s15387_s1 + $0xf8] sm:$0xff]  }
 0x2f0   : > { %10097 = vmatprep.mubr.msk.bf16.mxu0 %vm12542_vm1, %v12541_v3  ;;  %10129 = vmatprep.mubr.msk.bf16.mxu1 %vm12542_vm1, %v12541_v3 }
 0x2f7   : > { %10098 = vmatmul.mubr.msk.bf16.gmra.mrb[8].mxu0 %vm238_vm2, %v13944_v19  ;;  %10130 = vmatmul.mubr.msk.bf16.gmra.mrb[8].mxu1 %vm238_vm2, %v14379_v56  ;;  %v14540_v19 = vld [vmem:[%s13196_s12 + $0xf0] sm:$0xff]  }
 0x2f8   : > { %10101 = vmatprep.mubr.msk.bf16.mxu0 %vm12542_vm1, %v12541_v3  ;;  %10133 = vmatprep.mubr.msk.bf16.mxu1 %vm12542_vm1, %v12541_v3 }
 0x2ff   : > { %10102 = vmatmul.mubr.msk.bf16.gmra.mrb[12].mxu0 %vm238_vm2, %v13955_v10  ;;  %10134 = vmatmul.mubr.msk.bf16.gmra.mrb[12].mxu1 %vm238_vm2, %v14390_v58  ;;  %v14553_v10 = vld [vmem:[%s13196_s12 + $0xf8] sm:$0xff]  }
 0x300   : > { %10105 = vmatprep.mubr.msk.bf16.mxu0 %vm12542_vm1, %v12541_v3  ;;  %10137 = vmatprep.mubr.msk.bf16.mxu1 %vm12542_vm1, %v12541_v3 }
 0x307   : > { %10106 = vmatmul.mubr.msk.bf16.gmra.mrb[16].mxu0 %vm238_vm2, %v13966_v13  ;;  %10138 = vmatmul.mubr.msk.bf16.gmra.mrb[16].mxu1 %vm238_vm2, %v14401_v60  ;;  %v14564_v13 = vld [vmem:[%s13196_s12 + $0x100] sm:$0xff]  }
 0x308   : > { %10109 = vmatprep.mubr.msk.bf16.mxu0 %vm12542_vm1, %v12541_v3  ;;  %10141 = vmatprep.mubr.msk.bf16.mxu1 %vm12542_vm1, %v12541_v3 }
 0x30f   : > { %10110 = vmatmul.mubr.msk.bf16.gmra.mrb[20].mxu0 %vm238_vm2, %v13977_v15  ;;  %10142 = vmatmul.mubr.msk.bf16.gmra.mrb[20].mxu1 %vm238_vm2, %v14412_v62  ;;  %v14575_v15 = vld [vmem:[%s13196_s12 + $0x108] sm:$0xff]  }
 0x310   : > { %10113 = vmatprep.mubr.msk.bf16.mxu0 %vm12542_vm1, %v12541_v3  ;;  %10145 = vmatprep.mubr.msk.bf16.mxu1 %vm12542_vm1, %v12541_v3 }
 0x317   : > { %10114 = vmatmul.mubr.msk.bf16.gmra.mrb[24].mxu0 %vm238_vm2, %v13988_v17  ;;  %10146 = vmatmul.mubr.msk.bf16.gmra.mrb[24].mxu1 %vm238_vm2, %v14423_v1  ;;  %v14586_v17 = vld [vmem:[%s13196_s12 + $0x110] sm:$0xff]  }
 0x318   : > { %10153 = vmatprep.mubr.msk.bf16.mxu0 %vm12542_vm1, %v12541_v3  ;;  %10185 = vmatprep.mubr.msk.bf16.mxu1 %vm12542_vm1, %v12541_v3 }
 0x31f   : > { %10154 = vmatmul.mubr.msk.bf16.vlgmr.msra.gmra.mrb[0].mxu0 %vm238_vm2, %v13999_v20  ;;  %10186 = vmatmul.mubr.msk.bf16.vlgmr.msra.gmra.mrb[0].mxu1 %vm238_vm2, %v14434_v12  ;;  %v14597_v20 = vld [vmem:[%s13196_s12 + $0x118] sm:$0xff]  }
 0x320   : > { %10214 = vmatpush3.bf16.msra.mxu0 %v12427_v4  ;;  %10246 = vmatpush3.bf16.msra.mxu1 %v12427_v4  ;;  %v12489_v4 = vld [vmem:[%s13196_s12 + $0x168] sm:$0xff]  }
 0x321   : > { %10157 = vmatprep.mubr.msk.bf16.mxu0 %vm12542_vm1, %v12541_v3  ;;  %10189 = vmatprep.mubr.msk.bf16.mxu1 %vm12542_vm1, %v12541_v3 }
 0x322   : > { %10215 = vmatprep.subr.bf16.mxu0 %v12541_v3  ;;  %10247 = vmatprep.subr.bf16.mxu1 %v12541_v3 }
 0x324   : > { %10216 = vmatpush3.bf16.msra.mxu0 %v12431_v11  ;;  %10248 = vmatpush3.bf16.msra.mxu1 %v12431_v11  ;;  %v12490_v11 = vld [vmem:[%s15387_s1 + $0x150] sm:$0xff]  }
 0x325   : > { %10277 = vmatprep.subr.bf16.mxu0 %v12541_v3  ;;  %10309 = vmatprep.subr.bf16.mxu1 %v12541_v3 }
 0x327   : > { %10158 = vmatmul.mubr.msk.bf16.gmra.mrb[4].mxu0 %vm238_vm2, %v14018_v23  ;;  %10190 = vmatmul.mubr.msk.bf16.gmra.mrb[4].mxu1 %vm238_vm2, %v14453_v14  ;;  %v12449_v23 = vld [vmem:[%s15387_s1 + $0x108] sm:$0xff]  }
 0x328   : > { %10161 = vmatprep.mubr.msk.bf16.mxu0 %vm12542_vm1, %v12541_v3  ;;  %10193 = vmatprep.mubr.msk.bf16.mxu1 %vm12542_vm1, %v12541_v3 }
 0x32f   : > { %10162 = vmatmul.mubr.msk.bf16.gmra.mrb[8].mxu0 %vm238_vm2, %v14031_v25  ;;  %10194 = vmatmul.mubr.msk.bf16.gmra.mrb[8].mxu1 %vm238_vm2, %v14466_v18  ;;  %v14627_v25 = vld [vmem:[%s13196_s12 + $0x128] sm:$0xff]  }
 0x330   : > { %10165 = vmatprep.mubr.msk.bf16.mxu0 %vm12542_vm1, %v12541_v3  ;;  %10197 = vmatprep.mubr.msk.bf16.mxu1 %vm12542_vm1, %v12541_v3 }
 0x337   : > { %10166 = vmatmul.mubr.msk.bf16.gmra.mrb[12].mxu0 %vm238_vm2, %v14042_v26  ;;  %10198 = vmatmul.mubr.msk.bf16.gmra.mrb[12].mxu1 %vm238_vm2, %v14477_v24  ;;  %v14640_v26 = vld [vmem:[%s13196_s12 + $0x130] sm:$0xff]  }
 0x338   : > { %10169 = vmatprep.mubr.msk.bf16.mxu0 %vm12542_vm1, %v12541_v3  ;;  %10201 = vmatprep.mubr.msk.bf16.mxu1 %vm12542_vm1, %v12541_v3 }
 0x33f   : > { %10170 = vmatmul.mubr.msk.bf16.gmra.mrb[16].mxu0 %vm238_vm2, %v14053_v27  ;;  %10202 = vmatmul.mubr.msk.bf16.gmra.mrb[16].mxu1 %vm238_vm2, %v14488_v30  ;;  %v14651_v27 = vld [vmem:[%s13196_s12 + $0x138] sm:$0xff]  }
 0x340   : > { %10173 = vmatprep.mubr.msk.bf16.mxu0 %vm12542_vm1, %v12541_v3  ;;  %10205 = vmatprep.mubr.msk.bf16.mxu1 %vm12542_vm1, %v12541_v3 }
 0x347   : > { %10174 = vmatmul.mubr.msk.bf16.gmra.mrb[20].mxu0 %vm238_vm2, %v14064_v28  ;;  %10206 = vmatmul.mubr.msk.bf16.gmra.mrb[20].mxu1 %vm238_vm2, %v14499_v36  ;;  %v14662_v28 = vld [vmem:[%s13196_s12 + $0x140] sm:$0xff]  }
 0x348   : > { %10177 = vmatprep.mubr.msk.bf16.mxu0 %vm12542_vm1, %v12541_v3  ;;  %10209 = vmatprep.mubr.msk.bf16.mxu1 %vm12542_vm1, %v12541_v3 }
 0x34f   : > { %10178 = vmatmul.mubr.msk.bf16.gmra.mrb[24].mxu0 %vm238_vm2, %v14075_v29  ;;  %10210 = vmatmul.mubr.msk.bf16.gmra.mrb[24].mxu1 %vm238_vm2, %v14510_v42  ;;  %v14673_v29 = vld [vmem:[%s13196_s12 + $0x148] sm:$0xff]  }
 0x350   : > { %10217 = vmatprep.mubr.msk.bf16.mxu0 %vm12542_vm1, %v12541_v3  ;;  %10249 = vmatprep.mubr.msk.bf16.mxu1 %vm12542_vm1, %v12541_v3 }
 0x357   : > { %10218 = vmatmul.mubr.msk.bf16.vlgmr.msra.gmra.mrb[0].mxu0 %vm238_vm2, %v14086_v31  ;;  %10250 = vmatmul.mubr.msk.bf16.vlgmr.msra.gmra.mrb[0].mxu1 %vm238_vm2, %v14521_v16  ;;  %v14684_v31 = vld [vmem:[%s13196_s12 + $0x150] sm:$0xff]  }
 0x358   : > { %10278 = vmatpush3.bf16.msra.mxu0 %v12436_v48  ;;  %10310 = vmatpush3.bf16.msra.mxu1 %v12436_v48  ;;  %v12498_v48 = vld [vmem:[%s13196_s12 + $0x16c] sm:$0xff]  }
 0x359   : > { %10221 = vmatprep.mubr.msk.bf16.mxu0 %vm12542_vm1, %v12541_v3  ;;  %10253 = vmatprep.mubr.msk.bf16.mxu1 %vm12542_vm1, %v12541_v3 }
 0x35a   : > { %10279 = vmatprep.subr.bf16.mxu0 %v12541_v3  ;;  %10311 = vmatprep.subr.bf16.mxu1 %v12541_v3 }
 0x35c   : > { %10280 = vmatpush3.bf16.msra.mxu0 %v12440_v6  ;;  %10312 = vmatpush3.bf16.msra.mxu1 %v12440_v6  ;;  %v12499_v6 = vld [vmem:[%s15387_s1 + $0x160] sm:$0xff]  }
 0x35d   : > { %10341 = vmatprep.subr.bf16.mxu0 %v12541_v3  ;;  %10373 = vmatprep.subr.bf16.mxu1 %v12541_v3 }
 0x35f   : > { %10222 = vmatmul.mubr.msk.bf16.gmra.mrb[4].mxu0 %vm238_vm2, %v14105_v34  ;;  %10254 = vmatmul.mubr.msk.bf16.gmra.mrb[4].mxu1 %vm238_vm2, %v14540_v19  ;;  %v12458_v34 = vld [vmem:[%s15387_s1 + $0x118] sm:$0xff]  }
 0x360   : > { %10225 = vmatprep.mubr.msk.bf16.mxu0 %vm12542_vm1, %v12541_v3  ;;  %10257 = vmatprep.mubr.msk.bf16.mxu1 %vm12542_vm1, %v12541_v3 }
 0x367   : > { %10226 = vmatmul.mubr.msk.bf16.gmra.mrb[8].mxu0 %vm238_vm2, %v14118_v35  ;;  %10258 = vmatmul.mubr.msk.bf16.gmra.mrb[8].mxu1 %vm238_vm2, %v14553_v10  ;;  %v14714_v35 = vld [vmem:[%s13196_s12 + $0x12c] sm:$0xff]  }
 0x368   : > { %10229 = vmatprep.mubr.msk.bf16.mxu0 %vm12542_vm1, %v12541_v3  ;;  %10261 = vmatprep.mubr.msk.bf16.mxu1 %vm12542_vm1, %v12541_v3 }
 0x36f   : > { %10230 = vmatmul.mubr.msk.bf16.gmra.mrb[12].mxu0 %vm238_vm2, %v14129_v37  ;;  %10262 = vmatmul.mubr.msk.bf16.gmra.mrb[12].mxu1 %vm238_vm2, %v14564_v13  ;;  %v14727_v37 = vld [vmem:[%s13196_s12 + $0x134] sm:$0xff]  }
 0x370   : > { %10233 = vmatprep.mubr.msk.bf16.mxu0 %vm12542_vm1, %v12541_v3  ;;  %10265 = vmatprep.mubr.msk.bf16.mxu1 %vm12542_vm1, %v12541_v3 }
 0x377   : > { %10234 = vmatmul.mubr.msk.bf16.gmra.mrb[16].mxu0 %vm238_vm2, %v14140_v38  ;;  %10266 = vmatmul.mubr.msk.bf16.gmra.mrb[16].mxu1 %vm238_vm2, %v14575_v15  ;;  %v14738_v38 = vld [vmem:[%s13196_s12 + $0x13c] sm:$0xff]  }
 0x378   : > { %10237 = vmatprep.mubr.msk.bf16.mxu0 %vm12542_vm1, %v12541_v3  ;;  %10269 = vmatprep.mubr.msk.bf16.mxu1 %vm12542_vm1, %v12541_v3 }
 0x37f   : > { %10238 = vmatmul.mubr.msk.bf16.gmra.mrb[20].mxu0 %vm238_vm2, %v14151_v39  ;;  %10270 = vmatmul.mubr.msk.bf16.gmra.mrb[20].mxu1 %vm238_vm2, %v14586_v17  ;;  %v14749_v39 = vld [vmem:[%s13196_s12 + $0x144] sm:$0xff]  }
 0x380   : > { %10241 = vmatprep.mubr.msk.bf16.mxu0 %vm12542_vm1, %v12541_v3  ;;  %10273 = vmatprep.mubr.msk.bf16.mxu1 %vm12542_vm1, %v12541_v3 }
 0x387   : > { %10242 = vmatmul.mubr.msk.bf16.gmra.mrb[24].mxu0 %vm238_vm2, %v14162_v40  ;;  %10274 = vmatmul.mubr.msk.bf16.gmra.mrb[24].mxu1 %vm238_vm2, %v14597_v20  ;;  %v14760_v40 = vld [vmem:[%s13196_s12 + $0x14c] sm:$0xff]  }
 0x388   : > { %10281 = vmatprep.mubr.msk.bf16.mxu0 %vm12542_vm1, %v12541_v3  ;;  %10313 = vmatprep.mubr.msk.bf16.mxu1 %vm12542_vm1, %v12541_v3 }
 0x38f   : > { %10282 = vmatmul.mubr.msk.bf16.vlgmr.msra.gmra.mrb[0].mxu0 %vm238_vm2, %v14173_v41  ;;  %10314 = vmatmul.mubr.msk.bf16.vlgmr.msra.gmra.mrb[0].mxu1 %vm238_vm2, %v14608_v21  ;;  %v14771_v41 = vld [vmem:[%s13196_s12 + $0x154] sm:$0xff]  }
 0x390   : > { %10342 = vmatpush3.bf16.msra.mxu0 %v12445_v22  ;;  %10374 = vmatpush3.bf16.msra.mxu1 %v12445_v22  ;;  %v12507_v22 = vld [vmem:[%s13196_s12 + $0x170] sm:$0xff]  }
 0x391   : > { %10285 = vmatprep.mubr.msk.bf16.mxu0 %vm12542_vm1, %v12541_v3  ;;  %10317 = vmatprep.mubr.msk.bf16.mxu1 %vm12542_vm1, %v12541_v3 }
 0x392   : > { %10343 = vmatprep.subr.bf16.mxu0 %v12541_v3  ;;  %10375 = vmatprep.subr.bf16.mxu1 %v12541_v3 }
 0x394   : > { %10344 = vmatpush3.bf16.msra.mxu0 %v12449_v23  ;;  %10376 = vmatpush3.bf16.msra.mxu1 %v12449_v23  ;;  %v12508_v23 = vld [vmem:[%s15387_s1 + $0x170] sm:$0xff]  }
 0x395   : > { %10405 = vmatprep.subr.bf16.mxu0 %v12541_v3  ;;  %10437 = vmatprep.subr.bf16.mxu1 %v12541_v3 }
 0x397   : > { %10286 = vmatmul.mubr.msk.bf16.gmra.mrb[4].mxu0 %vm238_vm2, %v14192_v45  ;;  %10318 = vmatmul.mubr.msk.bf16.gmra.mrb[4].mxu1 %vm238_vm2, %v14627_v25  ;;  %v12467_v45 = vld [vmem:[%s15387_s1 + $0x128] sm:$0xff]  }
 0x398   : > { %10289 = vmatprep.mubr.msk.bf16.mxu0 %vm12542_vm1, %v12541_v3  ;;  %10321 = vmatprep.mubr.msk.bf16.mxu1 %vm12542_vm1, %v12541_v3 }
 0x39f   : > { %10290 = vmatmul.mubr.msk.bf16.gmra.mrb[8].mxu0 %vm238_vm2, %v14205_v46  ;;  %10322 = vmatmul.mubr.msk.bf16.gmra.mrb[8].mxu1 %vm238_vm2, %v14640_v26  ;;  %v14801_v46 = vld [vmem:[%s13196_s12 + $0x130] sm:$0xff]  }
 0x3a0   : > { %10293 = vmatprep.mubr.msk.bf16.mxu0 %vm12542_vm1, %v12541_v3  ;;  %10325 = vmatprep.mubr.msk.bf16.mxu1 %vm12542_vm1, %v12541_v3 }
 0x3a7   : > { %10294 = vmatmul.mubr.msk.bf16.gmra.mrb[12].mxu0 %vm238_vm2, %v14216_v47  ;;  %10326 = vmatmul.mubr.msk.bf16.gmra.mrb[12].mxu1 %vm238_vm2, %v14651_v27  ;;  %v14814_v47 = vld [vmem:[%s13196_s12 + $0x138] sm:$0xff]  }
 0x3a8   : > { %10297 = vmatprep.mubr.msk.bf16.mxu0 %vm12542_vm1, %v12541_v3  ;;  %10329 = vmatprep.mubr.msk.bf16.mxu1 %vm12542_vm1, %v12541_v3 }
 0x3af   : > { %10298 = vmatmul.mubr.msk.bf16.gmra.mrb[16].mxu0 %vm238_vm2, %v14227_v49  ;;  %10330 = vmatmul.mubr.msk.bf16.gmra.mrb[16].mxu1 %vm238_vm2, %v14662_v28  ;;  %v14825_v49 = vld [vmem:[%s13196_s12 + $0x140] sm:$0xff]  }
 0x3b0   : > { %10301 = vmatprep.mubr.msk.bf16.mxu0 %vm12542_vm1, %v12541_v3  ;;  %10333 = vmatprep.mubr.msk.bf16.mxu1 %vm12542_vm1, %v12541_v3 }
 0x3b7   : > { %10302 = vmatmul.mubr.msk.bf16.gmra.mrb[20].mxu0 %vm238_vm2, %v14238_v50  ;;  %10334 = vmatmul.mubr.msk.bf16.gmra.mrb[20].mxu1 %vm238_vm2, %v14673_v29  ;;  %v14836_v50 = vld [vmem:[%s13196_s12 + $0x148] sm:$0xff]  }
 0x3b8   : > { %10305 = vmatprep.mubr.msk.bf16.mxu0 %vm12542_vm1, %v12541_v3  ;;  %10337 = vmatprep.mubr.msk.bf16.mxu1 %vm12542_vm1, %v12541_v3 }
 0x3bf   : > { %10306 = vmatmul.mubr.msk.bf16.gmra.mrb[24].mxu0 %vm238_vm2, %v14249_v51  ;;  %10338 = vmatmul.mubr.msk.bf16.gmra.mrb[24].mxu1 %vm238_vm2, %v14684_v31  ;;  %v14847_v51 = vld [vmem:[%s13196_s12 + $0x150] sm:$0xff]  }
 0x3c0   : > { %10345 = vmatprep.mubr.msk.bf16.mxu0 %vm12542_vm1, %v12541_v3  ;;  %10377 = vmatprep.mubr.msk.bf16.mxu1 %vm12542_vm1, %v12541_v3 }
 0x3c7   : > { %10346 = vmatmul.mubr.msk.bf16.vlgmr.msra.gmra.mrb[0].mxu0 %vm238_vm2, %v14260_v52  ;;  %10378 = vmatmul.mubr.msk.bf16.vlgmr.msra.gmra.mrb[0].mxu1 %vm238_vm2, %v14695_v32  ;;  %v14858_v52 = vld [vmem:[%s13196_s12 + $0x158] sm:$0xff]  }
 0x3c8   : > { %10406 = vmatpush3.bf16.msra.mxu0 %v12454_v33  ;;  %10438 = vmatpush3.bf16.msra.mxu1 %v12454_v33  ;;  %v12516_v33 = vld [vmem:[%s13196_s12 + $0x174] sm:$0xff]  }
 0x3c9   : > { %10349 = vmatprep.mubr.msk.bf16.mxu0 %vm12542_vm1, %v12541_v3  ;;  %10381 = vmatprep.mubr.msk.bf16.mxu1 %vm12542_vm1, %v12541_v3 }
 0x3ca   : > { %10407 = vmatprep.subr.bf16.mxu0 %v12541_v3  ;;  %10439 = vmatprep.subr.bf16.mxu1 %v12541_v3 }
 0x3cc   : > { %10408 = vmatpush3.bf16.msra.mxu0 %v12458_v34  ;;  %10440 = vmatpush3.bf16.msra.mxu1 %v12458_v34  ;;  %v12517_v34 = vld [vmem:[%s15387_s1 + $0x180] sm:$0xff]  }
 0x3cd   : > { %10469 = vmatprep.subr.bf16.mxu0 %v12541_v3  ;;  %10501 = vmatprep.subr.bf16.mxu1 %v12541_v3 }
 0x3cf   : > { %10350 = vmatmul.mubr.msk.bf16.gmra.mrb[4].mxu0 %vm238_vm2, %v14279_v57  ;;  %10382 = vmatmul.mubr.msk.bf16.gmra.mrb[4].mxu1 %vm238_vm2, %v14714_v35  ;;  %v12476_v57 = vld [vmem:[%s15387_s1 + $0x138] sm:$0xff]  }
 0x3d0   : > { %10353 = vmatprep.mubr.msk.bf16.mxu0 %vm12542_vm1, %v12541_v3  ;;  %10385 = vmatprep.mubr.msk.bf16.mxu1 %vm12542_vm1, %v12541_v3 }
 0x3d7   : > { %10354 = vmatmul.mubr.msk.bf16.gmra.mrb[8].mxu0 %vm238_vm2, %v14292_v59  ;;  %10386 = vmatmul.mubr.msk.bf16.gmra.mrb[8].mxu1 %vm238_vm2, %v14727_v37  ;;  %v14888_v59 = vld [vmem:[%s13196_s12 + $0x134] sm:$0xff]  }
 0x3d8   : > { %10357 = vmatprep.mubr.msk.bf16.mxu0 %vm12542_vm1, %v12541_v3  ;;  %10389 = vmatprep.mubr.msk.bf16.mxu1 %vm12542_vm1, %v12541_v3 }
 0x3df   : > { %10358 = vmatmul.mubr.msk.bf16.gmra.mrb[12].mxu0 %vm238_vm2, %v14303_v61  ;;  %10390 = vmatmul.mubr.msk.bf16.gmra.mrb[12].mxu1 %vm238_vm2, %v14738_v38  ;;  %v14901_v61 = vld [vmem:[%s13196_s12 + $0x13c] sm:$0xff]  }
 0x3e0   : > { %10361 = vmatprep.mubr.msk.bf16.mxu0 %vm12542_vm1, %v12541_v3  ;;  %10393 = vmatprep.mubr.msk.bf16.mxu1 %vm12542_vm1, %v12541_v3 }
 0x3e7   : > { %10362 = vmatmul.mubr.msk.bf16.gmra.mrb[16].mxu0 %vm238_vm2, %v14314_v63  ;;  %10394 = vmatmul.mubr.msk.bf16.gmra.mrb[16].mxu1 %vm238_vm2, %v14749_v39  ;;  %v14912_v63 = vld [vmem:[%s13196_s12 + $0x144] sm:$0xff]  }
 0x3e8   : > { %10365 = vmatprep.mubr.msk.bf16.mxu0 %vm12542_vm1, %v12541_v3  ;;  %10397 = vmatprep.mubr.msk.bf16.mxu1 %vm12542_vm1, %v12541_v3 }
 0x3ef   : > { %10366 = vmatmul.mubr.msk.bf16.gmra.mrb[20].mxu0 %vm238_vm2, %v14325_v2  ;;  %10398 = vmatmul.mubr.msk.bf16.gmra.mrb[20].mxu1 %vm238_vm2, %v14760_v40  ;;  %v14923_v2 = vld [vmem:[%s13196_s12 + $0x14c] sm:$0xff]  }
 0x3f0   : > { %10369 = vmatprep.mubr.msk.bf16.mxu0 %vm12542_vm1, %v12541_v3  ;;  %10401 = vmatprep.mubr.msk.bf16.mxu1 %vm12542_vm1, %v12541_v3 }
 0x3f7   : > { %10370 = vmatmul.mubr.msk.bf16.gmra.mrb[24].mxu0 %vm238_vm2, %v14336_v5  ;;  %10402 = vmatmul.mubr.msk.bf16.gmra.mrb[24].mxu1 %vm238_vm2, %v14771_v41  ;;  %v14934_v5 = vld [vmem:[%s13196_s12 + $0x154] sm:$0xff]  }
 0x3f8   : > { %10409 = vmatprep.mubr.msk.bf16.mxu0 %vm12542_vm1, %v12541_v3  ;;  %10441 = vmatprep.mubr.msk.bf16.mxu1 %vm12542_vm1, %v12541_v3 }
 0x3ff   : > { %10410 = vmatmul.mubr.msk.bf16.vlgmr.msra.gmra.mrb[0].mxu0 %vm238_vm2, %v14347_v7  ;;  %10442 = vmatmul.mubr.msk.bf16.vlgmr.msra.gmra.mrb[0].mxu1 %vm238_vm2, %v14782_v43  ;;  %v14945_v7 = vld [vmem:[%s13196_s12 + $0x15c] sm:$0xff]  }
 0x400   : > { %10470 = vmatpush3.bf16.msra.mxu0 %v12463_v44  ;;  %10502 = vmatpush3.bf16.msra.mxu1 %v12463_v44  ;;  %v12525_v44 = vld [vmem:[%s13196_s12 + $0x178] sm:$0xff]  }
 0x401   : > { %10413 = vmatprep.mubr.msk.bf16.mxu0 %vm12542_vm1, %v12541_v3  ;;  %10445 = vmatprep.mubr.msk.bf16.mxu1 %vm12542_vm1, %v12541_v3 }
 0x402   : > { %10471 = vmatprep.subr.bf16.mxu0 %v12541_v3  ;;  %10503 = vmatprep.subr.bf16.mxu1 %v12541_v3 }
 0x404   : > { %10472 = vmatpush3.bf16.msra.mxu0 %v12467_v45  ;;  %10504 = vmatpush3.bf16.msra.mxu1 %v12467_v45  ;;  %v12526_v45 = vld [vmem:[%s13196_s12 + $0x180] sm:$0xff]  }
 0x405   : > { %10533 = vmatprep.subr.bf16.mxu0 %v12541_v3  ;;  %10565 = vmatprep.subr.bf16.mxu1 %v12541_v3 }
 0x407   : > { %10414 = vmatmul.mubr.msk.bf16.gmra.mrb[4].mxu0 %vm238_vm2, %v14366_v9  ;;  %10446 = vmatmul.mubr.msk.bf16.gmra.mrb[4].mxu1 %vm238_vm2, %v14801_v46  ;;  %v12485_v9 = vld [vmem:[%s15387_s1 + $0x148] sm:$0xff]  }
 0x408   : > { %10417 = vmatprep.mubr.msk.bf16.mxu0 %vm12542_vm1, %v12541_v3  ;;  %10449 = vmatprep.mubr.msk.bf16.mxu1 %vm12542_vm1, %v12541_v3 }
 0x40f   : > { %10418 = vmatmul.mubr.msk.bf16.gmra.mrb[8].mxu0 %vm238_vm2, %v14379_v56  ;;  %10450 = vmatmul.mubr.msk.bf16.gmra.mrb[8].mxu1 %vm238_vm2, %v14814_v47  ;;  %v14975_v56 = vld [vmem:[%s13196_s12 + $0x138] sm:$0xff]  }
 0x410   : > { %10421 = vmatprep.mubr.msk.bf16.mxu0 %vm12542_vm1, %v12541_v3  ;;  %10453 = vmatprep.mubr.msk.bf16.mxu1 %vm12542_vm1, %v12541_v3 }
 0x417   : > { %10422 = vmatmul.mubr.msk.bf16.gmra.mrb[12].mxu0 %vm238_vm2, %v14390_v58  ;;  %10454 = vmatmul.mubr.msk.bf16.gmra.mrb[12].mxu1 %vm238_vm2, %v14825_v49  ;;  %v14988_v58 = vld [vmem:[%s13196_s12 + $0x140] sm:$0xff]  }
 0x418   : > { %10425 = vmatprep.mubr.msk.bf16.mxu0 %vm12542_vm1, %v12541_v3  ;;  %10457 = vmatprep.mubr.msk.bf16.mxu1 %vm12542_vm1, %v12541_v3 }
 0x41f   : > { %10426 = vmatmul.mubr.msk.bf16.gmra.mrb[16].mxu0 %vm238_vm2, %v14401_v60  ;;  %10458 = vmatmul.mubr.msk.bf16.gmra.mrb[16].mxu1 %vm238_vm2, %v14836_v50  ;;  %v14999_v60 = vld [vmem:[%s13196_s12 + $0x148] sm:$0xff]  }
 0x420   : > { %10429 = vmatprep.mubr.msk.bf16.mxu0 %vm12542_vm1, %v12541_v3  ;;  %10461 = vmatprep.mubr.msk.bf16.mxu1 %vm12542_vm1, %v12541_v3 }
 0x427   : > { %10430 = vmatmul.mubr.msk.bf16.gmra.mrb[20].mxu0 %vm238_vm2, %v14412_v62  ;;  %10462 = vmatmul.mubr.msk.bf16.gmra.mrb[20].mxu1 %vm238_vm2, %v14847_v51  ;;  %v15010_v62 = vld [vmem:[%s13196_s12 + $0x150] sm:$0xff]  }
 0x428   : > { %10433 = vmatprep.mubr.msk.bf16.mxu0 %vm12542_vm1, %v12541_v3  ;;  %10465 = vmatprep.mubr.msk.bf16.mxu1 %vm12542_vm1, %v12541_v3 }
 0x42f   : > { %10434 = vmatmul.mubr.msk.bf16.gmra.mrb[24].mxu0 %vm238_vm2, %v14423_v1  ;;  %10466 = vmatmul.mubr.msk.bf16.gmra.mrb[24].mxu1 %vm238_vm2, %v14858_v52  ;;  %v15021_v1 = vld [vmem:[%s13196_s12 + $0x158] sm:$0xff]  }
 0x430   : > { %10473 = vmatprep.mubr.msk.bf16.mxu0 %vm12542_vm1, %v12541_v3  ;;  %10505 = vmatprep.mubr.msk.bf16.mxu1 %vm12542_vm1, %v12541_v3 }
 0x437   : > { %10474 = vmatmul.mubr.msk.bf16.vlgmr.msra.gmra.mrb[0].mxu0 %vm238_vm2, %v14434_v12  ;;  %10506 = vmatmul.mubr.msk.bf16.vlgmr.msra.gmra.mrb[0].mxu1 %vm238_vm2, %v14869_v54  ;;  %v15032_v12 = vld [vmem:[%s13196_s12 + $0x160] sm:$0xff]  }
 0x438   : > { %10534 = vmatpush3.bf16.msra.mxu0 %v12472_v55  ;;  %10566 = vmatpush3.bf16.msra.mxu1 %v12472_v55 }
 0x439   : > { %10477 = vmatprep.mubr.msk.bf16.mxu0 %vm12542_vm1, %v12541_v3  ;;  %10509 = vmatprep.mubr.msk.bf16.mxu1 %vm12542_vm1, %v12541_v3 }
 0x43a   : > { %10535 = vmatprep.subr.bf16.mxu0 %v12541_v3  ;;  %10567 = vmatprep.subr.bf16.mxu1 %v12541_v3 }
 0x43c   : > { %10536 = vmatpush3.bf16.msra.mxu0 %v12476_v57  ;;  %10568 = vmatpush3.bf16.msra.mxu1 %v12476_v57 }
 0x43d   : > { %10597 = vmatprep.subr.bf16.mxu0 %v12541_v3  ;;  %10629 = vmatprep.subr.bf16.mxu1 %v12541_v3 }
 0x43f   : > { %10478 = vmatmul.mubr.msk.bf16.gmra.mrb[4].mxu0 %vm238_vm2, %v14453_v14  ;;  %10510 = vmatmul.mubr.msk.bf16.gmra.mrb[4].mxu1 %vm238_vm2, %v14888_v59  ;;  %v12494_v14 = vld [vmem:[%s15387_s1 + $0x158] sm:$0xff]  }
 0x440   : > { %10481 = vmatprep.mubr.msk.bf16.mxu0 %vm12542_vm1, %v12541_v3  ;;  %10513 = vmatprep.mubr.msk.bf16.mxu1 %vm12542_vm1, %v12541_v3 }
 0x447   : > { %10482 = vmatmul.mubr.msk.bf16.gmra.mrb[8].mxu0 %vm238_vm2, %v14466_v18  ;;  %10514 = vmatmul.mubr.msk.bf16.gmra.mrb[8].mxu1 %vm238_vm2, %v14901_v61  ;;  %v12491_v18 = vld [vmem:[%s13196_s12 + $0x170] sm:$0xff]  }
 0x448   : > { %10485 = vmatprep.mubr.msk.bf16.mxu0 %vm12542_vm1, %v12541_v3  ;;  %10517 = vmatprep.mubr.msk.bf16.mxu1 %vm12542_vm1, %v12541_v3 }
 0x44f   : > { %10486 = vmatmul.mubr.msk.bf16.gmra.mrb[12].mxu0 %vm238_vm2, %v14477_v24  ;;  %10518 = vmatmul.mubr.msk.bf16.gmra.mrb[12].mxu1 %vm238_vm2, %v14912_v63  ;;  %v12492_v24 = vld [vmem:[%s13196_s12 + $0x178] sm:$0xff]  }
 0x450   : > { %10489 = vmatprep.mubr.msk.bf16.mxu0 %vm12542_vm1, %v12541_v3  ;;  %10521 = vmatprep.mubr.msk.bf16.mxu1 %vm12542_vm1, %v12541_v3 }
 0x457   : > { %10490 = vmatmul.mubr.msk.bf16.gmra.mrb[16].mxu0 %vm238_vm2, %v14488_v30  ;;  %10522 = vmatmul.mubr.msk.bf16.gmra.mrb[16].mxu1 %vm238_vm2, %v14923_v2  ;;  %v12493_v30 = vld [vmem:[%s13196_s12 + $0x180] sm:$0xff]  }
 0x458   : > { %10493 = vmatprep.mubr.msk.bf16.mxu0 %vm12542_vm1, %v12541_v3  ;;  %10525 = vmatprep.mubr.msk.bf16.mxu1 %vm12542_vm1, %v12541_v3 }
 0x45f   : > { %10494 = vmatmul.mubr.msk.bf16.gmra.mrb[20].mxu0 %vm238_vm2, %v14499_v36  ;;  %10526 = vmatmul.mubr.msk.bf16.gmra.mrb[20].mxu1 %vm238_vm2, %v14934_v5  ;;  %v12495_v36 = vld [vmem:[%s13196_s12 + $0x188] sm:$0xff]  }
 0x460   : > { %10497 = vmatprep.mubr.msk.bf16.mxu0 %vm12542_vm1, %v12541_v3  ;;  %10529 = vmatprep.mubr.msk.bf16.mxu1 %vm12542_vm1, %v12541_v3 }
 0x467   : > { %10498 = vmatmul.mubr.msk.bf16.gmra.mrb[24].mxu0 %vm238_vm2, %v14510_v42  ;;  %10530 = vmatmul.mubr.msk.bf16.gmra.mrb[24].mxu1 %vm238_vm2, %v14945_v7  ;;  %v12496_v42 = vld [vmem:[%s13196_s12 + $0x190] sm:$0xff]  }
 0x468   : > { %10537 = vmatprep.mubr.msk.bf16.mxu0 %vm12542_vm1, %v12541_v3  ;;  %10569 = vmatprep.mubr.msk.bf16.mxu1 %vm12542_vm1, %v12541_v3 }
 0x46f   : > { %10538 = vmatmul.mubr.msk.bf16.vlgmr.msra.gmra.mrb[0].mxu0 %vm238_vm2, %v14521_v16  ;;  %10570 = vmatmul.mubr.msk.bf16.vlgmr.msra.gmra.mrb[0].mxu1 %vm238_vm2, %v14956_v8  ;;  %v12497_v16 = vld [vmem:[%s13196_s12 + $0x198] sm:$0xff]  }
 0x470   : > { %10598 = vmatpush3.bf16.msra.mxu0 %v12481_v53  ;;  %10630 = vmatpush3.bf16.msra.mxu1 %v12481_v53 }
 0x471   : > { %10541 = vmatprep.mubr.msk.bf16.mxu0 %vm12542_vm1, %v12541_v3  ;;  %10573 = vmatprep.mubr.msk.bf16.mxu1 %vm12542_vm1, %v12541_v3 }
 0x472   : > { %10599 = vmatprep.subr.bf16.mxu0 %v12541_v3  ;;  %10631 = vmatprep.subr.bf16.mxu1 %v12541_v3 }
 0x474   : > { %10600 = vmatpush3.bf16.msra.mxu0 %v12485_v9  ;;  %10632 = vmatpush3.bf16.msra.mxu1 %v12485_v9 }
 0x475   : > { %10661 = vmatprep.subr.bf16.mxu0 %v12541_v3  ;;  %10693 = vmatprep.subr.bf16.mxu1 %v12541_v3 }
 0x477   : > { %10542 = vmatmul.mubr.msk.bf16.gmra.mrb[4].mxu0 %vm238_vm2, %v14540_v19  ;;  %10574 = vmatmul.mubr.msk.bf16.gmra.mrb[4].mxu1 %vm238_vm2, %v14975_v56  ;;  %v12503_v19 = vld [vmem:[%s15387_s1 + $0x168] sm:$0xff]  }
 0x478   : > { %10545 = vmatprep.mubr.msk.bf16.mxu0 %vm12542_vm1, %v12541_v3  ;;  %10577 = vmatprep.mubr.msk.bf16.mxu1 %vm12542_vm1, %v12541_v3 }
 0x47f   : > { %10546 = vmatmul.mubr.msk.bf16.gmra.mrb[8].mxu0 %vm238_vm2, %v14553_v10  ;;  %10578 = vmatmul.mubr.msk.bf16.gmra.mrb[8].mxu1 %vm238_vm2, %v14988_v58  ;;  %v12500_v10 = vld [vmem:[%s13196_s12 + $0x174] sm:$0xff]  }
 0x480   : > { %10549 = vmatprep.mubr.msk.bf16.mxu0 %vm12542_vm1, %v12541_v3  ;;  %10581 = vmatprep.mubr.msk.bf16.mxu1 %vm12542_vm1, %v12541_v3 }
 0x487   : > { %10550 = vmatmul.mubr.msk.bf16.gmra.mrb[12].mxu0 %vm238_vm2, %v14564_v13  ;;  %10582 = vmatmul.mubr.msk.bf16.gmra.mrb[12].mxu1 %vm238_vm2, %v14999_v60  ;;  %v12501_v13 = vld [vmem:[%s13196_s12 + $0x17c] sm:$0xff]  }
 0x488   : > { %10553 = vmatprep.mubr.msk.bf16.mxu0 %vm12542_vm1, %v12541_v3  ;;  %10585 = vmatprep.mubr.msk.bf16.mxu1 %vm12542_vm1, %v12541_v3 }
 0x48f   : > { %10554 = vmatmul.mubr.msk.bf16.gmra.mrb[16].mxu0 %vm238_vm2, %v14575_v15  ;;  %10586 = vmatmul.mubr.msk.bf16.gmra.mrb[16].mxu1 %vm238_vm2, %v15010_v62  ;;  %v12502_v15 = vld [vmem:[%s13196_s12 + $0x184] sm:$0xff]  }
 0x490   : > { %10557 = vmatprep.mubr.msk.bf16.mxu0 %vm12542_vm1, %v12541_v3  ;;  %10589 = vmatprep.mubr.msk.bf16.mxu1 %vm12542_vm1, %v12541_v3 }
 0x497   : > { %10558 = vmatmul.mubr.msk.bf16.gmra.mrb[20].mxu0 %vm238_vm2, %v14586_v17  ;;  %10590 = vmatmul.mubr.msk.bf16.gmra.mrb[20].mxu1 %vm238_vm2, %v15021_v1  ;;  %v12504_v17 = vld [vmem:[%s13196_s12 + $0x18c] sm:$0xff]  }
 0x498   : > { %10561 = vmatprep.mubr.msk.bf16.mxu0 %vm12542_vm1, %v12541_v3  ;;  %10593 = vmatprep.mubr.msk.bf16.mxu1 %vm12542_vm1, %v12541_v3 }
 0x49f   : > { %10562 = vmatmul.mubr.msk.bf16.gmra.mrb[24].mxu0 %vm238_vm2, %v14597_v20  ;;  %10594 = vmatmul.mubr.msk.bf16.gmra.mrb[24].mxu1 %vm238_vm2, %v15032_v12  ;;  %v12505_v20 = vld [vmem:[%s13196_s12 + $0x194] sm:$0xff]  }
 0x4a0   : > { %10601 = vmatprep.mubr.msk.bf16.mxu0 %vm12542_vm1, %v12541_v3  ;;  %10633 = vmatprep.mubr.msk.bf16.mxu1 %vm12542_vm1, %v12541_v3 }
 0x4a7   : > { %10602 = vmatmul.mubr.msk.bf16.vlgmr.msra.gmra.mrb[0].mxu0 %vm238_vm2, %v14608_v21  ;;  %10634 = vmatmul.mubr.msk.bf16.vlgmr.msra.gmra.mrb[0].mxu1 %vm238_vm2, %v12489_v4  ;;  %v12506_v21 = vld [vmem:[%s13196_s12 + $0x19c] sm:$0xff]  }
 0x4a8   : > { %10662 = vmatpush3.bf16.msra.mxu0 %v12490_v11  ;;  %10694 = vmatpush3.bf16.msra.mxu1 %v12490_v11 }
 0x4a9   : > { %10605 = vmatprep.mubr.msk.bf16.mxu0 %vm12542_vm1, %v12541_v3  ;;  %10637 = vmatprep.mubr.msk.bf16.mxu1 %vm12542_vm1, %v12541_v3 }
 0x4aa   : > { %10663 = vmatprep.subr.bf16.mxu0 %v12541_v3  ;;  %10695 = vmatprep.subr.bf16.mxu1 %v12541_v3 }
 0x4ac   : > { %10664 = vmatpush3.bf16.msra.mxu0 %v12494_v14  ;;  %10696 = vmatpush3.bf16.msra.mxu1 %v12494_v14 }
 0x4ad   : > { %10725 = vmatprep.subr.bf16.mxu0 %v12541_v3  ;;  %10757 = vmatprep.subr.bf16.mxu1 %v12541_v3 }
 0x4af   : > { %10606 = vmatmul.mubr.msk.bf16.gmra.mrb[4].mxu0 %vm238_vm2, %v14627_v25  ;;  %10638 = vmatmul.mubr.msk.bf16.gmra.mrb[4].mxu1 %vm238_vm2, %v12491_v18  ;;  %v12512_v25 = vld [vmem:[%s15387_s1 + $0x178] sm:$0xff]  }
 0x4b0   : > { %10609 = vmatprep.mubr.msk.bf16.mxu0 %vm12542_vm1, %v12541_v3  ;;  %10641 = vmatprep.mubr.msk.bf16.mxu1 %vm12542_vm1, %v12541_v3 }
 0x4b7   : > { %10610 = vmatmul.mubr.msk.bf16.gmra.mrb[8].mxu0 %vm238_vm2, %v14640_v26  ;;  %10642 = vmatmul.mubr.msk.bf16.gmra.mrb[8].mxu1 %vm238_vm2, %v12492_v24  ;;  %v12509_v26 = vld [vmem:[%s13196_s12 + $0x178] sm:$0xff]  }
 0x4b8   : > { %10613 = vmatprep.mubr.msk.bf16.mxu0 %vm12542_vm1, %v12541_v3  ;;  %10645 = vmatprep.mubr.msk.bf16.mxu1 %vm12542_vm1, %v12541_v3 }
 0x4bf   : > { %10614 = vmatmul.mubr.msk.bf16.gmra.mrb[12].mxu0 %vm238_vm2, %v14651_v27  ;;  %10646 = vmatmul.mubr.msk.bf16.gmra.mrb[12].mxu1 %vm238_vm2, %v12493_v30  ;;  %v12510_v27 = vld [vmem:[%s13196_s12 + $0x180] sm:$0xff]  }
 0x4c0   : > { %10617 = vmatprep.mubr.msk.bf16.mxu0 %vm12542_vm1, %v12541_v3  ;;  %10649 = vmatprep.mubr.msk.bf16.mxu1 %vm12542_vm1, %v12541_v3 }
 0x4c7   : > { %10618 = vmatmul.mubr.msk.bf16.gmra.mrb[16].mxu0 %vm238_vm2, %v14662_v28  ;;  %10650 = vmatmul.mubr.msk.bf16.gmra.mrb[16].mxu1 %vm238_vm2, %v12495_v36  ;;  %v12511_v28 = vld [vmem:[%s13196_s12 + $0x188] sm:$0xff]  }
 0x4c8   : > { %10621 = vmatprep.mubr.msk.bf16.mxu0 %vm12542_vm1, %v12541_v3  ;;  %10653 = vmatprep.mubr.msk.bf16.mxu1 %vm12542_vm1, %v12541_v3 }
 0x4cf   : > { %10622 = vmatmul.mubr.msk.bf16.gmra.mrb[20].mxu0 %vm238_vm2, %v14673_v29  ;;  %10654 = vmatmul.mubr.msk.bf16.gmra.mrb[20].mxu1 %vm238_vm2, %v12496_v42  ;;  %v12513_v29 = vld [vmem:[%s13196_s12 + $0x190] sm:$0xff]  }
 0x4d0   : > { %10625 = vmatprep.mubr.msk.bf16.mxu0 %vm12542_vm1, %v12541_v3  ;;  %10657 = vmatprep.mubr.msk.bf16.mxu1 %vm12542_vm1, %v12541_v3 }
 0x4d7   : > { %10626 = vmatmul.mubr.msk.bf16.gmra.mrb[24].mxu0 %vm238_vm2, %v14684_v31  ;;  %10658 = vmatmul.mubr.msk.bf16.gmra.mrb[24].mxu1 %vm238_vm2, %v12497_v16  ;;  %v12514_v31 = vld [vmem:[%s13196_s12 + $0x198] sm:$0xff]  }
 0x4d8   : > { %10665 = vmatprep.mubr.msk.bf16.mxu0 %vm12542_vm1, %v12541_v3  ;;  %10697 = vmatprep.mubr.msk.bf16.mxu1 %vm12542_vm1, %v12541_v3 }
 0x4df   : > { %10666 = vmatmul.mubr.msk.bf16.vlgmr.msra.gmra.mrb[0].mxu0 %vm238_vm2, %v14695_v32  ;;  %10698 = vmatmul.mubr.msk.bf16.vlgmr.msra.gmra.mrb[0].mxu1 %vm238_vm2, %v12498_v48  ;;  %v12515_v32 = vld [vmem:[%s13196_s12 + $0x1a0] sm:$0xff]  }
 0x4e0   : > { %10726 = vmatpush3.bf16.msra.mxu0 %v12499_v6  ;;  %10758 = vmatpush3.bf16.msra.mxu1 %v12499_v6 }
 0x4e1   : > { %10669 = vmatprep.mubr.msk.bf16.mxu0 %vm12542_vm1, %v12541_v3  ;;  %10701 = vmatprep.mubr.msk.bf16.mxu1 %vm12542_vm1, %v12541_v3 }
 0x4e2   : > { %10727 = vmatprep.subr.bf16.mxu0 %v12541_v3  ;;  %10759 = vmatprep.subr.bf16.mxu1 %v12541_v3 }
 0x4e4   : > { %10728 = vmatpush3.bf16.msra.mxu0 %v12503_v19  ;;  %10760 = vmatpush3.bf16.msra.mxu1 %v12503_v19 }
 0x4e5   : > { %10789 = vmatprep.subr.bf16.mxu0 %v12541_v3  ;;  %10821 = vmatprep.subr.bf16.mxu1 %v12541_v3 }
 0x4e7   : > { %10670 = vmatmul.mubr.msk.bf16.gmra.mrb[4].mxu0 %vm238_vm2, %v14714_v35  ;;  %10702 = vmatmul.mubr.msk.bf16.gmra.mrb[4].mxu1 %vm238_vm2, %v12500_v10  ;;  %v12521_v35 = vld [vmem:[%s15387_s1 + $0x188] sm:$0xff]  }
 0x4e8   : > { %10673 = vmatprep.mubr.msk.bf16.mxu0 %vm12542_vm1, %v12541_v3  ;;  %10705 = vmatprep.mubr.msk.bf16.mxu1 %vm12542_vm1, %v12541_v3 }
 0x4ef   : > { %10674 = vmatmul.mubr.msk.bf16.gmra.mrb[8].mxu0 %vm238_vm2, %v14727_v37  ;;  %10706 = vmatmul.mubr.msk.bf16.gmra.mrb[8].mxu1 %vm238_vm2, %v12501_v13  ;;  %v12518_v37 = vld [vmem:[%s13196_s12 + $0x17c] sm:$0xff]  }
 0x4f0   : > { %10677 = vmatprep.mubr.msk.bf16.mxu0 %vm12542_vm1, %v12541_v3  ;;  %10709 = vmatprep.mubr.msk.bf16.mxu1 %vm12542_vm1, %v12541_v3 }
 0x4f7   : > { %10678 = vmatmul.mubr.msk.bf16.gmra.mrb[12].mxu0 %vm238_vm2, %v14738_v38  ;;  %10710 = vmatmul.mubr.msk.bf16.gmra.mrb[12].mxu1 %vm238_vm2, %v12502_v15  ;;  %v12519_v38 = vld [vmem:[%s13196_s12 + $0x184] sm:$0xff]  }
 0x4f8   : > { %10681 = vmatprep.mubr.msk.bf16.mxu0 %vm12542_vm1, %v12541_v3  ;;  %10713 = vmatprep.mubr.msk.bf16.mxu1 %vm12542_vm1, %v12541_v3 }
 0x4ff   : > { %10682 = vmatmul.mubr.msk.bf16.gmra.mrb[16].mxu0 %vm238_vm2, %v14749_v39  ;;  %10714 = vmatmul.mubr.msk.bf16.gmra.mrb[16].mxu1 %vm238_vm2, %v12504_v17  ;;  %v12520_v39 = vld [vmem:[%s13196_s12 + $0x18c] sm:$0xff]  }
 0x500   : > { %10685 = vmatprep.mubr.msk.bf16.mxu0 %vm12542_vm1, %v12541_v3  ;;  %10717 = vmatprep.mubr.msk.bf16.mxu1 %vm12542_vm1, %v12541_v3 }
 0x507   : > { %10686 = vmatmul.mubr.msk.bf16.gmra.mrb[20].mxu0 %vm238_vm2, %v14760_v40  ;;  %10718 = vmatmul.mubr.msk.bf16.gmra.mrb[20].mxu1 %vm238_vm2, %v12505_v20  ;;  %v12522_v40 = vld [vmem:[%s13196_s12 + $0x194] sm:$0xff]  }
 0x508   : > { %10689 = vmatprep.mubr.msk.bf16.mxu0 %vm12542_vm1, %v12541_v3  ;;  %10721 = vmatprep.mubr.msk.bf16.mxu1 %vm12542_vm1, %v12541_v3 }
 0x50f   : > { %10690 = vmatmul.mubr.msk.bf16.gmra.mrb[24].mxu0 %vm238_vm2, %v14771_v41  ;;  %10722 = vmatmul.mubr.msk.bf16.gmra.mrb[24].mxu1 %vm238_vm2, %v12506_v21  ;;  %v12523_v41 = vld [vmem:[%s13196_s12 + $0x19c] sm:$0xff]  }
 0x510   : > { %10729 = vmatprep.mubr.msk.bf16.mxu0 %vm12542_vm1, %v12541_v3  ;;  %10761 = vmatprep.mubr.msk.bf16.mxu1 %vm12542_vm1, %v12541_v3 }
 0x517   : > { %10730 = vmatmul.mubr.msk.bf16.vlgmr.msra.gmra.mrb[0].mxu0 %vm238_vm2, %v14782_v43  ;;  %10762 = vmatmul.mubr.msk.bf16.vlgmr.msra.gmra.mrb[0].mxu1 %vm238_vm2, %v12507_v22  ;;  %v12524_v43 = vld [vmem:[%s13196_s12 + $0x1a4] sm:$0xff]  }
 0x518   : > { %10790 = vmatpush3.bf16.msra.mxu0 %v12508_v23  ;;  %10822 = vmatpush3.bf16.msra.mxu1 %v12508_v23 }
 0x519   : > { %10733 = vmatprep.mubr.msk.bf16.mxu0 %vm12542_vm1, %v12541_v3  ;;  %10765 = vmatprep.mubr.msk.bf16.mxu1 %vm12542_vm1, %v12541_v3 }
 0x51a   : > { %10791 = vmatprep.subr.bf16.mxu0 %v12541_v3  ;;  %10823 = vmatprep.subr.bf16.mxu1 %v12541_v3 }
 0x51c   : > { %10792 = vmatpush3.bf16.msra.mxu0 %v12512_v25  ;;  %10824 = vmatpush3.bf16.msra.mxu1 %v12512_v25 }
 0x51d   : > { %10853 = vmatprep.subr.bf16.mxu0 %v12541_v3  ;;  %10885 = vmatprep.subr.bf16.mxu1 %v12541_v3 }
 0x51f   : > { %10734 = vmatmul.mubr.msk.bf16.gmra.mrb[4].mxu0 %vm238_vm2, %v14801_v46  ;;  %10766 = vmatmul.mubr.msk.bf16.gmra.mrb[4].mxu1 %vm238_vm2, %v12509_v26  ;;  %v12527_v46 = vld [vmem:[%s13196_s12 + $0x188] sm:$0xff]  }
 0x520   : > { %10737 = vmatprep.mubr.msk.bf16.mxu0 %vm12542_vm1, %v12541_v3  ;;  %10769 = vmatprep.mubr.msk.bf16.mxu1 %vm12542_vm1, %v12541_v3 }
 0x527   : > { %10738 = vmatmul.mubr.msk.bf16.gmra.mrb[8].mxu0 %vm238_vm2, %v14814_v47  ;;  %10770 = vmatmul.mubr.msk.bf16.gmra.mrb[8].mxu1 %vm238_vm2, %v12510_v27  ;;  %v12528_v47 = vld [vmem:[%s13196_s12 + $0x190] sm:$0xff]  }
 0x528   : > { %10741 = vmatprep.mubr.msk.bf16.mxu0 %vm12542_vm1, %v12541_v3  ;;  %10773 = vmatprep.mubr.msk.bf16.mxu1 %vm12542_vm1, %v12541_v3 }
 0x52f   : > { %10742 = vmatmul.mubr.msk.bf16.gmra.mrb[12].mxu0 %vm238_vm2, %v14825_v49  ;;  %10774 = vmatmul.mubr.msk.bf16.gmra.mrb[12].mxu1 %vm238_vm2, %v12511_v28  ;;  %v12529_v49 = vld [vmem:[%s13196_s12 + $0x198] sm:$0xff]  }
 0x530   : > { %10745 = vmatprep.mubr.msk.bf16.mxu0 %vm12542_vm1, %v12541_v3  ;;  %10777 = vmatprep.mubr.msk.bf16.mxu1 %vm12542_vm1, %v12541_v3 }
 0x537   : > { %10746 = vmatmul.mubr.msk.bf16.gmra.mrb[16].mxu0 %vm238_vm2, %v14836_v50  ;;  %10778 = vmatmul.mubr.msk.bf16.gmra.mrb[16].mxu1 %vm238_vm2, %v12513_v29  ;;  %v12530_v50 = vld [vmem:[%s13196_s12 + $0x1a0] sm:$0xff]  }
 0x538   : > { %10749 = vmatprep.mubr.msk.bf16.mxu0 %vm12542_vm1, %v12541_v3  ;;  %10781 = vmatprep.mubr.msk.bf16.mxu1 %vm12542_vm1, %v12541_v3 }
 0x53f   : > { %10750 = vmatmul.mubr.msk.bf16.gmra.mrb[20].mxu0 %vm238_vm2, %v14847_v51  ;;  %10782 = vmatmul.mubr.msk.bf16.gmra.mrb[20].mxu1 %vm238_vm2, %v12514_v31  ;;  %v12531_v51 = vld [vmem:[%s13196_s12 + $0x1a8] sm:$0xff]  }
 0x540   : > { %10753 = vmatprep.mubr.msk.bf16.mxu0 %vm12542_vm1, %v12541_v3  ;;  %10785 = vmatprep.mubr.msk.bf16.mxu1 %vm12542_vm1, %v12541_v3 }
 0x547   : > { %10754 = vmatmul.mubr.msk.bf16.gmra.mrb[24].mxu0 %vm238_vm2, %v14858_v52  ;;  %10786 = vmatmul.mubr.msk.bf16.gmra.mrb[24].mxu1 %vm238_vm2, %v12515_v32 }
 0x548   : > { %10793 = vmatprep.mubr.msk.bf16.mxu0 %vm12542_vm1, %v12541_v3  ;;  %10825 = vmatprep.mubr.msk.bf16.mxu1 %vm12542_vm1, %v12541_v3 }
 0x54f   : > { %10794 = vmatmul.mubr.msk.bf16.vlgmr.msra.gmra.mrb[0].mxu0 %vm238_vm2, %v14869_v54  ;;  %10826 = vmatmul.mubr.msk.bf16.vlgmr.msra.gmra.mrb[0].mxu1 %vm238_vm2, %v12516_v33 }
 0x550   : > { %10854 = vmatpush3.bf16.msra.mxu0 %v12517_v34  ;;  %10886 = vmatpush3.bf16.msra.mxu1 %v12517_v34 }
 0x551   : > { %10797 = vmatprep.mubr.msk.bf16.mxu0 %vm12542_vm1, %v12541_v3  ;;  %10829 = vmatprep.mubr.msk.bf16.mxu1 %vm12542_vm1, %v12541_v3 }
 0x552   : > { %10855 = vmatprep.subr.bf16.mxu0 %v12541_v3  ;;  %10887 = vmatprep.subr.bf16.mxu1 %v12541_v3 }
 0x554   : > { %10856 = vmatpush3.bf16.msra.mxu0 %v12521_v35  ;;  %10888 = vmatpush3.bf16.msra.mxu1 %v12521_v35 }
 0x557   : > { %10798 = vmatmul.mubr.msk.bf16.gmra.mrb[4].mxu0 %vm238_vm2, %v14888_v59  ;;  %10830 = vmatmul.mubr.msk.bf16.gmra.mrb[4].mxu1 %vm238_vm2, %v12518_v37 }
 0x558   : > { %10801 = vmatprep.mubr.msk.bf16.mxu0 %vm12542_vm1, %v12541_v3  ;;  %10833 = vmatprep.mubr.msk.bf16.mxu1 %vm12542_vm1, %v12541_v3 }
 0x55f   : > { %10802 = vmatmul.mubr.msk.bf16.gmra.mrb[8].mxu0 %vm238_vm2, %v14901_v61  ;;  %10834 = vmatmul.mubr.msk.bf16.gmra.mrb[8].mxu1 %vm238_vm2, %v12519_v38 }
 0x560   : > { %10805 = vmatprep.mubr.msk.bf16.mxu0 %vm12542_vm1, %v12541_v3  ;;  %10837 = vmatprep.mubr.msk.bf16.mxu1 %vm12542_vm1, %v12541_v3 }
 0x567   : > { %10806 = vmatmul.mubr.msk.bf16.gmra.mrb[12].mxu0 %vm238_vm2, %v14912_v63  ;;  %10838 = vmatmul.mubr.msk.bf16.gmra.mrb[12].mxu1 %vm238_vm2, %v12520_v39 }
 0x568   : > { %10809 = vmatprep.mubr.msk.bf16.mxu0 %vm12542_vm1, %v12541_v3  ;;  %10841 = vmatprep.mubr.msk.bf16.mxu1 %vm12542_vm1, %v12541_v3 }
 0x56f   : > { %10810 = vmatmul.mubr.msk.bf16.gmra.mrb[16].mxu0 %vm238_vm2, %v14923_v2  ;;  %10842 = vmatmul.mubr.msk.bf16.gmra.mrb[16].mxu1 %vm238_vm2, %v12522_v40 }
 0x570   : > { %10813 = vmatprep.mubr.msk.bf16.mxu0 %vm12542_vm1, %v12541_v3  ;;  %10845 = vmatprep.mubr.msk.bf16.mxu1 %vm12542_vm1, %v12541_v3 }
 0x577   : > { %10814 = vmatmul.mubr.msk.bf16.gmra.mrb[20].mxu0 %vm238_vm2, %v14934_v5  ;;  %10846 = vmatmul.mubr.msk.bf16.gmra.mrb[20].mxu1 %vm238_vm2, %v12523_v41 }
 0x578   : > { %10817 = vmatprep.mubr.msk.bf16.mxu0 %vm12542_vm1, %v12541_v3  ;;  %10849 = vmatprep.mubr.msk.bf16.mxu1 %vm12542_vm1, %v12541_v3 }
 0x57f   : > { %10818 = vmatmul.mubr.msk.bf16.gmra.mrb[24].mxu0 %vm238_vm2, %v14945_v7  ;;  %10850 = vmatmul.mubr.msk.bf16.gmra.mrb[24].mxu1 %vm238_vm2, %v12524_v43 }
 0x580   : > { %10857 = vmatprep.mubr.msk.bf16.mxu0 %vm12542_vm1, %v12541_v3  ;;  %10889 = vmatprep.mubr.msk.bf16.mxu1 %vm12542_vm1, %v12541_v3 }
 0x587   : > { %10858 = vmatmul.mubr.msk.bf16.vlgmr.msra.gmra.mrb[0].mxu0 %vm238_vm2, %v14956_v8  ;;  %10890 = vmatmul.mubr.msk.bf16.vlgmr.msra.gmra.mrb[0].mxu1 %vm238_vm2, %v12525_v44 }
 0x588   : > { %10861 = vmatprep.mubr.msk.bf16.mxu0 %vm12542_vm1, %v12541_v3  ;;  %10893 = vmatprep.mubr.msk.bf16.mxu1 %vm12542_vm1, %v12541_v3 }
 0x58f   : > { %10862 = vmatmul.mubr.msk.bf16.gmra.mrb[4].mxu0 %vm238_vm2, %v14975_v56  ;;  %10894 = vmatmul.mubr.msk.bf16.gmra.mrb[4].mxu1 %vm238_vm2, %v12526_v45 }
 0x590   : > { %10865 = vmatprep.mubr.msk.bf16.mxu0 %vm12542_vm1, %v12541_v3  ;;  %10897 = vmatprep.mubr.msk.bf16.mxu1 %vm12542_vm1, %v12541_v3 }
 0x597   : > { %10866 = vmatmul.mubr.msk.bf16.gmra.mrb[8].mxu0 %vm238_vm2, %v14988_v58  ;;  %10898 = vmatmul.mubr.msk.bf16.gmra.mrb[8].mxu1 %vm238_vm2, %v12527_v46 }
 0x598   : > { %10869 = vmatprep.mubr.msk.bf16.mxu0 %vm12542_vm1, %v12541_v3  ;;  %10901 = vmatprep.mubr.msk.bf16.mxu1 %vm12542_vm1, %v12541_v3 }
 0x59f   : > { %10870 = vmatmul.mubr.msk.bf16.gmra.mrb[12].mxu0 %vm238_vm2, %v14999_v60  ;;  %10902 = vmatmul.mubr.msk.bf16.gmra.mrb[12].mxu1 %vm238_vm2, %v12528_v47 }
 0x5a0   : > { %10873 = vmatprep.mubr.msk.bf16.mxu0 %vm12542_vm1, %v12541_v3  ;;  %10905 = vmatprep.mubr.msk.bf16.mxu1 %vm12542_vm1, %v12541_v3 }
 0x5a7   : > { %10874 = vmatmul.mubr.msk.bf16.gmra.mrb[16].mxu0 %vm238_vm2, %v15010_v62  ;;  %10906 = vmatmul.mubr.msk.bf16.gmra.mrb[16].mxu1 %vm238_vm2, %v12529_v49 }
 0x5a8   : > { %10877 = vmatprep.mubr.msk.bf16.mxu0 %vm12542_vm1, %v12541_v3  ;;  %10909 = vmatprep.mubr.msk.bf16.mxu1 %vm12542_vm1, %v12541_v3 }
 0x5af   : > { %10878 = vmatmul.mubr.msk.bf16.gmra.mrb[20].mxu0 %vm238_vm2, %v15021_v1  ;;  %10910 = vmatmul.mubr.msk.bf16.gmra.mrb[20].mxu1 %vm238_vm2, %v12530_v50 }
 0x5b0   : > { %10881 = vmatprep.mubr.msk.bf16.mxu0 %vm12542_vm1, %v12541_v3  ;;  %10913 = vmatprep.mubr.msk.bf16.mxu1 %vm12542_vm1, %v12541_v3 }
 0x5b7   : > { %10882 = vmatmul.mubr.msk.bf16.gmra.mrb[24].mxu0 %vm238_vm2, %v15032_v12  ;;  %10914 = vmatmul.mubr.msk.bf16.gmra.mrb[24].mxu1 %vm238_vm2, %v12531_v51 }
 0x65a   : > { %v7481_v52 = vpop.f32.mrb[0].mxu0  ;;  %v7640_v54 = vpop.f32.mrb[0].mxu1 }
 0x65b   : > { %v7709_v55 = vmax.f32 %v7481_v52, %v7640_v54  ;;  %v10859_v57 = vpop.f32.mrb[1].mxu0  ;;  %v10891_v59 = vpop.f32.mrb[1].mxu1 }
 0x65c   : > { %v7484_v61 = vpop.f32.mrb[2].mxu0  ;;  %v7643_v63 = vpop.f32.mrb[2].mxu1 }
 0x65d   : > { %v7710_v2 = vmax.f32 %v7484_v61, %v7643_v63  ;;  %v10860_v5 = vpop.f32.mrb[3].mxu0  ;;  %v10892_v7 = vpop.f32.mrb[3].mxu1 }
 0x65f   : > { %v7723_v8 = vmax.f32 %v7709_v55, %v7710_v2 }
 0x661   : > { %v7730_v3 = vadd.f32 %v12566_v0, %v7723_v8 }
 0x662   : > { %v7489_v53 = vpop.f32.mrb[4].mxu0  ;;  %v7648_v9 = vpop.f32.mrb[4].mxu1 }
 0x663   : > { %v7731_v56 = vmax.f32 %v7730_v3, 0.0  ;;  %v7711_v58 = vmax.f32 %v7489_v53, %v7648_v9  ;;  %v10863_v60 = vpop.f32.mrb[5].mxu0  ;;  %v10895_v62 = vpop.f32.mrb[5].mxu1 }
 0x664   : > { %v7492_v1 = vpop.f32.mrb[6].mxu0  ;;  %v7651_v12 = vpop.f32.mrb[6].mxu1 }
 0x665   : > { %v7732_v4 = vpack.c.bf16 %v7731_v56, %v7731_v56  ;;  %v7712_v11 = vmax.f32 %v7492_v1, %v7651_v12  ;;  %v10864_v14 = vpop.f32.mrb[7].mxu0  ;;  %v10896_v18 = vpop.f32.mrb[7].mxu1 }
 0x667   : > { %8859 = vst.msk [vmem:[%s15361_s6 + $0x60] sm:$0xf] %vm16_vm0, %v7732_v4  ;;  %v7738_v24 = vmax.f32 %v7711_v58, %v7712_v11 }
 0x669   : > { %v7739_v30 = vadd.f32 %v12566_v0, %v7738_v24 }
 0x66a   : > { %v7497_v36 = vpop.f32.mrb[8].mxu0  ;;  %v7656_v42 = vpop.f32.mrb[8].mxu1 }
 0x66b   : > { %v7740_v16 = vmax.f32 %v7739_v30, 0.0  ;;  %v7713_v48 = vmax.f32 %v7497_v36, %v7656_v42  ;;  %v10867_v6 = vpop.f32.mrb[9].mxu0  ;;  %v10899_v19 = vpop.f32.mrb[9].mxu1 }
 0x66c   : > { %v7500_v10 = vpop.f32.mrb[10].mxu0  ;;  %v7659_v13 = vpop.f32.mrb[10].mxu1 }
 0x66d   : > { %v7741_v15 = vpack.c.bf16 %v7740_v16, %v7740_v16  ;;  %v7714_v17 = vmax.f32 %v7500_v10, %v7659_v13  ;;  %v10868_v20 = vpop.f32.mrb[11].mxu0  ;;  %v10900_v21 = vpop.f32.mrb[11].mxu1 }
 0x66f   : > { %8860 = vst.msk [vmem:[%s15361_s6 + $0x64] sm:$0xf] %vm16_vm0, %v7741_v15  ;;  %v7743_v22 = vmax.f32 %v7713_v48, %v7714_v17 }
 0x671   : > { %v7744_v23 = vadd.f32 %v12566_v0, %v7743_v22 }
 0x672   : > { %v7505_v25 = vpop.f32.mrb[12].mxu0  ;;  %v7664_v26 = vpop.f32.mrb[12].mxu1 }
 0x673   : > { %v7745_v27 = vmax.f32 %v7744_v23, 0.0  ;;  %v7715_v28 = vmax.f32 %v7505_v25, %v7664_v26  ;;  %v10871_v29 = vpop.f32.mrb[13].mxu0  ;;  %v10903_v31 = vpop.f32.mrb[13].mxu1 }
 0x674   : > { %v7508_v32 = vpop.f32.mrb[14].mxu0  ;;  %v7667_v33 = vpop.f32.mrb[14].mxu1 }
 0x675   : > { %v7746_v34 = vpack.c.bf16 %v7745_v27, %v7745_v27  ;;  %v7716_v35 = vmax.f32 %v7508_v32, %v7667_v33  ;;  %v10872_v37 = vpop.f32.mrb[15].mxu0  ;;  %v10904_v38 = vpop.f32.mrb[15].mxu1 }
 0x677   : > { %8861 = vst.msk [vmem:[%s15361_s6 + $0x68] sm:$0xf] %vm16_vm0, %v7746_v34  ;;  %v7748_v39 = vmax.f32 %v7715_v28, %v7716_v35 }
 0x679   : > { %v7749_v40 = vadd.f32 %v12566_v0, %v7748_v39 }
 0x67a   : > { %v7513_v41 = vpop.f32.mrb[16].mxu0  ;;  %v7672_v43 = vpop.f32.mrb[16].mxu1 }
 0x67b   : > { %v7750_v44 = vmax.f32 %v7749_v40, 0.0  ;;  %v7717_v45 = vmax.f32 %v7513_v41, %v7672_v43  ;;  %v10875_v46 = vpop.f32.mrb[17].mxu0  ;;  %v10907_v47 = vpop.f32.mrb[17].mxu1 }
 0x67c   : > { %v7516_v49 = vpop.f32.mrb[18].mxu0  ;;  %v7675_v50 = vpop.f32.mrb[18].mxu1 }
 0x67d   : > { %v7751_v51 = vpack.c.bf16 %v7750_v44, %v7750_v44  ;;  %v7718_v52 = vmax.f32 %v7516_v49, %v7675_v50  ;;  %v10876_v54 = vpop.f32.mrb[19].mxu0  ;;  %v10908_v55 = vpop.f32.mrb[19].mxu1 }
 0x67f   : > { %8862 = vst.msk [vmem:[%s15361_s6 + $0x6c] sm:$0xf] %vm16_vm0, %v7751_v51  ;;  %v7753_v57 = vmax.f32 %v7717_v45, %v7718_v52 }
 0x681   : > { %v7754_v59 = vadd.f32 %v12566_v0, %v7753_v57 }
 0x682   : > { %v7521_v61 = vpop.f32.mrb[20].mxu0  ;;  %v7680_v63 = vpop.f32.mrb[20].mxu1 }
 0x683   : > { %v7755_v2 = vmax.f32 %v7754_v59, 0.0  ;;  %v7719_v5 = vmax.f32 %v7521_v61, %v7680_v63  ;;  %v10879_v7 = vpop.f32.mrb[21].mxu0  ;;  %v10911_v8 = vpop.f32.mrb[21].mxu1 }
 0x684   : > { %v7524_v3 = vpop.f32.mrb[22].mxu0  ;;  %v7683_v53 = vpop.f32.mrb[22].mxu1 }
 0x685   : > { %v7756_v9 = vpack.c.bf16 %v7755_v2, %v7755_v2  ;;  %v7720_v56 = vmax.f32 %v7524_v3, %v7683_v53  ;;  %v10880_v58 = vpop.f32.mrb[23].mxu0  ;;  %v10912_v60 = vpop.f32.mrb[23].mxu1 }
 0x687   : > { %8863 = vst.msk [vmem:[%s15361_s6 + $0x70] sm:$0xf] %vm16_vm0, %v7756_v9  ;;  %v7758_v62 = vmax.f32 %v7719_v5, %v7720_v56 }
 0x689   : > { %v7759_v1 = vadd.f32 %v12566_v0, %v7758_v62 }
 0x68a   : > { %v7529_v12 = vpop.f32.mrb[24].mxu0  ;;  %v7688_v4 = vpop.f32.mrb[24].mxu1 }
 0x68b   : > { %v7760_v11 = vmax.f32 %v7759_v1, 0.0  ;;  %v7721_v14 = vmax.f32 %v7529_v12, %v7688_v4  ;;  %v10883_v18 = vpop.f32.mrb[25].mxu0  ;;  %v10915_v24 = vpop.f32.mrb[25].mxu1 }
 0x68c   : > { %v7532_v30 = vpop.f32.mrb[26].mxu0  ;;  %v7691_v36 = vpop.f32.mrb[26].mxu1 }
 0x68d   : > { %v7761_v42 = vpack.c.bf16 %v7760_v11, %v7760_v11  ;;  %v7722_v16 = vmax.f32 %v7532_v30, %v7691_v36  ;;  %v10884_v48 = vpop.f32.mrb[27].mxu0  ;;  %v10916_v6 = vpop.f32.mrb[27].mxu1 }
 0x68f   : > { %8864 = vst.msk [vmem:[%s15361_s6 + $0x74] sm:$0xf] %vm16_vm0, %v7761_v42  ;;  %v7763_v19 = vmax.f32 %v7721_v14, %v7722_v16 }
 0x691   : > { %v7764_v10 = vadd.f32 %v12566_v0, %v7763_v19  ;;  %142 = sbr.rel (!%p140_p0) target bundleno = 62 (0x3e), region = 70 }
 0x693   : > { %v7765_v13 = vmax.f32 %v7764_v10, 0.0 }
 0x695   : > { %v7766_v15 = vpack.c.bf16 %v7765_v13, %v7765_v13 }
 0x697   : > { %8865 = vst.msk [vmem:[%s15361_s6 + $0x78] sm:$0xf] %vm16_vm0, %v7766_v15 }

// kernel: net_forward.7
= control target key start
LH: loop header
LB: loop body
LE: loop exit
PB: predicated region body
PF: predicated region fallthrough
CT: control target
= control target key end

     0   :  { %v4458_v1 = vmov 0   ;;  %vm3231_vm0 = vcmask 80896   ;;  %s5731_s1 = inlined_call_operand.vmem [shape: bf16[9,128,512], index: 1, kind: input, shape index: {}]   ;;  %s5732_s0 = inlined_call_operand.vmem [shape: bf16[1,3,24,128], index: 0, kind: input, shape index: {}]   ;;  %s5733_s3 = inlined_call_operand.vmem [shape: bf16[512,256], index: 3, kind: input, shape index: {}]   ;;  %s5734_s5 = inlined_call_operand.vmem [shape: bf16[256,10], index: 5, kind: input, shape index: {}]   ;;  %s5735_s2 = inlined_call_operand.vmem [shape: f32[1,512], index: 2, kind: input, shape index: {}]   ;;  %s5736_s4 = inlined_call_operand.vmem [shape: f32[1,256], index: 4, kind: input, shape index: {}]   ;;  %s5737_s6 = inlined_call_operand.vmem [shape: f32[1,10], index: 6, kind: input, shape index: {}]   ;;  %s5738_s7 = inlined_call_operand.vmem [shape: f32[8,10], index: 7, kind: output, shape index: {}]  }
   0x1   :  { %v3910_v0 = vld [vmem:[%s5731_s1 + $0x104] ss:$16 sps:$4 sm:$0xff]   ;;  %286 = vmatprep.mubr.bf16.mxu1 %v4458_v1  ;;  %528 = vmatprep.mubr.bf16.mxu0 %v4458_v1  ;;  %v3914_v3 = vld [vmem:[%s5731_s1 + $0x100] ss:$16 sps:$4 sm:$0xff]   ;;  %v3960_v33 = vld [vmem:[%s5731_s1 + $0x10c] ss:$16 sps:$4 sm:$0xff]  }
   0x2   :  { %v3912_v2 = vld [vmem:[%s5731_s1 + $0x4] ss:$16 sps:$4 sm:$0xff]   ;;  %254 = vmatprep.subr.bf16.mxu1 %v3910_v0  ;;  %v3915_v4 = vld [vmem:[%s5731_s1] ss:$16 sps:$4 sm:$0xff]   ;;  %v3958_v36 = vld [vmem:[%s5731_s1 + $0x108] ss:$16 sps:$4 sm:$0xff]  }
   0x3   :  { %496 = vmatprep.subr.bf16.mxu0 %v3912_v2  ;;  %v3916_v5 = vld [vmem:[%s5731_s1 + $0x124] ss:$16 sps:$4 sm:$0xff]   ;;  %255 = vmatpush1.bf16.msra.mxu1 %v3914_v3  ;;  %v3920_v7 = vld [vmem:[%s5731_s1 + $0x120] ss:$16 sps:$4 sm:$0xff]   ;;  %v3966_v39 = vld [vmem:[%s5731_s1 + $0x12c] ss:$16 sps:$4 sm:$0xff]  }
   0x4   :  { %497 = vmatpush1.bf16.msra.mxu0 %v3915_v4  ;;  %v3918_v6 = vld [vmem:[%s5731_s1 + $0x24] ss:$16 sps:$4 sm:$0xff]   ;;  %256 = vmatprep.subr.bf16.mxu1 %v3916_v5  ;;  %v3921_v8 = vld [vmem:[%s5731_s1 + $0x20] ss:$16 sps:$4 sm:$0xff]   ;;  %v3964_v41 = vld [vmem:[%s5731_s1 + $0x128] ss:$16 sps:$4 sm:$0xff]  }
   0x5   :  { %498 = vmatprep.subr.bf16.mxu0 %v3918_v6  ;;  %v3922_v9 = vld [vmem:[%s5731_s1 + $0x144] ss:$16 sps:$4 sm:$0xff]   ;;  %v3926_v11 = vld [vmem:[%s5731_s1 + $0x140] ss:$16 sps:$4 sm:$0xff]   ;;  %v3972_v43 = vld [vmem:[%s5731_s1 + $0x14c] ss:$16 sps:$4 sm:$0xff]  }
   0x6   :  { %v3924_v10 = vld [vmem:[%s5731_s1 + $0x44] ss:$16 sps:$4 sm:$0xff]   ;;  %v3927_v12 = vld [vmem:[%s5731_s1 + $0x40] ss:$16 sps:$4 sm:$0xff]   ;;  %v3970_v45 = vld [vmem:[%s5731_s1 + $0x148] ss:$16 sps:$4 sm:$0xff]  }
   0x7   :  { %257 = vmatpush1.bf16.msra.mxu1 %v3920_v7  ;;  %v3928_v13 = vld [vmem:[%s5731_s1 + $0x164] ss:$16 sps:$4 sm:$0xff]   ;;  %v3932_v15 = vld [vmem:[%s5731_s1 + $0x160] ss:$16 sps:$4 sm:$0xff]   ;;  %v3978_v47 = vld [vmem:[%s5731_s1 + $0x16c] ss:$16 sps:$4 sm:$0xff]  }
   0x8   :  { %499 = vmatpush1.bf16.msra.mxu0 %v3921_v8  ;;  %258 = vmatprep.subr.bf16.mxu1 %v3922_v9  ;;  %v3930_v14 = vld [vmem:[%s5731_s1 + $0x64] ss:$16 sps:$4 sm:$0xff]   ;;  %v3933_v16 = vld [vmem:[%s5731_s1 + $0x60] ss:$16 sps:$4 sm:$0xff]   ;;  %v3976_v49 = vld [vmem:[%s5731_s1 + $0x168] ss:$16 sps:$4 sm:$0xff]  }
   0x9   :  { %500 = vmatprep.subr.bf16.mxu0 %v3924_v10  ;;  %v3934_v17 = vld [vmem:[%s5731_s1 + $0x184] ss:$16 sps:$4 sm:$0xff]   ;;  %v3938_v19 = vld [vmem:[%s5731_s1 + $0x180] ss:$16 sps:$4 sm:$0xff]   ;;  %v3984_v51 = vld [vmem:[%s5731_s1 + $0x18c] ss:$16 sps:$4 sm:$0xff]  }
   0xa   :  { %v3936_v18 = vld [vmem:[%s5731_s1 + $0x84] ss:$16 sps:$4 sm:$0xff]   ;;  %v3939_v20 = vld [vmem:[%s5731_s1 + $0x80] ss:$16 sps:$4 sm:$0xff]   ;;  %v3982_v53 = vld [vmem:[%s5731_s1 + $0x188] ss:$16 sps:$4 sm:$0xff]  }
   0xb   :  { %259 = vmatpush1.bf16.msra.mxu1 %v3926_v11  ;;  %v3940_v21 = vld [vmem:[%s5731_s1 + $0x1a4] ss:$16 sps:$4 sm:$0xff]   ;;  %v3944_v23 = vld [vmem:[%s5731_s1 + $0x1a0] ss:$16 sps:$4 sm:$0xff]   ;;  %v3990_v55 = vld [vmem:[%s5731_s1 + $0x1ac] ss:$16 sps:$4 sm:$0xff]  }
   0xc   :  { %501 = vmatpush1.bf16.msra.mxu0 %v3927_v12  ;;  %260 = vmatprep.subr.bf16.mxu1 %v3928_v13  ;;  %v3942_v22 = vld [vmem:[%s5731_s1 + $0xa4] ss:$16 sps:$4 sm:$0xff]   ;;  %v3945_v24 = vld [vmem:[%s5731_s1 + $0xa0] ss:$16 sps:$4 sm:$0xff]   ;;  %v3988_v57 = vld [vmem:[%s5731_s1 + $0x1a8] ss:$16 sps:$4 sm:$0xff]  }
   0xd   :  { %502 = vmatprep.subr.bf16.mxu0 %v3930_v14  ;;  %v3946_v25 = vld [vmem:[%s5731_s1 + $0x1c4] ss:$16 sps:$4 sm:$0xff]   ;;  %v3950_v27 = vld [vmem:[%s5731_s1 + $0x1c0] ss:$16 sps:$4 sm:$0xff]   ;;  %v3996_v59 = vld [vmem:[%s5731_s1 + $0x1cc] ss:$16 sps:$4 sm:$0xff]  }
   0xe   :  { %v3948_v26 = vld [vmem:[%s5731_s1 + $0xc4] ss:$16 sps:$4 sm:$0xff]   ;;  %v3951_v28 = vld [vmem:[%s5731_s1 + $0xc0] ss:$16 sps:$4 sm:$0xff]   ;;  %v3994_v61 = vld [vmem:[%s5731_s1 + $0x1c8] ss:$16 sps:$4 sm:$0xff]  }
   0xf   :  { %261 = vmatpush1.bf16.msra.mxu1 %v3932_v15  ;;  %v3952_v29 = vld [vmem:[%s5731_s1 + $0x1e4] ss:$16 sps:$4 sm:$0xff]   ;;  %v3956_v31 = vld [vmem:[%s5731_s1 + $0x1e0] ss:$16 sps:$4 sm:$0xff]   ;;  %v4002_v63 = vld [vmem:[%s5731_s1 + $0x1ec] ss:$16 sps:$4 sm:$0xff]  }
  0x10   :  { %503 = vmatpush1.bf16.msra.mxu0 %v3933_v16  ;;  %262 = vmatprep.subr.bf16.mxu1 %v3934_v17  ;;  %v3954_v30 = vld [vmem:[%s5731_s1 + $0xe4] ss:$16 sps:$4 sm:$0xff]   ;;  %v3957_v32 = vld [vmem:[%s5731_s1 + $0xe0] ss:$16 sps:$4 sm:$0xff]   ;;  %v4000_v2 = vld [vmem:[%s5731_s1 + $0x1e8] ss:$16 sps:$4 sm:$0xff]  }
  0x11   :  { %504 = vmatprep.subr.bf16.mxu0 %v3936_v18  ;;  %v3963_v34 = vld [vmem:[%s5731_s1 + $0x204] ss:$16 sps:$4 sm:$0xff]   ;;  %v4614_v37 = vld [vmem:[%s5732_s0] sm:$0xf]  ;;  %v4008_v4 = vld [vmem:[%s5731_s1 + $0xc] ss:$16 sps:$4 sm:$0xff]  }
  0x12   :  { %v4606_v35 = vld [vmem:[%s5732_s0 + $0x4] sm:$0xf]  ;;  %v3961_v38 = vld [vmem:[%s5731_s1 + $0x200] ss:$16 sps:$4 sm:$0xff]   ;;  %v4006_v6 = vld [vmem:[%s5731_s1 + $0x8] ss:$16 sps:$4 sm:$0xff]  }
  0x13   :  { %263 = vmatpush1.bf16.msra.mxu1 %v3938_v19  ;;  %v3969_v40 = vld [vmem:[%s5731_s1 + $0x224] ss:$16 sps:$4 sm:$0xff]   ;;  %v3967_v42 = vld [vmem:[%s5731_s1 + $0x220] ss:$16 sps:$4 sm:$0xff]   ;;  %v4719_v7 = vld [vmem:[%s5732_s0 + $0x8] sm:$0xf] }
  0x14   :  { %505 = vmatpush1.bf16.msra.mxu0 %v3939_v20  ;;  %264 = vmatprep.subr.bf16.mxu1 %v3940_v21  ;;  %v3975_v44 = vld [vmem:[%s5731_s1 + $0x244] ss:$16 sps:$4 sm:$0xff]   ;;  %v3973_v46 = vld [vmem:[%s5731_s1 + $0x240] ss:$16 sps:$4 sm:$0xff]   ;;  %v4014_v9 = vld [vmem:[%s5731_s1 + $0x2c] ss:$16 sps:$4 sm:$0xff]  }
  0x15   :  { %506 = vmatprep.subr.bf16.mxu0 %v3942_v22  ;;  %v3981_v48 = vld [vmem:[%s5731_s1 + $0x264] ss:$16 sps:$4 sm:$0xff]   ;;  %v3979_v50 = vld [vmem:[%s5731_s1 + $0x260] ss:$16 sps:$4 sm:$0xff]   ;;  %v4012_v11 = vld [vmem:[%s5731_s1 + $0x28] ss:$16 sps:$4 sm:$0xff]  }
  0x16   :  { %v3987_v52 = vld [vmem:[%s5731_s1 + $0x284] ss:$16 sps:$4 sm:$0xff]   ;;  %v3985_v54 = vld [vmem:[%s5731_s1 + $0x280] ss:$16 sps:$4 sm:$0xff]   ;;  %v4020_v13 = vld [vmem:[%s5731_s1 + $0x4c] ss:$16 sps:$4 sm:$0xff]  }
  0x17   :  { %265 = vmatpush1.bf16.msra.mxu1 %v3944_v23  ;;  %v3993_v56 = vld [vmem:[%s5731_s1 + $0x2a4] ss:$16 sps:$4 sm:$0xff]   ;;  %v3991_v58 = vld [vmem:[%s5731_s1 + $0x2a0] ss:$16 sps:$4 sm:$0xff]   ;;  %v4018_v15 = vld [vmem:[%s5731_s1 + $0x48] ss:$16 sps:$4 sm:$0xff]  }
  0x18   :  { %507 = vmatpush1.bf16.msra.mxu0 %v3945_v24  ;;  %266 = vmatprep.subr.bf16.mxu1 %v3946_v25  ;;  %v3999_v60 = vld [vmem:[%s5731_s1 + $0x2c4] ss:$16 sps:$4 sm:$0xff]   ;;  %v3997_v62 = vld [vmem:[%s5731_s1 + $0x2c0] ss:$16 sps:$4 sm:$0xff]   ;;  %v4026_v17 = vld [vmem:[%s5731_s1 + $0x6c] ss:$16 sps:$4 sm:$0xff]  }
  0x19   :  { %508 = vmatprep.subr.bf16.mxu0 %v3948_v26  ;;  %v4005_v0 = vld [vmem:[%s5731_s1 + $0x2e4] ss:$16 sps:$4 sm:$0xff]   ;;  %v4003_v3 = vld [vmem:[%s5731_s1 + $0x2e0] ss:$16 sps:$4 sm:$0xff]   ;;  %v4024_v19 = vld [vmem:[%s5731_s1 + $0x68] ss:$16 sps:$4 sm:$0xff]  }
  0x1a   :  { %v4011_v5 = vld [vmem:[%s5731_s1 + $0x304] ss:$16 sps:$4 sm:$0xff]   ;;  %v4009_v8 = vld [vmem:[%s5731_s1 + $0x300] ss:$16 sps:$4 sm:$0xff]   ;;  %v4032_v21 = vld [vmem:[%s5731_s1 + $0x8c] ss:$16 sps:$4 sm:$0xff]  }
  0x1b   :  { %267 = vmatpush1.bf16.msra.mxu1 %v3950_v27  ;;  %v4017_v10 = vld [vmem:[%s5731_s1 + $0x324] ss:$16 sps:$4 sm:$0xff]   ;;  %v4015_v12 = vld [vmem:[%s5731_s1 + $0x320] ss:$16 sps:$4 sm:$0xff]   ;;  %v4030_v23 = vld [vmem:[%s5731_s1 + $0x88] ss:$16 sps:$4 sm:$0xff]  }
  0x1c   :  { %509 = vmatpush1.bf16.msra.mxu0 %v3951_v28  ;;  %268 = vmatprep.subr.bf16.mxu1 %v3952_v29  ;;  %v4023_v14 = vld [vmem:[%s5731_s1 + $0x344] ss:$16 sps:$4 sm:$0xff]   ;;  %v4021_v16 = vld [vmem:[%s5731_s1 + $0x340] ss:$16 sps:$4 sm:$0xff]   ;;  %v4038_v25 = vld [vmem:[%s5731_s1 + $0xac] ss:$16 sps:$4 sm:$0xff]  }
  0x1d   :  { %510 = vmatprep.subr.bf16.mxu0 %v3954_v30  ;;  %v4029_v18 = vld [vmem:[%s5731_s1 + $0x364] ss:$16 sps:$4 sm:$0xff]   ;;  %v4027_v20 = vld [vmem:[%s5731_s1 + $0x360] ss:$16 sps:$4 sm:$0xff]   ;;  %v4036_v27 = vld [vmem:[%s5731_s1 + $0xa8] ss:$16 sps:$4 sm:$0xff]  }
  0x1e   :  { %v4035_v22 = vld [vmem:[%s5731_s1 + $0x384] ss:$16 sps:$4 sm:$0xff]   ;;  %v4033_v24 = vld [vmem:[%s5731_s1 + $0x380] ss:$16 sps:$4 sm:$0xff]   ;;  %v4044_v29 = vld [vmem:[%s5731_s1 + $0xcc] ss:$16 sps:$4 sm:$0xff]  }
  0x1f   :  { %269 = vmatpush1.bf16.msra.mxu1 %v3956_v31  ;;  %v4041_v26 = vld [vmem:[%s5731_s1 + $0x3a4] ss:$16 sps:$4 sm:$0xff]   ;;  %v4039_v28 = vld [vmem:[%s5731_s1 + $0x3a0] ss:$16 sps:$4 sm:$0xff]   ;;  %v4042_v31 = vld [vmem:[%s5731_s1 + $0xc8] ss:$16 sps:$4 sm:$0xff]  }
  0x20   :  { %511 = vmatpush1.bf16.msra.mxu0 %v3957_v32  ;;  %295 = vmatprep.subr.bf16.mxu1 %v3960_v33  ;;  %v4047_v30 = vld [vmem:[%s5731_s1 + $0x3c4] ss:$16 sps:$4 sm:$0xff]   ;;  %v4045_v32 = vld [vmem:[%s5731_s1 + $0x3c0] ss:$16 sps:$4 sm:$0xff]   ;;  %v4050_v33 = vld [vmem:[%s5731_s1 + $0xec] ss:$16 sps:$4 sm:$0xff]  }
  0x21   :  { %772 = vmatprep.subr.bf16.mxu0 %v3963_v34  ;;  %v4053_v34 = vld [vmem:[%s5731_s1 + $0x3e4] ss:$16 sps:$4 sm:$0xff]  }
  0x22   :  { %287 = vmatmul.mubr.bf16.vlgmr.msra.gmra.mrb[0].mxu1 %v4606_v35 }
  0x23   :  { %529 = vmatmul.mubr.bf16.vlgmr.msra.gmra.mrb[0].mxu0 %v4614_v37  ;;  %296 = vmatpush1.bf16.msra.mxu1 %v3958_v36  ;;  %v4051_v36 = vld [vmem:[%s5731_s1 + $0x3e0] ss:$16 sps:$4 sm:$0xff]  }
  0x24   :  { %773 = vmatpush1.bf16.msra.mxu0 %v3961_v38  ;;  %297 = vmatprep.subr.bf16.mxu1 %v3966_v39  ;;  %v4056_v38 = vld [vmem:[%s5731_s1 + $0x20c] ss:$16 sps:$4 sm:$0xff]   ;;  %v4059_v39 = vld [vmem:[%s5731_s1 + $0x404] ss:$16 sps:$4 sm:$0xff]  }
  0x25   :  { %774 = vmatprep.subr.bf16.mxu0 %v3969_v40  ;;  %327 = vmatprep.mubr.bf16.mxu1 %v4458_v1  ;;  %v4054_v40 = vld [vmem:[%s5731_s1 + $0x208] ss:$16 sps:$4 sm:$0xff]  }
  0x26   :  { %804 = vmatprep.mubr.bf16.mxu0 %v4458_v1 }
  0x27   :  { %298 = vmatpush1.bf16.msra.mxu1 %v3964_v41  ;;  %v4824_v41 = vld [vmem:[%s5732_s0 + $0xc] sm:$0xf] }
  0x28   :  { %775 = vmatpush1.bf16.msra.mxu0 %v3967_v42  ;;  %299 = vmatprep.subr.bf16.mxu1 %v3972_v43  ;;  %v4057_v42 = vld [vmem:[%s5731_s1 + $0x400] ss:$16 sps:$4 sm:$0xff]   ;;  %v4062_v43 = vld [vmem:[%s5731_s1 + $0x22c] ss:$16 sps:$4 sm:$0xff]  }
  0x29   :  { %776 = vmatprep.subr.bf16.mxu0 %v3975_v44  ;;  %v4065_v44 = vld [vmem:[%s5731_s1 + $0x424] ss:$16 sps:$4 sm:$0xff]  }
  0x2b   :  { %300 = vmatpush1.bf16.msra.mxu1 %v3970_v45  ;;  %v4060_v45 = vld [vmem:[%s5731_s1 + $0x228] ss:$16 sps:$4 sm:$0xff]  }
  0x2c   :  { %777 = vmatpush1.bf16.msra.mxu0 %v3973_v46  ;;  %301 = vmatprep.subr.bf16.mxu1 %v3978_v47  ;;  %v4063_v46 = vld [vmem:[%s5731_s1 + $0x420] ss:$16 sps:$4 sm:$0xff]   ;;  %v4068_v47 = vld [vmem:[%s5731_s1 + $0x24c] ss:$16 sps:$4 sm:$0xff]  }
  0x2d   :  { %778 = vmatprep.subr.bf16.mxu0 %v3981_v48  ;;  %v4066_v48 = vld [vmem:[%s5731_s1 + $0x248] ss:$16 sps:$4 sm:$0xff]  }
  0x2f   :  { %302 = vmatpush1.bf16.msra.mxu1 %v3976_v49  ;;  %v4069_v49 = vld [vmem:[%s5731_s1 + $0x440] ss:$16 sps:$4 sm:$0xff]  }
  0x30   :  { %779 = vmatpush1.bf16.msra.mxu0 %v3979_v50  ;;  %303 = vmatprep.subr.bf16.mxu1 %v3984_v51  ;;  %v4074_v50 = vld [vmem:[%s5731_s1 + $0x26c] ss:$16 sps:$4 sm:$0xff]   ;;  %v4077_v51 = vld [vmem:[%s5731_s1 + $0x464] ss:$16 sps:$4 sm:$0xff]  }
  0x31   :  { %780 = vmatprep.subr.bf16.mxu0 %v3987_v52  ;;  %v4072_v52 = vld [vmem:[%s5731_s1 + $0x268] ss:$16 sps:$4 sm:$0xff]  }
  0x33   :  { %304 = vmatpush1.bf16.msra.mxu1 %v3982_v53  ;;  %v4075_v53 = vld [vmem:[%s5731_s1 + $0x460] ss:$16 sps:$4 sm:$0xff]  }
  0x34   :  { %781 = vmatpush1.bf16.msra.mxu0 %v3985_v54  ;;  %305 = vmatprep.subr.bf16.mxu1 %v3990_v55  ;;  %v4080_v54 = vld [vmem:[%s5731_s1 + $0x28c] ss:$16 sps:$4 sm:$0xff]   ;;  %v4083_v55 = vld [vmem:[%s5731_s1 + $0x484] ss:$16 sps:$4 sm:$0xff]  }
  0x35   :  { %782 = vmatprep.subr.bf16.mxu0 %v3993_v56  ;;  %v4078_v56 = vld [vmem:[%s5731_s1 + $0x288] ss:$16 sps:$4 sm:$0xff]  }
  0x37   :  { %306 = vmatpush1.bf16.msra.mxu1 %v3988_v57  ;;  %v4081_v57 = vld [vmem:[%s5731_s1 + $0x480] ss:$16 sps:$4 sm:$0xff]  }
  0x38   :  { %783 = vmatpush1.bf16.msra.mxu0 %v3991_v58  ;;  %307 = vmatprep.subr.bf16.mxu1 %v3996_v59  ;;  %v4086_v58 = vld [vmem:[%s5731_s1 + $0x2ac] ss:$16 sps:$4 sm:$0xff]   ;;  %v4089_v59 = vld [vmem:[%s5731_s1 + $0x4a4] ss:$16 sps:$4 sm:$0xff]  }
  0x39   :  { %784 = vmatprep.subr.bf16.mxu0 %v3999_v60  ;;  %v4084_v60 = vld [vmem:[%s5731_s1 + $0x2a8] ss:$16 sps:$4 sm:$0xff]  }
  0x3b   :  { %308 = vmatpush1.bf16.msra.mxu1 %v3994_v61  ;;  %v4087_v61 = vld [vmem:[%s5731_s1 + $0x4a0] ss:$16 sps:$4 sm:$0xff]  }
  0x3c   :  { %785 = vmatpush1.bf16.msra.mxu0 %v3997_v62  ;;  %309 = vmatprep.subr.bf16.mxu1 %v4002_v63  ;;  %v4092_v62 = vld [vmem:[%s5731_s1 + $0x2cc] ss:$16 sps:$4 sm:$0xff]   ;;  %v4095_v63 = vld [vmem:[%s5731_s1 + $0x4c4] ss:$16 sps:$4 sm:$0xff]  }
  0x3d   :  { %786 = vmatprep.subr.bf16.mxu0 %v4005_v0  ;;  %v4090_v0 = vld [vmem:[%s5731_s1 + $0x2c8] ss:$16 sps:$4 sm:$0xff]  }
  0x3f   :  { %310 = vmatpush1.bf16.msra.mxu1 %v4000_v2  ;;  %v4093_v2 = vld [vmem:[%s5731_s1 + $0x4c0] ss:$16 sps:$4 sm:$0xff]  }
  0x40   :  { %787 = vmatpush1.bf16.msra.mxu0 %v4003_v3  ;;  %537 = vmatprep.subr.bf16.mxu1 %v4008_v4  ;;  %v4098_v3 = vld [vmem:[%s5731_s1 + $0x2ec] ss:$16 sps:$4 sm:$0xff]   ;;  %v4101_v4 = vld [vmem:[%s5731_s1 + $0x4e4] ss:$16 sps:$4 sm:$0xff]  }
  0x41   :  { %1053 = vmatprep.subr.bf16.mxu0 %v4011_v5  ;;  %v4096_v5 = vld [vmem:[%s5731_s1 + $0x2e8] ss:$16 sps:$4 sm:$0xff]  }
  0x42   :  { %328 = vmatmul.mubr.bf16.vlgmr.msra.gmra.mrb[4].mxu1 %v4606_v35  ;;  %v4048_v35 = vld [vmem:[%s5731_s1 + $0xe8] ss:$16 sps:$4 sm:$0xff]  }
  0x43   :  { %805 = vmatmul.mubr.bf16.vlgmr.msra.gmra.mrb[4].mxu0 %v4719_v7  ;;  %538 = vmatpush1.bf16.msra.mxu1 %v4006_v6  ;;  %v4099_v6 = vld [vmem:[%s5731_s1 + $0x4e0] ss:$16 sps:$4 sm:$0xff]  }
  0x44   :  { %1054 = vmatpush1.bf16.msra.mxu0 %v4009_v8  ;;  %539 = vmatprep.subr.bf16.mxu1 %v4014_v9  ;;  %v4104_v8 = vld [vmem:[%s5731_s1 + $0x30c] ss:$16 sps:$4 sm:$0xff]   ;;  %v4107_v9 = vld [vmem:[%s5731_s1 + $0x504] ss:$16 sps:$4 sm:$0xff]  }
  0x45   :  { %1055 = vmatprep.subr.bf16.mxu0 %v4017_v10  ;;  %569 = vmatprep.mubr.bf16.mxu1 %v4458_v1  ;;  %v4102_v10 = vld [vmem:[%s5731_s1 + $0x308] ss:$16 sps:$4 sm:$0xff]  }
  0x46   :  { %1085 = vmatprep.mubr.bf16.mxu0 %v4458_v1 }
  0x47   :  { %540 = vmatpush1.bf16.msra.mxu1 %v4012_v11  ;;  %v4929_v11 = vld [vmem:[%s5732_s0 + $0x10] sm:$0xf] }
  0x48   :  { %1056 = vmatpush1.bf16.msra.mxu0 %v4015_v12  ;;  %541 = vmatprep.subr.bf16.mxu1 %v4020_v13  ;;  %v4105_v12 = vld [vmem:[%s5731_s1 + $0x500] ss:$16 sps:$4 sm:$0xff]   ;;  %v4110_v13 = vld [vmem:[%s5731_s1 + $0x32c] ss:$16 sps:$4 sm:$0xff]  }
  0x49   :  { %1057 = vmatprep.subr.bf16.mxu0 %v4023_v14  ;;  %v4113_v14 = vld [vmem:[%s5731_s1 + $0x524] ss:$16 sps:$4 sm:$0xff]  }
  0x4b   :  { %542 = vmatpush1.bf16.msra.mxu1 %v4018_v15  ;;  %v4108_v15 = vld [vmem:[%s5731_s1 + $0x328] ss:$16 sps:$4 sm:$0xff]  }
  0x4c   :  { %1058 = vmatpush1.bf16.msra.mxu0 %v4021_v16  ;;  %543 = vmatprep.subr.bf16.mxu1 %v4026_v17  ;;  %v4111_v16 = vld [vmem:[%s5731_s1 + $0x520] ss:$16 sps:$4 sm:$0xff]   ;;  %v4116_v17 = vld [vmem:[%s5731_s1 + $0x34c] ss:$16 sps:$4 sm:$0xff]  }
  0x4d   :  { %1059 = vmatprep.subr.bf16.mxu0 %v4029_v18  ;;  %v4114_v18 = vld [vmem:[%s5731_s1 + $0x348] ss:$16 sps:$4 sm:$0xff]  }
  0x4f   :  { %544 = vmatpush1.bf16.msra.mxu1 %v4024_v19  ;;  %v4117_v19 = vld [vmem:[%s5731_s1 + $0x540] ss:$16 sps:$4 sm:$0xff]  }
  0x50   :  { %1060 = vmatpush1.bf16.msra.mxu0 %v4027_v20  ;;  %545 = vmatprep.subr.bf16.mxu1 %v4032_v21  ;;  %v4122_v20 = vld [vmem:[%s5731_s1 + $0x36c] ss:$16 sps:$4 sm:$0xff]   ;;  %v4125_v21 = vld [vmem:[%s5731_s1 + $0x564] ss:$16 sps:$4 sm:$0xff]  }
  0x51   :  { %1061 = vmatprep.subr.bf16.mxu0 %v4035_v22  ;;  %v4120_v22 = vld [vmem:[%s5731_s1 + $0x368] ss:$16 sps:$4 sm:$0xff]  }
  0x53   :  { %546 = vmatpush1.bf16.msra.mxu1 %v4030_v23  ;;  %v4123_v23 = vld [vmem:[%s5731_s1 + $0x560] ss:$16 sps:$4 sm:$0xff]  }
  0x54   :  { %1062 = vmatpush1.bf16.msra.mxu0 %v4033_v24  ;;  %547 = vmatprep.subr.bf16.mxu1 %v4038_v25  ;;  %v4128_v24 = vld [vmem:[%s5731_s1 + $0x38c] ss:$16 sps:$4 sm:$0xff]   ;;  %v4131_v25 = vld [vmem:[%s5731_s1 + $0x584] ss:$16 sps:$4 sm:$0xff]  }
  0x55   :  { %1063 = vmatprep.subr.bf16.mxu0 %v4041_v26  ;;  %v4126_v26 = vld [vmem:[%s5731_s1 + $0x388] ss:$16 sps:$4 sm:$0xff]  }
  0x57   :  { %548 = vmatpush1.bf16.msra.mxu1 %v4036_v27  ;;  %v4129_v27 = vld [vmem:[%s5731_s1 + $0x580] ss:$16 sps:$4 sm:$0xff]  }
  0x58   :  { %1064 = vmatpush1.bf16.msra.mxu0 %v4039_v28  ;;  %549 = vmatprep.subr.bf16.mxu1 %v4044_v29  ;;  %v4134_v28 = vld [vmem:[%s5731_s1 + $0x3ac] ss:$16 sps:$4 sm:$0xff]   ;;  %v4137_v29 = vld [vmem:[%s5731_s1 + $0x5a4] ss:$16 sps:$4 sm:$0xff]  }
  0x59   :  { %1065 = vmatprep.subr.bf16.mxu0 %v4047_v30  ;;  %v4132_v30 = vld [vmem:[%s5731_s1 + $0x3a8] ss:$16 sps:$4 sm:$0xff]  }
  0x5b   :  { %550 = vmatpush1.bf16.msra.mxu1 %v4042_v31  ;;  %v4135_v31 = vld [vmem:[%s5731_s1 + $0x5a0] ss:$16 sps:$4 sm:$0xff]  }
  0x5c   :  { %1066 = vmatpush1.bf16.msra.mxu0 %v4045_v32  ;;  %551 = vmatprep.subr.bf16.mxu1 %v4050_v33  ;;  %v4140_v32 = vld [vmem:[%s5731_s1 + $0x3cc] ss:$16 sps:$4 sm:$0xff]   ;;  %v4143_v33 = vld [vmem:[%s5731_s1 + $0x5c4] ss:$16 sps:$4 sm:$0xff]  }
  0x5d   :  { %1067 = vmatprep.subr.bf16.mxu0 %v4053_v34  ;;  %v4138_v34 = vld [vmem:[%s5731_s1 + $0x3c8] ss:$16 sps:$4 sm:$0xff]  }
  0x5f   :  { %552 = vmatpush1.bf16.msra.mxu1 %v4048_v35  ;;  %v4141_v35 = vld [vmem:[%s5731_s1 + $0x5c0] ss:$16 sps:$4 sm:$0xff]  }
  0x60   :  { %1068 = vmatpush1.bf16.msra.mxu0 %v4051_v36  ;;  %813 = vmatprep.subr.bf16.mxu1 %v4056_v38  ;;  %v4146_v36 = vld [vmem:[%s5731_s1 + $0x3ec] ss:$16 sps:$4 sm:$0xff]   ;;  %v4149_v38 = vld [vmem:[%s5731_s1 + $0x5e4] ss:$16 sps:$4 sm:$0xff]  }
  0x61   :  { %1333 = vmatprep.subr.bf16.mxu0 %v4059_v39  ;;  %v4144_v39 = vld [vmem:[%s5731_s1 + $0x3e8] ss:$16 sps:$4 sm:$0xff]  }
  0x62   :  { %570 = vmatmul.mubr.bf16.vlgmr.msra.gmra.mrb[8].mxu1 %v4614_v37  ;;  %v4071_v37 = vld [vmem:[%s5731_s1 + $0x444] ss:$16 sps:$4 sm:$0xff]  }
  0x63   :  { %1086 = vmatmul.mubr.bf16.vlgmr.msra.gmra.mrb[8].mxu0 %v4824_v41  ;;  %814 = vmatpush1.bf16.msra.mxu1 %v4054_v40  ;;  %v4147_v40 = vld [vmem:[%s5731_s1 + $0x5e0] ss:$16 sps:$4 sm:$0xff]  }
  0x64   :  { %1334 = vmatpush1.bf16.msra.mxu0 %v4057_v42  ;;  %815 = vmatprep.subr.bf16.mxu1 %v4062_v43  ;;  %v4152_v42 = vld [vmem:[%s5731_s1 + $0x40c] ss:$16 sps:$4 sm:$0xff]   ;;  %v4155_v43 = vld [vmem:[%s5731_s1 + $0x604] ss:$16 sps:$4 sm:$0xff]  }
  0x65   :  { %1335 = vmatprep.subr.bf16.mxu0 %v4065_v44  ;;  %845 = vmatprep.mubr.bf16.mxu1 %v4458_v1  ;;  %v4150_v44 = vld [vmem:[%s5731_s1 + $0x408] ss:$16 sps:$4 sm:$0xff]  }
  0x66   :  { %1365 = vmatprep.mubr.bf16.mxu0 %v4458_v1 }
  0x67   :  { %816 = vmatpush1.bf16.msra.mxu1 %v4060_v45  ;;  %v5034_v45 = vld [vmem:[%s5732_s0 + $0x14] sm:$0xf] }
  0x68   :  { %1336 = vmatpush1.bf16.msra.mxu0 %v4063_v46  ;;  %817 = vmatprep.subr.bf16.mxu1 %v4068_v47  ;;  %v4153_v46 = vld [vmem:[%s5731_s1 + $0x600] ss:$16 sps:$4 sm:$0xff]   ;;  %v4158_v47 = vld [vmem:[%s5731_s1 + $0x42c] ss:$16 sps:$4 sm:$0xff]  }
  0x69   :  { %1337 = vmatprep.subr.bf16.mxu0 %v4071_v37  ;;  %v4161_v37 = vld [vmem:[%s5731_s1 + $0x624] ss:$16 sps:$4 sm:$0xff]  }
  0x6b   :  { %818 = vmatpush1.bf16.msra.mxu1 %v4066_v48  ;;  %v4156_v48 = vld [vmem:[%s5731_s1 + $0x428] ss:$16 sps:$4 sm:$0xff]  }
  0x6c   :  { %1338 = vmatpush1.bf16.msra.mxu0 %v4069_v49  ;;  %819 = vmatprep.subr.bf16.mxu1 %v4074_v50  ;;  %v4159_v49 = vld [vmem:[%s5731_s1 + $0x620] ss:$16 sps:$4 sm:$0xff]   ;;  %v4164_v50 = vld [vmem:[%s5731_s1 + $0x44c] ss:$16 sps:$4 sm:$0xff]  }
  0x6d   :  { %1339 = vmatprep.subr.bf16.mxu0 %v4077_v51  ;;  %v4162_v51 = vld [vmem:[%s5731_s1 + $0x448] ss:$16 sps:$4 sm:$0xff]  }
  0x6f   :  { %820 = vmatpush1.bf16.msra.mxu1 %v4072_v52  ;;  %v4165_v52 = vld [vmem:[%s5731_s1 + $0x640] ss:$16 sps:$4 sm:$0xff]  }
  0x70   :  { %1340 = vmatpush1.bf16.msra.mxu0 %v4075_v53  ;;  %821 = vmatprep.subr.bf16.mxu1 %v4080_v54  ;;  %v4170_v53 = vld [vmem:[%s5731_s1 + $0x46c] ss:$16 sps:$4 sm:$0xff]   ;;  %v4173_v54 = vld [vmem:[%s5731_s1 + $0x664] ss:$16 sps:$4 sm:$0xff]  }
  0x71   :  { %1341 = vmatprep.subr.bf16.mxu0 %v4083_v55  ;;  %v4168_v55 = vld [vmem:[%s5731_s1 + $0x468] ss:$16 sps:$4 sm:$0xff]  }
  0x73   :  { %822 = vmatpush1.bf16.msra.mxu1 %v4078_v56  ;;  %v4171_v56 = vld [vmem:[%s5731_s1 + $0x660] ss:$16 sps:$4 sm:$0xff]  }
  0x74   :  { %1342 = vmatpush1.bf16.msra.mxu0 %v4081_v57  ;;  %823 = vmatprep.subr.bf16.mxu1 %v4086_v58  ;;  %v4176_v57 = vld [vmem:[%s5731_s1 + $0x48c] ss:$16 sps:$4 sm:$0xff]   ;;  %v4179_v58 = vld [vmem:[%s5731_s1 + $0x684] ss:$16 sps:$4 sm:$0xff]  }
  0x75   :  { %1343 = vmatprep.subr.bf16.mxu0 %v4089_v59  ;;  %v4174_v59 = vld [vmem:[%s5731_s1 + $0x488] ss:$16 sps:$4 sm:$0xff]  }
  0x77   :  { %824 = vmatpush1.bf16.msra.mxu1 %v4084_v60  ;;  %v4177_v60 = vld [vmem:[%s5731_s1 + $0x680] ss:$16 sps:$4 sm:$0xff]  }
  0x78   :  { %1344 = vmatpush1.bf16.msra.mxu0 %v4087_v61  ;;  %825 = vmatprep.subr.bf16.mxu1 %v4092_v62  ;;  %v4182_v61 = vld [vmem:[%s5731_s1 + $0x4ac] ss:$16 sps:$4 sm:$0xff]   ;;  %v4185_v62 = vld [vmem:[%s5731_s1 + $0x6a4] ss:$16 sps:$4 sm:$0xff]  }
  0x79   :  { %1345 = vmatprep.subr.bf16.mxu0 %v4095_v63  ;;  %v4180_v63 = vld [vmem:[%s5731_s1 + $0x4a8] ss:$16 sps:$4 sm:$0xff]  }
  0x7b   :  { %826 = vmatpush1.bf16.msra.mxu1 %v4090_v0  ;;  %v4183_v0 = vld [vmem:[%s5731_s1 + $0x6a0] ss:$16 sps:$4 sm:$0xff]  }
  0x7c   :  { %1346 = vmatpush1.bf16.msra.mxu0 %v4093_v2  ;;  %827 = vmatprep.subr.bf16.mxu1 %v4098_v3  ;;  %v4188_v2 = vld [vmem:[%s5731_s1 + $0x4cc] ss:$16 sps:$4 sm:$0xff]   ;;  %v4191_v3 = vld [vmem:[%s5731_s1 + $0x6c4] ss:$16 sps:$4 sm:$0xff]  }
  0x7d   :  { %1347 = vmatprep.subr.bf16.mxu0 %v4101_v4  ;;  %v4186_v4 = vld [vmem:[%s5731_s1 + $0x4c8] ss:$16 sps:$4 sm:$0xff]  }
  0x7f   :  { %828 = vmatpush1.bf16.msra.mxu1 %v4096_v5  ;;  %v4189_v5 = vld [vmem:[%s5731_s1 + $0x6c0] ss:$16 sps:$4 sm:$0xff]  }
  0x80   :  { %1348 = vmatpush1.bf16.msra.mxu0 %v4099_v6  ;;  %1094 = vmatprep.subr.bf16.mxu1 %v4104_v8  ;;  %v4194_v6 = vld [vmem:[%s5731_s1 + $0x4ec] ss:$16 sps:$4 sm:$0xff]   ;;  %v4197_v8 = vld [vmem:[%s5731_s1 + $0x6e4] ss:$16 sps:$4 sm:$0xff]  }
  0x81   :  { %1613 = vmatprep.subr.bf16.mxu0 %v4107_v9  ;;  %v4192_v9 = vld [vmem:[%s5731_s1 + $0x4e8] ss:$16 sps:$4 sm:$0xff]  }
  0x82   :  { %846 = vmatmul.mubr.bf16.vlgmr.msra.gmra.mrb[12].mxu1 %v4719_v7  ;;  %v4119_v7 = vld [vmem:[%s5731_s1 + $0x544] ss:$16 sps:$4 sm:$0xff]  }
  0x83   :  { %1366 = vmatmul.mubr.bf16.vlgmr.msra.gmra.mrb[12].mxu0 %v4929_v11  ;;  %1095 = vmatpush1.bf16.msra.mxu1 %v4102_v10  ;;  %v4195_v10 = vld [vmem:[%s5731_s1 + $0x6e0] ss:$16 sps:$4 sm:$0xff]  }
  0x84   :  { %1614 = vmatpush1.bf16.msra.mxu0 %v4105_v12  ;;  %1096 = vmatprep.subr.bf16.mxu1 %v4110_v13  ;;  %v4200_v12 = vld [vmem:[%s5731_s1 + $0x50c] ss:$16 sps:$4 sm:$0xff]   ;;  %v4203_v13 = vld [vmem:[%s5731_s1 + $0x704] ss:$16 sps:$4 sm:$0xff]  }
  0x85   :  { %1615 = vmatprep.subr.bf16.mxu0 %v4113_v14  ;;  %1126 = vmatprep.mubr.bf16.mxu1 %v4458_v1  ;;  %v4198_v14 = vld [vmem:[%s5731_s1 + $0x508] ss:$16 sps:$4 sm:$0xff]  }
  0x86   :  { %1645 = vmatprep.mubr.bf16.mxu0 %v4458_v1 }
  0x87   :  { %1097 = vmatpush1.bf16.msra.mxu1 %v4108_v15  ;;  %v5139_v15 = vld [vmem:[%s5732_s0 + $0x18] sm:$0xf] }
  0x88   :  { %1616 = vmatpush1.bf16.msra.mxu0 %v4111_v16  ;;  %1098 = vmatprep.subr.bf16.mxu1 %v4116_v17  ;;  %v4201_v16 = vld [vmem:[%s5731_s1 + $0x700] ss:$16 sps:$4 sm:$0xff]   ;;  %v4206_v17 = vld [vmem:[%s5731_s1 + $0x52c] ss:$16 sps:$4 sm:$0xff]  }
  0x89   :  { %1617 = vmatprep.subr.bf16.mxu0 %v4119_v7  ;;  %v4209_v7 = vld [vmem:[%s5731_s1 + $0x724] ss:$16 sps:$4 sm:$0xff]  }
  0x8b   :  { %1099 = vmatpush1.bf16.msra.mxu1 %v4114_v18  ;;  %v4204_v18 = vld [vmem:[%s5731_s1 + $0x528] ss:$16 sps:$4 sm:$0xff]  }
  0x8c   :  { %1618 = vmatpush1.bf16.msra.mxu0 %v4117_v19  ;;  %1100 = vmatprep.subr.bf16.mxu1 %v4122_v20  ;;  %v4207_v19 = vld [vmem:[%s5731_s1 + $0x720] ss:$16 sps:$4 sm:$0xff]   ;;  %v4212_v20 = vld [vmem:[%s5731_s1 + $0x54c] ss:$16 sps:$4 sm:$0xff]  }
  0x8d   :  { %1619 = vmatprep.subr.bf16.mxu0 %v4125_v21  ;;  %v4210_v21 = vld [vmem:[%s5731_s1 + $0x548] ss:$16 sps:$4 sm:$0xff]  }
  0x8f   :  { %1101 = vmatpush1.bf16.msra.mxu1 %v4120_v22  ;;  %v4213_v22 = vld [vmem:[%s5731_s1 + $0x740] ss:$16 sps:$4 sm:$0xff]  }
  0x90   :  { %1620 = vmatpush1.bf16.msra.mxu0 %v4123_v23  ;;  %1102 = vmatprep.subr.bf16.mxu1 %v4128_v24  ;;  %v4218_v23 = vld [vmem:[%s5731_s1 + $0x56c] ss:$16 sps:$4 sm:$0xff]   ;;  %v4221_v24 = vld [vmem:[%s5731_s1 + $0x764] ss:$16 sps:$4 sm:$0xff]  }
  0x91   :  { %1621 = vmatprep.subr.bf16.mxu0 %v4131_v25  ;;  %v4216_v25 = vld [vmem:[%s5731_s1 + $0x568] ss:$16 sps:$4 sm:$0xff]  }
  0x93   :  { %1103 = vmatpush1.bf16.msra.mxu1 %v4126_v26  ;;  %v4219_v26 = vld [vmem:[%s5731_s1 + $0x760] ss:$16 sps:$4 sm:$0xff]  }
  0x94   :  { %1622 = vmatpush1.bf16.msra.mxu0 %v4129_v27  ;;  %1104 = vmatprep.subr.bf16.mxu1 %v4134_v28  ;;  %v4224_v27 = vld [vmem:[%s5731_s1 + $0x58c] ss:$16 sps:$4 sm:$0xff]   ;;  %v4227_v28 = vld [vmem:[%s5731_s1 + $0x784] ss:$16 sps:$4 sm:$0xff]  }
  0x95   :  { %1623 = vmatprep.subr.bf16.mxu0 %v4137_v29  ;;  %v4222_v29 = vld [vmem:[%s5731_s1 + $0x588] ss:$16 sps:$4 sm:$0xff]  }
  0x97   :  { %1105 = vmatpush1.bf16.msra.mxu1 %v4132_v30  ;;  %v4225_v30 = vld [vmem:[%s5731_s1 + $0x780] ss:$16 sps:$4 sm:$0xff]  }
  0x98   :  { %1624 = vmatpush1.bf16.msra.mxu0 %v4135_v31  ;;  %1106 = vmatprep.subr.bf16.mxu1 %v4140_v32  ;;  %v4230_v31 = vld [vmem:[%s5731_s1 + $0x5ac] ss:$16 sps:$4 sm:$0xff]   ;;  %v4233_v32 = vld [vmem:[%s5731_s1 + $0x7a4] ss:$16 sps:$4 sm:$0xff]  }
  0x99   :  { %1625 = vmatprep.subr.bf16.mxu0 %v4143_v33  ;;  %v4228_v33 = vld [vmem:[%s5731_s1 + $0x5a8] ss:$16 sps:$4 sm:$0xff]  }
  0x9b   :  { %1107 = vmatpush1.bf16.msra.mxu1 %v4138_v34  ;;  %v4231_v34 = vld [vmem:[%s5731_s1 + $0x7a0] ss:$16 sps:$4 sm:$0xff]  }
  0x9c   :  { %1626 = vmatpush1.bf16.msra.mxu0 %v4141_v35  ;;  %1108 = vmatprep.subr.bf16.mxu1 %v4146_v36  ;;  %v4236_v35 = vld [vmem:[%s5731_s1 + $0x5cc] ss:$16 sps:$4 sm:$0xff]   ;;  %v4239_v36 = vld [vmem:[%s5731_s1 + $0x7c4] ss:$16 sps:$4 sm:$0xff]  }
  0x9d   :  { %1627 = vmatprep.subr.bf16.mxu0 %v4149_v38  ;;  %v4234_v38 = vld [vmem:[%s5731_s1 + $0x5c8] ss:$16 sps:$4 sm:$0xff]  }
  0x9f   :  { %1109 = vmatpush1.bf16.msra.mxu1 %v4144_v39  ;;  %v4237_v39 = vld [vmem:[%s5731_s1 + $0x7c0] ss:$16 sps:$4 sm:$0xff]  }
  0xa0   :  { %1628 = vmatpush1.bf16.msra.mxu0 %v4147_v40  ;;  %1374 = vmatprep.subr.bf16.mxu1 %v4152_v42  ;;  %v4242_v40 = vld [vmem:[%s5731_s1 + $0x5ec] ss:$16 sps:$4 sm:$0xff]   ;;  %v4245_v42 = vld [vmem:[%s5731_s1 + $0x7e4] ss:$16 sps:$4 sm:$0xff]  }
  0xa1   :  { %1894 = vmatprep.subr.bf16.mxu0 %v4155_v43  ;;  %v4240_v43 = vld [vmem:[%s5731_s1 + $0x5e8] ss:$16 sps:$4 sm:$0xff]  }
  0xa2   :  { %1127 = vmatmul.mubr.bf16.vlgmr.msra.gmra.mrb[16].mxu1 %v4824_v41  ;;  %v4167_v41 = vld [vmem:[%s5731_s1 + $0x644] ss:$16 sps:$4 sm:$0xff]  }
  0xa3   :  { %1646 = vmatmul.mubr.bf16.vlgmr.msra.gmra.mrb[16].mxu0 %v5034_v45  ;;  %1375 = vmatpush1.bf16.msra.mxu1 %v4150_v44  ;;  %v4243_v44 = vld [vmem:[%s5731_s1 + $0x7e0] ss:$16 sps:$4 sm:$0xff]  }
  0xa4   :  { %1895 = vmatpush1.bf16.msra.mxu0 %v4153_v46  ;;  %1376 = vmatprep.subr.bf16.mxu1 %v4158_v47  ;;  %v4248_v46 = vld [vmem:[%s5731_s1 + $0x60c] ss:$16 sps:$4 sm:$0xff]   ;;  %v4251_v47 = vld [vmem:[%s5731_s1 + $0x804] ss:$16 sps:$4 sm:$0xff]  }
  0xa5   :  { %1896 = vmatprep.subr.bf16.mxu0 %v4161_v37  ;;  %1406 = vmatprep.mubr.bf16.mxu1 %v4458_v1  ;;  %v4246_v37 = vld [vmem:[%s5731_s1 + $0x608] ss:$16 sps:$4 sm:$0xff]  }
  0xa6   :  { %1926 = vmatprep.mubr.bf16.mxu0 %v4458_v1 }
  0xa7   :  { %1377 = vmatpush1.bf16.msra.mxu1 %v4156_v48  ;;  %v5244_v48 = vld [vmem:[%s5732_s0 + $0x1c] sm:$0xf] }
  0xa8   :  { %1897 = vmatpush1.bf16.msra.mxu0 %v4159_v49  ;;  %1378 = vmatprep.subr.bf16.mxu1 %v4164_v50  ;;  %v4249_v49 = vld [vmem:[%s5731_s1 + $0x800] ss:$16 sps:$4 sm:$0xff]   ;;  %v4254_v50 = vld [vmem:[%s5731_s1 + $0x62c] ss:$16 sps:$4 sm:$0xff]  }
  0xa9   :  { %1898 = vmatprep.subr.bf16.mxu0 %v4167_v41  ;;  %v4257_v41 = vld [vmem:[%s5731_s1 + $0x824] ss:$16 sps:$4 sm:$0xff]  }
  0xab   :  { %1379 = vmatpush1.bf16.msra.mxu1 %v4162_v51  ;;  %v4252_v51 = vld [vmem:[%s5731_s1 + $0x628] ss:$16 sps:$4 sm:$0xff]  }
  0xac   :  { %1899 = vmatpush1.bf16.msra.mxu0 %v4165_v52  ;;  %1380 = vmatprep.subr.bf16.mxu1 %v4170_v53  ;;  %v4255_v52 = vld [vmem:[%s5731_s1 + $0x820] ss:$16 sps:$4 sm:$0xff]   ;;  %v4260_v53 = vld [vmem:[%s5731_s1 + $0x64c] ss:$16 sps:$4 sm:$0xff]  }
  0xad   :  { %1900 = vmatprep.subr.bf16.mxu0 %v4173_v54  ;;  %v4258_v54 = vld [vmem:[%s5731_s1 + $0x648] ss:$16 sps:$4 sm:$0xff]  }
  0xaf   :  { %1381 = vmatpush1.bf16.msra.mxu1 %v4168_v55  ;;  %v4261_v55 = vld [vmem:[%s5731_s1 + $0x840] ss:$16 sps:$4 sm:$0xff]  }
  0xb0   :  { %1901 = vmatpush1.bf16.msra.mxu0 %v4171_v56  ;;  %1382 = vmatprep.subr.bf16.mxu1 %v4176_v57  ;;  %v4266_v56 = vld [vmem:[%s5731_s1 + $0x66c] ss:$16 sps:$4 sm:$0xff]   ;;  %v4269_v57 = vld [vmem:[%s5731_s1 + $0x864] ss:$16 sps:$4 sm:$0xff]  }
  0xb1   :  { %1902 = vmatprep.subr.bf16.mxu0 %v4179_v58  ;;  %v4264_v58 = vld [vmem:[%s5731_s1 + $0x668] ss:$16 sps:$4 sm:$0xff]  }
  0xb3   :  { %1383 = vmatpush1.bf16.msra.mxu1 %v4174_v59  ;;  %v4267_v59 = vld [vmem:[%s5731_s1 + $0x860] ss:$16 sps:$4 sm:$0xff]  }
  0xb4   :  { %1903 = vmatpush1.bf16.msra.mxu0 %v4177_v60  ;;  %1384 = vmatprep.subr.bf16.mxu1 %v4182_v61  ;;  %v4272_v60 = vld [vmem:[%s5731_s1 + $0x68c] ss:$16 sps:$4 sm:$0xff]   ;;  %v4275_v61 = vld [vmem:[%s5731_s1 + $0x884] ss:$16 sps:$4 sm:$0xff]  }
  0xb5   :  { %1904 = vmatprep.subr.bf16.mxu0 %v4185_v62  ;;  %v4270_v62 = vld [vmem:[%s5731_s1 + $0x688] ss:$16 sps:$4 sm:$0xff]  }
  0xb7   :  { %1385 = vmatpush1.bf16.msra.mxu1 %v4180_v63  ;;  %v4273_v63 = vld [vmem:[%s5731_s1 + $0x880] ss:$16 sps:$4 sm:$0xff]  }
  0xb8   :  { %1905 = vmatpush1.bf16.msra.mxu0 %v4183_v0  ;;  %1386 = vmatprep.subr.bf16.mxu1 %v4188_v2  ;;  %v4278_v0 = vld [vmem:[%s5731_s1 + $0x6ac] ss:$16 sps:$4 sm:$0xff]   ;;  %v4281_v2 = vld [vmem:[%s5731_s1 + $0x8a4] ss:$16 sps:$4 sm:$0xff]  }
  0xb9   :  { %1906 = vmatprep.subr.bf16.mxu0 %v4191_v3  ;;  %v4276_v3 = vld [vmem:[%s5731_s1 + $0x6a8] ss:$16 sps:$4 sm:$0xff]  }
  0xbb   :  { %1387 = vmatpush1.bf16.msra.mxu1 %v4186_v4  ;;  %v4279_v4 = vld [vmem:[%s5731_s1 + $0x8a0] ss:$16 sps:$4 sm:$0xff]  }
  0xbc   :  { %1907 = vmatpush1.bf16.msra.mxu0 %v4189_v5  ;;  %1388 = vmatprep.subr.bf16.mxu1 %v4194_v6  ;;  %v4284_v5 = vld [vmem:[%s5731_s1 + $0x6cc] ss:$16 sps:$4 sm:$0xff]   ;;  %v4287_v6 = vld [vmem:[%s5731_s1 + $0x8c4] ss:$16 sps:$4 sm:$0xff]  }
  0xbd   :  { %1908 = vmatprep.subr.bf16.mxu0 %v4197_v8 }
  0xbf   :  { %1389 = vmatpush1.bf16.msra.mxu1 %v4192_v9 }
  0xc0   :  { %1909 = vmatpush1.bf16.msra.mxu0 %v4195_v10  ;;  %1654 = vmatprep.subr.bf16.mxu1 %v4200_v12 }
  0xc1   :  { %2174 = vmatprep.subr.bf16.mxu0 %v4203_v13 }
  0xc2   :  { %1407 = vmatmul.mubr.bf16.vlgmr.msra.gmra.mrb[20].mxu1 %v4929_v11  ;;  %v4215_v11 = vld [vmem:[%s5731_s1 + $0x744] ss:$16 sps:$4 sm:$0xff]  }
  0xc3   :  { %1927 = vmatmul.mubr.bf16.vlgmr.msra.gmra.mrb[20].mxu0 %v5139_v15  ;;  %1655 = vmatpush1.bf16.msra.mxu1 %v4198_v14 }
  0xc4   :  { %2175 = vmatpush1.bf16.msra.mxu0 %v4201_v16  ;;  %1656 = vmatprep.subr.bf16.mxu1 %v4206_v17 }
  0xc5   :  { %2176 = vmatprep.subr.bf16.mxu0 %v4209_v7  ;;  %1686 = vmatprep.mubr.bf16.mxu1 %v4458_v1  ;;  %v4282_v7 = vld [vmem:[%s5731_s1 + $0x6c8] ss:$16 sps:$4 sm:$0xff]  }
  0xc6   :  { %2206 = vmatprep.mubr.bf16.mxu0 %v4458_v1 }
  0xc7   :  { %1657 = vmatpush1.bf16.msra.mxu1 %v4204_v18  ;;  %v4285_v18 = vld [vmem:[%s5731_s1 + $0x8c0] ss:$16 sps:$4 sm:$0xff]  }
  0xc8   :  { %2177 = vmatpush1.bf16.msra.mxu0 %v4207_v19  ;;  %1658 = vmatprep.subr.bf16.mxu1 %v4212_v20 }
  0xc9   :  { %2178 = vmatprep.subr.bf16.mxu0 %v4215_v11  ;;  %v4290_v11 = vld [vmem:[%s5731_s1 + $0x6ec] ss:$16 sps:$4 sm:$0xff]  }
  0xcb   :  { %1659 = vmatpush1.bf16.msra.mxu1 %v4210_v21  ;;  %v4293_v21 = vld [vmem:[%s5731_s1 + $0x8e4] ss:$16 sps:$4 sm:$0xff]  }
  0xcc   :  { %2179 = vmatpush1.bf16.msra.mxu0 %v4213_v22  ;;  %1660 = vmatprep.subr.bf16.mxu1 %v4218_v23  ;;  %v4288_v22 = vld [vmem:[%s5731_s1 + $0x6e8] ss:$16 sps:$4 sm:$0xff]   ;;  %v4291_v23 = vld [vmem:[%s5731_s1 + $0x8e0] ss:$16 sps:$4 sm:$0xff]  }
  0xcd   :  { %2180 = vmatprep.subr.bf16.mxu0 %v4221_v24  ;;  %v4296_v24 = vld [vmem:[%s5731_s1 + $0x70c] ss:$16 sps:$4 sm:$0xff]  }
  0xcf   :  { %1661 = vmatpush1.bf16.msra.mxu1 %v4216_v25  ;;  %v4294_v25 = vld [vmem:[%s5731_s1 + $0x708] ss:$16 sps:$4 sm:$0xff]  }
  0xd0   :  { %2181 = vmatpush1.bf16.msra.mxu0 %v4219_v26  ;;  %1662 = vmatprep.subr.bf16.mxu1 %v4224_v27  ;;  %v5346_v26 = vld [vmem:[%s5732_s0 + $0x20] sm:$0xf]  ;;  %v4299_v27 = vld [vmem:[%s5731_s1 + $0x72c] ss:$16 sps:$4 sm:$0xff]  }
  0xd1   :  { %2182 = vmatprep.subr.bf16.mxu0 %v4227_v28  ;;  %v4297_v28 = vld [vmem:[%s5731_s1 + $0x728] ss:$16 sps:$4 sm:$0xff]  }
  0xd3   :  { %1663 = vmatpush1.bf16.msra.mxu1 %v4222_v29  ;;  %v4302_v29 = vld [vmem:[%s5731_s1 + $0x74c] ss:$16 sps:$4 sm:$0xff]  }
  0xd4   :  { %2183 = vmatpush1.bf16.msra.mxu0 %v4225_v30  ;;  %1664 = vmatprep.subr.bf16.mxu1 %v4230_v31  ;;  %v4300_v30 = vld [vmem:[%s5731_s1 + $0x748] ss:$16 sps:$4 sm:$0xff]  }
  0xd5   :  { %2184 = vmatprep.subr.bf16.mxu0 %v4233_v32  ;;  %v4303_v31 = vld [vmem:[%s5731_s1 + $0x768] ss:$16 sps:$4 sm:$0xff]   ;;  %v4308_v32 = vld [vmem:[%s5731_s1 + $0x78c] ss:$16 sps:$4 sm:$0xff]  }
  0xd7   :  { %1665 = vmatpush1.bf16.msra.mxu1 %v4228_v33  ;;  %v4306_v33 = vld [vmem:[%s5731_s1 + $0x788] ss:$16 sps:$4 sm:$0xff]  }
  0xd8   :  { %2185 = vmatpush1.bf16.msra.mxu0 %v4231_v34  ;;  %1666 = vmatprep.subr.bf16.mxu1 %v4236_v35  ;;  %v4311_v34 = vld [vmem:[%s5731_s1 + $0x7ac] ss:$16 sps:$4 sm:$0xff]   ;;  %v4309_v35 = vld [vmem:[%s5731_s1 + $0x7a8] ss:$16 sps:$4 sm:$0xff]  }
  0xd9   :  { %2186 = vmatprep.subr.bf16.mxu0 %v4239_v36  ;;  %v4314_v36 = vld [vmem:[%s5731_s1 + $0x7cc] ss:$16 sps:$4 sm:$0xff]  }
  0xdb   :  { %1667 = vmatpush1.bf16.msra.mxu1 %v4234_v38 }
  0xdc   :  { %2187 = vmatpush1.bf16.msra.mxu0 %v4237_v39  ;;  %1668 = vmatprep.subr.bf16.mxu1 %v4242_v40 }
  0xdd   :  { %2188 = vmatprep.subr.bf16.mxu0 %v4245_v42 }
  0xdf   :  { %1669 = vmatpush1.bf16.msra.mxu1 %v4240_v43 }
  0xe0   :  { %2189 = vmatpush1.bf16.msra.mxu0 %v4243_v44  ;;  %1935 = vmatprep.subr.bf16.mxu1 %v4248_v46 }
  0xe1   :  { %2454 = vmatprep.subr.bf16.mxu0 %v4251_v47 }
  0xe2   :  { %1687 = vmatmul.mubr.bf16.vlgmr.msra.gmra.mrb[24].mxu1 %v5034_v45  ;;  %v4263_v45 = vld [vmem:[%s5731_s1 + $0x844] ss:$16 sps:$4 sm:$0xff]  }
  0xe3   :  { %2207 = vmatmul.mubr.bf16.vlgmr.msra.gmra.mrb[24].mxu0 %v5244_v48  ;;  %1936 = vmatpush1.bf16.msra.mxu1 %v4246_v37  ;;  %v4312_v37 = vld [vmem:[%s5731_s1 + $0x7c8] ss:$16 sps:$4 sm:$0xff]  }
  0xe4   :  { %2455 = vmatpush1.bf16.msra.mxu0 %v4249_v49  ;;  %1937 = vmatprep.subr.bf16.mxu1 %v4254_v50 }
  0xe5   :  { %2456 = vmatprep.subr.bf16.mxu0 %v4257_v41  ;;  %1967 = vmatprep.mubr.bf16.mxu1 %v4458_v1  ;;  %v4317_v41 = vld [vmem:[%s5731_s1 + $0x7ec] ss:$16 sps:$4 sm:$0xff]  }
  0xe6   :  { %2486 = vmatprep.mubr.bf16.mxu0 %v4458_v1 }
  0xe7   :  { %1938 = vmatpush1.bf16.msra.mxu1 %v4252_v51  ;;  %v4342_v51 = vld [vmem:[%s5733_s3] ss:$8 sps:$4 sm:$0xff]  }
  0xe8   :  { %2457 = vmatpush1.bf16.msra.mxu0 %v4255_v52  ;;  %1939 = vmatprep.subr.bf16.mxu1 %v4260_v53  ;;  %v4344_v52 = vld [vmem:[%s5733_s3 + $0x4] ss:$8 sps:$4 sm:$0xff]   ;;  %v4315_v53 = vld [vmem:[%s5731_s1 + $0x7e8] ss:$16 sps:$4 sm:$0xff]  }
  0xe9   :  { %2458 = vmatprep.subr.bf16.mxu0 %v4263_v45  ;;  %v4347_v45 = vld [vmem:[%s5733_s3 + $0x14] ss:$8 sps:$4 sm:$0xff]  }
  0xeb   :  { %1940 = vmatpush1.bf16.msra.mxu1 %v4258_v54  ;;  %v4320_v54 = vld [vmem:[%s5731_s1 + $0x80c] ss:$16 sps:$4 sm:$0xff]  }
  0xec   :  { %2459 = vmatpush1.bf16.msra.mxu0 %v4261_v55  ;;  %1941 = vmatprep.subr.bf16.mxu1 %v4266_v56  ;;  %v4345_v55 = vld [vmem:[%s5733_s3 + $0x10] ss:$8 sps:$4 sm:$0xff]   ;;  %v4350_v56 = vld [vmem:[%s5733_s3 + $0x24] ss:$8 sps:$4 sm:$0xff]  }
  0xed   :  { %2460 = vmatprep.subr.bf16.mxu0 %v4269_v57  ;;  %v4318_v57 = vld [vmem:[%s5731_s1 + $0x808] ss:$16 sps:$4 sm:$0xff]  }
  0xef   :  { %1942 = vmatpush1.bf16.msra.mxu1 %v4264_v58  ;;  %v4323_v58 = vld [vmem:[%s5731_s1 + $0x82c] ss:$16 sps:$4 sm:$0xff]  }
  0xf0   :  { %2461 = vmatpush1.bf16.msra.mxu0 %v4267_v59  ;;  %1943 = vmatprep.subr.bf16.mxu1 %v4272_v60  ;;  %v4348_v59 = vld [vmem:[%s5733_s3 + $0x20] ss:$8 sps:$4 sm:$0xff]   ;;  %v4353_v60 = vld [vmem:[%s5733_s3 + $0x34] ss:$8 sps:$4 sm:$0xff]  }
  0xf1   :  { %2462 = vmatprep.subr.bf16.mxu0 %v4275_v61  ;;  %v4321_v61 = vld [vmem:[%s5731_s1 + $0x828] ss:$16 sps:$4 sm:$0xff]  }
  0xf3   :  { %1944 = vmatpush1.bf16.msra.mxu1 %v4270_v62  ;;  %v4326_v62 = vld [vmem:[%s5731_s1 + $0x84c] ss:$16 sps:$4 sm:$0xff]  }
  0xf4   :  { %2463 = vmatpush1.bf16.msra.mxu0 %v4273_v63  ;;  %1945 = vmatprep.subr.bf16.mxu1 %v4278_v0  ;;  %v4351_v63 = vld [vmem:[%s5733_s3 + $0x30] ss:$8 sps:$4 sm:$0xff]   ;;  %v4356_v0 = vld [vmem:[%s5733_s3 + $0x44] ss:$8 sps:$4 sm:$0xff]  }
  0xf5   :  { %2464 = vmatprep.subr.bf16.mxu0 %v4281_v2  ;;  %v288_v8 = vpop.f32.mrb[0].mxu1  ;;  %v4329_v2 = vld [vmem:[%s5731_s1 + $0x86c] ss:$16 sps:$4 sm:$0xff]  }
  0xf6   :  { %v530_v9 = vpop.f32.mrb[0].mxu0  ;;  %v290_v12 = vpop.f32.mrb[1].mxu1 }
  0xf7   :  { %v531_v10 = vadd.f32 %v530_v9, %v288_v8  ;;  %v532_v13 = vpop.f32.mrb[1].mxu0  ;;  %v292_v16 = vpop.f32.mrb[2].mxu1  ;;  %1946 = vmatpush1.bf16.msra.mxu1 %v4276_v3  ;;  %v4359_v3 = vld [vmem:[%s5733_s3 + $0x54] ss:$8 sps:$4 sm:$0xff]   ;;  %v4330_v8 = vld [vmem:[%s5731_s1 + $0x888] ss:$16 sps:$4 sm:$0xff]  }
  0xf8   :  { %v533_v14 = vadd.f32 %v532_v13, %v290_v12  ;;  %v534_v17 = vpop.f32.mrb[2].mxu0  ;;  %2465 = vmatpush1.bf16.msra.mxu0 %v4279_v4  ;;  %v293_v19 = vpop.f32.mrb[3].mxu1  ;;  %1947 = vmatprep.subr.bf16.mxu1 %v4284_v5  ;;  %v4327_v4 = vld [vmem:[%s5731_s1 + $0x868] ss:$16 sps:$4 sm:$0xff]   ;;  %v4332_v5 = vld [vmem:[%s5731_s1 + $0x88c] ss:$16 sps:$4 sm:$0xff]  }
  0xf9   :  { %v535_v20 = vpop.f32.mrb[3].mxu0  ;;  %2466 = vmatprep.subr.bf16.mxu0 %v4287_v6  ;;  %v4357_v6 = vld [vmem:[%s5733_s3 + $0x50] ss:$8 sps:$4 sm:$0xff]   ;;  %v4335_v9 = vld [vmem:[%s5731_s1 + $0x8ac] ss:$16 sps:$4 sm:$0xff]  }
  0xfa   :  { %v4338_v12 = vld [vmem:[%s5731_s1 + $0x8cc] ss:$16 sps:$4 sm:$0xff]  }
  0xfb   :  { %1948 = vmatpush1.bf16.msra.mxu1 %v4282_v7  ;;  %v4362_v19 = vld [vmem:[%s5733_s3 + $0x64] ss:$8 sps:$4 sm:$0xff]  }
  0xfc   :  { %2467 = vmatpush1.bf16.msra.mxu0 %v4285_v18  ;;  %1949 = vmatprep.subr.bf16.mxu1 %v4290_v11 }
  0xfd   :  { %2468 = vmatprep.subr.bf16.mxu0 %v4293_v21 }
  0xff   :  { %1950 = vmatpush1.bf16.msra.mxu1 %v4288_v22 }
 0x100   :  { %2469 = vmatpush1.bf16.msra.mxu0 %v4291_v23  ;;  %2215 = vmatprep.subr.bf16.mxu1 %v4296_v24  ;;  %v4336_v23 = vld [vmem:[%s5731_s1 + $0x8c8] ss:$16 sps:$4 sm:$0xff]  }
 0x101   :  { %2970 = vmatprep.subr.bf16.mxu0 %v4344_v52  ;;  %v4360_v24 = vld [vmem:[%s5733_s3 + $0x60] ss:$8 sps:$4 sm:$0xff]  }
 0x102   :  { %1968 = vmatmul.mubr.bf16.vlgmr.msra.gmra.mrb[28].mxu1 %v5139_v15  ;;  %v4305_v15 = vld [vmem:[%s5731_s1 + $0x76c] ss:$16 sps:$4 sm:$0xff]  }
 0x103   :  { %2487 = vmatmul.mubr.bf16.vlgmr.msra.gmra.mrb[28].mxu0 %v5346_v26  ;;  %2216 = vmatpush1.bf16.msra.mxu1 %v4294_v25 }
 0x104   :  { %2247 = vmatprep.mubr.bf16.mxu1 %v4458_v1  ;;  %2217 = vmatprep.subr.bf16.mxu1 %v4299_v27 }
 0x105   :  { %2971 = vmatpush1.bf16.msra.mxu0 %v4342_v51 }
 0x106   :  { %2972 = vmatprep.subr.bf16.mxu0 %v4347_v45 }
 0x107   :  { %2218 = vmatpush1.bf16.msra.mxu1 %v4297_v28  ;;  %v4341_v28 = vld [vmem:[%s5731_s1 + $0x8ec] ss:$16 sps:$4 sm:$0xff]  }
 0x108   :  { %2219 = vmatprep.subr.bf16.mxu1 %v4302_v29  ;;  %v4365_v29 = vld [vmem:[%s5733_s3 + $0x74] ss:$8 sps:$4 sm:$0xff]  }
 0x109   :  { %2973 = vmatpush1.bf16.msra.mxu0 %v4345_v55 }
 0x10a   :  { %2974 = vmatprep.subr.bf16.mxu0 %v4350_v56 }
 0x10b   :  { %2220 = vmatpush1.bf16.msra.mxu1 %v4300_v30  ;;  %v4363_v30 = vld [vmem:[%s5733_s3 + $0x70] ss:$8 sps:$4 sm:$0xff]  }
 0x10c   :  { %2221 = vmatprep.subr.bf16.mxu1 %v4305_v15  ;;  %v4368_v15 = vld [vmem:[%s5733_s3 + $0x84] ss:$8 sps:$4 sm:$0xff]  }
 0x10d   :  { %2975 = vmatpush1.bf16.msra.mxu0 %v4348_v59  ;;  %v4392_v59 = vld [vmem:[%s5733_s3 + $0x104] ss:$8 sps:$4 sm:$0xff]  }
 0x10e   :  { %2976 = vmatprep.subr.bf16.mxu0 %v4353_v60 }
 0x10f   :  { %2222 = vmatpush1.bf16.msra.mxu1 %v4303_v31  ;;  %v4339_v31 = vld [vmem:[%s5731_s1 + $0x8e8] ss:$16 sps:$4 sm:$0xff]  }
 0x110   :  { %2223 = vmatprep.subr.bf16.mxu1 %v4308_v32  ;;  %v4366_v32 = vld [vmem:[%s5733_s3 + $0x80] ss:$8 sps:$4 sm:$0xff]  }
 0x111   :  { %2977 = vmatpush1.bf16.msra.mxu0 %v4351_v63 }
 0x112   :  { %2978 = vmatprep.subr.bf16.mxu0 %v4356_v0 }
 0x113   :  { %2224 = vmatpush1.bf16.msra.mxu1 %v4306_v33  ;;  %v4371_v33 = vld [vmem:[%s5733_s3 + $0x94] ss:$8 sps:$4 sm:$0xff]  }
 0x114   :  { %2225 = vmatprep.subr.bf16.mxu1 %v4311_v34  ;;  %v4369_v34 = vld [vmem:[%s5733_s3 + $0x90] ss:$8 sps:$4 sm:$0xff]  }
 0x115   :  { %v5384_v38 = vpop.f32.mrb[4].mxu1 }
 0x116   :  { %v806_v39 = vpop.f32.mrb[4].mxu0  ;;  %v5388_v42 = vpop.f32.mrb[5].mxu1 }
 0x117   :  { %v5386_v40 = vadd.f32 %v806_v39, %v531_v10  ;;  %v808_v43 = vpop.f32.mrb[5].mxu0  ;;  %v333_v46 = vpop.f32.mrb[6].mxu1  ;;  %2226 = vmatpush1.bf16.msra.mxu1 %v4309_v35  ;;  %v4333_v10 = vld [vmem:[%s5731_s1 + $0x8a8] ss:$16 sps:$4 sm:$0xff]   ;;  %v4374_v35 = vld [vmem:[%s5733_s3 + $0xa4] ss:$8 sps:$4 sm:$0xff]  }
 0x118   :  { %v5390_v44 = vadd.f32 %v808_v43, %v533_v14  ;;  %v810_v47 = vpop.f32.mrb[6].mxu0  ;;  %v334_v49 = vpop.f32.mrb[7].mxu1  ;;  %2227 = vmatprep.subr.bf16.mxu1 %v4314_v36  ;;  %v4372_v36 = vld [vmem:[%s5733_s3 + $0xa0] ss:$8 sps:$4 sm:$0xff]   ;;  %v4380_v39 = vld [vmem:[%s5733_s3 + $0xc4] ss:$8 sps:$4 sm:$0xff]  }
 0x119   :  { %v811_v50 = vpop.f32.mrb[7].mxu0  ;;  %v4381_v43 = vld [vmem:[%s5733_s3 + $0xd0] ss:$8 sps:$4 sm:$0xff]  }
 0x11b   :  { %2228 = vmatpush1.bf16.msra.mxu1 %v4312_v37 }
 0x11c   :  { %2229 = vmatprep.subr.bf16.mxu1 %v4317_v41  ;;  %v4386_v41 = vld [vmem:[%s5733_s3 + $0xe4] ss:$8 sps:$4 sm:$0xff]  }
 0x11f   :  { %2230 = vmatpush1.bf16.msra.mxu1 %v4315_v53 }
 0x120   :  { %2495 = vmatprep.subr.bf16.mxu1 %v4320_v54  ;;  %v4384_v54 = vld [vmem:[%s5733_s3 + $0xe0] ss:$8 sps:$4 sm:$0xff]  }
 0x122   :  { %2248 = vmatmul.mubr.bf16.vlgmr.msra.gmra.mrb[32].mxu1 %v5244_v48  ;;  %v4324_v48 = vld [vmem:[%s5731_s1 + $0x848] ss:$16 sps:$4 sm:$0xff]  }
 0x123   :  { %2496 = vmatpush1.bf16.msra.mxu1 %v4318_v57  ;;  %2527 = vmatprep.mubr.bf16.mxu1 %v4458_v1  ;;  %v4354_v1 = vld [vmem:[%s5733_s3 + $0x40] ss:$8 sps:$4 sm:$0xff]   ;;  %v4389_v57 = vld [vmem:[%s5733_s3 + $0xf4] ss:$8 sps:$4 sm:$0xff]  }
 0x124   :  { %2497 = vmatprep.subr.bf16.mxu1 %v4323_v58  ;;  %2979 = vmatpush1.bf16.msra.mxu0 %v4354_v1  ;;  %v4387_v58 = vld [vmem:[%s5733_s3 + $0xf0] ss:$8 sps:$4 sm:$0xff]  }
 0x125   :  { %2980 = vmatprep.subr.bf16.mxu0 %v4359_v3 }
 0x127   :  { %2498 = vmatpush1.bf16.msra.mxu1 %v4321_v61 }
 0x128   :  { %2499 = vmatprep.subr.bf16.mxu1 %v4326_v62  ;;  %2981 = vmatpush1.bf16.msra.mxu0 %v4357_v6 }
 0x129   :  { %2982 = vmatprep.subr.bf16.mxu0 %v4362_v19 }
 0x12b   :  { %2500 = vmatpush1.bf16.msra.mxu1 %v4324_v48 }
 0x12c   :  { %2501 = vmatprep.subr.bf16.mxu1 %v4329_v2  ;;  %2983 = vmatpush1.bf16.msra.mxu0 %v4360_v24  ;;  %v4442_v24 = vld [vmem:[%s5734_s5 + $0x50] sm:$0xff]  }
 0x12d   :  { %2984 = vmatprep.subr.bf16.mxu0 %v4365_v29  ;;  %v4446_v29 = vld [vmem:[%s5734_s5 + $0x60] sm:$0xff]  }
 0x12f   :  { %2502 = vmatpush1.bf16.msra.mxu1 %v4327_v4 }
 0x130   :  { %2503 = vmatprep.subr.bf16.mxu1 %v4332_v5  ;;  %2985 = vmatpush1.bf16.msra.mxu0 %v4363_v30  ;;  %v4447_v30 = vld [vmem:[%s5734_s5 + $0x20] sm:$0xff]  }
 0x131   :  { %2986 = vmatprep.subr.bf16.mxu0 %v4368_v15  ;;  %v4448_v15 = vld [vmem:[%s5734_s5 + $0x68] sm:$0xff]  }
 0x133   :  { %2504 = vmatpush1.bf16.msra.mxu1 %v4330_v8 }
 0x134   :  { %2505 = vmatprep.subr.bf16.mxu1 %v4335_v9  ;;  %2987 = vmatpush1.bf16.msra.mxu0 %v4366_v32 }
 0x135   :  { %v571_v13 = vpop.f32.mrb[8].mxu1  ;;  %2988 = vmatprep.subr.bf16.mxu0 %v4371_v33 }
 0x136   :  { %v1087_v14 = vpop.f32.mrb[8].mxu0  ;;  %v572_v16 = vadd.f32 %v571_v13, %v5384_v38  ;;  %v573_v7 = vpop.f32.mrb[9].mxu1  ;;  %v4377_v38 = vld [vmem:[%s5733_s3 + $0xb4] ss:$8 sps:$4 sm:$0xff]  }
 0x137   :  { %v1135_v17 = vadd.f32 %v1087_v14, %v5386_v40  ;;  %v1089_v18 = vpop.f32.mrb[9].mxu0  ;;  %v574_v20 = vadd.f32 %v573_v7, %v5388_v42  ;;  %v575_v21 = vpop.f32.mrb[10].mxu1  ;;  %2506 = vmatpush1.bf16.msra.mxu1 %v4333_v10  ;;  %v4378_v40 = vld [vmem:[%s5733_s3 + $0xc0] ss:$8 sps:$4 sm:$0xff]   ;;  %v4383_v42 = vld [vmem:[%s5733_s3 + $0xd4] ss:$8 sps:$4 sm:$0xff]  }
 0x138   :  { %v1136_v11 = vadd.f32 %v1089_v18, %v5390_v44  ;;  %v1091_v22 = vpop.f32.mrb[10].mxu0  ;;  %v576_v25 = vpop.f32.mrb[11].mxu1  ;;  %2507 = vmatprep.subr.bf16.mxu1 %v4338_v12  ;;  %2989 = vmatpush1.bf16.msra.mxu0 %v4369_v34  ;;  %v4439_v21 = vld [vmem:[%s5734_s5] sm:$0xff]  }
 0x139   :  { %v1092_v27 = vpop.f32.mrb[11].mxu0  ;;  %2990 = vmatprep.subr.bf16.mxu0 %v4374_v35  ;;  %v4440_v22 = vld [vmem:[%s5734_s5 + $0x48] sm:$0xff]   ;;  %v4443_v25 = vld [vmem:[%s5734_s5 + $0x10] sm:$0xff]  }
 0x13a   :  { %v4444_v27 = vld [vmem:[%s5734_s5 + $0x58] sm:$0xff]  }
 0x13b   :  { %2508 = vmatpush1.bf16.msra.mxu1 %v4336_v23  ;;  %v4441_v23 = vld [vmem:[%s5734_s5 + $0x8] sm:$0xff]  }
 0x13c   :  { %2509 = vmatprep.subr.bf16.mxu1 %v4341_v28  ;;  %2991 = vmatpush1.bf16.msra.mxu0 %v4372_v36  ;;  %v4445_v28 = vld [vmem:[%s5734_s5 + $0x18] sm:$0xff]  }
 0x13d   :  { %2992 = vmatprep.subr.bf16.mxu0 %v4377_v38 }
 0x13f   :  { %2510 = vmatpush1.bf16.msra.mxu1 %v4339_v31  ;;  %v4449_v31 = vld [vmem:[%s5734_s5 + $0x28] sm:$0xff]  }
 0x142   :  { %2528 = vmatmul.mubr.bf16.vlgmr.msra.gmra.mrb[36].mxu1 %v5346_v26  ;;  %v4375_v26 = vld [vmem:[%s5733_s3 + $0xb0] ss:$8 sps:$4 sm:$0xff]  }
 0x143   :  { %2993 = vmatpush1.bf16.msra.mxu0 %v4375_v26 }
 0x144   :  { %2994 = vmatprep.subr.bf16.mxu0 %v4380_v39 }
 0x147   :  { %2995 = vmatpush1.bf16.msra.mxu0 %v4378_v40 }
 0x148   :  { %2996 = vmatprep.subr.bf16.mxu0 %v4383_v42 }
 0x14b   :  { %2997 = vmatpush1.bf16.msra.mxu0 %v4381_v43 }
 0x14c   :  { %2998 = vmatprep.subr.bf16.mxu0 %v4386_v41 }
 0x14f   :  { %2999 = vmatpush1.bf16.msra.mxu0 %v4384_v54 }
 0x150   :  { %3000 = vmatprep.subr.bf16.mxu0 %v4389_v57 }
 0x153   :  { %3001 = vmatpush1.bf16.msra.mxu0 %v4387_v58 }
 0x154   :  { %3011 = vmatprep.subr.bf16.mxu0 %v4392_v59 }
 0x155   :  { %v847_v44 = vpop.f32.mrb[12].mxu1 }
 0x156   :  { %v1367_v46 = vpop.f32.mrb[12].mxu0  ;;  %v856_v47 = vadd.f32 %v847_v44, %v572_v16  ;;  %v849_v49 = vpop.f32.mrb[13].mxu1 }
 0x157   :  { %v1415_v37 = vadd.f32 %v1367_v46, %v1135_v17  ;;  %v1369_v50 = vpop.f32.mrb[13].mxu0  ;;  %v857_v51 = vadd.f32 %v849_v49, %v574_v20  ;;  %v851_v53 = vpop.f32.mrb[14].mxu1  ;;  %v2542_v46 = vlaneseq  ;;  %v5597_v49 = vld [vmem:[%s5735_s2] sm:$0xf] }
 0x158   :  { %v1416_v52 = vadd.f32 %v1369_v50, %v1136_v11  ;;  %v1371_v45 = vpop.f32.mrb[14].mxu0  ;;  %v852_v55 = vpop.f32.mrb[15].mxu1  ;;  %v4438_v11 = vld [vmem:[%s5734_s5 + $0x40] sm:$0xff]  }
 0x159   :  { %v1372_v56 = vpop.f32.mrb[15].mxu0  ;;  %3881 = vmatprep.subr.bf16.mxu1 %v4438_v11 }
 0x15a   :  { %3882 = vmatpush3.bf16.msra.mxu1 %v4439_v21  ;;  %v4413_v21 = vld [vmem:[%s5733_s3 + $0x174] ss:$8 sps:$4 sm:$0xff]  }
 0x15b   :  { %3883 = vmatprep.subr.bf16.mxu1 %v4440_v22 }
 0x15e   :  { %3884 = vmatpush3.bf16.msra.mxu1 %v4441_v23 }
 0x15f   :  { %3885 = vmatprep.subr.bf16.mxu1 %v4442_v24 }
 0x162   :  { %3886 = vmatpush3.bf16.msra.mxu1 %v4443_v25  ;;  %v4411_v25 = vld [vmem:[%s5733_s3 + $0x170] ss:$8 sps:$4 sm:$0xff]  }
 0x163   :  { %3887 = vmatprep.subr.bf16.mxu1 %v4444_v27  ;;  %v4416_v27 = vld [vmem:[%s5733_s3 + $0x184] ss:$8 sps:$4 sm:$0xff]  }
 0x166   :  { %3888 = vmatpush3.bf16.msra.mxu1 %v4445_v28  ;;  %v4414_v28 = vld [vmem:[%s5733_s3 + $0x180] ss:$8 sps:$4 sm:$0xff]  }
 0x167   :  { %3889 = vmatprep.subr.bf16.mxu1 %v4446_v29  ;;  %v4419_v29 = vld [vmem:[%s5733_s3 + $0x194] ss:$8 sps:$4 sm:$0xff]  }
 0x16a   :  { %3890 = vmatpush3.bf16.msra.mxu1 %v4447_v30  ;;  %v4417_v30 = vld [vmem:[%s5733_s3 + $0x190] ss:$8 sps:$4 sm:$0xff]  }
 0x16b   :  { %3891 = vmatprep.subr.bf16.mxu1 %v4448_v15  ;;  %v4422_v15 = vld [vmem:[%s5733_s3 + $0x1a4] ss:$8 sps:$4 sm:$0xff]  }
 0x16e   :  { %3892 = vmatpush3.bf16.msra.mxu1 %v4449_v31  ;;  %v4420_v31 = vld [vmem:[%s5733_s3 + $0x1a0] ss:$8 sps:$4 sm:$0xff]  }
 0x175   :  { %v1128_v60 = vpop.f32.mrb[16].mxu1 }
 0x176   :  { %v1647_v61 = vpop.f32.mrb[16].mxu0  ;;  %v1137_v62 = vadd.f32 %v1128_v60, %v856_v47  ;;  %v1130_v0 = vpop.f32.mrb[17].mxu1  ;;  %v5591_v47 = vshrl.u32 %v2542_v46, 7  ;;  %v4432_v46 = vld [vmem:[%s5733_s3 + $0x1e0] ss:$8 sps:$4 sm:$0xff]  }
 0x177   :  { %v1695_v63 = vadd.f32 %v1647_v61, %v1415_v37  ;;  %v1649_v48 = vpop.f32.mrb[17].mxu0  ;;  %v1138_v2 = vadd.f32 %v1130_v0, %v857_v51  ;;  %v1132_v3 = vpop.f32.mrb[18].mxu1 }
 0x178   :  { %v1696_v1 = vadd.f32 %v1649_v48, %v1416_v52  ;;  %v1651_v4 = vpop.f32.mrb[18].mxu0  ;;  %v1133_v5 = vpop.f32.mrb[19].mxu1  ;;  %v2544_v37 = vsub.s32 0, %v5591_v47  ;;  %v2548_v50 = vsub.s32 1, %v5591_v47  ;;  %v4390_v3 = vld [vmem:[%s5733_s3 + $0x100] ss:$8 sps:$4 sm:$0xff]  }
 0x179   :  { %v1652_v6 = vpop.f32.mrb[19].mxu0  ;;  %v4395_v5 = vld [vmem:[%s5733_s3 + $0x114] ss:$8 sps:$4 sm:$0xff]  }
 0x17a   :  { %v2545_v41 = vrot.slane %v5597_v49, %v2544_v37  ;;  %v2549_v53 = vrot.slane %v5597_v49, %v2548_v50  ;;  %v4393_v6 = vld [vmem:[%s5733_s3 + $0x110] ss:$8 sps:$4 sm:$0xff]  }
 0x195   :  { %v1408_v8 = vpop.f32.mrb[20].mxu1 }
 0x196   :  { %v1928_v9 = vpop.f32.mrb[20].mxu0  ;;  %v1417_v10 = vadd.f32 %v1408_v8, %v1137_v62  ;;  %v1410_v13 = vpop.f32.mrb[21].mxu1  ;;  %v4398_v8 = vld [vmem:[%s5733_s3 + $0x124] ss:$8 sps:$4 sm:$0xff]  }
 0x197   :  { %v1976_v12 = vadd.f32 %v1928_v9, %v1695_v63  ;;  %v1930_v14 = vpop.f32.mrb[21].mxu0  ;;  %v1418_v16 = vadd.f32 %v1410_v13, %v1138_v2  ;;  %v1412_v7 = vpop.f32.mrb[22].mxu1  ;;  %v4396_v9 = vld [vmem:[%s5733_s3 + $0x120] ss:$8 sps:$4 sm:$0xff]   ;;  %v4404_v13 = vld [vmem:[%s5733_s3 + $0x144] ss:$8 sps:$4 sm:$0xff]  }
 0x198   :  { %v1977_v17 = vadd.f32 %v1930_v14, %v1696_v1  ;;  %v1932_v18 = vpop.f32.mrb[22].mxu0  ;;  %v1413_v19 = vpop.f32.mrb[23].mxu1  ;;  %v4402_v14 = vld [vmem:[%s5733_s3 + $0x140] ss:$8 sps:$4 sm:$0xff]   ;;  %v4410_v7 = vld [vmem:[%s5733_s3 + $0x164] ss:$8 sps:$4 sm:$0xff]  }
 0x199   :  { %v1933_v20 = vpop.f32.mrb[23].mxu0  ;;  %v4408_v19 = vld [vmem:[%s5733_s3 + $0x160] ss:$8 sps:$4 sm:$0xff]  }
 0x1b5   :  { %v1688_v32 = vpop.f32.mrb[24].mxu1 }
 0x1b6   :  { %v2208_v33 = vpop.f32.mrb[24].mxu0  ;;  %v1697_v34 = vadd.f32 %v1688_v32, %v1417_v10  ;;  %v1690_v36 = vpop.f32.mrb[25].mxu1  ;;  %v4401_v10 = vld [vmem:[%s5733_s3 + $0x134] ss:$8 sps:$4 sm:$0xff]  }
 0x1b7   :  { %v2256_v35 = vadd.f32 %v2208_v33, %v1976_v12  ;;  %v2210_v38 = vpop.f32.mrb[25].mxu0  ;;  %v1698_v26 = vadd.f32 %v1690_v36, %v1418_v16  ;;  %v1692_v40 = vpop.f32.mrb[26].mxu1  ;;  %v4399_v12 = vld [vmem:[%s5733_s3 + $0x130] ss:$8 sps:$4 sm:$0xff]   ;;  %v4407_v16 = vld [vmem:[%s5733_s3 + $0x154] ss:$8 sps:$4 sm:$0xff]  }
 0x1b8   :  { %v2257_v39 = vadd.f32 %v2210_v38, %v1977_v17  ;;  %v2212_v42 = vpop.f32.mrb[26].mxu0  ;;  %v1693_v43 = vpop.f32.mrb[27].mxu1  ;;  %v4405_v17 = vld [vmem:[%s5733_s3 + $0x150] ss:$8 sps:$4 sm:$0xff]   ;;  %v4425_v32 = vld [vmem:[%s5733_s3 + $0x1b4] ss:$8 sps:$4 sm:$0xff]  }
 0x1b9   :  { %v2213_v44 = vpop.f32.mrb[27].mxu0  ;;  %v4423_v33 = vld [vmem:[%s5733_s3 + $0x1b0] ss:$8 sps:$4 sm:$0xff]   ;;  %v4431_v36 = vld [vmem:[%s5733_s3 + $0x1d4] ss:$8 sps:$4 sm:$0xff]   ;;  %v2552_v38 = vsub.s32 2, %v5591_v47 }
 0x1ba   :  { %v4434_v40 = vld [vmem:[%s5733_s3 + $0x1e4] ss:$8 sps:$4 sm:$0xff]  }
 0x1bb   :  { %v2553_v42 = vrot.slane %v5597_v49, %v2552_v38 }
 0x1d5   :  { %v1969_v51 = vpop.f32.mrb[28].mxu1 }
 0x1d6   :  { %v2488_v52 = vpop.f32.mrb[28].mxu0  ;;  %v1978_v45 = vadd.f32 %v1969_v51, %v1697_v34  ;;  %v1971_v55 = vpop.f32.mrb[29].mxu1  ;;  %v4428_v34 = vld [vmem:[%s5733_s3 + $0x1c4] ss:$8 sps:$4 sm:$0xff]  }
 0x1d7   :  { %v2536_v54 = vadd.f32 %v2488_v52, %v2256_v35  ;;  %v2490_v56 = vpop.f32.mrb[29].mxu0  ;;  %v1979_v57 = vadd.f32 %v1971_v55, %v1698_v26  ;;  %v1973_v59 = vpop.f32.mrb[30].mxu1  ;;  %v4426_v35 = vld [vmem:[%s5733_s3 + $0x1c0] ss:$8 sps:$4 sm:$0xff]   ;;  %v4429_v26 = vld [vmem:[%s5733_s3 + $0x1d0] ss:$8 sps:$4 sm:$0xff]  }
 0x1d8   :  { %v2537_v58 = vadd.f32 %v2490_v56, %v2257_v39  ;;  %v2492_v60 = vpop.f32.mrb[30].mxu0  ;;  %v1974_v62 = vpop.f32.mrb[31].mxu1  ;;  %v2556_v39 = vsub.s32 3, %v5591_v47  ;;  %v4437_v52 = vld [vmem:[%s5733_s3 + $0x1f4] ss:$8 sps:$4 sm:$0xff]  }
 0x1d9   :  { %v2562_v61 = vadd.f32 %v2545_v41, %v2536_v54  ;;  %v2493_v63 = vpop.f32.mrb[31].mxu0  ;;  %v4451_v62 = vld [vmem:[%s5734_s5 + $0x30] sm:$0xff]  }
 0x1da   :  { %v2563_v0 = vadd.f32 %v2549_v53, %v2537_v58  ;;  %v2557_v44 = vrot.slane %v5597_v49, %v2556_v39  ;;  %v4435_v49 = vld [vmem:[%s5733_s3 + $0x1f0] ss:$8 sps:$4 sm:$0xff]  }
 0x1db   :  { %v2566_v48 = vmax.f32 %v2562_v61, 0.0  ;;  %v4450_v61 = vld [vmem:[%s5734_s5 + $0x70] sm:$0xff]   ;;  %v4452_v63 = vld [vmem:[%s5734_s5 + $0x78] sm:$0xff]  }
 0x1dc   :  { %v2567_v2 = vmax.f32 %v2563_v0, 0.0  ;;  %3893 = vmatprep.subr.bf16.mxu1 %v4450_v61  ;;  %v4453_v0 = vld [vmem:[%s5734_s5 + $0x38] sm:$0xff]  }
 0x1dd   :  { %v2570_v4 = vpack.c.bf16 %v2566_v48, %v2566_v48  ;;  %3894 = vmatpush3.bf16.msra.mxu1 %v4451_v62  ;;  %v2638_v48 = vld [vmem:[%s5736_s4] sm:$0x3] }
 0x1de   :  { %v2571_v1 = vpack.c.bf16 %v2567_v2, %v2567_v2  ;;  %3895 = vmatprep.subr.bf16.mxu1 %v4452_v63  ;;  %v2643_v2 = vrot.slane %v2638_v48, %v2544_v37  ;;  %v3864_v37 = vld [vmem:[%s5737_s6] ss:$0 sm:$0xff] }
 0x1e0   :  { %3002 = vmatprep.mubr.bf16.mxu0 %v2571_v1  ;;  %v2647_v1 = vrot.slane %v2638_v48, %v2548_v50 }
 0x1e1   :  { %3003 = vmatmul.mubr.bf16.vlgmr.msra.gmra.mrb[32].mxu0 %v2570_v4  ;;  %3896 = vmatpush3.bf16.msra.mxu1 %v4453_v0 }
 0x1e2   :  { %3012 = vmatpush1.bf16.msra.mxu0 %v4390_v3 }
 0x1e3   :  { %3013 = vmatprep.subr.bf16.mxu0 %v4395_v5 }
 0x1e6   :  { %3014 = vmatpush1.bf16.msra.mxu0 %v4393_v6 }
 0x1e7   :  { %3015 = vmatprep.subr.bf16.mxu0 %v4398_v8 }
 0x1ea   :  { %3016 = vmatpush1.bf16.msra.mxu0 %v4396_v9 }
 0x1eb   :  { %3017 = vmatprep.subr.bf16.mxu0 %v4401_v10 }
 0x1ee   :  { %3018 = vmatpush1.bf16.msra.mxu0 %v4399_v12 }
 0x1ef   :  { %3019 = vmatprep.subr.bf16.mxu0 %v4404_v13 }
 0x1f2   :  { %3020 = vmatpush1.bf16.msra.mxu0 %v4402_v14 }
 0x1f3   :  { %3021 = vmatprep.subr.bf16.mxu0 %v4407_v16 }
 0x1f5   :  { %v2249_v18 = vpop.f32.mrb[32].mxu1 }
 0x1f6   :  { %3022 = vmatpush1.bf16.msra.mxu0 %v4405_v17  ;;  %v2258_v20 = vadd.f32 %v2249_v18, %v1978_v45  ;;  %v2251_v11 = vpop.f32.mrb[33].mxu1 }
 0x1f7   :  { %3023 = vmatprep.subr.bf16.mxu0 %v4410_v7  ;;  %v2259_v22 = vadd.f32 %v2251_v11, %v1979_v57  ;;  %v2253_v23 = vpop.f32.mrb[34].mxu1 }
 0x1f8   :  { %v2254_v24 = vpop.f32.mrb[35].mxu1 }
 0x1fa   :  { %3024 = vmatpush1.bf16.msra.mxu0 %v4408_v19 }
 0x1fb   :  { %3025 = vmatprep.subr.bf16.mxu0 %v4413_v21 }
 0x1fe   :  { %3026 = vmatpush1.bf16.msra.mxu0 %v4411_v25 }
 0x1ff   :  { %3027 = vmatprep.subr.bf16.mxu0 %v4416_v27 }
 0x202   :  { %3028 = vmatpush1.bf16.msra.mxu0 %v4414_v28 }
 0x203   :  { %3029 = vmatprep.subr.bf16.mxu0 %v4419_v29 }
 0x206   :  { %3030 = vmatpush1.bf16.msra.mxu0 %v4417_v30 }
 0x207   :  { %3031 = vmatprep.subr.bf16.mxu0 %v4422_v15 }
 0x20a   :  { %3032 = vmatpush1.bf16.msra.mxu0 %v4420_v31 }
 0x20b   :  { %3033 = vmatprep.subr.bf16.mxu0 %v4425_v32 }
 0x20e   :  { %3034 = vmatpush1.bf16.msra.mxu0 %v4423_v33 }
 0x20f   :  { %3035 = vmatprep.subr.bf16.mxu0 %v4428_v34 }
 0x212   :  { %3036 = vmatpush1.bf16.msra.mxu0 %v4426_v35 }
 0x213   :  { %3037 = vmatprep.subr.bf16.mxu0 %v4431_v36 }
 0x215   :  { %v2529_v43 = vpop.f32.mrb[36].mxu1 }
 0x216   :  { %3038 = vmatpush1.bf16.msra.mxu0 %v4429_v26  ;;  %v2538_v41 = vadd.f32 %v2529_v43, %v2258_v20  ;;  %v2531_v51 = vpop.f32.mrb[37].mxu1 }
 0x217   :  { %3039 = vmatprep.subr.bf16.mxu0 %v4434_v40  ;;  %v2539_v53 = vadd.f32 %v2531_v51, %v2259_v22  ;;  %v2533_v45 = vpop.f32.mrb[38].mxu1 }
 0x218   :  { %v2564_v54 = vadd.f32 %v2553_v42, %v2538_v41  ;;  %v2534_v55 = vpop.f32.mrb[39].mxu1 }
 0x219   :  { %v2565_v56 = vadd.f32 %v2557_v44, %v2539_v53 }
 0x21a   :  { %3040 = vmatpush1.bf16.msra.mxu0 %v4432_v46  ;;  %v2568_v57 = vmax.f32 %v2564_v54, 0.0 }
 0x21b   :  { %3041 = vmatprep.subr.bf16.mxu0 %v4437_v52  ;;  %v2569_v58 = vmax.f32 %v2565_v56, 0.0 }
 0x21c   :  { %v2572_v60 = vpack.c.bf16 %v2568_v57, %v2568_v57 }
 0x21d   :  { %v2573_v59 = vpack.c.bf16 %v2569_v58, %v2569_v58 }
 0x21e   :  { %3042 = vmatpush1.bf16.msra.mxu0 %v4435_v49 }
 0x21f   :  { %3043 = vmatprep.mubr.bf16.mxu0 %v2573_v59 }
 0x221   :  { %3044 = vmatmul.mubr.bf16.vlgmr.msra.gmra.mrb[32].mxu0 %v2572_v60 }
 0x2f4   :  { %v3045_v3 = vpop.f32.mrb[32].mxu0 }
 0x2f5   :  { %v3903_v4 = vadd.f32 %v3045_v3, %v2643_v2  ;;  %v3047_v5 = vpop.f32.mrb[33].mxu0 }
 0x2f6   :  { %v3904_v6 = vadd.f32 %v3047_v5, %v2647_v1  ;;  %v3049_v8 = vpop.f32.mrb[34].mxu0 }
 0x2f7   :  { %v3052_v9 = vmax.f32 %v3903_v4, 0.0  ;;  %v3050_v10 = vpop.f32.mrb[35].mxu0 }
 0x2f8   :  { %v3053_v12 = vmax.f32 %v3904_v6, 0.0 }
 0x2f9   :  { %v3054_v14 = vpack.c.bf16 %v3052_v9, %v3052_v9 }
 0x2fa   :  { %v3055_v13 = vpack.c.bf16 %v3053_v12, %v3053_v12 }
 0x2fc   :  { %3223 = vmatprep.mubr.bf16.mxu1 %v3055_v13 }
 0x2fd   :  { %3224 = vmatmul.mubr.bf16.vlgmr.msra.gmra.mrb[40].mxu1 %v3054_v14 }
 0x3d0   :  { %v3897_v16 = vpop.f32.mrb[40].mxu1 }
 0x3d1   :  { %v3898_v17 = vpop.f32.mrb[41].mxu1 }
 0x3d2   :  { %v3899_v47 = vadd.f32 %v3898_v17, %v3897_v16  ;;  %v3900_v50 = vpop.f32.mrb[42].mxu1 }
 0x3d3   :  { %v3901_v7 = vpop.f32.mrb[43].mxu1 }
 0x3d4   :  { %v3226_v18 = vadd.f32 %v3899_v47, %v3864_v37 }
 0x3d6   :  { %v3232_v19 = vsel %vm3231_vm0, %v3226_v18, -inf }
 0x3d7   :  { %3233 = vmax.xlane.f32.xlu0 %v3232_v19 }
 0x464   :  { %v3234_v20 = vpop.xlane.xlu0 %3233 }
 0x465   :  { %v3235_v11 = vsub.f32 %v3226_v18, %v3234_v20 }
 0x467   :  { %v3236_v21 = vmul.f32 1.442695, %v3235_v11 }
 0x469   :  { %4454 = vpow2.f32 %v3236_v21 }
 0x473   :  { %v4455_v22 = vpop.eup %4454 }
 0x474   :  { %v3238_v23 = vsel %vm3231_vm0, %v4455_v22, 0.0 }
 0x475   :  { %3239 = vadd.xlane.f32.xlu0 %v3238_v23 }
 0x502   :  { %v3240_v24 = vpop.xlane.xlu0 %3239 }
 0x503   :  { %4456 = vlog2.f32 %v3240_v24 }
 0x50d   :  { %v4457_v25 = vpop.eup %4456 }
 0x50e   :  { %v3242_v27 = vmul.f32 0.6931472, %v4457_v25 }
 0x510   :  { %v3243_v28 = vadd.f32 %v3242_v27, %v3234_v20 }
 0x512   :  { %v3244_v29 = vsub.f32 %v3226_v18, %v3243_v28 }
 0x514   :  { %3245 = vst.msk [vmem:[%s5738_s7] sm:$0xff] %vm3231_vm0, %v3244_v29 }

</bundles_post_ra>
